<compile_context>
chip_gen: v5e
topology: v5e:2x2
jax: 0.10.0
libtpu: 0.0.40
codegen_flags: <defaults>
</compile_context>

<pallas_src>
import jax
import jax.numpy as jnp
from jax import lax
from jax.experimental import pallas as pl
from jax.experimental.pallas import tpu as pltpu

BN_EPS = 1e-5


# ----------------------------------------------------------------------------
# Fused Pallas kernel: one image per grid step, everything VMEM-resident.
# Feature maps are kept channel-major (C, 49) with the pooled 7x7 grid
# flattened onto the lane dimension (s = m*7 + n).
# ----------------------------------------------------------------------------
def _fused_cnn_kernel(xv_ref, mask_ref,
                      w1_ref, s1_ref, w2t_ref, s2_ref,
                      wf1_ref, s3_ref, wf2_ref, b2_ref,
                      o_ref):
    f32 = jnp.float32

    # Hoisted loads: 144 pre-strided input rows (1, 49) and 9 conv1 taps (8, 1).
    X = [[xv_ref[0, a, b] for b in range(12)] for a in range(12)]
    W1 = [w1_ref[k] for k in range(9)]
    shift1 = s1_ref[...]                                                       # (8, 1)

    # ---- conv1 + bn1 + relu + pool1 (VPU) --------------------------------
    # S[u][v][c, s] = p1_pad[2m+u, 2n+v, c], the zero-padded pooled block-1
    # output sampled exactly as conv2 will need it.  Each map is a max over
    # the 4 pooling phases (d, e) of a 9-tap conv built from pre-strided
    # input views (X), so no strided / shifted access happens in-kernel.
    S = [[None] * 4 for _ in range(4)]
    for u in range(4):
        for v in range(4):
            best = None
            for d in range(2):
                for e in range(2):
                    acc = jnp.zeros((8, 49), f32)
                    for ky in range(3):
                        for kx in range(3):
                            xrow = X[2 * u + d + ky][2 * v + e + kx]           # (1, 49)
                            acc = acc + W1[ky * 3 + kx] * xrow                 # (8,1)*(1,49)
                    best = acc if best is None else jnp.maximum(best, acc)
            smap = jnp.maximum(best + shift1, 0.0)                             # (8, 49)
            # zero the rows/cols that fall on conv2's "same" padding of the
            # 14x14 map (precomputed 0/1 mask row, only border maps need it)
            if u in (0, 3) or v in (0, 3):
                smap = smap * mask_ref[pl.ds(u * 4 + v, 1), :]                 # (1, 49)
            S[u][v] = smap

    # ---- conv2 + bn2 + relu + pool2 (MXU) --------------------------------
    # One K=72 matmul per pooling phase: (16,72) @ (72,49); pool = max of 4.
    p2t = None
    for d in range(2):
        for e in range(2):
            a_mat = jnp.concatenate(
                [S[d + ky][e + kx] for ky in range(3) for kx in range(3)],
                axis=0)                                                        # (72, 49)
            c2t = jnp.dot(w2t_ref[...], a_mat, preferred_element_type=f32)     # (16, 49)
            p2t = c2t if p2t is None else jnp.maximum(p2t, c2t)
    p2t = jnp.maximum(p2t + s2_ref[...], 0.0)                                  # (16, 49)

    # ---- fc1 + bn3 + relu -------------------------------------------------
    # M=1 per image makes an MXU matmul degenerate, so contract on the VPU.
    # fc1 weights were pre-permuted to (cin, spatial, out) so the PyTorch
    # NCHW flatten order needs no activation transpose.
    prod = p2t[:, :, None] * wf1_ref[...]                                      # (16, 49, 64)
    h = jnp.sum(jnp.sum(prod, axis=0), axis=0, keepdims=True)                  # (1, 64)
    h = jnp.maximum(h + s3_ref[...], 0.0)

    # ---- fc2 (dropout3 is identity in eval mode) ---------------------------
    logits = jnp.dot(h, wf2_ref[...], preferred_element_type=f32) + b2_ref[...]  # (1, 10)
    o_ref[0] = logits


# ----------------------------------------------------------------------------
# Host-side parameter prep (one-time): BN folding + kernel-friendly layouts.
# ----------------------------------------------------------------------------
def prepare_params(p):
    s1 = p['bn1_gamma'] / jnp.sqrt(p['bn1_var'] + BN_EPS)
    s2 = p['bn2_gamma'] / jnp.sqrt(p['bn2_var'] + BN_EPS)
    s3 = p['bn3_gamma'] / jnp.sqrt(p['bn3_var'] + BN_EPS)
    # conv1: (9, 8, 1), tap-major, BN scale folded into the weights
    w1 = (jnp.transpose(p['conv1_w'], (2, 3, 1, 0)).reshape(9, 8)
          * s1[None, :]).reshape(9, 8, 1)
    shift1 = ((p['conv1_b'] - p['bn1_mean']) * s1 + p['bn1_beta']).reshape(8, 1)
    # conv2: (16, 72), columns ordered (ky, kx, cin) to match the kernel's patch
    w2t = jnp.transpose(p['conv2_w'], (0, 2, 3, 1)).reshape(16, 72) * s2[:, None]
    shift2 = ((p['conv2_b'] - p['bn2_mean']) * s2 + p['bn2_beta']).reshape(16, 1)
    # fc1: (cin=16, spatial=49, out=64); absorbs PyTorch's (C,H,W) flatten order
    wf1 = jnp.transpose(p['fc1_w'].reshape(64, 16, 49), (1, 2, 0)) * s3[None, None, :]
    shift3 = ((p['fc1_b'] - p['bn3_mean']) * s3 + p['bn3_beta']).reshape(1, 64)
    wf2 = p['fc2_w'].T                              # (64, 10)
    b2 = p['fc2_b'].reshape(1, 10)
    # (16, 49) 0/1 masks: row u*4+v zeroes the lanes of map S[u][v] that land
    # on conv2's "same" zero padding of the pooled 14x14 feature map.
    m_idx = (jnp.arange(49) // 7).astype(jnp.float32)
    n_idx = (jnp.arange(49) % 7).astype(jnp.float32)
    edge = jnp.ones((4, 4, 49), jnp.float32)
    edge = edge.at[0].multiply(jnp.where(m_idx == 0.0, 0.0, 1.0))
    edge = edge.at[3].multiply(jnp.where(m_idx == 6.0, 0.0, 1.0))
    edge = edge.at[:, 0].multiply(jnp.where(n_idx == 0.0, 0.0, 1.0))
    edge = edge.at[:, 3].multiply(jnp.where(n_idx == 6.0, 0.0, 1.0))
    edge_mask = edge.reshape(16, 49)
    return dict(w1=w1, shift1=shift1, w2t=w2t, shift2=shift2,
                wf1=wf1, shift3=shift3, wf2=wf2, b2=b2,
                edge_mask=edge_mask)


def _input_views(x_nchw):
    # Tiny host-side re-view of the input (no activation-sized glue):
    # views[b, a, c, 0, m*7+n] = x_pad[4m + a - 2, 4n + c - 2]
    # where x_pad is the conv1 "same" zero padding of the 28x28 image.
    x2 = x_nchw[:, 0]                                   # (B, 28, 28)
    xq = jnp.pad(x2, ((0, 0), (3, 5), (3, 5)))          # rows/cols -3..32 of x
    bsz = x2.shape[0]
    v = jnp.stack(
        [jnp.stack([xq[:, ai:ai + 25:4, bi:bi + 25:4] for bi in range(12)], axis=1)
         for ai in range(12)], axis=1)                  # (B, 12, 12, 7, 7)
    return v.reshape(bsz, 12, 12, 1, 49)


@jax.jit
def simple_cnn_pallas(x_nchw, prep):
    B = x_nchw.shape[0]
    xv = _input_views(x_nchw)
    out = pl.pallas_call(
        _fused_cnn_kernel,
        out_shape=jax.ShapeDtypeStruct((B, 1, 10), jnp.float32),
        grid=(B,),
        in_specs=[
            pl.BlockSpec((1, 12, 12, 1, 49), lambda b: (b, 0, 0, 0, 0)),
            pl.BlockSpec((16, 49), lambda b: (0, 0)),
            pl.BlockSpec((9, 8, 1), lambda b: (0, 0, 0)),
            pl.BlockSpec((8, 1), lambda b: (0, 0)),
            pl.BlockSpec((16, 72), lambda b: (0, 0)),
            pl.BlockSpec((16, 1), lambda b: (0, 0)),
            pl.BlockSpec((16, 49, 64), lambda b: (0, 0, 0)),
            pl.BlockSpec((1, 64), lambda b: (0, 0)),
            pl.BlockSpec((64, 10), lambda b: (0, 0)),
            pl.BlockSpec((1, 10), lambda b: (0, 0)),
        ],
        out_specs=pl.BlockSpec((1, 1, 10), lambda b: (b, 0, 0)),
        compiler_params=pltpu.CompilerParams(
            dimension_semantics=("parallel",),
            vmem_limit_bytes=32 * 1024 * 1024,
        ),
    )(xv, prep['edge_mask'],
      prep['w1'], prep['shift1'], prep['w2t'], prep['shift2'],
      prep['wf1'], prep['shift3'], prep['wf2'], prep['b2'])
    return out.reshape(B, 10)


# ----------------------------------------------------------------------------
# Parameter init + pure-JAX reference (mirrors PyTorch eval-mode semantics)
# ----------------------------------------------------------------------------
def init_params(key):
    keys = iter(jax.random.split(key, 24))
    nk = lambda: next(keys)
    p = {}
    p['conv1_w'] = 0.2 * jax.random.normal(nk(), (8, 1, 3, 3), jnp.float32)
    p['conv1_b'] = 0.1 * jax.random.normal(nk(), (8,), jnp.float32)
    p['bn1_gamma'] = 1.0 + 0.1 * jax.random.normal(nk(), (8,), jnp.float32)
    p['bn1_beta'] = 0.1 * jax.random.normal(nk(), (8,), jnp.float32)
    p['bn1_mean'] = 0.1 * jax.random.normal(nk(), (8,), jnp.float32)
    p['bn1_var'] = 1.0 + 0.1 * jnp.abs(jax.random.normal(nk(), (8,), jnp.float32))
    p['conv2_w'] = 0.1 * jax.random.normal(nk(), (16, 8, 3, 3), jnp.float32)
    p['conv2_b'] = 0.1 * jax.random.normal(nk(), (16,), jnp.float32)
    p['bn2_gamma'] = 1.0 + 0.1 * jax.random.normal(nk(), (16,), jnp.float32)
    p['bn2_beta'] = 0.1 * jax.random.normal(nk(), (16,), jnp.float32)
    p['bn2_mean'] = 0.1 * jax.random.normal(nk(), (16,), jnp.float32)
    p['bn2_var'] = 1.0 + 0.1 * jnp.abs(jax.random.normal(nk(), (16,), jnp.float32))
    p['fc1_w'] = 0.05 * jax.random.normal(nk(), (64, 7 * 7 * 16), jnp.float32)
    p['fc1_b'] = 0.1 * jax.random.normal(nk(), (64,), jnp.float32)
    p['bn3_gamma'] = 1.0 + 0.1 * jax.random.normal(nk(), (64,), jnp.float32)
    p['bn3_beta'] = 0.1 * jax.random.normal(nk(), (64,), jnp.float32)
    p['bn3_mean'] = 0.1 * jax.random.normal(nk(), (64,), jnp.float32)
    p['bn3_var'] = 1.0 + 0.1 * jnp.abs(jax.random.normal(nk(), (64,), jnp.float32))
    p['fc2_w'] = 0.1 * jax.random.normal(nk(), (10, 64), jnp.float32)
    p['fc2_b'] = 0.1 * jax.random.normal(nk(), (10,), jnp.float32)
    return p


def simple_cnn_ref(x, p):
    def bn4(y, g, b, m, v):
        return ((y - m[None, :, None, None]) / jnp.sqrt(v[None, :, None, None] + BN_EPS)
                * g[None, :, None, None] + b[None, :, None, None])

    y = lax.conv_general_dilated(x, p['conv1_w'], (1, 1), ((1, 1), (1, 1)),
                                 dimension_numbers=('NCHW', 'OIHW', 'NCHW'),
                                 precision=lax.Precision.HIGHEST)
    y = y + p['conv1_b'][None, :, None, None]
    y = jnp.maximum(bn4(y, p['bn1_gamma'], p['bn1_beta'], p['bn1_mean'], p['bn1_var']), 0.0)
    y = lax.reduce_window(y, -jnp.inf, lax.max, (1, 1, 2, 2), (1, 1, 2, 2), 'VALID')
    y = lax.conv_general_dilated(y, p['conv2_w'], (1, 1), ((1, 1), (1, 1)),
                                 dimension_numbers=('NCHW', 'OIHW', 'NCHW'),
                                 precision=lax.Precision.HIGHEST)
    y = y + p['conv2_b'][None, :, None, None]
    y = jnp.maximum(bn4(y, p['bn2_gamma'], p['bn2_beta'], p['bn2_mean'], p['bn2_var']), 0.0)
    y = lax.reduce_window(y, -jnp.inf, lax.max, (1, 1, 2, 2), (1, 1, 2, 2), 'VALID')
    f = y.reshape(y.shape[0], -1)
    h = jnp.dot(f, p['fc1_w'].T, precision=lax.Precision.HIGHEST) + p['fc1_b']
    h = (h - p['bn3_mean']) / jnp.sqrt(p['bn3_var'] + BN_EPS) * p['bn3_gamma'] + p['bn3_beta']
    h = jnp.maximum(h, 0.0)
    return jnp.dot(h, p['fc2_w'].T, precision=lax.Precision.HIGHEST) + p['fc2_b']


if __name__ == "__main__":
    key = jax.random.PRNGKey(0)
    pkey, xkey = jax.random.split(key)
    params = init_params(pkey)
    x = jax.random.normal(xkey, (2, 1, 28, 28), jnp.float32)   # MNIST-shaped, batch=2

    prep = prepare_params(params)
    out = jax.block_until_ready(simple_cnn_pallas(x, prep))
    ref = jax.block_until_ready(simple_cnn_ref(x, params))

    assert out.shape == (2, 10), out.shape
    max_err = float(jnp.max(jnp.abs(out - ref)))
    assert jnp.allclose(out, ref, atol=2e-2, rtol=2e-2), max_err
    print("KERNEL_OK")
</pallas_src>

<mosaic_0001>
module attributes {stable_mosaic.version = 11 : i64} {
  func.func @_fused_cnn_kernel(%arg0: i32, %arg1: memref<1x12x12x1x49xf32, #tpu.memory_space<vmem>>, %arg2: memref<16x49xf32, #tpu.memory_space<vmem>>, %arg3: memref<9x8x1xf32, #tpu.memory_space<vmem>>, %arg4: memref<8x1xf32, #tpu.memory_space<vmem>>, %arg5: memref<16x72xf32, #tpu.memory_space<vmem>>, %arg6: memref<16x1xf32, #tpu.memory_space<vmem>>, %arg7: memref<16x49x64xf32, #tpu.memory_space<vmem>>, %arg8: memref<1x64xf32, #tpu.memory_space<vmem>>, %arg9: memref<64x10xf32, #tpu.memory_space<vmem>>, %arg10: memref<1x10xf32, #tpu.memory_space<vmem>>, %arg11: memref<1x1x10xf32, #tpu.memory_space<vmem>>) attributes {dimension_semantics = [#tpu.dimension_semantics<parallel>], iteration_bounds = array<i64: 2>, scalar_prefetch = 0 : i64, scratch_operands = 0 : i64, tpu.core_type = #tpu.core_type<tc>, window_params = [{transform_indices = @transform_0, window_bounds = array<i64: 1, 12, 12, 1, 49>}, {pipeline_mode = #tpu.pipeline_mode<synchronous>, transform_indices = @transform_1, window_bounds = array<i64: 16, 49>}, {pipeline_mode = #tpu.pipeline_mode<synchronous>, transform_indices = @transform_2, window_bounds = array<i64: 9, 8, 1>}, {pipeline_mode = #tpu.pipeline_mode<synchronous>, transform_indices = @transform_3, window_bounds = array<i64: 8, 1>}, {pipeline_mode = #tpu.pipeline_mode<synchronous>, transform_indices = @transform_4, window_bounds = array<i64: 16, 72>}, {pipeline_mode = #tpu.pipeline_mode<synchronous>, transform_indices = @transform_5, window_bounds = array<i64: 16, 1>}, {pipeline_mode = #tpu.pipeline_mode<synchronous>, transform_indices = @transform_6, window_bounds = array<i64: 16, 49, 64>}, {pipeline_mode = #tpu.pipeline_mode<synchronous>, transform_indices = @transform_7, window_bounds = array<i64: 1, 64>}, {pipeline_mode = #tpu.pipeline_mode<synchronous>, transform_indices = @transform_8, window_bounds = array<i64: 64, 10>}, {pipeline_mode = #tpu.pipeline_mode<synchronous>, transform_indices = @transform_9, window_bounds = array<i64: 1, 10>}, {transform_indices = @transform_10, window_bounds = array<i64: 1, 1, 10>}]} {
    %c0 = arith.constant 0 : index
    %c0_0 = arith.constant 0 : index
    %c0_1 = arith.constant 0 : index
    %c0_2 = arith.constant 0 : index
    %c0_3 = arith.constant 0 : index
    %0 = vector.load %arg1[%c0, %c0_0, %c0_1, %c0_2, %c0_3] : memref<1x12x12x1x49xf32, #tpu.memory_space<vmem>>, vector<1x1x1x1x49xf32>
    %1 = vector.shape_cast %0 : vector<1x1x1x1x49xf32> to vector<1x49xf32>
    %c0_4 = arith.constant 0 : index
    %c0_5 = arith.constant 0 : index
    %c1 = arith.constant 1 : index
    %c0_6 = arith.constant 0 : index
    %c0_7 = arith.constant 0 : index
    %2 = vector.load %arg1[%c0_4, %c0_5, %c1, %c0_6, %c0_7] : memref<1x12x12x1x49xf32, #tpu.memory_space<vmem>>, vector<1x1x1x1x49xf32>
    %3 = vector.shape_cast %2 : vector<1x1x1x1x49xf32> to vector<1x49xf32>
    %c0_8 = arith.constant 0 : index
    %c0_9 = arith.constant 0 : index
    %c2 = arith.constant 2 : index
    %c0_10 = arith.constant 0 : index
    %c0_11 = arith.constant 0 : index
    %4 = vector.load %arg1[%c0_8, %c0_9, %c2, %c0_10, %c0_11] : memref<1x12x12x1x49xf32, #tpu.memory_space<vmem>>, vector<1x1x1x1x49xf32>
    %5 = vector.shape_cast %4 : vector<1x1x1x1x49xf32> to vector<1x49xf32>
    %c0_12 = arith.constant 0 : index
    %c0_13 = arith.constant 0 : index
    %c3 = arith.constant 3 : index
    %c0_14 = arith.constant 0 : index
    %c0_15 = arith.constant 0 : index
    %6 = vector.load %arg1[%c0_12, %c0_13, %c3, %c0_14, %c0_15] : memref<1x12x12x1x49xf32, #tpu.memory_space<vmem>>, vector<1x1x1x1x49xf32>
    %7 = vector.shape_cast %6 : vector<1x1x1x1x49xf32> to vector<1x49xf32>
    %c0_16 = arith.constant 0 : index
    %c0_17 = arith.constant 0 : index
    %c4 = arith.constant 4 : index
    %c0_18 = arith.constant 0 : index
    %c0_19 = arith.constant 0 : index
    %8 = vector.load %arg1[%c0_16, %c0_17, %c4, %c0_18, %c0_19] : memref<1x12x12x1x49xf32, #tpu.memory_space<vmem>>, vector<1x1x1x1x49xf32>
    %9 = vector.shape_cast %8 : vector<1x1x1x1x49xf32> to vector<1x49xf32>
    %c0_20 = arith.constant 0 : index
    %c0_21 = arith.constant 0 : index
    %c5 = arith.constant 5 : index
    %c0_22 = arith.constant 0 : index
    %c0_23 = arith.constant 0 : index
    %10 = vector.load %arg1[%c0_20, %c0_21, %c5, %c0_22, %c0_23] : memref<1x12x12x1x49xf32, #tpu.memory_space<vmem>>, vector<1x1x1x1x49xf32>
    %11 = vector.shape_cast %10 : vector<1x1x1x1x49xf32> to vector<1x49xf32>
    %c0_24 = arith.constant 0 : index
    %c0_25 = arith.constant 0 : index
    %c6 = arith.constant 6 : index
    %c0_26 = arith.constant 0 : index
    %c0_27 = arith.constant 0 : index
    %12 = vector.load %arg1[%c0_24, %c0_25, %c6, %c0_26, %c0_27] : memref<1x12x12x1x49xf32, #tpu.memory_space<vmem>>, vector<1x1x1x1x49xf32>
    %13 = vector.shape_cast %12 : vector<1x1x1x1x49xf32> to vector<1x49xf32>
    %c0_28 = arith.constant 0 : index
    %c0_29 = arith.constant 0 : index
    %c7 = arith.constant 7 : index
    %c0_30 = arith.constant 0 : index
    %c0_31 = arith.constant 0 : index
    %14 = vector.load %arg1[%c0_28, %c0_29, %c7, %c0_30, %c0_31] : memref<1x12x12x1x49xf32, #tpu.memory_space<vmem>>, vector<1x1x1x1x49xf32>
    %15 = vector.shape_cast %14 : vector<1x1x1x1x49xf32> to vector<1x49xf32>
    %c0_32 = arith.constant 0 : index
    %c0_33 = arith.constant 0 : index
    %c8 = arith.constant 8 : index
    %c0_34 = arith.constant 0 : index
    %c0_35 = arith.constant 0 : index
    %16 = vector.load %arg1[%c0_32, %c0_33, %c8, %c0_34, %c0_35] : memref<1x12x12x1x49xf32, #tpu.memory_space<vmem>>, vector<1x1x1x1x49xf32>
    %17 = vector.shape_cast %16 : vector<1x1x1x1x49xf32> to vector<1x49xf32>
    %c0_36 = arith.constant 0 : index
    %c0_37 = arith.constant 0 : index
    %c9 = arith.constant 9 : index
    %c0_38 = arith.constant 0 : index
    %c0_39 = arith.constant 0 : index
    %18 = vector.load %arg1[%c0_36, %c0_37, %c9, %c0_38, %c0_39] : memref<1x12x12x1x49xf32, #tpu.memory_space<vmem>>, vector<1x1x1x1x49xf32>
    %19 = vector.shape_cast %18 : vector<1x1x1x1x49xf32> to vector<1x49xf32>
    %c0_40 = arith.constant 0 : index
    %c1_41 = arith.constant 1 : index
    %c0_42 = arith.constant 0 : index
    %c0_43 = arith.constant 0 : index
    %c0_44 = arith.constant 0 : index
    %20 = vector.load %arg1[%c0_40, %c1_41, %c0_42, %c0_43, %c0_44] : memref<1x12x12x1x49xf32, #tpu.memory_space<vmem>>, vector<1x1x1x1x49xf32>
    %21 = vector.shape_cast %20 : vector<1x1x1x1x49xf32> to vector<1x49xf32>
    %c0_45 = arith.constant 0 : index
    %c1_46 = arith.constant 1 : index
    %c1_47 = arith.constant 1 : index
    %c0_48 = arith.constant 0 : index
    %c0_49 = arith.constant 0 : index
    %22 = vector.load %arg1[%c0_45, %c1_46, %c1_47, %c0_48, %c0_49] : memref<1x12x12x1x49xf32, #tpu.memory_space<vmem>>, vector<1x1x1x1x49xf32>
    %23 = vector.shape_cast %22 : vector<1x1x1x1x49xf32> to vector<1x49xf32>
    %c0_50 = arith.constant 0 : index
    %c1_51 = arith.constant 1 : index
    %c2_52 = arith.constant 2 : index
    %c0_53 = arith.constant 0 : index
    %c0_54 = arith.constant 0 : index
    %24 = vector.load %arg1[%c0_50, %c1_51, %c2_52, %c0_53, %c0_54] : memref<1x12x12x1x49xf32, #tpu.memory_space<vmem>>, vector<1x1x1x1x49xf32>
    %25 = vector.shape_cast %24 : vector<1x1x1x1x49xf32> to vector<1x49xf32>
    %c0_55 = arith.constant 0 : index
    %c1_56 = arith.constant 1 : index
    %c3_57 = arith.constant 3 : index
    %c0_58 = arith.constant 0 : index
    %c0_59 = arith.constant 0 : index
    %26 = vector.load %arg1[%c0_55, %c1_56, %c3_57, %c0_58, %c0_59] : memref<1x12x12x1x49xf32, #tpu.memory_space<vmem>>, vector<1x1x1x1x49xf32>
    %27 = vector.shape_cast %26 : vector<1x1x1x1x49xf32> to vector<1x49xf32>
    %c0_60 = arith.constant 0 : index
    %c1_61 = arith.constant 1 : index
    %c4_62 = arith.constant 4 : index
    %c0_63 = arith.constant 0 : index
    %c0_64 = arith.constant 0 : index
    %28 = vector.load %arg1[%c0_60, %c1_61, %c4_62, %c0_63, %c0_64] : memref<1x12x12x1x49xf32, #tpu.memory_space<vmem>>, vector<1x1x1x1x49xf32>
    %29 = vector.shape_cast %28 : vector<1x1x1x1x49xf32> to vector<1x49xf32>
    %c0_65 = arith.constant 0 : index
    %c1_66 = arith.constant 1 : index
    %c5_67 = arith.constant 5 : index
    %c0_68 = arith.constant 0 : index
    %c0_69 = arith.constant 0 : index
    %30 = vector.load %arg1[%c0_65, %c1_66, %c5_67, %c0_68, %c0_69] : memref<1x12x12x1x49xf32, #tpu.memory_space<vmem>>, vector<1x1x1x1x49xf32>
    %31 = vector.shape_cast %30 : vector<1x1x1x1x49xf32> to vector<1x49xf32>
    %c0_70 = arith.constant 0 : index
    %c1_71 = arith.constant 1 : index
    %c6_72 = arith.constant 6 : index
    %c0_73 = arith.constant 0 : index
    %c0_74 = arith.constant 0 : index
    %32 = vector.load %arg1[%c0_70, %c1_71, %c6_72, %c0_73, %c0_74] : memref<1x12x12x1x49xf32, #tpu.memory_space<vmem>>, vector<1x1x1x1x49xf32>
    %33 = vector.shape_cast %32 : vector<1x1x1x1x49xf32> to vector<1x49xf32>
    %c0_75 = arith.constant 0 : index
    %c1_76 = arith.constant 1 : index
    %c7_77 = arith.constant 7 : index
    %c0_78 = arith.constant 0 : index
    %c0_79 = arith.constant 0 : index
    %34 = vector.load %arg1[%c0_75, %c1_76, %c7_77, %c0_78, %c0_79] : memref<1x12x12x1x49xf32, #tpu.memory_space<vmem>>, vector<1x1x1x1x49xf32>
    %35 = vector.shape_cast %34 : vector<1x1x1x1x49xf32> to vector<1x49xf32>
    %c0_80 = arith.constant 0 : index
    %c1_81 = arith.constant 1 : index
    %c8_82 = arith.constant 8 : index
    %c0_83 = arith.constant 0 : index
    %c0_84 = arith.constant 0 : index
    %36 = vector.load %arg1[%c0_80, %c1_81, %c8_82, %c0_83, %c0_84] : memref<1x12x12x1x49xf32, #tpu.memory_space<vmem>>, vector<1x1x1x1x49xf32>
    %37 = vector.shape_cast %36 : vector<1x1x1x1x49xf32> to vector<1x49xf32>
    %c0_85 = arith.constant 0 : index
    %c1_86 = arith.constant 1 : index
    %c9_87 = arith.constant 9 : index
    %c0_88 = arith.constant 0 : index
    %c0_89 = arith.constant 0 : index
    %38 = vector.load %arg1[%c0_85, %c1_86, %c9_87, %c0_88, %c0_89] : memref<1x12x12x1x49xf32, #tpu.memory_space<vmem>>, vector<1x1x1x1x49xf32>
    %39 = vector.shape_cast %38 : vector<1x1x1x1x49xf32> to vector<1x49xf32>
    %c0_90 = arith.constant 0 : index
    %c2_91 = arith.constant 2 : index
    %c0_92 = arith.constant 0 : index
    %c0_93 = arith.constant 0 : index
    %c0_94 = arith.constant 0 : index
    %40 = vector.load %arg1[%c0_90, %c2_91, %c0_92, %c0_93, %c0_94] : memref<1x12x12x1x49xf32, #tpu.memory_space<vmem>>, vector<1x1x1x1x49xf32>
    %41 = vector.shape_cast %40 : vector<1x1x1x1x49xf32> to vector<1x49xf32>
    %c0_95 = arith.constant 0 : index
    %c2_96 = arith.constant 2 : index
    %c1_97 = arith.constant 1 : index
    %c0_98 = arith.constant 0 : index
    %c0_99 = arith.constant 0 : index
    %42 = vector.load %arg1[%c0_95, %c2_96, %c1_97, %c0_98, %c0_99] : memref<1x12x12x1x49xf32, #tpu.memory_space<vmem>>, vector<1x1x1x1x49xf32>
    %43 = vector.shape_cast %42 : vector<1x1x1x1x49xf32> to vector<1x49xf32>
    %c0_100 = arith.constant 0 : index
    %c2_101 = arith.constant 2 : index
    %c2_102 = arith.constant 2 : index
    %c0_103 = arith.constant 0 : index
    %c0_104 = arith.constant 0 : index
    %44 = vector.load %arg1[%c0_100, %c2_101, %c2_102, %c0_103, %c0_104] : memref<1x12x12x1x49xf32, #tpu.memory_space<vmem>>, vector<1x1x1x1x49xf32>
    %45 = vector.shape_cast %44 : vector<1x1x1x1x49xf32> to vector<1x49xf32>
    %c0_105 = arith.constant 0 : index
    %c2_106 = arith.constant 2 : index
    %c3_107 = arith.constant 3 : index
    %c0_108 = arith.constant 0 : index
    %c0_109 = arith.constant 0 : index
    %46 = vector.load %arg1[%c0_105, %c2_106, %c3_107, %c0_108, %c0_109] : memref<1x12x12x1x49xf32, #tpu.memory_space<vmem>>, vector<1x1x1x1x49xf32>
    %47 = vector.shape_cast %46 : vector<1x1x1x1x49xf32> to vector<1x49xf32>
    %c0_110 = arith.constant 0 : index
    %c2_111 = arith.constant 2 : index
    %c4_112 = arith.constant 4 : index
    %c0_113 = arith.constant 0 : index
    %c0_114 = arith.constant 0 : index
    %48 = vector.load %arg1[%c0_110, %c2_111, %c4_112, %c0_113, %c0_114] : memref<1x12x12x1x49xf32, #tpu.memory_space<vmem>>, vector<1x1x1x1x49xf32>
    %49 = vector.shape_cast %48 : vector<1x1x1x1x49xf32> to vector<1x49xf32>
    %c0_115 = arith.constant 0 : index
    %c2_116 = arith.constant 2 : index
    %c5_117 = arith.constant 5 : index
    %c0_118 = arith.constant 0 : index
    %c0_119 = arith.constant 0 : index
    %50 = vector.load %arg1[%c0_115, %c2_116, %c5_117, %c0_118, %c0_119] : memref<1x12x12x1x49xf32, #tpu.memory_space<vmem>>, vector<1x1x1x1x49xf32>
    %51 = vector.shape_cast %50 : vector<1x1x1x1x49xf32> to vector<1x49xf32>
    %c0_120 = arith.constant 0 : index
    %c2_121 = arith.constant 2 : index
    %c6_122 = arith.constant 6 : index
    %c0_123 = arith.constant 0 : index
    %c0_124 = arith.constant 0 : index
    %52 = vector.load %arg1[%c0_120, %c2_121, %c6_122, %c0_123, %c0_124] : memref<1x12x12x1x49xf32, #tpu.memory_space<vmem>>, vector<1x1x1x1x49xf32>
    %53 = vector.shape_cast %52 : vector<1x1x1x1x49xf32> to vector<1x49xf32>
    %c0_125 = arith.constant 0 : index
    %c2_126 = arith.constant 2 : index
    %c7_127 = arith.constant 7 : index
    %c0_128 = arith.constant 0 : index
    %c0_129 = arith.constant 0 : index
    %54 = vector.load %arg1[%c0_125, %c2_126, %c7_127, %c0_128, %c0_129] : memref<1x12x12x1x49xf32, #tpu.memory_space<vmem>>, vector<1x1x1x1x49xf32>
    %55 = vector.shape_cast %54 : vector<1x1x1x1x49xf32> to vector<1x49xf32>
    %c0_130 = arith.constant 0 : index
    %c2_131 = arith.constant 2 : index
    %c8_132 = arith.constant 8 : index
    %c0_133 = arith.constant 0 : index
    %c0_134 = arith.constant 0 : index
    %56 = vector.load %arg1[%c0_130, %c2_131, %c8_132, %c0_133, %c0_134] : memref<1x12x12x1x49xf32, #tpu.memory_space<vmem>>, vector<1x1x1x1x49xf32>
    %57 = vector.shape_cast %56 : vector<1x1x1x1x49xf32> to vector<1x49xf32>
    %c0_135 = arith.constant 0 : index
    %c2_136 = arith.constant 2 : index
    %c9_137 = arith.constant 9 : index
    %c0_138 = arith.constant 0 : index
    %c0_139 = arith.constant 0 : index
    %58 = vector.load %arg1[%c0_135, %c2_136, %c9_137, %c0_138, %c0_139] : memref<1x12x12x1x49xf32, #tpu.memory_space<vmem>>, vector<1x1x1x1x49xf32>
    %59 = vector.shape_cast %58 : vector<1x1x1x1x49xf32> to vector<1x49xf32>
    %c0_140 = arith.constant 0 : index
    %c3_141 = arith.constant 3 : index
    %c0_142 = arith.constant 0 : index
    %c0_143 = arith.constant 0 : index
    %c0_144 = arith.constant 0 : index
    %60 = vector.load %arg1[%c0_140, %c3_141, %c0_142, %c0_143, %c0_144] : memref<1x12x12x1x49xf32, #tpu.memory_space<vmem>>, vector<1x1x1x1x49xf32>
    %61 = vector.shape_cast %60 : vector<1x1x1x1x49xf32> to vector<1x49xf32>
    %c0_145 = arith.constant 0 : index
    %c3_146 = arith.constant 3 : index
    %c1_147 = arith.constant 1 : index
    %c0_148 = arith.constant 0 : index
    %c0_149 = arith.constant 0 : index
    %62 = vector.load %arg1[%c0_145, %c3_146, %c1_147, %c0_148, %c0_149] : memref<1x12x12x1x49xf32, #tpu.memory_space<vmem>>, vector<1x1x1x1x49xf32>
    %63 = vector.shape_cast %62 : vector<1x1x1x1x49xf32> to vector<1x49xf32>
    %c0_150 = arith.constant 0 : index
    %c3_151 = arith.constant 3 : index
    %c2_152 = arith.constant 2 : index
    %c0_153 = arith.constant 0 : index
    %c0_154 = arith.constant 0 : index
    %64 = vector.load %arg1[%c0_150, %c3_151, %c2_152, %c0_153, %c0_154] : memref<1x12x12x1x49xf32, #tpu.memory_space<vmem>>, vector<1x1x1x1x49xf32>
    %65 = vector.shape_cast %64 : vector<1x1x1x1x49xf32> to vector<1x49xf32>
    %c0_155 = arith.constant 0 : index
    %c3_156 = arith.constant 3 : index
    %c3_157 = arith.constant 3 : index
    %c0_158 = arith.constant 0 : index
    %c0_159 = arith.constant 0 : index
    %66 = vector.load %arg1[%c0_155, %c3_156, %c3_157, %c0_158, %c0_159] : memref<1x12x12x1x49xf32, #tpu.memory_space<vmem>>, vector<1x1x1x1x49xf32>
    %67 = vector.shape_cast %66 : vector<1x1x1x1x49xf32> to vector<1x49xf32>
    %c0_160 = arith.constant 0 : index
    %c3_161 = arith.constant 3 : index
    %c4_162 = arith.constant 4 : index
    %c0_163 = arith.constant 0 : index
    %c0_164 = arith.constant 0 : index
    %68 = vector.load %arg1[%c0_160, %c3_161, %c4_162, %c0_163, %c0_164] : memref<1x12x12x1x49xf32, #tpu.memory_space<vmem>>, vector<1x1x1x1x49xf32>
    %69 = vector.shape_cast %68 : vector<1x1x1x1x49xf32> to vector<1x49xf32>
    %c0_165 = arith.constant 0 : index
    %c3_166 = arith.constant 3 : index
    %c5_167 = arith.constant 5 : index
    %c0_168 = arith.constant 0 : index
    %c0_169 = arith.constant 0 : index
    %70 = vector.load %arg1[%c0_165, %c3_166, %c5_167, %c0_168, %c0_169] : memref<1x12x12x1x49xf32, #tpu.memory_space<vmem>>, vector<1x1x1x1x49xf32>
    %71 = vector.shape_cast %70 : vector<1x1x1x1x49xf32> to vector<1x49xf32>
    %c0_170 = arith.constant 0 : index
    %c3_171 = arith.constant 3 : index
    %c6_172 = arith.constant 6 : index
    %c0_173 = arith.constant 0 : index
    %c0_174 = arith.constant 0 : index
    %72 = vector.load %arg1[%c0_170, %c3_171, %c6_172, %c0_173, %c0_174] : memref<1x12x12x1x49xf32, #tpu.memory_space<vmem>>, vector<1x1x1x1x49xf32>
    %73 = vector.shape_cast %72 : vector<1x1x1x1x49xf32> to vector<1x49xf32>
    %c0_175 = arith.constant 0 : index
    %c3_176 = arith.constant 3 : index
    %c7_177 = arith.constant 7 : index
    %c0_178 = arith.constant 0 : index
    %c0_179 = arith.constant 0 : index
    %74 = vector.load %arg1[%c0_175, %c3_176, %c7_177, %c0_178, %c0_179] : memref<1x12x12x1x49xf32, #tpu.memory_space<vmem>>, vector<1x1x1x1x49xf32>
    %75 = vector.shape_cast %74 : vector<1x1x1x1x49xf32> to vector<1x49xf32>
    %c0_180 = arith.constant 0 : index
    %c3_181 = arith.constant 3 : index
    %c8_182 = arith.constant 8 : index
    %c0_183 = arith.constant 0 : index
    %c0_184 = arith.constant 0 : index
    %76 = vector.load %arg1[%c0_180, %c3_181, %c8_182, %c0_183, %c0_184] : memref<1x12x12x1x49xf32, #tpu.memory_space<vmem>>, vector<1x1x1x1x49xf32>
    %77 = vector.shape_cast %76 : vector<1x1x1x1x49xf32> to vector<1x49xf32>
    %c0_185 = arith.constant 0 : index
    %c3_186 = arith.constant 3 : index
    %c9_187 = arith.constant 9 : index
    %c0_188 = arith.constant 0 : index
    %c0_189 = arith.constant 0 : index
    %78 = vector.load %arg1[%c0_185, %c3_186, %c9_187, %c0_188, %c0_189] : memref<1x12x12x1x49xf32, #tpu.memory_space<vmem>>, vector<1x1x1x1x49xf32>
    %79 = vector.shape_cast %78 : vector<1x1x1x1x49xf32> to vector<1x49xf32>
    %c0_190 = arith.constant 0 : index
    %c4_191 = arith.constant 4 : index
    %c0_192 = arith.constant 0 : index
    %c0_193 = arith.constant 0 : index
    %c0_194 = arith.constant 0 : index
    %80 = vector.load %arg1[%c0_190, %c4_191, %c0_192, %c0_193, %c0_194] : memref<1x12x12x1x49xf32, #tpu.memory_space<vmem>>, vector<1x1x1x1x49xf32>
    %81 = vector.shape_cast %80 : vector<1x1x1x1x49xf32> to vector<1x49xf32>
    %c0_195 = arith.constant 0 : index
    %c4_196 = arith.constant 4 : index
    %c1_197 = arith.constant 1 : index
    %c0_198 = arith.constant 0 : index
    %c0_199 = arith.constant 0 : index
    %82 = vector.load %arg1[%c0_195, %c4_196, %c1_197, %c0_198, %c0_199] : memref<1x12x12x1x49xf32, #tpu.memory_space<vmem>>, vector<1x1x1x1x49xf32>
    %83 = vector.shape_cast %82 : vector<1x1x1x1x49xf32> to vector<1x49xf32>
    %c0_200 = arith.constant 0 : index
    %c4_201 = arith.constant 4 : index
    %c2_202 = arith.constant 2 : index
    %c0_203 = arith.constant 0 : index
    %c0_204 = arith.constant 0 : index
    %84 = vector.load %arg1[%c0_200, %c4_201, %c2_202, %c0_203, %c0_204] : memref<1x12x12x1x49xf32, #tpu.memory_space<vmem>>, vector<1x1x1x1x49xf32>
    %85 = vector.shape_cast %84 : vector<1x1x1x1x49xf32> to vector<1x49xf32>
    %c0_205 = arith.constant 0 : index
    %c4_206 = arith.constant 4 : index
    %c3_207 = arith.constant 3 : index
    %c0_208 = arith.constant 0 : index
    %c0_209 = arith.constant 0 : index
    %86 = vector.load %arg1[%c0_205, %c4_206, %c3_207, %c0_208, %c0_209] : memref<1x12x12x1x49xf32, #tpu.memory_space<vmem>>, vector<1x1x1x1x49xf32>
    %87 = vector.shape_cast %86 : vector<1x1x1x1x49xf32> to vector<1x49xf32>
    %c0_210 = arith.constant 0 : index
    %c4_211 = arith.constant 4 : index
    %c4_212 = arith.constant 4 : index
    %c0_213 = arith.constant 0 : index
    %c0_214 = arith.constant 0 : index
    %88 = vector.load %arg1[%c0_210, %c4_211, %c4_212, %c0_213, %c0_214] : memref<1x12x12x1x49xf32, #tpu.memory_space<vmem>>, vector<1x1x1x1x49xf32>
    %89 = vector.shape_cast %88 : vector<1x1x1x1x49xf32> to vector<1x49xf32>
    %c0_215 = arith.constant 0 : index
    %c4_216 = arith.constant 4 : index
    %c5_217 = arith.constant 5 : index
    %c0_218 = arith.constant 0 : index
    %c0_219 = arith.constant 0 : index
    %90 = vector.load %arg1[%c0_215, %c4_216, %c5_217, %c0_218, %c0_219] : memref<1x12x12x1x49xf32, #tpu.memory_space<vmem>>, vector<1x1x1x1x49xf32>
    %91 = vector.shape_cast %90 : vector<1x1x1x1x49xf32> to vector<1x49xf32>
    %c0_220 = arith.constant 0 : index
    %c4_221 = arith.constant 4 : index
    %c6_222 = arith.constant 6 : index
    %c0_223 = arith.constant 0 : index
    %c0_224 = arith.constant 0 : index
    %92 = vector.load %arg1[%c0_220, %c4_221, %c6_222, %c0_223, %c0_224] : memref<1x12x12x1x49xf32, #tpu.memory_space<vmem>>, vector<1x1x1x1x49xf32>
    %93 = vector.shape_cast %92 : vector<1x1x1x1x49xf32> to vector<1x49xf32>
    %c0_225 = arith.constant 0 : index
    %c4_226 = arith.constant 4 : index
    %c7_227 = arith.constant 7 : index
    %c0_228 = arith.constant 0 : index
    %c0_229 = arith.constant 0 : index
    %94 = vector.load %arg1[%c0_225, %c4_226, %c7_227, %c0_228, %c0_229] : memref<1x12x12x1x49xf32, #tpu.memory_space<vmem>>, vector<1x1x1x1x49xf32>
    %95 = vector.shape_cast %94 : vector<1x1x1x1x49xf32> to vector<1x49xf32>
    %c0_230 = arith.constant 0 : index
    %c4_231 = arith.constant 4 : index
    %c8_232 = arith.constant 8 : index
    %c0_233 = arith.constant 0 : index
    %c0_234 = arith.constant 0 : index
    %96 = vector.load %arg1[%c0_230, %c4_231, %c8_232, %c0_233, %c0_234] : memref<1x12x12x1x49xf32, #tpu.memory_space<vmem>>, vector<1x1x1x1x49xf32>
    %97 = vector.shape_cast %96 : vector<1x1x1x1x49xf32> to vector<1x49xf32>
    %c0_235 = arith.constant 0 : index
    %c4_236 = arith.constant 4 : index
    %c9_237 = arith.constant 9 : index
    %c0_238 = arith.constant 0 : index
    %c0_239 = arith.constant 0 : index
    %98 = vector.load %arg1[%c0_235, %c4_236, %c9_237, %c0_238, %c0_239] : memref<1x12x12x1x49xf32, #tpu.memory_space<vmem>>, vector<1x1x1x1x49xf32>
    %99 = vector.shape_cast %98 : vector<1x1x1x1x49xf32> to vector<1x49xf32>
    %c0_240 = arith.constant 0 : index
    %c5_241 = arith.constant 5 : index
    %c0_242 = arith.constant 0 : index
    %c0_243 = arith.constant 0 : index
    %c0_244 = arith.constant 0 : index
    %100 = vector.load %arg1[%c0_240, %c5_241, %c0_242, %c0_243, %c0_244] : memref<1x12x12x1x49xf32, #tpu.memory_space<vmem>>, vector<1x1x1x1x49xf32>
    %101 = vector.shape_cast %100 : vector<1x1x1x1x49xf32> to vector<1x49xf32>
    %c0_245 = arith.constant 0 : index
    %c5_246 = arith.constant 5 : index
    %c1_247 = arith.constant 1 : index
    %c0_248 = arith.constant 0 : index
    %c0_249 = arith.constant 0 : index
    %102 = vector.load %arg1[%c0_245, %c5_246, %c1_247, %c0_248, %c0_249] : memref<1x12x12x1x49xf32, #tpu.memory_space<vmem>>, vector<1x1x1x1x49xf32>
    %103 = vector.shape_cast %102 : vector<1x1x1x1x49xf32> to vector<1x49xf32>
    %c0_250 = arith.constant 0 : index
    %c5_251 = arith.constant 5 : index
    %c2_252 = arith.constant 2 : index
    %c0_253 = arith.constant 0 : index
    %c0_254 = arith.constant 0 : index
    %104 = vector.load %arg1[%c0_250, %c5_251, %c2_252, %c0_253, %c0_254] : memref<1x12x12x1x49xf32, #tpu.memory_space<vmem>>, vector<1x1x1x1x49xf32>
    %105 = vector.shape_cast %104 : vector<1x1x1x1x49xf32> to vector<1x49xf32>
    %c0_255 = arith.constant 0 : index
    %c5_256 = arith.constant 5 : index
    %c3_257 = arith.constant 3 : index
    %c0_258 = arith.constant 0 : index
    %c0_259 = arith.constant 0 : index
    %106 = vector.load %arg1[%c0_255, %c5_256, %c3_257, %c0_258, %c0_259] : memref<1x12x12x1x49xf32, #tpu.memory_space<vmem>>, vector<1x1x1x1x49xf32>
    %107 = vector.shape_cast %106 : vector<1x1x1x1x49xf32> to vector<1x49xf32>
    %c0_260 = arith.constant 0 : index
    %c5_261 = arith.constant 5 : index
    %c4_262 = arith.constant 4 : index
    %c0_263 = arith.constant 0 : index
    %c0_264 = arith.constant 0 : index
    %108 = vector.load %arg1[%c0_260, %c5_261, %c4_262, %c0_263, %c0_264] : memref<1x12x12x1x49xf32, #tpu.memory_space<vmem>>, vector<1x1x1x1x49xf32>
    %109 = vector.shape_cast %108 : vector<1x1x1x1x49xf32> to vector<1x49xf32>
    %c0_265 = arith.constant 0 : index
    %c5_266 = arith.constant 5 : index
    %c5_267 = arith.constant 5 : index
    %c0_268 = arith.constant 0 : index
    %c0_269 = arith.constant 0 : index
    %110 = vector.load %arg1[%c0_265, %c5_266, %c5_267, %c0_268, %c0_269] : memref<1x12x12x1x49xf32, #tpu.memory_space<vmem>>, vector<1x1x1x1x49xf32>
    %111 = vector.shape_cast %110 : vector<1x1x1x1x49xf32> to vector<1x49xf32>
    %c0_270 = arith.constant 0 : index
    %c5_271 = arith.constant 5 : index
    %c6_272 = arith.constant 6 : index
    %c0_273 = arith.constant 0 : index
    %c0_274 = arith.constant 0 : index
    %112 = vector.load %arg1[%c0_270, %c5_271, %c6_272, %c0_273, %c0_274] : memref<1x12x12x1x49xf32, #tpu.memory_space<vmem>>, vector<1x1x1x1x49xf32>
    %113 = vector.shape_cast %112 : vector<1x1x1x1x49xf32> to vector<1x49xf32>
    %c0_275 = arith.constant 0 : index
    %c5_276 = arith.constant 5 : index
    %c7_277 = arith.constant 7 : index
    %c0_278 = arith.constant 0 : index
    %c0_279 = arith.constant 0 : index
    %114 = vector.load %arg1[%c0_275, %c5_276, %c7_277, %c0_278, %c0_279] : memref<1x12x12x1x49xf32, #tpu.memory_space<vmem>>, vector<1x1x1x1x49xf32>
    %115 = vector.shape_cast %114 : vector<1x1x1x1x49xf32> to vector<1x49xf32>
    %c0_280 = arith.constant 0 : index
    %c5_281 = arith.constant 5 : index
    %c8_282 = arith.constant 8 : index
    %c0_283 = arith.constant 0 : index
    %c0_284 = arith.constant 0 : index
    %116 = vector.load %arg1[%c0_280, %c5_281, %c8_282, %c0_283, %c0_284] : memref<1x12x12x1x49xf32, #tpu.memory_space<vmem>>, vector<1x1x1x1x49xf32>
    %117 = vector.shape_cast %116 : vector<1x1x1x1x49xf32> to vector<1x49xf32>
    %c0_285 = arith.constant 0 : index
    %c5_286 = arith.constant 5 : index
    %c9_287 = arith.constant 9 : index
    %c0_288 = arith.constant 0 : index
    %c0_289 = arith.constant 0 : index
    %118 = vector.load %arg1[%c0_285, %c5_286, %c9_287, %c0_288, %c0_289] : memref<1x12x12x1x49xf32, #tpu.memory_space<vmem>>, vector<1x1x1x1x49xf32>
    %119 = vector.shape_cast %118 : vector<1x1x1x1x49xf32> to vector<1x49xf32>
    %c0_290 = arith.constant 0 : index
    %c6_291 = arith.constant 6 : index
    %c0_292 = arith.constant 0 : index
    %c0_293 = arith.constant 0 : index
    %c0_294 = arith.constant 0 : index
    %120 = vector.load %arg1[%c0_290, %c6_291, %c0_292, %c0_293, %c0_294] : memref<1x12x12x1x49xf32, #tpu.memory_space<vmem>>, vector<1x1x1x1x49xf32>
    %121 = vector.shape_cast %120 : vector<1x1x1x1x49xf32> to vector<1x49xf32>
    %c0_295 = arith.constant 0 : index
    %c6_296 = arith.constant 6 : index
    %c1_297 = arith.constant 1 : index
    %c0_298 = arith.constant 0 : index
    %c0_299 = arith.constant 0 : index
    %122 = vector.load %arg1[%c0_295, %c6_296, %c1_297, %c0_298, %c0_299] : memref<1x12x12x1x49xf32, #tpu.memory_space<vmem>>, vector<1x1x1x1x49xf32>
    %123 = vector.shape_cast %122 : vector<1x1x1x1x49xf32> to vector<1x49xf32>
    %c0_300 = arith.constant 0 : index
    %c6_301 = arith.constant 6 : index
    %c2_302 = arith.constant 2 : index
    %c0_303 = arith.constant 0 : index
    %c0_304 = arith.constant 0 : index
    %124 = vector.load %arg1[%c0_300, %c6_301, %c2_302, %c0_303, %c0_304] : memref<1x12x12x1x49xf32, #tpu.memory_space<vmem>>, vector<1x1x1x1x49xf32>
    %125 = vector.shape_cast %124 : vector<1x1x1x1x49xf32> to vector<1x49xf32>
    %c0_305 = arith.constant 0 : index
    %c6_306 = arith.constant 6 : index
    %c3_307 = arith.constant 3 : index
    %c0_308 = arith.constant 0 : index
    %c0_309 = arith.constant 0 : index
    %126 = vector.load %arg1[%c0_305, %c6_306, %c3_307, %c0_308, %c0_309] : memref<1x12x12x1x49xf32, #tpu.memory_space<vmem>>, vector<1x1x1x1x49xf32>
    %127 = vector.shape_cast %126 : vector<1x1x1x1x49xf32> to vector<1x49xf32>
    %c0_310 = arith.constant 0 : index
    %c6_311 = arith.constant 6 : index
    %c4_312 = arith.constant 4 : index
    %c0_313 = arith.constant 0 : index
    %c0_314 = arith.constant 0 : index
    %128 = vector.load %arg1[%c0_310, %c6_311, %c4_312, %c0_313, %c0_314] : memref<1x12x12x1x49xf32, #tpu.memory_space<vmem>>, vector<1x1x1x1x49xf32>
    %129 = vector.shape_cast %128 : vector<1x1x1x1x49xf32> to vector<1x49xf32>
    %c0_315 = arith.constant 0 : index
    %c6_316 = arith.constant 6 : index
    %c5_317 = arith.constant 5 : index
    %c0_318 = arith.constant 0 : index
    %c0_319 = arith.constant 0 : index
    %130 = vector.load %arg1[%c0_315, %c6_316, %c5_317, %c0_318, %c0_319] : memref<1x12x12x1x49xf32, #tpu.memory_space<vmem>>, vector<1x1x1x1x49xf32>
    %131 = vector.shape_cast %130 : vector<1x1x1x1x49xf32> to vector<1x49xf32>
    %c0_320 = arith.constant 0 : index
    %c6_321 = arith.constant 6 : index
    %c6_322 = arith.constant 6 : index
    %c0_323 = arith.constant 0 : index
    %c0_324 = arith.constant 0 : index
    %132 = vector.load %arg1[%c0_320, %c6_321, %c6_322, %c0_323, %c0_324] : memref<1x12x12x1x49xf32, #tpu.memory_space<vmem>>, vector<1x1x1x1x49xf32>
    %133 = vector.shape_cast %132 : vector<1x1x1x1x49xf32> to vector<1x49xf32>
    %c0_325 = arith.constant 0 : index
    %c6_326 = arith.constant 6 : index
    %c7_327 = arith.constant 7 : index
    %c0_328 = arith.constant 0 : index
    %c0_329 = arith.constant 0 : index
    %134 = vector.load %arg1[%c0_325, %c6_326, %c7_327, %c0_328, %c0_329] : memref<1x12x12x1x49xf32, #tpu.memory_space<vmem>>, vector<1x1x1x1x49xf32>
    %135 = vector.shape_cast %134 : vector<1x1x1x1x49xf32> to vector<1x49xf32>
    %c0_330 = arith.constant 0 : index
    %c6_331 = arith.constant 6 : index
    %c8_332 = arith.constant 8 : index
    %c0_333 = arith.constant 0 : index
    %c0_334 = arith.constant 0 : index
    %136 = vector.load %arg1[%c0_330, %c6_331, %c8_332, %c0_333, %c0_334] : memref<1x12x12x1x49xf32, #tpu.memory_space<vmem>>, vector<1x1x1x1x49xf32>
    %137 = vector.shape_cast %136 : vector<1x1x1x1x49xf32> to vector<1x49xf32>
    %c0_335 = arith.constant 0 : index
    %c6_336 = arith.constant 6 : index
    %c9_337 = arith.constant 9 : index
    %c0_338 = arith.constant 0 : index
    %c0_339 = arith.constant 0 : index
    %138 = vector.load %arg1[%c0_335, %c6_336, %c9_337, %c0_338, %c0_339] : memref<1x12x12x1x49xf32, #tpu.memory_space<vmem>>, vector<1x1x1x1x49xf32>
    %139 = vector.shape_cast %138 : vector<1x1x1x1x49xf32> to vector<1x49xf32>
    %c0_340 = arith.constant 0 : index
    %c7_341 = arith.constant 7 : index
    %c0_342 = arith.constant 0 : index
    %c0_343 = arith.constant 0 : index
    %c0_344 = arith.constant 0 : index
    %140 = vector.load %arg1[%c0_340, %c7_341, %c0_342, %c0_343, %c0_344] : memref<1x12x12x1x49xf32, #tpu.memory_space<vmem>>, vector<1x1x1x1x49xf32>
    %141 = vector.shape_cast %140 : vector<1x1x1x1x49xf32> to vector<1x49xf32>
    %c0_345 = arith.constant 0 : index
    %c7_346 = arith.constant 7 : index
    %c1_347 = arith.constant 1 : index
    %c0_348 = arith.constant 0 : index
    %c0_349 = arith.constant 0 : index
    %142 = vector.load %arg1[%c0_345, %c7_346, %c1_347, %c0_348, %c0_349] : memref<1x12x12x1x49xf32, #tpu.memory_space<vmem>>, vector<1x1x1x1x49xf32>
    %143 = vector.shape_cast %142 : vector<1x1x1x1x49xf32> to vector<1x49xf32>
    %c0_350 = arith.constant 0 : index
    %c7_351 = arith.constant 7 : index
    %c2_352 = arith.constant 2 : index
    %c0_353 = arith.constant 0 : index
    %c0_354 = arith.constant 0 : index
    %144 = vector.load %arg1[%c0_350, %c7_351, %c2_352, %c0_353, %c0_354] : memref<1x12x12x1x49xf32, #tpu.memory_space<vmem>>, vector<1x1x1x1x49xf32>
    %145 = vector.shape_cast %144 : vector<1x1x1x1x49xf32> to vector<1x49xf32>
    %c0_355 = arith.constant 0 : index
    %c7_356 = arith.constant 7 : index
    %c3_357 = arith.constant 3 : index
    %c0_358 = arith.constant 0 : index
    %c0_359 = arith.constant 0 : index
    %146 = vector.load %arg1[%c0_355, %c7_356, %c3_357, %c0_358, %c0_359] : memref<1x12x12x1x49xf32, #tpu.memory_space<vmem>>, vector<1x1x1x1x49xf32>
    %147 = vector.shape_cast %146 : vector<1x1x1x1x49xf32> to vector<1x49xf32>
    %c0_360 = arith.constant 0 : index
    %c7_361 = arith.constant 7 : index
    %c4_362 = arith.constant 4 : index
    %c0_363 = arith.constant 0 : index
    %c0_364 = arith.constant 0 : index
    %148 = vector.load %arg1[%c0_360, %c7_361, %c4_362, %c0_363, %c0_364] : memref<1x12x12x1x49xf32, #tpu.memory_space<vmem>>, vector<1x1x1x1x49xf32>
    %149 = vector.shape_cast %148 : vector<1x1x1x1x49xf32> to vector<1x49xf32>
    %c0_365 = arith.constant 0 : index
    %c7_366 = arith.constant 7 : index
    %c5_367 = arith.constant 5 : index
    %c0_368 = arith.constant 0 : index
    %c0_369 = arith.constant 0 : index
    %150 = vector.load %arg1[%c0_365, %c7_366, %c5_367, %c0_368, %c0_369] : memref<1x12x12x1x49xf32, #tpu.memory_space<vmem>>, vector<1x1x1x1x49xf32>
    %151 = vector.shape_cast %150 : vector<1x1x1x1x49xf32> to vector<1x49xf32>
    %c0_370 = arith.constant 0 : index
    %c7_371 = arith.constant 7 : index
    %c6_372 = arith.constant 6 : index
    %c0_373 = arith.constant 0 : index
    %c0_374 = arith.constant 0 : index
    %152 = vector.load %arg1[%c0_370, %c7_371, %c6_372, %c0_373, %c0_374] : memref<1x12x12x1x49xf32, #tpu.memory_space<vmem>>, vector<1x1x1x1x49xf32>
    %153 = vector.shape_cast %152 : vector<1x1x1x1x49xf32> to vector<1x49xf32>
    %c0_375 = arith.constant 0 : index
    %c7_376 = arith.constant 7 : index
    %c7_377 = arith.constant 7 : index
    %c0_378 = arith.constant 0 : index
    %c0_379 = arith.constant 0 : index
    %154 = vector.load %arg1[%c0_375, %c7_376, %c7_377, %c0_378, %c0_379] : memref<1x12x12x1x49xf32, #tpu.memory_space<vmem>>, vector<1x1x1x1x49xf32>
    %155 = vector.shape_cast %154 : vector<1x1x1x1x49xf32> to vector<1x49xf32>
    %c0_380 = arith.constant 0 : index
    %c7_381 = arith.constant 7 : index
    %c8_382 = arith.constant 8 : index
    %c0_383 = arith.constant 0 : index
    %c0_384 = arith.constant 0 : index
    %156 = vector.load %arg1[%c0_380, %c7_381, %c8_382, %c0_383, %c0_384] : memref<1x12x12x1x49xf32, #tpu.memory_space<vmem>>, vector<1x1x1x1x49xf32>
    %157 = vector.shape_cast %156 : vector<1x1x1x1x49xf32> to vector<1x49xf32>
    %c0_385 = arith.constant 0 : index
    %c7_386 = arith.constant 7 : index
    %c9_387 = arith.constant 9 : index
    %c0_388 = arith.constant 0 : index
    %c0_389 = arith.constant 0 : index
    %158 = vector.load %arg1[%c0_385, %c7_386, %c9_387, %c0_388, %c0_389] : memref<1x12x12x1x49xf32, #tpu.memory_space<vmem>>, vector<1x1x1x1x49xf32>
    %159 = vector.shape_cast %158 : vector<1x1x1x1x49xf32> to vector<1x49xf32>
    %c0_390 = arith.constant 0 : index
    %c8_391 = arith.constant 8 : index
    %c0_392 = arith.constant 0 : index
    %c0_393 = arith.constant 0 : index
    %c0_394 = arith.constant 0 : index
    %160 = vector.load %arg1[%c0_390, %c8_391, %c0_392, %c0_393, %c0_394] : memref<1x12x12x1x49xf32, #tpu.memory_space<vmem>>, vector<1x1x1x1x49xf32>
    %161 = vector.shape_cast %160 : vector<1x1x1x1x49xf32> to vector<1x49xf32>
    %c0_395 = arith.constant 0 : index
    %c8_396 = arith.constant 8 : index
    %c1_397 = arith.constant 1 : index
    %c0_398 = arith.constant 0 : index
    %c0_399 = arith.constant 0 : index
    %162 = vector.load %arg1[%c0_395, %c8_396, %c1_397, %c0_398, %c0_399] : memref<1x12x12x1x49xf32, #tpu.memory_space<vmem>>, vector<1x1x1x1x49xf32>
    %163 = vector.shape_cast %162 : vector<1x1x1x1x49xf32> to vector<1x49xf32>
    %c0_400 = arith.constant 0 : index
    %c8_401 = arith.constant 8 : index
    %c2_402 = arith.constant 2 : index
    %c0_403 = arith.constant 0 : index
    %c0_404 = arith.constant 0 : index
    %164 = vector.load %arg1[%c0_400, %c8_401, %c2_402, %c0_403, %c0_404] : memref<1x12x12x1x49xf32, #tpu.memory_space<vmem>>, vector<1x1x1x1x49xf32>
    %165 = vector.shape_cast %164 : vector<1x1x1x1x49xf32> to vector<1x49xf32>
    %c0_405 = arith.constant 0 : index
    %c8_406 = arith.constant 8 : index
    %c3_407 = arith.constant 3 : index
    %c0_408 = arith.constant 0 : index
    %c0_409 = arith.constant 0 : index
    %166 = vector.load %arg1[%c0_405, %c8_406, %c3_407, %c0_408, %c0_409] : memref<1x12x12x1x49xf32, #tpu.memory_space<vmem>>, vector<1x1x1x1x49xf32>
    %167 = vector.shape_cast %166 : vector<1x1x1x1x49xf32> to vector<1x49xf32>
    %c0_410 = arith.constant 0 : index
    %c8_411 = arith.constant 8 : index
    %c4_412 = arith.constant 4 : index
    %c0_413 = arith.constant 0 : index
    %c0_414 = arith.constant 0 : index
    %168 = vector.load %arg1[%c0_410, %c8_411, %c4_412, %c0_413, %c0_414] : memref<1x12x12x1x49xf32, #tpu.memory_space<vmem>>, vector<1x1x1x1x49xf32>
    %169 = vector.shape_cast %168 : vector<1x1x1x1x49xf32> to vector<1x49xf32>
    %c0_415 = arith.constant 0 : index
    %c8_416 = arith.constant 8 : index
    %c5_417 = arith.constant 5 : index
    %c0_418 = arith.constant 0 : index
    %c0_419 = arith.constant 0 : index
    %170 = vector.load %arg1[%c0_415, %c8_416, %c5_417, %c0_418, %c0_419] : memref<1x12x12x1x49xf32, #tpu.memory_space<vmem>>, vector<1x1x1x1x49xf32>
    %171 = vector.shape_cast %170 : vector<1x1x1x1x49xf32> to vector<1x49xf32>
    %c0_420 = arith.constant 0 : index
    %c8_421 = arith.constant 8 : index
    %c6_422 = arith.constant 6 : index
    %c0_423 = arith.constant 0 : index
    %c0_424 = arith.constant 0 : index
    %172 = vector.load %arg1[%c0_420, %c8_421, %c6_422, %c0_423, %c0_424] : memref<1x12x12x1x49xf32, #tpu.memory_space<vmem>>, vector<1x1x1x1x49xf32>
    %173 = vector.shape_cast %172 : vector<1x1x1x1x49xf32> to vector<1x49xf32>
    %c0_425 = arith.constant 0 : index
    %c8_426 = arith.constant 8 : index
    %c7_427 = arith.constant 7 : index
    %c0_428 = arith.constant 0 : index
    %c0_429 = arith.constant 0 : index
    %174 = vector.load %arg1[%c0_425, %c8_426, %c7_427, %c0_428, %c0_429] : memref<1x12x12x1x49xf32, #tpu.memory_space<vmem>>, vector<1x1x1x1x49xf32>
    %175 = vector.shape_cast %174 : vector<1x1x1x1x49xf32> to vector<1x49xf32>
    %c0_430 = arith.constant 0 : index
    %c8_431 = arith.constant 8 : index
    %c8_432 = arith.constant 8 : index
    %c0_433 = arith.constant 0 : index
    %c0_434 = arith.constant 0 : index
    %176 = vector.load %arg1[%c0_430, %c8_431, %c8_432, %c0_433, %c0_434] : memref<1x12x12x1x49xf32, #tpu.memory_space<vmem>>, vector<1x1x1x1x49xf32>
    %177 = vector.shape_cast %176 : vector<1x1x1x1x49xf32> to vector<1x49xf32>
    %c0_435 = arith.constant 0 : index
    %c8_436 = arith.constant 8 : index
    %c9_437 = arith.constant 9 : index
    %c0_438 = arith.constant 0 : index
    %c0_439 = arith.constant 0 : index
    %178 = vector.load %arg1[%c0_435, %c8_436, %c9_437, %c0_438, %c0_439] : memref<1x12x12x1x49xf32, #tpu.memory_space<vmem>>, vector<1x1x1x1x49xf32>
    %179 = vector.shape_cast %178 : vector<1x1x1x1x49xf32> to vector<1x49xf32>
    %c0_440 = arith.constant 0 : index
    %c9_441 = arith.constant 9 : index
    %c0_442 = arith.constant 0 : index
    %c0_443 = arith.constant 0 : index
    %c0_444 = arith.constant 0 : index
    %180 = vector.load %arg1[%c0_440, %c9_441, %c0_442, %c0_443, %c0_444] : memref<1x12x12x1x49xf32, #tpu.memory_space<vmem>>, vector<1x1x1x1x49xf32>
    %181 = vector.shape_cast %180 : vector<1x1x1x1x49xf32> to vector<1x49xf32>
    %c0_445 = arith.constant 0 : index
    %c9_446 = arith.constant 9 : index
    %c1_447 = arith.constant 1 : index
    %c0_448 = arith.constant 0 : index
    %c0_449 = arith.constant 0 : index
    %182 = vector.load %arg1[%c0_445, %c9_446, %c1_447, %c0_448, %c0_449] : memref<1x12x12x1x49xf32, #tpu.memory_space<vmem>>, vector<1x1x1x1x49xf32>
    %183 = vector.shape_cast %182 : vector<1x1x1x1x49xf32> to vector<1x49xf32>
    %c0_450 = arith.constant 0 : index
    %c9_451 = arith.constant 9 : index
    %c2_452 = arith.constant 2 : index
    %c0_453 = arith.constant 0 : index
    %c0_454 = arith.constant 0 : index
    %184 = vector.load %arg1[%c0_450, %c9_451, %c2_452, %c0_453, %c0_454] : memref<1x12x12x1x49xf32, #tpu.memory_space<vmem>>, vector<1x1x1x1x49xf32>
    %185 = vector.shape_cast %184 : vector<1x1x1x1x49xf32> to vector<1x49xf32>
    %c0_455 = arith.constant 0 : index
    %c9_456 = arith.constant 9 : index
    %c3_457 = arith.constant 3 : index
    %c0_458 = arith.constant 0 : index
    %c0_459 = arith.constant 0 : index
    %186 = vector.load %arg1[%c0_455, %c9_456, %c3_457, %c0_458, %c0_459] : memref<1x12x12x1x49xf32, #tpu.memory_space<vmem>>, vector<1x1x1x1x49xf32>
    %187 = vector.shape_cast %186 : vector<1x1x1x1x49xf32> to vector<1x49xf32>
    %c0_460 = arith.constant 0 : index
    %c9_461 = arith.constant 9 : index
    %c4_462 = arith.constant 4 : index
    %c0_463 = arith.constant 0 : index
    %c0_464 = arith.constant 0 : index
    %188 = vector.load %arg1[%c0_460, %c9_461, %c4_462, %c0_463, %c0_464] : memref<1x12x12x1x49xf32, #tpu.memory_space<vmem>>, vector<1x1x1x1x49xf32>
    %189 = vector.shape_cast %188 : vector<1x1x1x1x49xf32> to vector<1x49xf32>
    %c0_465 = arith.constant 0 : index
    %c9_466 = arith.constant 9 : index
    %c5_467 = arith.constant 5 : index
    %c0_468 = arith.constant 0 : index
    %c0_469 = arith.constant 0 : index
    %190 = vector.load %arg1[%c0_465, %c9_466, %c5_467, %c0_468, %c0_469] : memref<1x12x12x1x49xf32, #tpu.memory_space<vmem>>, vector<1x1x1x1x49xf32>
    %191 = vector.shape_cast %190 : vector<1x1x1x1x49xf32> to vector<1x49xf32>
    %c0_470 = arith.constant 0 : index
    %c9_471 = arith.constant 9 : index
    %c6_472 = arith.constant 6 : index
    %c0_473 = arith.constant 0 : index
    %c0_474 = arith.constant 0 : index
    %192 = vector.load %arg1[%c0_470, %c9_471, %c6_472, %c0_473, %c0_474] : memref<1x12x12x1x49xf32, #tpu.memory_space<vmem>>, vector<1x1x1x1x49xf32>
    %193 = vector.shape_cast %192 : vector<1x1x1x1x49xf32> to vector<1x49xf32>
    %c0_475 = arith.constant 0 : index
    %c9_476 = arith.constant 9 : index
    %c7_477 = arith.constant 7 : index
    %c0_478 = arith.constant 0 : index
    %c0_479 = arith.constant 0 : index
    %194 = vector.load %arg1[%c0_475, %c9_476, %c7_477, %c0_478, %c0_479] : memref<1x12x12x1x49xf32, #tpu.memory_space<vmem>>, vector<1x1x1x1x49xf32>
    %195 = vector.shape_cast %194 : vector<1x1x1x1x49xf32> to vector<1x49xf32>
    %c0_480 = arith.constant 0 : index
    %c9_481 = arith.constant 9 : index
    %c8_482 = arith.constant 8 : index
    %c0_483 = arith.constant 0 : index
    %c0_484 = arith.constant 0 : index
    %196 = vector.load %arg1[%c0_480, %c9_481, %c8_482, %c0_483, %c0_484] : memref<1x12x12x1x49xf32, #tpu.memory_space<vmem>>, vector<1x1x1x1x49xf32>
    %197 = vector.shape_cast %196 : vector<1x1x1x1x49xf32> to vector<1x49xf32>
    %c0_485 = arith.constant 0 : index
    %c9_486 = arith.constant 9 : index
    %c9_487 = arith.constant 9 : index
    %c0_488 = arith.constant 0 : index
    %c0_489 = arith.constant 0 : index
    %198 = vector.load %arg1[%c0_485, %c9_486, %c9_487, %c0_488, %c0_489] : memref<1x12x12x1x49xf32, #tpu.memory_space<vmem>>, vector<1x1x1x1x49xf32>
    %199 = vector.shape_cast %198 : vector<1x1x1x1x49xf32> to vector<1x49xf32>
    %c0_490 = arith.constant 0 : index
    %c0_491 = arith.constant 0 : index
    %c0_492 = arith.constant 0 : index
    %200 = vector.load %arg3[%c0_490, %c0_491, %c0_492] : memref<9x8x1xf32, #tpu.memory_space<vmem>>, vector<1x8x1xf32>
    %201 = vector.shape_cast %200 : vector<1x8x1xf32> to vector<8x1xf32>
    %c1_493 = arith.constant 1 : index
    %c0_494 = arith.constant 0 : index
    %c0_495 = arith.constant 0 : index
    %202 = vector.load %arg3[%c1_493, %c0_494, %c0_495] : memref<9x8x1xf32, #tpu.memory_space<vmem>>, vector<1x8x1xf32>
    %203 = vector.shape_cast %202 : vector<1x8x1xf32> to vector<8x1xf32>
    %c2_496 = arith.constant 2 : index
    %c0_497 = arith.constant 0 : index
    %c0_498 = arith.constant 0 : index
    %204 = vector.load %arg3[%c2_496, %c0_497, %c0_498] : memref<9x8x1xf32, #tpu.memory_space<vmem>>, vector<1x8x1xf32>
    %205 = vector.shape_cast %204 : vector<1x8x1xf32> to vector<8x1xf32>
    %c3_499 = arith.constant 3 : index
    %c0_500 = arith.constant 0 : index
    %c0_501 = arith.constant 0 : index
    %206 = vector.load %arg3[%c3_499, %c0_500, %c0_501] : memref<9x8x1xf32, #tpu.memory_space<vmem>>, vector<1x8x1xf32>
    %207 = vector.shape_cast %206 : vector<1x8x1xf32> to vector<8x1xf32>
    %c4_502 = arith.constant 4 : index
    %c0_503 = arith.constant 0 : index
    %c0_504 = arith.constant 0 : index
    %208 = vector.load %arg3[%c4_502, %c0_503, %c0_504] : memref<9x8x1xf32, #tpu.memory_space<vmem>>, vector<1x8x1xf32>
    %209 = vector.shape_cast %208 : vector<1x8x1xf32> to vector<8x1xf32>
    %c5_505 = arith.constant 5 : index
    %c0_506 = arith.constant 0 : index
    %c0_507 = arith.constant 0 : index
    %210 = vector.load %arg3[%c5_505, %c0_506, %c0_507] : memref<9x8x1xf32, #tpu.memory_space<vmem>>, vector<1x8x1xf32>
    %211 = vector.shape_cast %210 : vector<1x8x1xf32> to vector<8x1xf32>
    %c6_508 = arith.constant 6 : index
    %c0_509 = arith.constant 0 : index
    %c0_510 = arith.constant 0 : index
    %212 = vector.load %arg3[%c6_508, %c0_509, %c0_510] : memref<9x8x1xf32, #tpu.memory_space<vmem>>, vector<1x8x1xf32>
    %213 = vector.shape_cast %212 : vector<1x8x1xf32> to vector<8x1xf32>
    %c7_511 = arith.constant 7 : index
    %c0_512 = arith.constant 0 : index
    %c0_513 = arith.constant 0 : index
    %214 = vector.load %arg3[%c7_511, %c0_512, %c0_513] : memref<9x8x1xf32, #tpu.memory_space<vmem>>, vector<1x8x1xf32>
    %215 = vector.shape_cast %214 : vector<1x8x1xf32> to vector<8x1xf32>
    %c8_514 = arith.constant 8 : index
    %c0_515 = arith.constant 0 : index
    %c0_516 = arith.constant 0 : index
    %216 = vector.load %arg3[%c8_514, %c0_515, %c0_516] : memref<9x8x1xf32, #tpu.memory_space<vmem>>, vector<1x8x1xf32>
    %217 = vector.shape_cast %216 : vector<1x8x1xf32> to vector<8x1xf32>
    %c0_517 = arith.constant 0 : index
    %c0_518 = arith.constant 0 : index
    %218 = vector.load %arg4[%c0_517, %c0_518] : memref<8x1xf32, #tpu.memory_space<vmem>>, vector<8x1xf32>
    %cst = arith.constant 0.000000e+00 : f32
    %219 = vector.broadcast %cst : f32 to vector<8x49xf32>
    %220 = vector.broadcast %201 : vector<8x1xf32> to vector<8x49xf32>
    %221 = vector.broadcast %1 : vector<1x49xf32> to vector<8x49xf32>
    %222 = arith.mulf %220, %221 : vector<8x49xf32>
    %223 = arith.addf %219, %222 : vector<8x49xf32>
    %224 = vector.broadcast %203 : vector<8x1xf32> to vector<8x49xf32>
    %225 = vector.broadcast %3 : vector<1x49xf32> to vector<8x49xf32>
    %226 = arith.mulf %224, %225 : vector<8x49xf32>
    %227 = arith.addf %223, %226 : vector<8x49xf32>
    %228 = vector.broadcast %205 : vector<8x1xf32> to vector<8x49xf32>
    %229 = vector.broadcast %5 : vector<1x49xf32> to vector<8x49xf32>
    %230 = arith.mulf %228, %229 : vector<8x49xf32>
    %231 = arith.addf %227, %230 : vector<8x49xf32>
    %232 = vector.broadcast %207 : vector<8x1xf32> to vector<8x49xf32>
    %233 = vector.broadcast %21 : vector<1x49xf32> to vector<8x49xf32>
    %234 = arith.mulf %232, %233 : vector<8x49xf32>
    %235 = arith.addf %231, %234 : vector<8x49xf32>
    %236 = vector.broadcast %209 : vector<8x1xf32> to vector<8x49xf32>
    %237 = vector.broadcast %23 : vector<1x49xf32> to vector<8x49xf32>
    %238 = arith.mulf %236, %237 : vector<8x49xf32>
    %239 = arith.addf %235, %238 : vector<8x49xf32>
    %240 = vector.broadcast %211 : vector<8x1xf32> to vector<8x49xf32>
    %241 = vector.broadcast %25 : vector<1x49xf32> to vector<8x49xf32>
    %242 = arith.mulf %240, %241 : vector<8x49xf32>
    %243 = arith.addf %239, %242 : vector<8x49xf32>
    %244 = vector.broadcast %213 : vector<8x1xf32> to vector<8x49xf32>
    %245 = vector.broadcast %41 : vector<1x49xf32> to vector<8x49xf32>
    %246 = arith.mulf %244, %245 : vector<8x49xf32>
    %247 = arith.addf %243, %246 : vector<8x49xf32>
    %248 = vector.broadcast %215 : vector<8x1xf32> to vector<8x49xf32>
    %249 = vector.broadcast %43 : vector<1x49xf32> to vector<8x49xf32>
    %250 = arith.mulf %248, %249 : vector<8x49xf32>
    %251 = arith.addf %247, %250 : vector<8x49xf32>
    %252 = vector.broadcast %217 : vector<8x1xf32> to vector<8x49xf32>
    %253 = vector.broadcast %45 : vector<1x49xf32> to vector<8x49xf32>
    %254 = arith.mulf %252, %253 : vector<8x49xf32>
    %255 = arith.addf %251, %254 : vector<8x49xf32>
    %cst_519 = arith.constant 0.000000e+00 : f32
    %256 = vector.broadcast %cst_519 : f32 to vector<8x49xf32>
    %257 = vector.broadcast %201 : vector<8x1xf32> to vector<8x49xf32>
    %258 = vector.broadcast %3 : vector<1x49xf32> to vector<8x49xf32>
    %259 = arith.mulf %257, %258 : vector<8x49xf32>
    %260 = arith.addf %256, %259 : vector<8x49xf32>
    %261 = vector.broadcast %203 : vector<8x1xf32> to vector<8x49xf32>
    %262 = vector.broadcast %5 : vector<1x49xf32> to vector<8x49xf32>
    %263 = arith.mulf %261, %262 : vector<8x49xf32>
    %264 = arith.addf %260, %263 : vector<8x49xf32>
    %265 = vector.broadcast %205 : vector<8x1xf32> to vector<8x49xf32>
    %266 = vector.broadcast %7 : vector<1x49xf32> to vector<8x49xf32>
    %267 = arith.mulf %265, %266 : vector<8x49xf32>
    %268 = arith.addf %264, %267 : vector<8x49xf32>
    %269 = vector.broadcast %207 : vector<8x1xf32> to vector<8x49xf32>
    %270 = vector.broadcast %23 : vector<1x49xf32> to vector<8x49xf32>
    %271 = arith.mulf %269, %270 : vector<8x49xf32>
    %272 = arith.addf %268, %271 : vector<8x49xf32>
    %273 = vector.broadcast %209 : vector<8x1xf32> to vector<8x49xf32>
    %274 = vector.broadcast %25 : vector<1x49xf32> to vector<8x49xf32>
    %275 = arith.mulf %273, %274 : vector<8x49xf32>
    %276 = arith.addf %272, %275 : vector<8x49xf32>
    %277 = vector.broadcast %211 : vector<8x1xf32> to vector<8x49xf32>
    %278 = vector.broadcast %27 : vector<1x49xf32> to vector<8x49xf32>
    %279 = arith.mulf %277, %278 : vector<8x49xf32>
    %280 = arith.addf %276, %279 : vector<8x49xf32>
    %281 = vector.broadcast %213 : vector<8x1xf32> to vector<8x49xf32>
    %282 = vector.broadcast %43 : vector<1x49xf32> to vector<8x49xf32>
    %283 = arith.mulf %281, %282 : vector<8x49xf32>
    %284 = arith.addf %280, %283 : vector<8x49xf32>
    %285 = vector.broadcast %215 : vector<8x1xf32> to vector<8x49xf32>
    %286 = vector.broadcast %45 : vector<1x49xf32> to vector<8x49xf32>
    %287 = arith.mulf %285, %286 : vector<8x49xf32>
    %288 = arith.addf %284, %287 : vector<8x49xf32>
    %289 = vector.broadcast %217 : vector<8x1xf32> to vector<8x49xf32>
    %290 = vector.broadcast %47 : vector<1x49xf32> to vector<8x49xf32>
    %291 = arith.mulf %289, %290 : vector<8x49xf32>
    %292 = arith.addf %288, %291 : vector<8x49xf32>
    %293 = arith.maximumf %255, %292 : vector<8x49xf32>
    %cst_520 = arith.constant 0.000000e+00 : f32
    %294 = vector.broadcast %cst_520 : f32 to vector<8x49xf32>
    %295 = vector.broadcast %201 : vector<8x1xf32> to vector<8x49xf32>
    %296 = vector.broadcast %21 : vector<1x49xf32> to vector<8x49xf32>
    %297 = arith.mulf %295, %296 : vector<8x49xf32>
    %298 = arith.addf %294, %297 : vector<8x49xf32>
    %299 = vector.broadcast %203 : vector<8x1xf32> to vector<8x49xf32>
    %300 = vector.broadcast %23 : vector<1x49xf32> to vector<8x49xf32>
    %301 = arith.mulf %299, %300 : vector<8x49xf32>
    %302 = arith.addf %298, %301 : vector<8x49xf32>
    %303 = vector.broadcast %205 : vector<8x1xf32> to vector<8x49xf32>
    %304 = vector.broadcast %25 : vector<1x49xf32> to vector<8x49xf32>
    %305 = arith.mulf %303, %304 : vector<8x49xf32>
    %306 = arith.addf %302, %305 : vector<8x49xf32>
    %307 = vector.broadcast %207 : vector<8x1xf32> to vector<8x49xf32>
    %308 = vector.broadcast %41 : vector<1x49xf32> to vector<8x49xf32>
    %309 = arith.mulf %307, %308 : vector<8x49xf32>
    %310 = arith.addf %306, %309 : vector<8x49xf32>
    %311 = vector.broadcast %209 : vector<8x1xf32> to vector<8x49xf32>
    %312 = vector.broadcast %43 : vector<1x49xf32> to vector<8x49xf32>
    %313 = arith.mulf %311, %312 : vector<8x49xf32>
    %314 = arith.addf %310, %313 : vector<8x49xf32>
    %315 = vector.broadcast %211 : vector<8x1xf32> to vector<8x49xf32>
    %316 = vector.broadcast %45 : vector<1x49xf32> to vector<8x49xf32>
    %317 = arith.mulf %315, %316 : vector<8x49xf32>
    %318 = arith.addf %314, %317 : vector<8x49xf32>
    %319 = vector.broadcast %213 : vector<8x1xf32> to vector<8x49xf32>
    %320 = vector.broadcast %61 : vector<1x49xf32> to vector<8x49xf32>
    %321 = arith.mulf %319, %320 : vector<8x49xf32>
    %322 = arith.addf %318, %321 : vector<8x49xf32>
    %323 = vector.broadcast %215 : vector<8x1xf32> to vector<8x49xf32>
    %324 = vector.broadcast %63 : vector<1x49xf32> to vector<8x49xf32>
    %325 = arith.mulf %323, %324 : vector<8x49xf32>
    %326 = arith.addf %322, %325 : vector<8x49xf32>
    %327 = vector.broadcast %217 : vector<8x1xf32> to vector<8x49xf32>
    %328 = vector.broadcast %65 : vector<1x49xf32> to vector<8x49xf32>
    %329 = arith.mulf %327, %328 : vector<8x49xf32>
    %330 = arith.addf %326, %329 : vector<8x49xf32>
    %331 = arith.maximumf %293, %330 : vector<8x49xf32>
    %cst_521 = arith.constant 0.000000e+00 : f32
    %332 = vector.broadcast %cst_521 : f32 to vector<8x49xf32>
    %333 = vector.broadcast %201 : vector<8x1xf32> to vector<8x49xf32>
    %334 = vector.broadcast %23 : vector<1x49xf32> to vector<8x49xf32>
    %335 = arith.mulf %333, %334 : vector<8x49xf32>
    %336 = arith.addf %332, %335 : vector<8x49xf32>
    %337 = vector.broadcast %203 : vector<8x1xf32> to vector<8x49xf32>
    %338 = vector.broadcast %25 : vector<1x49xf32> to vector<8x49xf32>
    %339 = arith.mulf %337, %338 : vector<8x49xf32>
    %340 = arith.addf %336, %339 : vector<8x49xf32>
    %341 = vector.broadcast %205 : vector<8x1xf32> to vector<8x49xf32>
    %342 = vector.broadcast %27 : vector<1x49xf32> to vector<8x49xf32>
    %343 = arith.mulf %341, %342 : vector<8x49xf32>
    %344 = arith.addf %340, %343 : vector<8x49xf32>
    %345 = vector.broadcast %207 : vector<8x1xf32> to vector<8x49xf32>
    %346 = vector.broadcast %43 : vector<1x49xf32> to vector<8x49xf32>
    %347 = arith.mulf %345, %346 : vector<8x49xf32>
    %348 = arith.addf %344, %347 : vector<8x49xf32>
    %349 = vector.broadcast %209 : vector<8x1xf32> to vector<8x49xf32>
    %350 = vector.broadcast %45 : vector<1x49xf32> to vector<8x49xf32>
    %351 = arith.mulf %349, %350 : vector<8x49xf32>
    %352 = arith.addf %348, %351 : vector<8x49xf32>
    %353 = vector.broadcast %211 : vector<8x1xf32> to vector<8x49xf32>
    %354 = vector.broadcast %47 : vector<1x49xf32> to vector<8x49xf32>
    %355 = arith.mulf %353, %354 : vector<8x49xf32>
    %356 = arith.addf %352, %355 : vector<8x49xf32>
    %357 = vector.broadcast %213 : vector<8x1xf32> to vector<8x49xf32>
    %358 = vector.broadcast %63 : vector<1x49xf32> to vector<8x49xf32>
    %359 = arith.mulf %357, %358 : vector<8x49xf32>
    %360 = arith.addf %356, %359 : vector<8x49xf32>
    %361 = vector.broadcast %215 : vector<8x1xf32> to vector<8x49xf32>
    %362 = vector.broadcast %65 : vector<1x49xf32> to vector<8x49xf32>
    %363 = arith.mulf %361, %362 : vector<8x49xf32>
    %364 = arith.addf %360, %363 : vector<8x49xf32>
    %365 = vector.broadcast %217 : vector<8x1xf32> to vector<8x49xf32>
    %366 = vector.broadcast %67 : vector<1x49xf32> to vector<8x49xf32>
    %367 = arith.mulf %365, %366 : vector<8x49xf32>
    %368 = arith.addf %364, %367 : vector<8x49xf32>
    %369 = arith.maximumf %331, %368 : vector<8x49xf32>
    %370 = vector.broadcast %218 : vector<8x1xf32> to vector<8x49xf32>
    %371 = arith.addf %369, %370 : vector<8x49xf32>
    %cst_522 = arith.constant 0.000000e+00 : f32
    %372 = vector.broadcast %cst_522 : f32 to vector<8x49xf32>
    %373 = arith.maximumf %371, %372 : vector<8x49xf32>
    %c0_523 = arith.constant 0 : index
    %c0_524 = arith.constant 0 : index
    %374 = vector.load %arg2[%c0_523, %c0_524] : memref<16x49xf32, #tpu.memory_space<vmem>>, vector<1x49xf32>
    %375 = vector.broadcast %374 : vector<1x49xf32> to vector<8x49xf32>
    %376 = arith.mulf %373, %375 : vector<8x49xf32>
    %cst_525 = arith.constant 0.000000e+00 : f32
    %377 = vector.broadcast %cst_525 : f32 to vector<8x49xf32>
    %378 = vector.broadcast %201 : vector<8x1xf32> to vector<8x49xf32>
    %379 = vector.broadcast %5 : vector<1x49xf32> to vector<8x49xf32>
    %380 = arith.mulf %378, %379 : vector<8x49xf32>
    %381 = arith.addf %377, %380 : vector<8x49xf32>
    %382 = vector.broadcast %203 : vector<8x1xf32> to vector<8x49xf32>
    %383 = vector.broadcast %7 : vector<1x49xf32> to vector<8x49xf32>
    %384 = arith.mulf %382, %383 : vector<8x49xf32>
    %385 = arith.addf %381, %384 : vector<8x49xf32>
    %386 = vector.broadcast %205 : vector<8x1xf32> to vector<8x49xf32>
    %387 = vector.broadcast %9 : vector<1x49xf32> to vector<8x49xf32>
    %388 = arith.mulf %386, %387 : vector<8x49xf32>
    %389 = arith.addf %385, %388 : vector<8x49xf32>
    %390 = vector.broadcast %207 : vector<8x1xf32> to vector<8x49xf32>
    %391 = vector.broadcast %25 : vector<1x49xf32> to vector<8x49xf32>
    %392 = arith.mulf %390, %391 : vector<8x49xf32>
    %393 = arith.addf %389, %392 : vector<8x49xf32>
    %394 = vector.broadcast %209 : vector<8x1xf32> to vector<8x49xf32>
    %395 = vector.broadcast %27 : vector<1x49xf32> to vector<8x49xf32>
    %396 = arith.mulf %394, %395 : vector<8x49xf32>
    %397 = arith.addf %393, %396 : vector<8x49xf32>
    %398 = vector.broadcast %211 : vector<8x1xf32> to vector<8x49xf32>
    %399 = vector.broadcast %29 : vector<1x49xf32> to vector<8x49xf32>
    %400 = arith.mulf %398, %399 : vector<8x49xf32>
    %401 = arith.addf %397, %400 : vector<8x49xf32>
    %402 = vector.broadcast %213 : vector<8x1xf32> to vector<8x49xf32>
    %403 = vector.broadcast %45 : vector<1x49xf32> to vector<8x49xf32>
    %404 = arith.mulf %402, %403 : vector<8x49xf32>
    %405 = arith.addf %401, %404 : vector<8x49xf32>
    %406 = vector.broadcast %215 : vector<8x1xf32> to vector<8x49xf32>
    %407 = vector.broadcast %47 : vector<1x49xf32> to vector<8x49xf32>
    %408 = arith.mulf %406, %407 : vector<8x49xf32>
    %409 = arith.addf %405, %408 : vector<8x49xf32>
    %410 = vector.broadcast %217 : vector<8x1xf32> to vector<8x49xf32>
    %411 = vector.broadcast %49 : vector<1x49xf32> to vector<8x49xf32>
    %412 = arith.mulf %410, %411 : vector<8x49xf32>
    %413 = arith.addf %409, %412 : vector<8x49xf32>
    %cst_526 = arith.constant 0.000000e+00 : f32
    %414 = vector.broadcast %cst_526 : f32 to vector<8x49xf32>
    %415 = vector.broadcast %201 : vector<8x1xf32> to vector<8x49xf32>
    %416 = vector.broadcast %7 : vector<1x49xf32> to vector<8x49xf32>
    %417 = arith.mulf %415, %416 : vector<8x49xf32>
    %418 = arith.addf %414, %417 : vector<8x49xf32>
    %419 = vector.broadcast %203 : vector<8x1xf32> to vector<8x49xf32>
    %420 = vector.broadcast %9 : vector<1x49xf32> to vector<8x49xf32>
    %421 = arith.mulf %419, %420 : vector<8x49xf32>
    %422 = arith.addf %418, %421 : vector<8x49xf32>
    %423 = vector.broadcast %205 : vector<8x1xf32> to vector<8x49xf32>
    %424 = vector.broadcast %11 : vector<1x49xf32> to vector<8x49xf32>
    %425 = arith.mulf %423, %424 : vector<8x49xf32>
    %426 = arith.addf %422, %425 : vector<8x49xf32>
    %427 = vector.broadcast %207 : vector<8x1xf32> to vector<8x49xf32>
    %428 = vector.broadcast %27 : vector<1x49xf32> to vector<8x49xf32>
    %429 = arith.mulf %427, %428 : vector<8x49xf32>
    %430 = arith.addf %426, %429 : vector<8x49xf32>
    %431 = vector.broadcast %209 : vector<8x1xf32> to vector<8x49xf32>
    %432 = vector.broadcast %29 : vector<1x49xf32> to vector<8x49xf32>
    %433 = arith.mulf %431, %432 : vector<8x49xf32>
    %434 = arith.addf %430, %433 : vector<8x49xf32>
    %435 = vector.broadcast %211 : vector<8x1xf32> to vector<8x49xf32>
    %436 = vector.broadcast %31 : vector<1x49xf32> to vector<8x49xf32>
    %437 = arith.mulf %435, %436 : vector<8x49xf32>
    %438 = arith.addf %434, %437 : vector<8x49xf32>
    %439 = vector.broadcast %213 : vector<8x1xf32> to vector<8x49xf32>
    %440 = vector.broadcast %47 : vector<1x49xf32> to vector<8x49xf32>
    %441 = arith.mulf %439, %440 : vector<8x49xf32>
    %442 = arith.addf %438, %441 : vector<8x49xf32>
    %443 = vector.broadcast %215 : vector<8x1xf32> to vector<8x49xf32>
    %444 = vector.broadcast %49 : vector<1x49xf32> to vector<8x49xf32>
    %445 = arith.mulf %443, %444 : vector<8x49xf32>
    %446 = arith.addf %442, %445 : vector<8x49xf32>
    %447 = vector.broadcast %217 : vector<8x1xf32> to vector<8x49xf32>
    %448 = vector.broadcast %51 : vector<1x49xf32> to vector<8x49xf32>
    %449 = arith.mulf %447, %448 : vector<8x49xf32>
    %450 = arith.addf %446, %449 : vector<8x49xf32>
    %451 = arith.maximumf %413, %450 : vector<8x49xf32>
    %cst_527 = arith.constant 0.000000e+00 : f32
    %452 = vector.broadcast %cst_527 : f32 to vector<8x49xf32>
    %453 = vector.broadcast %201 : vector<8x1xf32> to vector<8x49xf32>
    %454 = vector.broadcast %25 : vector<1x49xf32> to vector<8x49xf32>
    %455 = arith.mulf %453, %454 : vector<8x49xf32>
    %456 = arith.addf %452, %455 : vector<8x49xf32>
    %457 = vector.broadcast %203 : vector<8x1xf32> to vector<8x49xf32>
    %458 = vector.broadcast %27 : vector<1x49xf32> to vector<8x49xf32>
    %459 = arith.mulf %457, %458 : vector<8x49xf32>
    %460 = arith.addf %456, %459 : vector<8x49xf32>
    %461 = vector.broadcast %205 : vector<8x1xf32> to vector<8x49xf32>
    %462 = vector.broadcast %29 : vector<1x49xf32> to vector<8x49xf32>
    %463 = arith.mulf %461, %462 : vector<8x49xf32>
    %464 = arith.addf %460, %463 : vector<8x49xf32>
    %465 = vector.broadcast %207 : vector<8x1xf32> to vector<8x49xf32>
    %466 = vector.broadcast %45 : vector<1x49xf32> to vector<8x49xf32>
    %467 = arith.mulf %465, %466 : vector<8x49xf32>
    %468 = arith.addf %464, %467 : vector<8x49xf32>
    %469 = vector.broadcast %209 : vector<8x1xf32> to vector<8x49xf32>
    %470 = vector.broadcast %47 : vector<1x49xf32> to vector<8x49xf32>
    %471 = arith.mulf %469, %470 : vector<8x49xf32>
    %472 = arith.addf %468, %471 : vector<8x49xf32>
    %473 = vector.broadcast %211 : vector<8x1xf32> to vector<8x49xf32>
    %474 = vector.broadcast %49 : vector<1x49xf32> to vector<8x49xf32>
    %475 = arith.mulf %473, %474 : vector<8x49xf32>
    %476 = arith.addf %472, %475 : vector<8x49xf32>
    %477 = vector.broadcast %213 : vector<8x1xf32> to vector<8x49xf32>
    %478 = vector.broadcast %65 : vector<1x49xf32> to vector<8x49xf32>
    %479 = arith.mulf %477, %478 : vector<8x49xf32>
    %480 = arith.addf %476, %479 : vector<8x49xf32>
    %481 = vector.broadcast %215 : vector<8x1xf32> to vector<8x49xf32>
    %482 = vector.broadcast %67 : vector<1x49xf32> to vector<8x49xf32>
    %483 = arith.mulf %481, %482 : vector<8x49xf32>
    %484 = arith.addf %480, %483 : vector<8x49xf32>
    %485 = vector.broadcast %217 : vector<8x1xf32> to vector<8x49xf32>
    %486 = vector.broadcast %69 : vector<1x49xf32> to vector<8x49xf32>
    %487 = arith.mulf %485, %486 : vector<8x49xf32>
    %488 = arith.addf %484, %487 : vector<8x49xf32>
    %489 = arith.maximumf %451, %488 : vector<8x49xf32>
    %cst_528 = arith.constant 0.000000e+00 : f32
    %490 = vector.broadcast %cst_528 : f32 to vector<8x49xf32>
    %491 = vector.broadcast %201 : vector<8x1xf32> to vector<8x49xf32>
    %492 = vector.broadcast %27 : vector<1x49xf32> to vector<8x49xf32>
    %493 = arith.mulf %491, %492 : vector<8x49xf32>
    %494 = arith.addf %490, %493 : vector<8x49xf32>
    %495 = vector.broadcast %203 : vector<8x1xf32> to vector<8x49xf32>
    %496 = vector.broadcast %29 : vector<1x49xf32> to vector<8x49xf32>
    %497 = arith.mulf %495, %496 : vector<8x49xf32>
    %498 = arith.addf %494, %497 : vector<8x49xf32>
    %499 = vector.broadcast %205 : vector<8x1xf32> to vector<8x49xf32>
    %500 = vector.broadcast %31 : vector<1x49xf32> to vector<8x49xf32>
    %501 = arith.mulf %499, %500 : vector<8x49xf32>
    %502 = arith.addf %498, %501 : vector<8x49xf32>
    %503 = vector.broadcast %207 : vector<8x1xf32> to vector<8x49xf32>
    %504 = vector.broadcast %47 : vector<1x49xf32> to vector<8x49xf32>
    %505 = arith.mulf %503, %504 : vector<8x49xf32>
    %506 = arith.addf %502, %505 : vector<8x49xf32>
    %507 = vector.broadcast %209 : vector<8x1xf32> to vector<8x49xf32>
    %508 = vector.broadcast %49 : vector<1x49xf32> to vector<8x49xf32>
    %509 = arith.mulf %507, %508 : vector<8x49xf32>
    %510 = arith.addf %506, %509 : vector<8x49xf32>
    %511 = vector.broadcast %211 : vector<8x1xf32> to vector<8x49xf32>
    %512 = vector.broadcast %51 : vector<1x49xf32> to vector<8x49xf32>
    %513 = arith.mulf %511, %512 : vector<8x49xf32>
    %514 = arith.addf %510, %513 : vector<8x49xf32>
    %515 = vector.broadcast %213 : vector<8x1xf32> to vector<8x49xf32>
    %516 = vector.broadcast %67 : vector<1x49xf32> to vector<8x49xf32>
    %517 = arith.mulf %515, %516 : vector<8x49xf32>
    %518 = arith.addf %514, %517 : vector<8x49xf32>
    %519 = vector.broadcast %215 : vector<8x1xf32> to vector<8x49xf32>
    %520 = vector.broadcast %69 : vector<1x49xf32> to vector<8x49xf32>
    %521 = arith.mulf %519, %520 : vector<8x49xf32>
    %522 = arith.addf %518, %521 : vector<8x49xf32>
    %523 = vector.broadcast %217 : vector<8x1xf32> to vector<8x49xf32>
    %524 = vector.broadcast %71 : vector<1x49xf32> to vector<8x49xf32>
    %525 = arith.mulf %523, %524 : vector<8x49xf32>
    %526 = arith.addf %522, %525 : vector<8x49xf32>
    %527 = arith.maximumf %489, %526 : vector<8x49xf32>
    %528 = vector.broadcast %218 : vector<8x1xf32> to vector<8x49xf32>
    %529 = arith.addf %527, %528 : vector<8x49xf32>
    %cst_529 = arith.constant 0.000000e+00 : f32
    %530 = vector.broadcast %cst_529 : f32 to vector<8x49xf32>
    %531 = arith.maximumf %529, %530 : vector<8x49xf32>
    %c1_530 = arith.constant 1 : index
    %c0_531 = arith.constant 0 : index
    %532 = vector.load %arg2[%c1_530, %c0_531] : memref<16x49xf32, #tpu.memory_space<vmem>>, vector<1x49xf32>
    %533 = vector.broadcast %532 : vector<1x49xf32> to vector<8x49xf32>
    %534 = arith.mulf %531, %533 : vector<8x49xf32>
    %cst_532 = arith.constant 0.000000e+00 : f32
    %535 = vector.broadcast %cst_532 : f32 to vector<8x49xf32>
    %536 = vector.broadcast %201 : vector<8x1xf32> to vector<8x49xf32>
    %537 = vector.broadcast %9 : vector<1x49xf32> to vector<8x49xf32>
    %538 = arith.mulf %536, %537 : vector<8x49xf32>
    %539 = arith.addf %535, %538 : vector<8x49xf32>
    %540 = vector.broadcast %203 : vector<8x1xf32> to vector<8x49xf32>
    %541 = vector.broadcast %11 : vector<1x49xf32> to vector<8x49xf32>
    %542 = arith.mulf %540, %541 : vector<8x49xf32>
    %543 = arith.addf %539, %542 : vector<8x49xf32>
    %544 = vector.broadcast %205 : vector<8x1xf32> to vector<8x49xf32>
    %545 = vector.broadcast %13 : vector<1x49xf32> to vector<8x49xf32>
    %546 = arith.mulf %544, %545 : vector<8x49xf32>
    %547 = arith.addf %543, %546 : vector<8x49xf32>
    %548 = vector.broadcast %207 : vector<8x1xf32> to vector<8x49xf32>
    %549 = vector.broadcast %29 : vector<1x49xf32> to vector<8x49xf32>
    %550 = arith.mulf %548, %549 : vector<8x49xf32>
    %551 = arith.addf %547, %550 : vector<8x49xf32>
    %552 = vector.broadcast %209 : vector<8x1xf32> to vector<8x49xf32>
    %553 = vector.broadcast %31 : vector<1x49xf32> to vector<8x49xf32>
    %554 = arith.mulf %552, %553 : vector<8x49xf32>
    %555 = arith.addf %551, %554 : vector<8x49xf32>
    %556 = vector.broadcast %211 : vector<8x1xf32> to vector<8x49xf32>
    %557 = vector.broadcast %33 : vector<1x49xf32> to vector<8x49xf32>
    %558 = arith.mulf %556, %557 : vector<8x49xf32>
    %559 = arith.addf %555, %558 : vector<8x49xf32>
    %560 = vector.broadcast %213 : vector<8x1xf32> to vector<8x49xf32>
    %561 = vector.broadcast %49 : vector<1x49xf32> to vector<8x49xf32>
    %562 = arith.mulf %560, %561 : vector<8x49xf32>
    %563 = arith.addf %559, %562 : vector<8x49xf32>
    %564 = vector.broadcast %215 : vector<8x1xf32> to vector<8x49xf32>
    %565 = vector.broadcast %51 : vector<1x49xf32> to vector<8x49xf32>
    %566 = arith.mulf %564, %565 : vector<8x49xf32>
    %567 = arith.addf %563, %566 : vector<8x49xf32>
    %568 = vector.broadcast %217 : vector<8x1xf32> to vector<8x49xf32>
    %569 = vector.broadcast %53 : vector<1x49xf32> to vector<8x49xf32>
    %570 = arith.mulf %568, %569 : vector<8x49xf32>
    %571 = arith.addf %567, %570 : vector<8x49xf32>
    %cst_533 = arith.constant 0.000000e+00 : f32
    %572 = vector.broadcast %cst_533 : f32 to vector<8x49xf32>
    %573 = vector.broadcast %201 : vector<8x1xf32> to vector<8x49xf32>
    %574 = vector.broadcast %11 : vector<1x49xf32> to vector<8x49xf32>
    %575 = arith.mulf %573, %574 : vector<8x49xf32>
    %576 = arith.addf %572, %575 : vector<8x49xf32>
    %577 = vector.broadcast %203 : vector<8x1xf32> to vector<8x49xf32>
    %578 = vector.broadcast %13 : vector<1x49xf32> to vector<8x49xf32>
    %579 = arith.mulf %577, %578 : vector<8x49xf32>
    %580 = arith.addf %576, %579 : vector<8x49xf32>
    %581 = vector.broadcast %205 : vector<8x1xf32> to vector<8x49xf32>
    %582 = vector.broadcast %15 : vector<1x49xf32> to vector<8x49xf32>
    %583 = arith.mulf %581, %582 : vector<8x49xf32>
    %584 = arith.addf %580, %583 : vector<8x49xf32>
    %585 = vector.broadcast %207 : vector<8x1xf32> to vector<8x49xf32>
    %586 = vector.broadcast %31 : vector<1x49xf32> to vector<8x49xf32>
    %587 = arith.mulf %585, %586 : vector<8x49xf32>
    %588 = arith.addf %584, %587 : vector<8x49xf32>
    %589 = vector.broadcast %209 : vector<8x1xf32> to vector<8x49xf32>
    %590 = vector.broadcast %33 : vector<1x49xf32> to vector<8x49xf32>
    %591 = arith.mulf %589, %590 : vector<8x49xf32>
    %592 = arith.addf %588, %591 : vector<8x49xf32>
    %593 = vector.broadcast %211 : vector<8x1xf32> to vector<8x49xf32>
    %594 = vector.broadcast %35 : vector<1x49xf32> to vector<8x49xf32>
    %595 = arith.mulf %593, %594 : vector<8x49xf32>
    %596 = arith.addf %592, %595 : vector<8x49xf32>
    %597 = vector.broadcast %213 : vector<8x1xf32> to vector<8x49xf32>
    %598 = vector.broadcast %51 : vector<1x49xf32> to vector<8x49xf32>
    %599 = arith.mulf %597, %598 : vector<8x49xf32>
    %600 = arith.addf %596, %599 : vector<8x49xf32>
    %601 = vector.broadcast %215 : vector<8x1xf32> to vector<8x49xf32>
    %602 = vector.broadcast %53 : vector<1x49xf32> to vector<8x49xf32>
    %603 = arith.mulf %601, %602 : vector<8x49xf32>
    %604 = arith.addf %600, %603 : vector<8x49xf32>
    %605 = vector.broadcast %217 : vector<8x1xf32> to vector<8x49xf32>
    %606 = vector.broadcast %55 : vector<1x49xf32> to vector<8x49xf32>
    %607 = arith.mulf %605, %606 : vector<8x49xf32>
    %608 = arith.addf %604, %607 : vector<8x49xf32>
    %609 = arith.maximumf %571, %608 : vector<8x49xf32>
    %cst_534 = arith.constant 0.000000e+00 : f32
    %610 = vector.broadcast %cst_534 : f32 to vector<8x49xf32>
    %611 = vector.broadcast %201 : vector<8x1xf32> to vector<8x49xf32>
    %612 = vector.broadcast %29 : vector<1x49xf32> to vector<8x49xf32>
    %613 = arith.mulf %611, %612 : vector<8x49xf32>
    %614 = arith.addf %610, %613 : vector<8x49xf32>
    %615 = vector.broadcast %203 : vector<8x1xf32> to vector<8x49xf32>
    %616 = vector.broadcast %31 : vector<1x49xf32> to vector<8x49xf32>
    %617 = arith.mulf %615, %616 : vector<8x49xf32>
    %618 = arith.addf %614, %617 : vector<8x49xf32>
    %619 = vector.broadcast %205 : vector<8x1xf32> to vector<8x49xf32>
    %620 = vector.broadcast %33 : vector<1x49xf32> to vector<8x49xf32>
    %621 = arith.mulf %619, %620 : vector<8x49xf32>
    %622 = arith.addf %618, %621 : vector<8x49xf32>
    %623 = vector.broadcast %207 : vector<8x1xf32> to vector<8x49xf32>
    %624 = vector.broadcast %49 : vector<1x49xf32> to vector<8x49xf32>
    %625 = arith.mulf %623, %624 : vector<8x49xf32>
    %626 = arith.addf %622, %625 : vector<8x49xf32>
    %627 = vector.broadcast %209 : vector<8x1xf32> to vector<8x49xf32>
    %628 = vector.broadcast %51 : vector<1x49xf32> to vector<8x49xf32>
    %629 = arith.mulf %627, %628 : vector<8x49xf32>
    %630 = arith.addf %626, %629 : vector<8x49xf32>
    %631 = vector.broadcast %211 : vector<8x1xf32> to vector<8x49xf32>
    %632 = vector.broadcast %53 : vector<1x49xf32> to vector<8x49xf32>
    %633 = arith.mulf %631, %632 : vector<8x49xf32>
    %634 = arith.addf %630, %633 : vector<8x49xf32>
    %635 = vector.broadcast %213 : vector<8x1xf32> to vector<8x49xf32>
    %636 = vector.broadcast %69 : vector<1x49xf32> to vector<8x49xf32>
    %637 = arith.mulf %635, %636 : vector<8x49xf32>
    %638 = arith.addf %634, %637 : vector<8x49xf32>
    %639 = vector.broadcast %215 : vector<8x1xf32> to vector<8x49xf32>
    %640 = vector.broadcast %71 : vector<1x49xf32> to vector<8x49xf32>
    %641 = arith.mulf %639, %640 : vector<8x49xf32>
    %642 = arith.addf %638, %641 : vector<8x49xf32>
    %643 = vector.broadcast %217 : vector<8x1xf32> to vector<8x49xf32>
    %644 = vector.broadcast %73 : vector<1x49xf32> to vector<8x49xf32>
    %645 = arith.mulf %643, %644 : vector<8x49xf32>
    %646 = arith.addf %642, %645 : vector<8x49xf32>
    %647 = arith.maximumf %609, %646 : vector<8x49xf32>
    %cst_535 = arith.constant 0.000000e+00 : f32
    %648 = vector.broadcast %cst_535 : f32 to vector<8x49xf32>
    %649 = vector.broadcast %201 : vector<8x1xf32> to vector<8x49xf32>
    %650 = vector.broadcast %31 : vector<1x49xf32> to vector<8x49xf32>
    %651 = arith.mulf %649, %650 : vector<8x49xf32>
    %652 = arith.addf %648, %651 : vector<8x49xf32>
    %653 = vector.broadcast %203 : vector<8x1xf32> to vector<8x49xf32>
    %654 = vector.broadcast %33 : vector<1x49xf32> to vector<8x49xf32>
    %655 = arith.mulf %653, %654 : vector<8x49xf32>
    %656 = arith.addf %652, %655 : vector<8x49xf32>
    %657 = vector.broadcast %205 : vector<8x1xf32> to vector<8x49xf32>
    %658 = vector.broadcast %35 : vector<1x49xf32> to vector<8x49xf32>
    %659 = arith.mulf %657, %658 : vector<8x49xf32>
    %660 = arith.addf %656, %659 : vector<8x49xf32>
    %661 = vector.broadcast %207 : vector<8x1xf32> to vector<8x49xf32>
    %662 = vector.broadcast %51 : vector<1x49xf32> to vector<8x49xf32>
    %663 = arith.mulf %661, %662 : vector<8x49xf32>
    %664 = arith.addf %660, %663 : vector<8x49xf32>
    %665 = vector.broadcast %209 : vector<8x1xf32> to vector<8x49xf32>
    %666 = vector.broadcast %53 : vector<1x49xf32> to vector<8x49xf32>
    %667 = arith.mulf %665, %666 : vector<8x49xf32>
    %668 = arith.addf %664, %667 : vector<8x49xf32>
    %669 = vector.broadcast %211 : vector<8x1xf32> to vector<8x49xf32>
    %670 = vector.broadcast %55 : vector<1x49xf32> to vector<8x49xf32>
    %671 = arith.mulf %669, %670 : vector<8x49xf32>
    %672 = arith.addf %668, %671 : vector<8x49xf32>
    %673 = vector.broadcast %213 : vector<8x1xf32> to vector<8x49xf32>
    %674 = vector.broadcast %71 : vector<1x49xf32> to vector<8x49xf32>
    %675 = arith.mulf %673, %674 : vector<8x49xf32>
    %676 = arith.addf %672, %675 : vector<8x49xf32>
    %677 = vector.broadcast %215 : vector<8x1xf32> to vector<8x49xf32>
    %678 = vector.broadcast %73 : vector<1x49xf32> to vector<8x49xf32>
    %679 = arith.mulf %677, %678 : vector<8x49xf32>
    %680 = arith.addf %676, %679 : vector<8x49xf32>
    %681 = vector.broadcast %217 : vector<8x1xf32> to vector<8x49xf32>
    %682 = vector.broadcast %75 : vector<1x49xf32> to vector<8x49xf32>
    %683 = arith.mulf %681, %682 : vector<8x49xf32>
    %684 = arith.addf %680, %683 : vector<8x49xf32>
    %685 = arith.maximumf %647, %684 : vector<8x49xf32>
    %686 = vector.broadcast %218 : vector<8x1xf32> to vector<8x49xf32>
    %687 = arith.addf %685, %686 : vector<8x49xf32>
    %cst_536 = arith.constant 0.000000e+00 : f32
    %688 = vector.broadcast %cst_536 : f32 to vector<8x49xf32>
    %689 = arith.maximumf %687, %688 : vector<8x49xf32>
    %c2_537 = arith.constant 2 : index
    %c0_538 = arith.constant 0 : index
    %690 = vector.load %arg2[%c2_537, %c0_538] : memref<16x49xf32, #tpu.memory_space<vmem>>, vector<1x49xf32>
    %691 = vector.broadcast %690 : vector<1x49xf32> to vector<8x49xf32>
    %692 = arith.mulf %689, %691 : vector<8x49xf32>
    %cst_539 = arith.constant 0.000000e+00 : f32
    %693 = vector.broadcast %cst_539 : f32 to vector<8x49xf32>
    %694 = vector.broadcast %201 : vector<8x1xf32> to vector<8x49xf32>
    %695 = vector.broadcast %13 : vector<1x49xf32> to vector<8x49xf32>
    %696 = arith.mulf %694, %695 : vector<8x49xf32>
    %697 = arith.addf %693, %696 : vector<8x49xf32>
    %698 = vector.broadcast %203 : vector<8x1xf32> to vector<8x49xf32>
    %699 = vector.broadcast %15 : vector<1x49xf32> to vector<8x49xf32>
    %700 = arith.mulf %698, %699 : vector<8x49xf32>
    %701 = arith.addf %697, %700 : vector<8x49xf32>
    %702 = vector.broadcast %205 : vector<8x1xf32> to vector<8x49xf32>
    %703 = vector.broadcast %17 : vector<1x49xf32> to vector<8x49xf32>
    %704 = arith.mulf %702, %703 : vector<8x49xf32>
    %705 = arith.addf %701, %704 : vector<8x49xf32>
    %706 = vector.broadcast %207 : vector<8x1xf32> to vector<8x49xf32>
    %707 = vector.broadcast %33 : vector<1x49xf32> to vector<8x49xf32>
    %708 = arith.mulf %706, %707 : vector<8x49xf32>
    %709 = arith.addf %705, %708 : vector<8x49xf32>
    %710 = vector.broadcast %209 : vector<8x1xf32> to vector<8x49xf32>
    %711 = vector.broadcast %35 : vector<1x49xf32> to vector<8x49xf32>
    %712 = arith.mulf %710, %711 : vector<8x49xf32>
    %713 = arith.addf %709, %712 : vector<8x49xf32>
    %714 = vector.broadcast %211 : vector<8x1xf32> to vector<8x49xf32>
    %715 = vector.broadcast %37 : vector<1x49xf32> to vector<8x49xf32>
    %716 = arith.mulf %714, %715 : vector<8x49xf32>
    %717 = arith.addf %713, %716 : vector<8x49xf32>
    %718 = vector.broadcast %213 : vector<8x1xf32> to vector<8x49xf32>
    %719 = vector.broadcast %53 : vector<1x49xf32> to vector<8x49xf32>
    %720 = arith.mulf %718, %719 : vector<8x49xf32>
    %721 = arith.addf %717, %720 : vector<8x49xf32>
    %722 = vector.broadcast %215 : vector<8x1xf32> to vector<8x49xf32>
    %723 = vector.broadcast %55 : vector<1x49xf32> to vector<8x49xf32>
    %724 = arith.mulf %722, %723 : vector<8x49xf32>
    %725 = arith.addf %721, %724 : vector<8x49xf32>
    %726 = vector.broadcast %217 : vector<8x1xf32> to vector<8x49xf32>
    %727 = vector.broadcast %57 : vector<1x49xf32> to vector<8x49xf32>
    %728 = arith.mulf %726, %727 : vector<8x49xf32>
    %729 = arith.addf %725, %728 : vector<8x49xf32>
    %cst_540 = arith.constant 0.000000e+00 : f32
    %730 = vector.broadcast %cst_540 : f32 to vector<8x49xf32>
    %731 = vector.broadcast %201 : vector<8x1xf32> to vector<8x49xf32>
    %732 = vector.broadcast %15 : vector<1x49xf32> to vector<8x49xf32>
    %733 = arith.mulf %731, %732 : vector<8x49xf32>
    %734 = arith.addf %730, %733 : vector<8x49xf32>
    %735 = vector.broadcast %203 : vector<8x1xf32> to vector<8x49xf32>
    %736 = vector.broadcast %17 : vector<1x49xf32> to vector<8x49xf32>
    %737 = arith.mulf %735, %736 : vector<8x49xf32>
    %738 = arith.addf %734, %737 : vector<8x49xf32>
    %739 = vector.broadcast %205 : vector<8x1xf32> to vector<8x49xf32>
    %740 = vector.broadcast %19 : vector<1x49xf32> to vector<8x49xf32>
    %741 = arith.mulf %739, %740 : vector<8x49xf32>
    %742 = arith.addf %738, %741 : vector<8x49xf32>
    %743 = vector.broadcast %207 : vector<8x1xf32> to vector<8x49xf32>
    %744 = vector.broadcast %35 : vector<1x49xf32> to vector<8x49xf32>
    %745 = arith.mulf %743, %744 : vector<8x49xf32>
    %746 = arith.addf %742, %745 : vector<8x49xf32>
    %747 = vector.broadcast %209 : vector<8x1xf32> to vector<8x49xf32>
    %748 = vector.broadcast %37 : vector<1x49xf32> to vector<8x49xf32>
    %749 = arith.mulf %747, %748 : vector<8x49xf32>
    %750 = arith.addf %746, %749 : vector<8x49xf32>
    %751 = vector.broadcast %211 : vector<8x1xf32> to vector<8x49xf32>
    %752 = vector.broadcast %39 : vector<1x49xf32> to vector<8x49xf32>
    %753 = arith.mulf %751, %752 : vector<8x49xf32>
    %754 = arith.addf %750, %753 : vector<8x49xf32>
    %755 = vector.broadcast %213 : vector<8x1xf32> to vector<8x49xf32>
    %756 = vector.broadcast %55 : vector<1x49xf32> to vector<8x49xf32>
    %757 = arith.mulf %755, %756 : vector<8x49xf32>
    %758 = arith.addf %754, %757 : vector<8x49xf32>
    %759 = vector.broadcast %215 : vector<8x1xf32> to vector<8x49xf32>
    %760 = vector.broadcast %57 : vector<1x49xf32> to vector<8x49xf32>
    %761 = arith.mulf %759, %760 : vector<8x49xf32>
    %762 = arith.addf %758, %761 : vector<8x49xf32>
    %763 = vector.broadcast %217 : vector<8x1xf32> to vector<8x49xf32>
    %764 = vector.broadcast %59 : vector<1x49xf32> to vector<8x49xf32>
    %765 = arith.mulf %763, %764 : vector<8x49xf32>
    %766 = arith.addf %762, %765 : vector<8x49xf32>
    %767 = arith.maximumf %729, %766 : vector<8x49xf32>
    %cst_541 = arith.constant 0.000000e+00 : f32
    %768 = vector.broadcast %cst_541 : f32 to vector<8x49xf32>
    %769 = vector.broadcast %201 : vector<8x1xf32> to vector<8x49xf32>
    %770 = vector.broadcast %33 : vector<1x49xf32> to vector<8x49xf32>
    %771 = arith.mulf %769, %770 : vector<8x49xf32>
    %772 = arith.addf %768, %771 : vector<8x49xf32>
    %773 = vector.broadcast %203 : vector<8x1xf32> to vector<8x49xf32>
    %774 = vector.broadcast %35 : vector<1x49xf32> to vector<8x49xf32>
    %775 = arith.mulf %773, %774 : vector<8x49xf32>
    %776 = arith.addf %772, %775 : vector<8x49xf32>
    %777 = vector.broadcast %205 : vector<8x1xf32> to vector<8x49xf32>
    %778 = vector.broadcast %37 : vector<1x49xf32> to vector<8x49xf32>
    %779 = arith.mulf %777, %778 : vector<8x49xf32>
    %780 = arith.addf %776, %779 : vector<8x49xf32>
    %781 = vector.broadcast %207 : vector<8x1xf32> to vector<8x49xf32>
    %782 = vector.broadcast %53 : vector<1x49xf32> to vector<8x49xf32>
    %783 = arith.mulf %781, %782 : vector<8x49xf32>
    %784 = arith.addf %780, %783 : vector<8x49xf32>
    %785 = vector.broadcast %209 : vector<8x1xf32> to vector<8x49xf32>
    %786 = vector.broadcast %55 : vector<1x49xf32> to vector<8x49xf32>
    %787 = arith.mulf %785, %786 : vector<8x49xf32>
    %788 = arith.addf %784, %787 : vector<8x49xf32>
    %789 = vector.broadcast %211 : vector<8x1xf32> to vector<8x49xf32>
    %790 = vector.broadcast %57 : vector<1x49xf32> to vector<8x49xf32>
    %791 = arith.mulf %789, %790 : vector<8x49xf32>
    %792 = arith.addf %788, %791 : vector<8x49xf32>
    %793 = vector.broadcast %213 : vector<8x1xf32> to vector<8x49xf32>
    %794 = vector.broadcast %73 : vector<1x49xf32> to vector<8x49xf32>
    %795 = arith.mulf %793, %794 : vector<8x49xf32>
    %796 = arith.addf %792, %795 : vector<8x49xf32>
    %797 = vector.broadcast %215 : vector<8x1xf32> to vector<8x49xf32>
    %798 = vector.broadcast %75 : vector<1x49xf32> to vector<8x49xf32>
    %799 = arith.mulf %797, %798 : vector<8x49xf32>
    %800 = arith.addf %796, %799 : vector<8x49xf32>
    %801 = vector.broadcast %217 : vector<8x1xf32> to vector<8x49xf32>
    %802 = vector.broadcast %77 : vector<1x49xf32> to vector<8x49xf32>
    %803 = arith.mulf %801, %802 : vector<8x49xf32>
    %804 = arith.addf %800, %803 : vector<8x49xf32>
    %805 = arith.maximumf %767, %804 : vector<8x49xf32>
    %cst_542 = arith.constant 0.000000e+00 : f32
    %806 = vector.broadcast %cst_542 : f32 to vector<8x49xf32>
    %807 = vector.broadcast %201 : vector<8x1xf32> to vector<8x49xf32>
    %808 = vector.broadcast %35 : vector<1x49xf32> to vector<8x49xf32>
    %809 = arith.mulf %807, %808 : vector<8x49xf32>
    %810 = arith.addf %806, %809 : vector<8x49xf32>
    %811 = vector.broadcast %203 : vector<8x1xf32> to vector<8x49xf32>
    %812 = vector.broadcast %37 : vector<1x49xf32> to vector<8x49xf32>
    %813 = arith.mulf %811, %812 : vector<8x49xf32>
    %814 = arith.addf %810, %813 : vector<8x49xf32>
    %815 = vector.broadcast %205 : vector<8x1xf32> to vector<8x49xf32>
    %816 = vector.broadcast %39 : vector<1x49xf32> to vector<8x49xf32>
    %817 = arith.mulf %815, %816 : vector<8x49xf32>
    %818 = arith.addf %814, %817 : vector<8x49xf32>
    %819 = vector.broadcast %207 : vector<8x1xf32> to vector<8x49xf32>
    %820 = vector.broadcast %55 : vector<1x49xf32> to vector<8x49xf32>
    %821 = arith.mulf %819, %820 : vector<8x49xf32>
    %822 = arith.addf %818, %821 : vector<8x49xf32>
    %823 = vector.broadcast %209 : vector<8x1xf32> to vector<8x49xf32>
    %824 = vector.broadcast %57 : vector<1x49xf32> to vector<8x49xf32>
    %825 = arith.mulf %823, %824 : vector<8x49xf32>
    %826 = arith.addf %822, %825 : vector<8x49xf32>
    %827 = vector.broadcast %211 : vector<8x1xf32> to vector<8x49xf32>
    %828 = vector.broadcast %59 : vector<1x49xf32> to vector<8x49xf32>
    %829 = arith.mulf %827, %828 : vector<8x49xf32>
    %830 = arith.addf %826, %829 : vector<8x49xf32>
    %831 = vector.broadcast %213 : vector<8x1xf32> to vector<8x49xf32>
    %832 = vector.broadcast %75 : vector<1x49xf32> to vector<8x49xf32>
    %833 = arith.mulf %831, %832 : vector<8x49xf32>
    %834 = arith.addf %830, %833 : vector<8x49xf32>
    %835 = vector.broadcast %215 : vector<8x1xf32> to vector<8x49xf32>
    %836 = vector.broadcast %77 : vector<1x49xf32> to vector<8x49xf32>
    %837 = arith.mulf %835, %836 : vector<8x49xf32>
    %838 = arith.addf %834, %837 : vector<8x49xf32>
    %839 = vector.broadcast %217 : vector<8x1xf32> to vector<8x49xf32>
    %840 = vector.broadcast %79 : vector<1x49xf32> to vector<8x49xf32>
    %841 = arith.mulf %839, %840 : vector<8x49xf32>
    %842 = arith.addf %838, %841 : vector<8x49xf32>
    %843 = arith.maximumf %805, %842 : vector<8x49xf32>
    %844 = vector.broadcast %218 : vector<8x1xf32> to vector<8x49xf32>
    %845 = arith.addf %843, %844 : vector<8x49xf32>
    %cst_543 = arith.constant 0.000000e+00 : f32
    %846 = vector.broadcast %cst_543 : f32 to vector<8x49xf32>
    %847 = arith.maximumf %845, %846 : vector<8x49xf32>
    %c3_544 = arith.constant 3 : index
    %c0_545 = arith.constant 0 : index
    %848 = vector.load %arg2[%c3_544, %c0_545] : memref<16x49xf32, #tpu.memory_space<vmem>>, vector<1x49xf32>
    %849 = vector.broadcast %848 : vector<1x49xf32> to vector<8x49xf32>
    %850 = arith.mulf %847, %849 : vector<8x49xf32>
    %cst_546 = arith.constant 0.000000e+00 : f32
    %851 = vector.broadcast %cst_546 : f32 to vector<8x49xf32>
    %852 = vector.broadcast %201 : vector<8x1xf32> to vector<8x49xf32>
    %853 = vector.broadcast %41 : vector<1x49xf32> to vector<8x49xf32>
    %854 = arith.mulf %852, %853 : vector<8x49xf32>
    %855 = arith.addf %851, %854 : vector<8x49xf32>
    %856 = vector.broadcast %203 : vector<8x1xf32> to vector<8x49xf32>
    %857 = vector.broadcast %43 : vector<1x49xf32> to vector<8x49xf32>
    %858 = arith.mulf %856, %857 : vector<8x49xf32>
    %859 = arith.addf %855, %858 : vector<8x49xf32>
    %860 = vector.broadcast %205 : vector<8x1xf32> to vector<8x49xf32>
    %861 = vector.broadcast %45 : vector<1x49xf32> to vector<8x49xf32>
    %862 = arith.mulf %860, %861 : vector<8x49xf32>
    %863 = arith.addf %859, %862 : vector<8x49xf32>
    %864 = vector.broadcast %207 : vector<8x1xf32> to vector<8x49xf32>
    %865 = vector.broadcast %61 : vector<1x49xf32> to vector<8x49xf32>
    %866 = arith.mulf %864, %865 : vector<8x49xf32>
    %867 = arith.addf %863, %866 : vector<8x49xf32>
    %868 = vector.broadcast %209 : vector<8x1xf32> to vector<8x49xf32>
    %869 = vector.broadcast %63 : vector<1x49xf32> to vector<8x49xf32>
    %870 = arith.mulf %868, %869 : vector<8x49xf32>
    %871 = arith.addf %867, %870 : vector<8x49xf32>
    %872 = vector.broadcast %211 : vector<8x1xf32> to vector<8x49xf32>
    %873 = vector.broadcast %65 : vector<1x49xf32> to vector<8x49xf32>
    %874 = arith.mulf %872, %873 : vector<8x49xf32>
    %875 = arith.addf %871, %874 : vector<8x49xf32>
    %876 = vector.broadcast %213 : vector<8x1xf32> to vector<8x49xf32>
    %877 = vector.broadcast %81 : vector<1x49xf32> to vector<8x49xf32>
    %878 = arith.mulf %876, %877 : vector<8x49xf32>
    %879 = arith.addf %875, %878 : vector<8x49xf32>
    %880 = vector.broadcast %215 : vector<8x1xf32> to vector<8x49xf32>
    %881 = vector.broadcast %83 : vector<1x49xf32> to vector<8x49xf32>
    %882 = arith.mulf %880, %881 : vector<8x49xf32>
    %883 = arith.addf %879, %882 : vector<8x49xf32>
    %884 = vector.broadcast %217 : vector<8x1xf32> to vector<8x49xf32>
    %885 = vector.broadcast %85 : vector<1x49xf32> to vector<8x49xf32>
    %886 = arith.mulf %884, %885 : vector<8x49xf32>
    %887 = arith.addf %883, %886 : vector<8x49xf32>
    %cst_547 = arith.constant 0.000000e+00 : f32
    %888 = vector.broadcast %cst_547 : f32 to vector<8x49xf32>
    %889 = vector.broadcast %201 : vector<8x1xf32> to vector<8x49xf32>
    %890 = vector.broadcast %43 : vector<1x49xf32> to vector<8x49xf32>
    %891 = arith.mulf %889, %890 : vector<8x49xf32>
    %892 = arith.addf %888, %891 : vector<8x49xf32>
    %893 = vector.broadcast %203 : vector<8x1xf32> to vector<8x49xf32>
    %894 = vector.broadcast %45 : vector<1x49xf32> to vector<8x49xf32>
    %895 = arith.mulf %893, %894 : vector<8x49xf32>
    %896 = arith.addf %892, %895 : vector<8x49xf32>
    %897 = vector.broadcast %205 : vector<8x1xf32> to vector<8x49xf32>
    %898 = vector.broadcast %47 : vector<1x49xf32> to vector<8x49xf32>
    %899 = arith.mulf %897, %898 : vector<8x49xf32>
    %900 = arith.addf %896, %899 : vector<8x49xf32>
    %901 = vector.broadcast %207 : vector<8x1xf32> to vector<8x49xf32>
    %902 = vector.broadcast %63 : vector<1x49xf32> to vector<8x49xf32>
    %903 = arith.mulf %901, %902 : vector<8x49xf32>
    %904 = arith.addf %900, %903 : vector<8x49xf32>
    %905 = vector.broadcast %209 : vector<8x1xf32> to vector<8x49xf32>
    %906 = vector.broadcast %65 : vector<1x49xf32> to vector<8x49xf32>
    %907 = arith.mulf %905, %906 : vector<8x49xf32>
    %908 = arith.addf %904, %907 : vector<8x49xf32>
    %909 = vector.broadcast %211 : vector<8x1xf32> to vector<8x49xf32>
    %910 = vector.broadcast %67 : vector<1x49xf32> to vector<8x49xf32>
    %911 = arith.mulf %909, %910 : vector<8x49xf32>
    %912 = arith.addf %908, %911 : vector<8x49xf32>
    %913 = vector.broadcast %213 : vector<8x1xf32> to vector<8x49xf32>
    %914 = vector.broadcast %83 : vector<1x49xf32> to vector<8x49xf32>
    %915 = arith.mulf %913, %914 : vector<8x49xf32>
    %916 = arith.addf %912, %915 : vector<8x49xf32>
    %917 = vector.broadcast %215 : vector<8x1xf32> to vector<8x49xf32>
    %918 = vector.broadcast %85 : vector<1x49xf32> to vector<8x49xf32>
    %919 = arith.mulf %917, %918 : vector<8x49xf32>
    %920 = arith.addf %916, %919 : vector<8x49xf32>
    %921 = vector.broadcast %217 : vector<8x1xf32> to vector<8x49xf32>
    %922 = vector.broadcast %87 : vector<1x49xf32> to vector<8x49xf32>
    %923 = arith.mulf %921, %922 : vector<8x49xf32>
    %924 = arith.addf %920, %923 : vector<8x49xf32>
    %925 = arith.maximumf %887, %924 : vector<8x49xf32>
    %cst_548 = arith.constant 0.000000e+00 : f32
    %926 = vector.broadcast %cst_548 : f32 to vector<8x49xf32>
    %927 = vector.broadcast %201 : vector<8x1xf32> to vector<8x49xf32>
    %928 = vector.broadcast %61 : vector<1x49xf32> to vector<8x49xf32>
    %929 = arith.mulf %927, %928 : vector<8x49xf32>
    %930 = arith.addf %926, %929 : vector<8x49xf32>
    %931 = vector.broadcast %203 : vector<8x1xf32> to vector<8x49xf32>
    %932 = vector.broadcast %63 : vector<1x49xf32> to vector<8x49xf32>
    %933 = arith.mulf %931, %932 : vector<8x49xf32>
    %934 = arith.addf %930, %933 : vector<8x49xf32>
    %935 = vector.broadcast %205 : vector<8x1xf32> to vector<8x49xf32>
    %936 = vector.broadcast %65 : vector<1x49xf32> to vector<8x49xf32>
    %937 = arith.mulf %935, %936 : vector<8x49xf32>
    %938 = arith.addf %934, %937 : vector<8x49xf32>
    %939 = vector.broadcast %207 : vector<8x1xf32> to vector<8x49xf32>
    %940 = vector.broadcast %81 : vector<1x49xf32> to vector<8x49xf32>
    %941 = arith.mulf %939, %940 : vector<8x49xf32>
    %942 = arith.addf %938, %941 : vector<8x49xf32>
    %943 = vector.broadcast %209 : vector<8x1xf32> to vector<8x49xf32>
    %944 = vector.broadcast %83 : vector<1x49xf32> to vector<8x49xf32>
    %945 = arith.mulf %943, %944 : vector<8x49xf32>
    %946 = arith.addf %942, %945 : vector<8x49xf32>
    %947 = vector.broadcast %211 : vector<8x1xf32> to vector<8x49xf32>
    %948 = vector.broadcast %85 : vector<1x49xf32> to vector<8x49xf32>
    %949 = arith.mulf %947, %948 : vector<8x49xf32>
    %950 = arith.addf %946, %949 : vector<8x49xf32>
    %951 = vector.broadcast %213 : vector<8x1xf32> to vector<8x49xf32>
    %952 = vector.broadcast %101 : vector<1x49xf32> to vector<8x49xf32>
    %953 = arith.mulf %951, %952 : vector<8x49xf32>
    %954 = arith.addf %950, %953 : vector<8x49xf32>
    %955 = vector.broadcast %215 : vector<8x1xf32> to vector<8x49xf32>
    %956 = vector.broadcast %103 : vector<1x49xf32> to vector<8x49xf32>
    %957 = arith.mulf %955, %956 : vector<8x49xf32>
    %958 = arith.addf %954, %957 : vector<8x49xf32>
    %959 = vector.broadcast %217 : vector<8x1xf32> to vector<8x49xf32>
    %960 = vector.broadcast %105 : vector<1x49xf32> to vector<8x49xf32>
    %961 = arith.mulf %959, %960 : vector<8x49xf32>
    %962 = arith.addf %958, %961 : vector<8x49xf32>
    %963 = arith.maximumf %925, %962 : vector<8x49xf32>
    %cst_549 = arith.constant 0.000000e+00 : f32
    %964 = vector.broadcast %cst_549 : f32 to vector<8x49xf32>
    %965 = vector.broadcast %201 : vector<8x1xf32> to vector<8x49xf32>
    %966 = vector.broadcast %63 : vector<1x49xf32> to vector<8x49xf32>
    %967 = arith.mulf %965, %966 : vector<8x49xf32>
    %968 = arith.addf %964, %967 : vector<8x49xf32>
    %969 = vector.broadcast %203 : vector<8x1xf32> to vector<8x49xf32>
    %970 = vector.broadcast %65 : vector<1x49xf32> to vector<8x49xf32>
    %971 = arith.mulf %969, %970 : vector<8x49xf32>
    %972 = arith.addf %968, %971 : vector<8x49xf32>
    %973 = vector.broadcast %205 : vector<8x1xf32> to vector<8x49xf32>
    %974 = vector.broadcast %67 : vector<1x49xf32> to vector<8x49xf32>
    %975 = arith.mulf %973, %974 : vector<8x49xf32>
    %976 = arith.addf %972, %975 : vector<8x49xf32>
    %977 = vector.broadcast %207 : vector<8x1xf32> to vector<8x49xf32>
    %978 = vector.broadcast %83 : vector<1x49xf32> to vector<8x49xf32>
    %979 = arith.mulf %977, %978 : vector<8x49xf32>
    %980 = arith.addf %976, %979 : vector<8x49xf32>
    %981 = vector.broadcast %209 : vector<8x1xf32> to vector<8x49xf32>
    %982 = vector.broadcast %85 : vector<1x49xf32> to vector<8x49xf32>
    %983 = arith.mulf %981, %982 : vector<8x49xf32>
    %984 = arith.addf %980, %983 : vector<8x49xf32>
    %985 = vector.broadcast %211 : vector<8x1xf32> to vector<8x49xf32>
    %986 = vector.broadcast %87 : vector<1x49xf32> to vector<8x49xf32>
    %987 = arith.mulf %985, %986 : vector<8x49xf32>
    %988 = arith.addf %984, %987 : vector<8x49xf32>
    %989 = vector.broadcast %213 : vector<8x1xf32> to vector<8x49xf32>
    %990 = vector.broadcast %103 : vector<1x49xf32> to vector<8x49xf32>
    %991 = arith.mulf %989, %990 : vector<8x49xf32>
    %992 = arith.addf %988, %991 : vector<8x49xf32>
    %993 = vector.broadcast %215 : vector<8x1xf32> to vector<8x49xf32>
    %994 = vector.broadcast %105 : vector<1x49xf32> to vector<8x49xf32>
    %995 = arith.mulf %993, %994 : vector<8x49xf32>
    %996 = arith.addf %992, %995 : vector<8x49xf32>
    %997 = vector.broadcast %217 : vector<8x1xf32> to vector<8x49xf32>
    %998 = vector.broadcast %107 : vector<1x49xf32> to vector<8x49xf32>
    %999 = arith.mulf %997, %998 : vector<8x49xf32>
    %1000 = arith.addf %996, %999 : vector<8x49xf32>
    %1001 = arith.maximumf %963, %1000 : vector<8x49xf32>
    %1002 = vector.broadcast %218 : vector<8x1xf32> to vector<8x49xf32>
    %1003 = arith.addf %1001, %1002 : vector<8x49xf32>
    %cst_550 = arith.constant 0.000000e+00 : f32
    %1004 = vector.broadcast %cst_550 : f32 to vector<8x49xf32>
    %1005 = arith.maximumf %1003, %1004 : vector<8x49xf32>
    %c4_551 = arith.constant 4 : index
    %c0_552 = arith.constant 0 : index
    %1006 = vector.load %arg2[%c4_551, %c0_552] : memref<16x49xf32, #tpu.memory_space<vmem>>, vector<1x49xf32>
    %1007 = vector.broadcast %1006 : vector<1x49xf32> to vector<8x49xf32>
    %1008 = arith.mulf %1005, %1007 : vector<8x49xf32>
    %cst_553 = arith.constant 0.000000e+00 : f32
    %1009 = vector.broadcast %cst_553 : f32 to vector<8x49xf32>
    %1010 = vector.broadcast %201 : vector<8x1xf32> to vector<8x49xf32>
    %1011 = vector.broadcast %45 : vector<1x49xf32> to vector<8x49xf32>
    %1012 = arith.mulf %1010, %1011 : vector<8x49xf32>
    %1013 = arith.addf %1009, %1012 : vector<8x49xf32>
    %1014 = vector.broadcast %203 : vector<8x1xf32> to vector<8x49xf32>
    %1015 = vector.broadcast %47 : vector<1x49xf32> to vector<8x49xf32>
    %1016 = arith.mulf %1014, %1015 : vector<8x49xf32>
    %1017 = arith.addf %1013, %1016 : vector<8x49xf32>
    %1018 = vector.broadcast %205 : vector<8x1xf32> to vector<8x49xf32>
    %1019 = vector.broadcast %49 : vector<1x49xf32> to vector<8x49xf32>
    %1020 = arith.mulf %1018, %1019 : vector<8x49xf32>
    %1021 = arith.addf %1017, %1020 : vector<8x49xf32>
    %1022 = vector.broadcast %207 : vector<8x1xf32> to vector<8x49xf32>
    %1023 = vector.broadcast %65 : vector<1x49xf32> to vector<8x49xf32>
    %1024 = arith.mulf %1022, %1023 : vector<8x49xf32>
    %1025 = arith.addf %1021, %1024 : vector<8x49xf32>
    %1026 = vector.broadcast %209 : vector<8x1xf32> to vector<8x49xf32>
    %1027 = vector.broadcast %67 : vector<1x49xf32> to vector<8x49xf32>
    %1028 = arith.mulf %1026, %1027 : vector<8x49xf32>
    %1029 = arith.addf %1025, %1028 : vector<8x49xf32>
    %1030 = vector.broadcast %211 : vector<8x1xf32> to vector<8x49xf32>
    %1031 = vector.broadcast %69 : vector<1x49xf32> to vector<8x49xf32>
    %1032 = arith.mulf %1030, %1031 : vector<8x49xf32>
    %1033 = arith.addf %1029, %1032 : vector<8x49xf32>
    %1034 = vector.broadcast %213 : vector<8x1xf32> to vector<8x49xf32>
    %1035 = vector.broadcast %85 : vector<1x49xf32> to vector<8x49xf32>
    %1036 = arith.mulf %1034, %1035 : vector<8x49xf32>
    %1037 = arith.addf %1033, %1036 : vector<8x49xf32>
    %1038 = vector.broadcast %215 : vector<8x1xf32> to vector<8x49xf32>
    %1039 = vector.broadcast %87 : vector<1x49xf32> to vector<8x49xf32>
    %1040 = arith.mulf %1038, %1039 : vector<8x49xf32>
    %1041 = arith.addf %1037, %1040 : vector<8x49xf32>
    %1042 = vector.broadcast %217 : vector<8x1xf32> to vector<8x49xf32>
    %1043 = vector.broadcast %89 : vector<1x49xf32> to vector<8x49xf32>
    %1044 = arith.mulf %1042, %1043 : vector<8x49xf32>
    %1045 = arith.addf %1041, %1044 : vector<8x49xf32>
    %cst_554 = arith.constant 0.000000e+00 : f32
    %1046 = vector.broadcast %cst_554 : f32 to vector<8x49xf32>
    %1047 = vector.broadcast %201 : vector<8x1xf32> to vector<8x49xf32>
    %1048 = vector.broadcast %47 : vector<1x49xf32> to vector<8x49xf32>
    %1049 = arith.mulf %1047, %1048 : vector<8x49xf32>
    %1050 = arith.addf %1046, %1049 : vector<8x49xf32>
    %1051 = vector.broadcast %203 : vector<8x1xf32> to vector<8x49xf32>
    %1052 = vector.broadcast %49 : vector<1x49xf32> to vector<8x49xf32>
    %1053 = arith.mulf %1051, %1052 : vector<8x49xf32>
    %1054 = arith.addf %1050, %1053 : vector<8x49xf32>
    %1055 = vector.broadcast %205 : vector<8x1xf32> to vector<8x49xf32>
    %1056 = vector.broadcast %51 : vector<1x49xf32> to vector<8x49xf32>
    %1057 = arith.mulf %1055, %1056 : vector<8x49xf32>
    %1058 = arith.addf %1054, %1057 : vector<8x49xf32>
    %1059 = vector.broadcast %207 : vector<8x1xf32> to vector<8x49xf32>
    %1060 = vector.broadcast %67 : vector<1x49xf32> to vector<8x49xf32>
    %1061 = arith.mulf %1059, %1060 : vector<8x49xf32>
    %1062 = arith.addf %1058, %1061 : vector<8x49xf32>
    %1063 = vector.broadcast %209 : vector<8x1xf32> to vector<8x49xf32>
    %1064 = vector.broadcast %69 : vector<1x49xf32> to vector<8x49xf32>
    %1065 = arith.mulf %1063, %1064 : vector<8x49xf32>
    %1066 = arith.addf %1062, %1065 : vector<8x49xf32>
    %1067 = vector.broadcast %211 : vector<8x1xf32> to vector<8x49xf32>
    %1068 = vector.broadcast %71 : vector<1x49xf32> to vector<8x49xf32>
    %1069 = arith.mulf %1067, %1068 : vector<8x49xf32>
    %1070 = arith.addf %1066, %1069 : vector<8x49xf32>
    %1071 = vector.broadcast %213 : vector<8x1xf32> to vector<8x49xf32>
    %1072 = vector.broadcast %87 : vector<1x49xf32> to vector<8x49xf32>
    %1073 = arith.mulf %1071, %1072 : vector<8x49xf32>
    %1074 = arith.addf %1070, %1073 : vector<8x49xf32>
    %1075 = vector.broadcast %215 : vector<8x1xf32> to vector<8x49xf32>
    %1076 = vector.broadcast %89 : vector<1x49xf32> to vector<8x49xf32>
    %1077 = arith.mulf %1075, %1076 : vector<8x49xf32>
    %1078 = arith.addf %1074, %1077 : vector<8x49xf32>
    %1079 = vector.broadcast %217 : vector<8x1xf32> to vector<8x49xf32>
    %1080 = vector.broadcast %91 : vector<1x49xf32> to vector<8x49xf32>
    %1081 = arith.mulf %1079, %1080 : vector<8x49xf32>
    %1082 = arith.addf %1078, %1081 : vector<8x49xf32>
    %1083 = arith.maximumf %1045, %1082 : vector<8x49xf32>
    %cst_555 = arith.constant 0.000000e+00 : f32
    %1084 = vector.broadcast %cst_555 : f32 to vector<8x49xf32>
    %1085 = vector.broadcast %201 : vector<8x1xf32> to vector<8x49xf32>
    %1086 = vector.broadcast %65 : vector<1x49xf32> to vector<8x49xf32>
    %1087 = arith.mulf %1085, %1086 : vector<8x49xf32>
    %1088 = arith.addf %1084, %1087 : vector<8x49xf32>
    %1089 = vector.broadcast %203 : vector<8x1xf32> to vector<8x49xf32>
    %1090 = vector.broadcast %67 : vector<1x49xf32> to vector<8x49xf32>
    %1091 = arith.mulf %1089, %1090 : vector<8x49xf32>
    %1092 = arith.addf %1088, %1091 : vector<8x49xf32>
    %1093 = vector.broadcast %205 : vector<8x1xf32> to vector<8x49xf32>
    %1094 = vector.broadcast %69 : vector<1x49xf32> to vector<8x49xf32>
    %1095 = arith.mulf %1093, %1094 : vector<8x49xf32>
    %1096 = arith.addf %1092, %1095 : vector<8x49xf32>
    %1097 = vector.broadcast %207 : vector<8x1xf32> to vector<8x49xf32>
    %1098 = vector.broadcast %85 : vector<1x49xf32> to vector<8x49xf32>
    %1099 = arith.mulf %1097, %1098 : vector<8x49xf32>
    %1100 = arith.addf %1096, %1099 : vector<8x49xf32>
    %1101 = vector.broadcast %209 : vector<8x1xf32> to vector<8x49xf32>
    %1102 = vector.broadcast %87 : vector<1x49xf32> to vector<8x49xf32>
    %1103 = arith.mulf %1101, %1102 : vector<8x49xf32>
    %1104 = arith.addf %1100, %1103 : vector<8x49xf32>
    %1105 = vector.broadcast %211 : vector<8x1xf32> to vector<8x49xf32>
    %1106 = vector.broadcast %89 : vector<1x49xf32> to vector<8x49xf32>
    %1107 = arith.mulf %1105, %1106 : vector<8x49xf32>
    %1108 = arith.addf %1104, %1107 : vector<8x49xf32>
    %1109 = vector.broadcast %213 : vector<8x1xf32> to vector<8x49xf32>
    %1110 = vector.broadcast %105 : vector<1x49xf32> to vector<8x49xf32>
    %1111 = arith.mulf %1109, %1110 : vector<8x49xf32>
    %1112 = arith.addf %1108, %1111 : vector<8x49xf32>
    %1113 = vector.broadcast %215 : vector<8x1xf32> to vector<8x49xf32>
    %1114 = vector.broadcast %107 : vector<1x49xf32> to vector<8x49xf32>
    %1115 = arith.mulf %1113, %1114 : vector<8x49xf32>
    %1116 = arith.addf %1112, %1115 : vector<8x49xf32>
    %1117 = vector.broadcast %217 : vector<8x1xf32> to vector<8x49xf32>
    %1118 = vector.broadcast %109 : vector<1x49xf32> to vector<8x49xf32>
    %1119 = arith.mulf %1117, %1118 : vector<8x49xf32>
    %1120 = arith.addf %1116, %1119 : vector<8x49xf32>
    %1121 = arith.maximumf %1083, %1120 : vector<8x49xf32>
    %cst_556 = arith.constant 0.000000e+00 : f32
    %1122 = vector.broadcast %cst_556 : f32 to vector<8x49xf32>
    %1123 = vector.broadcast %201 : vector<8x1xf32> to vector<8x49xf32>
    %1124 = vector.broadcast %67 : vector<1x49xf32> to vector<8x49xf32>
    %1125 = arith.mulf %1123, %1124 : vector<8x49xf32>
    %1126 = arith.addf %1122, %1125 : vector<8x49xf32>
    %1127 = vector.broadcast %203 : vector<8x1xf32> to vector<8x49xf32>
    %1128 = vector.broadcast %69 : vector<1x49xf32> to vector<8x49xf32>
    %1129 = arith.mulf %1127, %1128 : vector<8x49xf32>
    %1130 = arith.addf %1126, %1129 : vector<8x49xf32>
    %1131 = vector.broadcast %205 : vector<8x1xf32> to vector<8x49xf32>
    %1132 = vector.broadcast %71 : vector<1x49xf32> to vector<8x49xf32>
    %1133 = arith.mulf %1131, %1132 : vector<8x49xf32>
    %1134 = arith.addf %1130, %1133 : vector<8x49xf32>
    %1135 = vector.broadcast %207 : vector<8x1xf32> to vector<8x49xf32>
    %1136 = vector.broadcast %87 : vector<1x49xf32> to vector<8x49xf32>
    %1137 = arith.mulf %1135, %1136 : vector<8x49xf32>
    %1138 = arith.addf %1134, %1137 : vector<8x49xf32>
    %1139 = vector.broadcast %209 : vector<8x1xf32> to vector<8x49xf32>
    %1140 = vector.broadcast %89 : vector<1x49xf32> to vector<8x49xf32>
    %1141 = arith.mulf %1139, %1140 : vector<8x49xf32>
    %1142 = arith.addf %1138, %1141 : vector<8x49xf32>
    %1143 = vector.broadcast %211 : vector<8x1xf32> to vector<8x49xf32>
    %1144 = vector.broadcast %91 : vector<1x49xf32> to vector<8x49xf32>
    %1145 = arith.mulf %1143, %1144 : vector<8x49xf32>
    %1146 = arith.addf %1142, %1145 : vector<8x49xf32>
    %1147 = vector.broadcast %213 : vector<8x1xf32> to vector<8x49xf32>
    %1148 = vector.broadcast %107 : vector<1x49xf32> to vector<8x49xf32>
    %1149 = arith.mulf %1147, %1148 : vector<8x49xf32>
    %1150 = arith.addf %1146, %1149 : vector<8x49xf32>
    %1151 = vector.broadcast %215 : vector<8x1xf32> to vector<8x49xf32>
    %1152 = vector.broadcast %109 : vector<1x49xf32> to vector<8x49xf32>
    %1153 = arith.mulf %1151, %1152 : vector<8x49xf32>
    %1154 = arith.addf %1150, %1153 : vector<8x49xf32>
    %1155 = vector.broadcast %217 : vector<8x1xf32> to vector<8x49xf32>
    %1156 = vector.broadcast %111 : vector<1x49xf32> to vector<8x49xf32>
    %1157 = arith.mulf %1155, %1156 : vector<8x49xf32>
    %1158 = arith.addf %1154, %1157 : vector<8x49xf32>
    %1159 = arith.maximumf %1121, %1158 : vector<8x49xf32>
    %1160 = vector.broadcast %218 : vector<8x1xf32> to vector<8x49xf32>
    %1161 = arith.addf %1159, %1160 : vector<8x49xf32>
    %cst_557 = arith.constant 0.000000e+00 : f32
    %1162 = vector.broadcast %cst_557 : f32 to vector<8x49xf32>
    %1163 = arith.maximumf %1161, %1162 : vector<8x49xf32>
    %cst_558 = arith.constant 0.000000e+00 : f32
    %1164 = vector.broadcast %cst_558 : f32 to vector<8x49xf32>
    %1165 = vector.broadcast %201 : vector<8x1xf32> to vector<8x49xf32>
    %1166 = vector.broadcast %49 : vector<1x49xf32> to vector<8x49xf32>
    %1167 = arith.mulf %1165, %1166 : vector<8x49xf32>
    %1168 = arith.addf %1164, %1167 : vector<8x49xf32>
    %1169 = vector.broadcast %203 : vector<8x1xf32> to vector<8x49xf32>
    %1170 = vector.broadcast %51 : vector<1x49xf32> to vector<8x49xf32>
    %1171 = arith.mulf %1169, %1170 : vector<8x49xf32>
    %1172 = arith.addf %1168, %1171 : vector<8x49xf32>
    %1173 = vector.broadcast %205 : vector<8x1xf32> to vector<8x49xf32>
    %1174 = vector.broadcast %53 : vector<1x49xf32> to vector<8x49xf32>
    %1175 = arith.mulf %1173, %1174 : vector<8x49xf32>
    %1176 = arith.addf %1172, %1175 : vector<8x49xf32>
    %1177 = vector.broadcast %207 : vector<8x1xf32> to vector<8x49xf32>
    %1178 = vector.broadcast %69 : vector<1x49xf32> to vector<8x49xf32>
    %1179 = arith.mulf %1177, %1178 : vector<8x49xf32>
    %1180 = arith.addf %1176, %1179 : vector<8x49xf32>
    %1181 = vector.broadcast %209 : vector<8x1xf32> to vector<8x49xf32>
    %1182 = vector.broadcast %71 : vector<1x49xf32> to vector<8x49xf32>
    %1183 = arith.mulf %1181, %1182 : vector<8x49xf32>
    %1184 = arith.addf %1180, %1183 : vector<8x49xf32>
    %1185 = vector.broadcast %211 : vector<8x1xf32> to vector<8x49xf32>
    %1186 = vector.broadcast %73 : vector<1x49xf32> to vector<8x49xf32>
    %1187 = arith.mulf %1185, %1186 : vector<8x49xf32>
    %1188 = arith.addf %1184, %1187 : vector<8x49xf32>
    %1189 = vector.broadcast %213 : vector<8x1xf32> to vector<8x49xf32>
    %1190 = vector.broadcast %89 : vector<1x49xf32> to vector<8x49xf32>
    %1191 = arith.mulf %1189, %1190 : vector<8x49xf32>
    %1192 = arith.addf %1188, %1191 : vector<8x49xf32>
    %1193 = vector.broadcast %215 : vector<8x1xf32> to vector<8x49xf32>
    %1194 = vector.broadcast %91 : vector<1x49xf32> to vector<8x49xf32>
    %1195 = arith.mulf %1193, %1194 : vector<8x49xf32>
    %1196 = arith.addf %1192, %1195 : vector<8x49xf32>
    %1197 = vector.broadcast %217 : vector<8x1xf32> to vector<8x49xf32>
    %1198 = vector.broadcast %93 : vector<1x49xf32> to vector<8x49xf32>
    %1199 = arith.mulf %1197, %1198 : vector<8x49xf32>
    %1200 = arith.addf %1196, %1199 : vector<8x49xf32>
    %cst_559 = arith.constant 0.000000e+00 : f32
    %1201 = vector.broadcast %cst_559 : f32 to vector<8x49xf32>
    %1202 = vector.broadcast %201 : vector<8x1xf32> to vector<8x49xf32>
    %1203 = vector.broadcast %51 : vector<1x49xf32> to vector<8x49xf32>
    %1204 = arith.mulf %1202, %1203 : vector<8x49xf32>
    %1205 = arith.addf %1201, %1204 : vector<8x49xf32>
    %1206 = vector.broadcast %203 : vector<8x1xf32> to vector<8x49xf32>
    %1207 = vector.broadcast %53 : vector<1x49xf32> to vector<8x49xf32>
    %1208 = arith.mulf %1206, %1207 : vector<8x49xf32>
    %1209 = arith.addf %1205, %1208 : vector<8x49xf32>
    %1210 = vector.broadcast %205 : vector<8x1xf32> to vector<8x49xf32>
    %1211 = vector.broadcast %55 : vector<1x49xf32> to vector<8x49xf32>
    %1212 = arith.mulf %1210, %1211 : vector<8x49xf32>
    %1213 = arith.addf %1209, %1212 : vector<8x49xf32>
    %1214 = vector.broadcast %207 : vector<8x1xf32> to vector<8x49xf32>
    %1215 = vector.broadcast %71 : vector<1x49xf32> to vector<8x49xf32>
    %1216 = arith.mulf %1214, %1215 : vector<8x49xf32>
    %1217 = arith.addf %1213, %1216 : vector<8x49xf32>
    %1218 = vector.broadcast %209 : vector<8x1xf32> to vector<8x49xf32>
    %1219 = vector.broadcast %73 : vector<1x49xf32> to vector<8x49xf32>
    %1220 = arith.mulf %1218, %1219 : vector<8x49xf32>
    %1221 = arith.addf %1217, %1220 : vector<8x49xf32>
    %1222 = vector.broadcast %211 : vector<8x1xf32> to vector<8x49xf32>
    %1223 = vector.broadcast %75 : vector<1x49xf32> to vector<8x49xf32>
    %1224 = arith.mulf %1222, %1223 : vector<8x49xf32>
    %1225 = arith.addf %1221, %1224 : vector<8x49xf32>
    %1226 = vector.broadcast %213 : vector<8x1xf32> to vector<8x49xf32>
    %1227 = vector.broadcast %91 : vector<1x49xf32> to vector<8x49xf32>
    %1228 = arith.mulf %1226, %1227 : vector<8x49xf32>
    %1229 = arith.addf %1225, %1228 : vector<8x49xf32>
    %1230 = vector.broadcast %215 : vector<8x1xf32> to vector<8x49xf32>
    %1231 = vector.broadcast %93 : vector<1x49xf32> to vector<8x49xf32>
    %1232 = arith.mulf %1230, %1231 : vector<8x49xf32>
    %1233 = arith.addf %1229, %1232 : vector<8x49xf32>
    %1234 = vector.broadcast %217 : vector<8x1xf32> to vector<8x49xf32>
    %1235 = vector.broadcast %95 : vector<1x49xf32> to vector<8x49xf32>
    %1236 = arith.mulf %1234, %1235 : vector<8x49xf32>
    %1237 = arith.addf %1233, %1236 : vector<8x49xf32>
    %1238 = arith.maximumf %1200, %1237 : vector<8x49xf32>
    %cst_560 = arith.constant 0.000000e+00 : f32
    %1239 = vector.broadcast %cst_560 : f32 to vector<8x49xf32>
    %1240 = vector.broadcast %201 : vector<8x1xf32> to vector<8x49xf32>
    %1241 = vector.broadcast %69 : vector<1x49xf32> to vector<8x49xf32>
    %1242 = arith.mulf %1240, %1241 : vector<8x49xf32>
    %1243 = arith.addf %1239, %1242 : vector<8x49xf32>
    %1244 = vector.broadcast %203 : vector<8x1xf32> to vector<8x49xf32>
    %1245 = vector.broadcast %71 : vector<1x49xf32> to vector<8x49xf32>
    %1246 = arith.mulf %1244, %1245 : vector<8x49xf32>
    %1247 = arith.addf %1243, %1246 : vector<8x49xf32>
    %1248 = vector.broadcast %205 : vector<8x1xf32> to vector<8x49xf32>
    %1249 = vector.broadcast %73 : vector<1x49xf32> to vector<8x49xf32>
    %1250 = arith.mulf %1248, %1249 : vector<8x49xf32>
    %1251 = arith.addf %1247, %1250 : vector<8x49xf32>
    %1252 = vector.broadcast %207 : vector<8x1xf32> to vector<8x49xf32>
    %1253 = vector.broadcast %89 : vector<1x49xf32> to vector<8x49xf32>
    %1254 = arith.mulf %1252, %1253 : vector<8x49xf32>
    %1255 = arith.addf %1251, %1254 : vector<8x49xf32>
    %1256 = vector.broadcast %209 : vector<8x1xf32> to vector<8x49xf32>
    %1257 = vector.broadcast %91 : vector<1x49xf32> to vector<8x49xf32>
    %1258 = arith.mulf %1256, %1257 : vector<8x49xf32>
    %1259 = arith.addf %1255, %1258 : vector<8x49xf32>
    %1260 = vector.broadcast %211 : vector<8x1xf32> to vector<8x49xf32>
    %1261 = vector.broadcast %93 : vector<1x49xf32> to vector<8x49xf32>
    %1262 = arith.mulf %1260, %1261 : vector<8x49xf32>
    %1263 = arith.addf %1259, %1262 : vector<8x49xf32>
    %1264 = vector.broadcast %213 : vector<8x1xf32> to vector<8x49xf32>
    %1265 = vector.broadcast %109 : vector<1x49xf32> to vector<8x49xf32>
    %1266 = arith.mulf %1264, %1265 : vector<8x49xf32>
    %1267 = arith.addf %1263, %1266 : vector<8x49xf32>
    %1268 = vector.broadcast %215 : vector<8x1xf32> to vector<8x49xf32>
    %1269 = vector.broadcast %111 : vector<1x49xf32> to vector<8x49xf32>
    %1270 = arith.mulf %1268, %1269 : vector<8x49xf32>
    %1271 = arith.addf %1267, %1270 : vector<8x49xf32>
    %1272 = vector.broadcast %217 : vector<8x1xf32> to vector<8x49xf32>
    %1273 = vector.broadcast %113 : vector<1x49xf32> to vector<8x49xf32>
    %1274 = arith.mulf %1272, %1273 : vector<8x49xf32>
    %1275 = arith.addf %1271, %1274 : vector<8x49xf32>
    %1276 = arith.maximumf %1238, %1275 : vector<8x49xf32>
    %cst_561 = arith.constant 0.000000e+00 : f32
    %1277 = vector.broadcast %cst_561 : f32 to vector<8x49xf32>
    %1278 = vector.broadcast %201 : vector<8x1xf32> to vector<8x49xf32>
    %1279 = vector.broadcast %71 : vector<1x49xf32> to vector<8x49xf32>
    %1280 = arith.mulf %1278, %1279 : vector<8x49xf32>
    %1281 = arith.addf %1277, %1280 : vector<8x49xf32>
    %1282 = vector.broadcast %203 : vector<8x1xf32> to vector<8x49xf32>
    %1283 = vector.broadcast %73 : vector<1x49xf32> to vector<8x49xf32>
    %1284 = arith.mulf %1282, %1283 : vector<8x49xf32>
    %1285 = arith.addf %1281, %1284 : vector<8x49xf32>
    %1286 = vector.broadcast %205 : vector<8x1xf32> to vector<8x49xf32>
    %1287 = vector.broadcast %75 : vector<1x49xf32> to vector<8x49xf32>
    %1288 = arith.mulf %1286, %1287 : vector<8x49xf32>
    %1289 = arith.addf %1285, %1288 : vector<8x49xf32>
    %1290 = vector.broadcast %207 : vector<8x1xf32> to vector<8x49xf32>
    %1291 = vector.broadcast %91 : vector<1x49xf32> to vector<8x49xf32>
    %1292 = arith.mulf %1290, %1291 : vector<8x49xf32>
    %1293 = arith.addf %1289, %1292 : vector<8x49xf32>
    %1294 = vector.broadcast %209 : vector<8x1xf32> to vector<8x49xf32>
    %1295 = vector.broadcast %93 : vector<1x49xf32> to vector<8x49xf32>
    %1296 = arith.mulf %1294, %1295 : vector<8x49xf32>
    %1297 = arith.addf %1293, %1296 : vector<8x49xf32>
    %1298 = vector.broadcast %211 : vector<8x1xf32> to vector<8x49xf32>
    %1299 = vector.broadcast %95 : vector<1x49xf32> to vector<8x49xf32>
    %1300 = arith.mulf %1298, %1299 : vector<8x49xf32>
    %1301 = arith.addf %1297, %1300 : vector<8x49xf32>
    %1302 = vector.broadcast %213 : vector<8x1xf32> to vector<8x49xf32>
    %1303 = vector.broadcast %111 : vector<1x49xf32> to vector<8x49xf32>
    %1304 = arith.mulf %1302, %1303 : vector<8x49xf32>
    %1305 = arith.addf %1301, %1304 : vector<8x49xf32>
    %1306 = vector.broadcast %215 : vector<8x1xf32> to vector<8x49xf32>
    %1307 = vector.broadcast %113 : vector<1x49xf32> to vector<8x49xf32>
    %1308 = arith.mulf %1306, %1307 : vector<8x49xf32>
    %1309 = arith.addf %1305, %1308 : vector<8x49xf32>
    %1310 = vector.broadcast %217 : vector<8x1xf32> to vector<8x49xf32>
    %1311 = vector.broadcast %115 : vector<1x49xf32> to vector<8x49xf32>
    %1312 = arith.mulf %1310, %1311 : vector<8x49xf32>
    %1313 = arith.addf %1309, %1312 : vector<8x49xf32>
    %1314 = arith.maximumf %1276, %1313 : vector<8x49xf32>
    %1315 = vector.broadcast %218 : vector<8x1xf32> to vector<8x49xf32>
    %1316 = arith.addf %1314, %1315 : vector<8x49xf32>
    %cst_562 = arith.constant 0.000000e+00 : f32
    %1317 = vector.broadcast %cst_562 : f32 to vector<8x49xf32>
    %1318 = arith.maximumf %1316, %1317 : vector<8x49xf32>
    %cst_563 = arith.constant 0.000000e+00 : f32
    %1319 = vector.broadcast %cst_563 : f32 to vector<8x49xf32>
    %1320 = vector.broadcast %201 : vector<8x1xf32> to vector<8x49xf32>
    %1321 = vector.broadcast %53 : vector<1x49xf32> to vector<8x49xf32>
    %1322 = arith.mulf %1320, %1321 : vector<8x49xf32>
    %1323 = arith.addf %1319, %1322 : vector<8x49xf32>
    %1324 = vector.broadcast %203 : vector<8x1xf32> to vector<8x49xf32>
    %1325 = vector.broadcast %55 : vector<1x49xf32> to vector<8x49xf32>
    %1326 = arith.mulf %1324, %1325 : vector<8x49xf32>
    %1327 = arith.addf %1323, %1326 : vector<8x49xf32>
    %1328 = vector.broadcast %205 : vector<8x1xf32> to vector<8x49xf32>
    %1329 = vector.broadcast %57 : vector<1x49xf32> to vector<8x49xf32>
    %1330 = arith.mulf %1328, %1329 : vector<8x49xf32>
    %1331 = arith.addf %1327, %1330 : vector<8x49xf32>
    %1332 = vector.broadcast %207 : vector<8x1xf32> to vector<8x49xf32>
    %1333 = vector.broadcast %73 : vector<1x49xf32> to vector<8x49xf32>
    %1334 = arith.mulf %1332, %1333 : vector<8x49xf32>
    %1335 = arith.addf %1331, %1334 : vector<8x49xf32>
    %1336 = vector.broadcast %209 : vector<8x1xf32> to vector<8x49xf32>
    %1337 = vector.broadcast %75 : vector<1x49xf32> to vector<8x49xf32>
    %1338 = arith.mulf %1336, %1337 : vector<8x49xf32>
    %1339 = arith.addf %1335, %1338 : vector<8x49xf32>
    %1340 = vector.broadcast %211 : vector<8x1xf32> to vector<8x49xf32>
    %1341 = vector.broadcast %77 : vector<1x49xf32> to vector<8x49xf32>
    %1342 = arith.mulf %1340, %1341 : vector<8x49xf32>
    %1343 = arith.addf %1339, %1342 : vector<8x49xf32>
    %1344 = vector.broadcast %213 : vector<8x1xf32> to vector<8x49xf32>
    %1345 = vector.broadcast %93 : vector<1x49xf32> to vector<8x49xf32>
    %1346 = arith.mulf %1344, %1345 : vector<8x49xf32>
    %1347 = arith.addf %1343, %1346 : vector<8x49xf32>
    %1348 = vector.broadcast %215 : vector<8x1xf32> to vector<8x49xf32>
    %1349 = vector.broadcast %95 : vector<1x49xf32> to vector<8x49xf32>
    %1350 = arith.mulf %1348, %1349 : vector<8x49xf32>
    %1351 = arith.addf %1347, %1350 : vector<8x49xf32>
    %1352 = vector.broadcast %217 : vector<8x1xf32> to vector<8x49xf32>
    %1353 = vector.broadcast %97 : vector<1x49xf32> to vector<8x49xf32>
    %1354 = arith.mulf %1352, %1353 : vector<8x49xf32>
    %1355 = arith.addf %1351, %1354 : vector<8x49xf32>
    %cst_564 = arith.constant 0.000000e+00 : f32
    %1356 = vector.broadcast %cst_564 : f32 to vector<8x49xf32>
    %1357 = vector.broadcast %201 : vector<8x1xf32> to vector<8x49xf32>
    %1358 = vector.broadcast %55 : vector<1x49xf32> to vector<8x49xf32>
    %1359 = arith.mulf %1357, %1358 : vector<8x49xf32>
    %1360 = arith.addf %1356, %1359 : vector<8x49xf32>
    %1361 = vector.broadcast %203 : vector<8x1xf32> to vector<8x49xf32>
    %1362 = vector.broadcast %57 : vector<1x49xf32> to vector<8x49xf32>
    %1363 = arith.mulf %1361, %1362 : vector<8x49xf32>
    %1364 = arith.addf %1360, %1363 : vector<8x49xf32>
    %1365 = vector.broadcast %205 : vector<8x1xf32> to vector<8x49xf32>
    %1366 = vector.broadcast %59 : vector<1x49xf32> to vector<8x49xf32>
    %1367 = arith.mulf %1365, %1366 : vector<8x49xf32>
    %1368 = arith.addf %1364, %1367 : vector<8x49xf32>
    %1369 = vector.broadcast %207 : vector<8x1xf32> to vector<8x49xf32>
    %1370 = vector.broadcast %75 : vector<1x49xf32> to vector<8x49xf32>
    %1371 = arith.mulf %1369, %1370 : vector<8x49xf32>
    %1372 = arith.addf %1368, %1371 : vector<8x49xf32>
    %1373 = vector.broadcast %209 : vector<8x1xf32> to vector<8x49xf32>
    %1374 = vector.broadcast %77 : vector<1x49xf32> to vector<8x49xf32>
    %1375 = arith.mulf %1373, %1374 : vector<8x49xf32>
    %1376 = arith.addf %1372, %1375 : vector<8x49xf32>
    %1377 = vector.broadcast %211 : vector<8x1xf32> to vector<8x49xf32>
    %1378 = vector.broadcast %79 : vector<1x49xf32> to vector<8x49xf32>
    %1379 = arith.mulf %1377, %1378 : vector<8x49xf32>
    %1380 = arith.addf %1376, %1379 : vector<8x49xf32>
    %1381 = vector.broadcast %213 : vector<8x1xf32> to vector<8x49xf32>
    %1382 = vector.broadcast %95 : vector<1x49xf32> to vector<8x49xf32>
    %1383 = arith.mulf %1381, %1382 : vector<8x49xf32>
    %1384 = arith.addf %1380, %1383 : vector<8x49xf32>
    %1385 = vector.broadcast %215 : vector<8x1xf32> to vector<8x49xf32>
    %1386 = vector.broadcast %97 : vector<1x49xf32> to vector<8x49xf32>
    %1387 = arith.mulf %1385, %1386 : vector<8x49xf32>
    %1388 = arith.addf %1384, %1387 : vector<8x49xf32>
    %1389 = vector.broadcast %217 : vector<8x1xf32> to vector<8x49xf32>
    %1390 = vector.broadcast %99 : vector<1x49xf32> to vector<8x49xf32>
    %1391 = arith.mulf %1389, %1390 : vector<8x49xf32>
    %1392 = arith.addf %1388, %1391 : vector<8x49xf32>
    %1393 = arith.maximumf %1355, %1392 : vector<8x49xf32>
    %cst_565 = arith.constant 0.000000e+00 : f32
    %1394 = vector.broadcast %cst_565 : f32 to vector<8x49xf32>
    %1395 = vector.broadcast %201 : vector<8x1xf32> to vector<8x49xf32>
    %1396 = vector.broadcast %73 : vector<1x49xf32> to vector<8x49xf32>
    %1397 = arith.mulf %1395, %1396 : vector<8x49xf32>
    %1398 = arith.addf %1394, %1397 : vector<8x49xf32>
    %1399 = vector.broadcast %203 : vector<8x1xf32> to vector<8x49xf32>
    %1400 = vector.broadcast %75 : vector<1x49xf32> to vector<8x49xf32>
    %1401 = arith.mulf %1399, %1400 : vector<8x49xf32>
    %1402 = arith.addf %1398, %1401 : vector<8x49xf32>
    %1403 = vector.broadcast %205 : vector<8x1xf32> to vector<8x49xf32>
    %1404 = vector.broadcast %77 : vector<1x49xf32> to vector<8x49xf32>
    %1405 = arith.mulf %1403, %1404 : vector<8x49xf32>
    %1406 = arith.addf %1402, %1405 : vector<8x49xf32>
    %1407 = vector.broadcast %207 : vector<8x1xf32> to vector<8x49xf32>
    %1408 = vector.broadcast %93 : vector<1x49xf32> to vector<8x49xf32>
    %1409 = arith.mulf %1407, %1408 : vector<8x49xf32>
    %1410 = arith.addf %1406, %1409 : vector<8x49xf32>
    %1411 = vector.broadcast %209 : vector<8x1xf32> to vector<8x49xf32>
    %1412 = vector.broadcast %95 : vector<1x49xf32> to vector<8x49xf32>
    %1413 = arith.mulf %1411, %1412 : vector<8x49xf32>
    %1414 = arith.addf %1410, %1413 : vector<8x49xf32>
    %1415 = vector.broadcast %211 : vector<8x1xf32> to vector<8x49xf32>
    %1416 = vector.broadcast %97 : vector<1x49xf32> to vector<8x49xf32>
    %1417 = arith.mulf %1415, %1416 : vector<8x49xf32>
    %1418 = arith.addf %1414, %1417 : vector<8x49xf32>
    %1419 = vector.broadcast %213 : vector<8x1xf32> to vector<8x49xf32>
    %1420 = vector.broadcast %113 : vector<1x49xf32> to vector<8x49xf32>
    %1421 = arith.mulf %1419, %1420 : vector<8x49xf32>
    %1422 = arith.addf %1418, %1421 : vector<8x49xf32>
    %1423 = vector.broadcast %215 : vector<8x1xf32> to vector<8x49xf32>
    %1424 = vector.broadcast %115 : vector<1x49xf32> to vector<8x49xf32>
    %1425 = arith.mulf %1423, %1424 : vector<8x49xf32>
    %1426 = arith.addf %1422, %1425 : vector<8x49xf32>
    %1427 = vector.broadcast %217 : vector<8x1xf32> to vector<8x49xf32>
    %1428 = vector.broadcast %117 : vector<1x49xf32> to vector<8x49xf32>
    %1429 = arith.mulf %1427, %1428 : vector<8x49xf32>
    %1430 = arith.addf %1426, %1429 : vector<8x49xf32>
    %1431 = arith.maximumf %1393, %1430 : vector<8x49xf32>
    %cst_566 = arith.constant 0.000000e+00 : f32
    %1432 = vector.broadcast %cst_566 : f32 to vector<8x49xf32>
    %1433 = vector.broadcast %201 : vector<8x1xf32> to vector<8x49xf32>
    %1434 = vector.broadcast %75 : vector<1x49xf32> to vector<8x49xf32>
    %1435 = arith.mulf %1433, %1434 : vector<8x49xf32>
    %1436 = arith.addf %1432, %1435 : vector<8x49xf32>
    %1437 = vector.broadcast %203 : vector<8x1xf32> to vector<8x49xf32>
    %1438 = vector.broadcast %77 : vector<1x49xf32> to vector<8x49xf32>
    %1439 = arith.mulf %1437, %1438 : vector<8x49xf32>
    %1440 = arith.addf %1436, %1439 : vector<8x49xf32>
    %1441 = vector.broadcast %205 : vector<8x1xf32> to vector<8x49xf32>
    %1442 = vector.broadcast %79 : vector<1x49xf32> to vector<8x49xf32>
    %1443 = arith.mulf %1441, %1442 : vector<8x49xf32>
    %1444 = arith.addf %1440, %1443 : vector<8x49xf32>
    %1445 = vector.broadcast %207 : vector<8x1xf32> to vector<8x49xf32>
    %1446 = vector.broadcast %95 : vector<1x49xf32> to vector<8x49xf32>
    %1447 = arith.mulf %1445, %1446 : vector<8x49xf32>
    %1448 = arith.addf %1444, %1447 : vector<8x49xf32>
    %1449 = vector.broadcast %209 : vector<8x1xf32> to vector<8x49xf32>
    %1450 = vector.broadcast %97 : vector<1x49xf32> to vector<8x49xf32>
    %1451 = arith.mulf %1449, %1450 : vector<8x49xf32>
    %1452 = arith.addf %1448, %1451 : vector<8x49xf32>
    %1453 = vector.broadcast %211 : vector<8x1xf32> to vector<8x49xf32>
    %1454 = vector.broadcast %99 : vector<1x49xf32> to vector<8x49xf32>
    %1455 = arith.mulf %1453, %1454 : vector<8x49xf32>
    %1456 = arith.addf %1452, %1455 : vector<8x49xf32>
    %1457 = vector.broadcast %213 : vector<8x1xf32> to vector<8x49xf32>
    %1458 = vector.broadcast %115 : vector<1x49xf32> to vector<8x49xf32>
    %1459 = arith.mulf %1457, %1458 : vector<8x49xf32>
    %1460 = arith.addf %1456, %1459 : vector<8x49xf32>
    %1461 = vector.broadcast %215 : vector<8x1xf32> to vector<8x49xf32>
    %1462 = vector.broadcast %117 : vector<1x49xf32> to vector<8x49xf32>
    %1463 = arith.mulf %1461, %1462 : vector<8x49xf32>
    %1464 = arith.addf %1460, %1463 : vector<8x49xf32>
    %1465 = vector.broadcast %217 : vector<8x1xf32> to vector<8x49xf32>
    %1466 = vector.broadcast %119 : vector<1x49xf32> to vector<8x49xf32>
    %1467 = arith.mulf %1465, %1466 : vector<8x49xf32>
    %1468 = arith.addf %1464, %1467 : vector<8x49xf32>
    %1469 = arith.maximumf %1431, %1468 : vector<8x49xf32>
    %1470 = vector.broadcast %218 : vector<8x1xf32> to vector<8x49xf32>
    %1471 = arith.addf %1469, %1470 : vector<8x49xf32>
    %cst_567 = arith.constant 0.000000e+00 : f32
    %1472 = vector.broadcast %cst_567 : f32 to vector<8x49xf32>
    %1473 = arith.maximumf %1471, %1472 : vector<8x49xf32>
    %c7_568 = arith.constant 7 : index
    %c0_569 = arith.constant 0 : index
    %1474 = vector.load %arg2[%c7_568, %c0_569] : memref<16x49xf32, #tpu.memory_space<vmem>>, vector<1x49xf32>
    %1475 = vector.broadcast %1474 : vector<1x49xf32> to vector<8x49xf32>
    %1476 = arith.mulf %1473, %1475 : vector<8x49xf32>
    %cst_570 = arith.constant 0.000000e+00 : f32
    %1477 = vector.broadcast %cst_570 : f32 to vector<8x49xf32>
    %1478 = vector.broadcast %201 : vector<8x1xf32> to vector<8x49xf32>
    %1479 = vector.broadcast %81 : vector<1x49xf32> to vector<8x49xf32>
    %1480 = arith.mulf %1478, %1479 : vector<8x49xf32>
    %1481 = arith.addf %1477, %1480 : vector<8x49xf32>
    %1482 = vector.broadcast %203 : vector<8x1xf32> to vector<8x49xf32>
    %1483 = vector.broadcast %83 : vector<1x49xf32> to vector<8x49xf32>
    %1484 = arith.mulf %1482, %1483 : vector<8x49xf32>
    %1485 = arith.addf %1481, %1484 : vector<8x49xf32>
    %1486 = vector.broadcast %205 : vector<8x1xf32> to vector<8x49xf32>
    %1487 = vector.broadcast %85 : vector<1x49xf32> to vector<8x49xf32>
    %1488 = arith.mulf %1486, %1487 : vector<8x49xf32>
    %1489 = arith.addf %1485, %1488 : vector<8x49xf32>
    %1490 = vector.broadcast %207 : vector<8x1xf32> to vector<8x49xf32>
    %1491 = vector.broadcast %101 : vector<1x49xf32> to vector<8x49xf32>
    %1492 = arith.mulf %1490, %1491 : vector<8x49xf32>
    %1493 = arith.addf %1489, %1492 : vector<8x49xf32>
    %1494 = vector.broadcast %209 : vector<8x1xf32> to vector<8x49xf32>
    %1495 = vector.broadcast %103 : vector<1x49xf32> to vector<8x49xf32>
    %1496 = arith.mulf %1494, %1495 : vector<8x49xf32>
    %1497 = arith.addf %1493, %1496 : vector<8x49xf32>
    %1498 = vector.broadcast %211 : vector<8x1xf32> to vector<8x49xf32>
    %1499 = vector.broadcast %105 : vector<1x49xf32> to vector<8x49xf32>
    %1500 = arith.mulf %1498, %1499 : vector<8x49xf32>
    %1501 = arith.addf %1497, %1500 : vector<8x49xf32>
    %1502 = vector.broadcast %213 : vector<8x1xf32> to vector<8x49xf32>
    %1503 = vector.broadcast %121 : vector<1x49xf32> to vector<8x49xf32>
    %1504 = arith.mulf %1502, %1503 : vector<8x49xf32>
    %1505 = arith.addf %1501, %1504 : vector<8x49xf32>
    %1506 = vector.broadcast %215 : vector<8x1xf32> to vector<8x49xf32>
    %1507 = vector.broadcast %123 : vector<1x49xf32> to vector<8x49xf32>
    %1508 = arith.mulf %1506, %1507 : vector<8x49xf32>
    %1509 = arith.addf %1505, %1508 : vector<8x49xf32>
    %1510 = vector.broadcast %217 : vector<8x1xf32> to vector<8x49xf32>
    %1511 = vector.broadcast %125 : vector<1x49xf32> to vector<8x49xf32>
    %1512 = arith.mulf %1510, %1511 : vector<8x49xf32>
    %1513 = arith.addf %1509, %1512 : vector<8x49xf32>
    %cst_571 = arith.constant 0.000000e+00 : f32
    %1514 = vector.broadcast %cst_571 : f32 to vector<8x49xf32>
    %1515 = vector.broadcast %201 : vector<8x1xf32> to vector<8x49xf32>
    %1516 = vector.broadcast %83 : vector<1x49xf32> to vector<8x49xf32>
    %1517 = arith.mulf %1515, %1516 : vector<8x49xf32>
    %1518 = arith.addf %1514, %1517 : vector<8x49xf32>
    %1519 = vector.broadcast %203 : vector<8x1xf32> to vector<8x49xf32>
    %1520 = vector.broadcast %85 : vector<1x49xf32> to vector<8x49xf32>
    %1521 = arith.mulf %1519, %1520 : vector<8x49xf32>
    %1522 = arith.addf %1518, %1521 : vector<8x49xf32>
    %1523 = vector.broadcast %205 : vector<8x1xf32> to vector<8x49xf32>
    %1524 = vector.broadcast %87 : vector<1x49xf32> to vector<8x49xf32>
    %1525 = arith.mulf %1523, %1524 : vector<8x49xf32>
    %1526 = arith.addf %1522, %1525 : vector<8x49xf32>
    %1527 = vector.broadcast %207 : vector<8x1xf32> to vector<8x49xf32>
    %1528 = vector.broadcast %103 : vector<1x49xf32> to vector<8x49xf32>
    %1529 = arith.mulf %1527, %1528 : vector<8x49xf32>
    %1530 = arith.addf %1526, %1529 : vector<8x49xf32>
    %1531 = vector.broadcast %209 : vector<8x1xf32> to vector<8x49xf32>
    %1532 = vector.broadcast %105 : vector<1x49xf32> to vector<8x49xf32>
    %1533 = arith.mulf %1531, %1532 : vector<8x49xf32>
    %1534 = arith.addf %1530, %1533 : vector<8x49xf32>
    %1535 = vector.broadcast %211 : vector<8x1xf32> to vector<8x49xf32>
    %1536 = vector.broadcast %107 : vector<1x49xf32> to vector<8x49xf32>
    %1537 = arith.mulf %1535, %1536 : vector<8x49xf32>
    %1538 = arith.addf %1534, %1537 : vector<8x49xf32>
    %1539 = vector.broadcast %213 : vector<8x1xf32> to vector<8x49xf32>
    %1540 = vector.broadcast %123 : vector<1x49xf32> to vector<8x49xf32>
    %1541 = arith.mulf %1539, %1540 : vector<8x49xf32>
    %1542 = arith.addf %1538, %1541 : vector<8x49xf32>
    %1543 = vector.broadcast %215 : vector<8x1xf32> to vector<8x49xf32>
    %1544 = vector.broadcast %125 : vector<1x49xf32> to vector<8x49xf32>
    %1545 = arith.mulf %1543, %1544 : vector<8x49xf32>
    %1546 = arith.addf %1542, %1545 : vector<8x49xf32>
    %1547 = vector.broadcast %217 : vector<8x1xf32> to vector<8x49xf32>
    %1548 = vector.broadcast %127 : vector<1x49xf32> to vector<8x49xf32>
    %1549 = arith.mulf %1547, %1548 : vector<8x49xf32>
    %1550 = arith.addf %1546, %1549 : vector<8x49xf32>
    %1551 = arith.maximumf %1513, %1550 : vector<8x49xf32>
    %cst_572 = arith.constant 0.000000e+00 : f32
    %1552 = vector.broadcast %cst_572 : f32 to vector<8x49xf32>
    %1553 = vector.broadcast %201 : vector<8x1xf32> to vector<8x49xf32>
    %1554 = vector.broadcast %101 : vector<1x49xf32> to vector<8x49xf32>
    %1555 = arith.mulf %1553, %1554 : vector<8x49xf32>
    %1556 = arith.addf %1552, %1555 : vector<8x49xf32>
    %1557 = vector.broadcast %203 : vector<8x1xf32> to vector<8x49xf32>
    %1558 = vector.broadcast %103 : vector<1x49xf32> to vector<8x49xf32>
    %1559 = arith.mulf %1557, %1558 : vector<8x49xf32>
    %1560 = arith.addf %1556, %1559 : vector<8x49xf32>
    %1561 = vector.broadcast %205 : vector<8x1xf32> to vector<8x49xf32>
    %1562 = vector.broadcast %105 : vector<1x49xf32> to vector<8x49xf32>
    %1563 = arith.mulf %1561, %1562 : vector<8x49xf32>
    %1564 = arith.addf %1560, %1563 : vector<8x49xf32>
    %1565 = vector.broadcast %207 : vector<8x1xf32> to vector<8x49xf32>
    %1566 = vector.broadcast %121 : vector<1x49xf32> to vector<8x49xf32>
    %1567 = arith.mulf %1565, %1566 : vector<8x49xf32>
    %1568 = arith.addf %1564, %1567 : vector<8x49xf32>
    %1569 = vector.broadcast %209 : vector<8x1xf32> to vector<8x49xf32>
    %1570 = vector.broadcast %123 : vector<1x49xf32> to vector<8x49xf32>
    %1571 = arith.mulf %1569, %1570 : vector<8x49xf32>
    %1572 = arith.addf %1568, %1571 : vector<8x49xf32>
    %1573 = vector.broadcast %211 : vector<8x1xf32> to vector<8x49xf32>
    %1574 = vector.broadcast %125 : vector<1x49xf32> to vector<8x49xf32>
    %1575 = arith.mulf %1573, %1574 : vector<8x49xf32>
    %1576 = arith.addf %1572, %1575 : vector<8x49xf32>
    %1577 = vector.broadcast %213 : vector<8x1xf32> to vector<8x49xf32>
    %1578 = vector.broadcast %141 : vector<1x49xf32> to vector<8x49xf32>
    %1579 = arith.mulf %1577, %1578 : vector<8x49xf32>
    %1580 = arith.addf %1576, %1579 : vector<8x49xf32>
    %1581 = vector.broadcast %215 : vector<8x1xf32> to vector<8x49xf32>
    %1582 = vector.broadcast %143 : vector<1x49xf32> to vector<8x49xf32>
    %1583 = arith.mulf %1581, %1582 : vector<8x49xf32>
    %1584 = arith.addf %1580, %1583 : vector<8x49xf32>
    %1585 = vector.broadcast %217 : vector<8x1xf32> to vector<8x49xf32>
    %1586 = vector.broadcast %145 : vector<1x49xf32> to vector<8x49xf32>
    %1587 = arith.mulf %1585, %1586 : vector<8x49xf32>
    %1588 = arith.addf %1584, %1587 : vector<8x49xf32>
    %1589 = arith.maximumf %1551, %1588 : vector<8x49xf32>
    %cst_573 = arith.constant 0.000000e+00 : f32
    %1590 = vector.broadcast %cst_573 : f32 to vector<8x49xf32>
    %1591 = vector.broadcast %201 : vector<8x1xf32> to vector<8x49xf32>
    %1592 = vector.broadcast %103 : vector<1x49xf32> to vector<8x49xf32>
    %1593 = arith.mulf %1591, %1592 : vector<8x49xf32>
    %1594 = arith.addf %1590, %1593 : vector<8x49xf32>
    %1595 = vector.broadcast %203 : vector<8x1xf32> to vector<8x49xf32>
    %1596 = vector.broadcast %105 : vector<1x49xf32> to vector<8x49xf32>
    %1597 = arith.mulf %1595, %1596 : vector<8x49xf32>
    %1598 = arith.addf %1594, %1597 : vector<8x49xf32>
    %1599 = vector.broadcast %205 : vector<8x1xf32> to vector<8x49xf32>
    %1600 = vector.broadcast %107 : vector<1x49xf32> to vector<8x49xf32>
    %1601 = arith.mulf %1599, %1600 : vector<8x49xf32>
    %1602 = arith.addf %1598, %1601 : vector<8x49xf32>
    %1603 = vector.broadcast %207 : vector<8x1xf32> to vector<8x49xf32>
    %1604 = vector.broadcast %123 : vector<1x49xf32> to vector<8x49xf32>
    %1605 = arith.mulf %1603, %1604 : vector<8x49xf32>
    %1606 = arith.addf %1602, %1605 : vector<8x49xf32>
    %1607 = vector.broadcast %209 : vector<8x1xf32> to vector<8x49xf32>
    %1608 = vector.broadcast %125 : vector<1x49xf32> to vector<8x49xf32>
    %1609 = arith.mulf %1607, %1608 : vector<8x49xf32>
    %1610 = arith.addf %1606, %1609 : vector<8x49xf32>
    %1611 = vector.broadcast %211 : vector<8x1xf32> to vector<8x49xf32>
    %1612 = vector.broadcast %127 : vector<1x49xf32> to vector<8x49xf32>
    %1613 = arith.mulf %1611, %1612 : vector<8x49xf32>
    %1614 = arith.addf %1610, %1613 : vector<8x49xf32>
    %1615 = vector.broadcast %213 : vector<8x1xf32> to vector<8x49xf32>
    %1616 = vector.broadcast %143 : vector<1x49xf32> to vector<8x49xf32>
    %1617 = arith.mulf %1615, %1616 : vector<8x49xf32>
    %1618 = arith.addf %1614, %1617 : vector<8x49xf32>
    %1619 = vector.broadcast %215 : vector<8x1xf32> to vector<8x49xf32>
    %1620 = vector.broadcast %145 : vector<1x49xf32> to vector<8x49xf32>
    %1621 = arith.mulf %1619, %1620 : vector<8x49xf32>
    %1622 = arith.addf %1618, %1621 : vector<8x49xf32>
    %1623 = vector.broadcast %217 : vector<8x1xf32> to vector<8x49xf32>
    %1624 = vector.broadcast %147 : vector<1x49xf32> to vector<8x49xf32>
    %1625 = arith.mulf %1623, %1624 : vector<8x49xf32>
    %1626 = arith.addf %1622, %1625 : vector<8x49xf32>
    %1627 = arith.maximumf %1589, %1626 : vector<8x49xf32>
    %1628 = vector.broadcast %218 : vector<8x1xf32> to vector<8x49xf32>
    %1629 = arith.addf %1627, %1628 : vector<8x49xf32>
    %cst_574 = arith.constant 0.000000e+00 : f32
    %1630 = vector.broadcast %cst_574 : f32 to vector<8x49xf32>
    %1631 = arith.maximumf %1629, %1630 : vector<8x49xf32>
    %c8_575 = arith.constant 8 : index
    %c0_576 = arith.constant 0 : index
    %1632 = vector.load %arg2[%c8_575, %c0_576] : memref<16x49xf32, #tpu.memory_space<vmem>>, vector<1x49xf32>
    %1633 = vector.broadcast %1632 : vector<1x49xf32> to vector<8x49xf32>
    %1634 = arith.mulf %1631, %1633 : vector<8x49xf32>
    %cst_577 = arith.constant 0.000000e+00 : f32
    %1635 = vector.broadcast %cst_577 : f32 to vector<8x49xf32>
    %1636 = vector.broadcast %201 : vector<8x1xf32> to vector<8x49xf32>
    %1637 = vector.broadcast %85 : vector<1x49xf32> to vector<8x49xf32>
    %1638 = arith.mulf %1636, %1637 : vector<8x49xf32>
    %1639 = arith.addf %1635, %1638 : vector<8x49xf32>
    %1640 = vector.broadcast %203 : vector<8x1xf32> to vector<8x49xf32>
    %1641 = vector.broadcast %87 : vector<1x49xf32> to vector<8x49xf32>
    %1642 = arith.mulf %1640, %1641 : vector<8x49xf32>
    %1643 = arith.addf %1639, %1642 : vector<8x49xf32>
    %1644 = vector.broadcast %205 : vector<8x1xf32> to vector<8x49xf32>
    %1645 = vector.broadcast %89 : vector<1x49xf32> to vector<8x49xf32>
    %1646 = arith.mulf %1644, %1645 : vector<8x49xf32>
    %1647 = arith.addf %1643, %1646 : vector<8x49xf32>
    %1648 = vector.broadcast %207 : vector<8x1xf32> to vector<8x49xf32>
    %1649 = vector.broadcast %105 : vector<1x49xf32> to vector<8x49xf32>
    %1650 = arith.mulf %1648, %1649 : vector<8x49xf32>
    %1651 = arith.addf %1647, %1650 : vector<8x49xf32>
    %1652 = vector.broadcast %209 : vector<8x1xf32> to vector<8x49xf32>
    %1653 = vector.broadcast %107 : vector<1x49xf32> to vector<8x49xf32>
    %1654 = arith.mulf %1652, %1653 : vector<8x49xf32>
    %1655 = arith.addf %1651, %1654 : vector<8x49xf32>
    %1656 = vector.broadcast %211 : vector<8x1xf32> to vector<8x49xf32>
    %1657 = vector.broadcast %109 : vector<1x49xf32> to vector<8x49xf32>
    %1658 = arith.mulf %1656, %1657 : vector<8x49xf32>
    %1659 = arith.addf %1655, %1658 : vector<8x49xf32>
    %1660 = vector.broadcast %213 : vector<8x1xf32> to vector<8x49xf32>
    %1661 = vector.broadcast %125 : vector<1x49xf32> to vector<8x49xf32>
    %1662 = arith.mulf %1660, %1661 : vector<8x49xf32>
    %1663 = arith.addf %1659, %1662 : vector<8x49xf32>
    %1664 = vector.broadcast %215 : vector<8x1xf32> to vector<8x49xf32>
    %1665 = vector.broadcast %127 : vector<1x49xf32> to vector<8x49xf32>
    %1666 = arith.mulf %1664, %1665 : vector<8x49xf32>
    %1667 = arith.addf %1663, %1666 : vector<8x49xf32>
    %1668 = vector.broadcast %217 : vector<8x1xf32> to vector<8x49xf32>
    %1669 = vector.broadcast %129 : vector<1x49xf32> to vector<8x49xf32>
    %1670 = arith.mulf %1668, %1669 : vector<8x49xf32>
    %1671 = arith.addf %1667, %1670 : vector<8x49xf32>
    %cst_578 = arith.constant 0.000000e+00 : f32
    %1672 = vector.broadcast %cst_578 : f32 to vector<8x49xf32>
    %1673 = vector.broadcast %201 : vector<8x1xf32> to vector<8x49xf32>
    %1674 = vector.broadcast %87 : vector<1x49xf32> to vector<8x49xf32>
    %1675 = arith.mulf %1673, %1674 : vector<8x49xf32>
    %1676 = arith.addf %1672, %1675 : vector<8x49xf32>
    %1677 = vector.broadcast %203 : vector<8x1xf32> to vector<8x49xf32>
    %1678 = vector.broadcast %89 : vector<1x49xf32> to vector<8x49xf32>
    %1679 = arith.mulf %1677, %1678 : vector<8x49xf32>
    %1680 = arith.addf %1676, %1679 : vector<8x49xf32>
    %1681 = vector.broadcast %205 : vector<8x1xf32> to vector<8x49xf32>
    %1682 = vector.broadcast %91 : vector<1x49xf32> to vector<8x49xf32>
    %1683 = arith.mulf %1681, %1682 : vector<8x49xf32>
    %1684 = arith.addf %1680, %1683 : vector<8x49xf32>
    %1685 = vector.broadcast %207 : vector<8x1xf32> to vector<8x49xf32>
    %1686 = vector.broadcast %107 : vector<1x49xf32> to vector<8x49xf32>
    %1687 = arith.mulf %1685, %1686 : vector<8x49xf32>
    %1688 = arith.addf %1684, %1687 : vector<8x49xf32>
    %1689 = vector.broadcast %209 : vector<8x1xf32> to vector<8x49xf32>
    %1690 = vector.broadcast %109 : vector<1x49xf32> to vector<8x49xf32>
    %1691 = arith.mulf %1689, %1690 : vector<8x49xf32>
    %1692 = arith.addf %1688, %1691 : vector<8x49xf32>
    %1693 = vector.broadcast %211 : vector<8x1xf32> to vector<8x49xf32>
    %1694 = vector.broadcast %111 : vector<1x49xf32> to vector<8x49xf32>
    %1695 = arith.mulf %1693, %1694 : vector<8x49xf32>
    %1696 = arith.addf %1692, %1695 : vector<8x49xf32>
    %1697 = vector.broadcast %213 : vector<8x1xf32> to vector<8x49xf32>
    %1698 = vector.broadcast %127 : vector<1x49xf32> to vector<8x49xf32>
    %1699 = arith.mulf %1697, %1698 : vector<8x49xf32>
    %1700 = arith.addf %1696, %1699 : vector<8x49xf32>
    %1701 = vector.broadcast %215 : vector<8x1xf32> to vector<8x49xf32>
    %1702 = vector.broadcast %129 : vector<1x49xf32> to vector<8x49xf32>
    %1703 = arith.mulf %1701, %1702 : vector<8x49xf32>
    %1704 = arith.addf %1700, %1703 : vector<8x49xf32>
    %1705 = vector.broadcast %217 : vector<8x1xf32> to vector<8x49xf32>
    %1706 = vector.broadcast %131 : vector<1x49xf32> to vector<8x49xf32>
    %1707 = arith.mulf %1705, %1706 : vector<8x49xf32>
    %1708 = arith.addf %1704, %1707 : vector<8x49xf32>
    %1709 = arith.maximumf %1671, %1708 : vector<8x49xf32>
    %cst_579 = arith.constant 0.000000e+00 : f32
    %1710 = vector.broadcast %cst_579 : f32 to vector<8x49xf32>
    %1711 = vector.broadcast %201 : vector<8x1xf32> to vector<8x49xf32>
    %1712 = vector.broadcast %105 : vector<1x49xf32> to vector<8x49xf32>
    %1713 = arith.mulf %1711, %1712 : vector<8x49xf32>
    %1714 = arith.addf %1710, %1713 : vector<8x49xf32>
    %1715 = vector.broadcast %203 : vector<8x1xf32> to vector<8x49xf32>
    %1716 = vector.broadcast %107 : vector<1x49xf32> to vector<8x49xf32>
    %1717 = arith.mulf %1715, %1716 : vector<8x49xf32>
    %1718 = arith.addf %1714, %1717 : vector<8x49xf32>
    %1719 = vector.broadcast %205 : vector<8x1xf32> to vector<8x49xf32>
    %1720 = vector.broadcast %109 : vector<1x49xf32> to vector<8x49xf32>
    %1721 = arith.mulf %1719, %1720 : vector<8x49xf32>
    %1722 = arith.addf %1718, %1721 : vector<8x49xf32>
    %1723 = vector.broadcast %207 : vector<8x1xf32> to vector<8x49xf32>
    %1724 = vector.broadcast %125 : vector<1x49xf32> to vector<8x49xf32>
    %1725 = arith.mulf %1723, %1724 : vector<8x49xf32>
    %1726 = arith.addf %1722, %1725 : vector<8x49xf32>
    %1727 = vector.broadcast %209 : vector<8x1xf32> to vector<8x49xf32>
    %1728 = vector.broadcast %127 : vector<1x49xf32> to vector<8x49xf32>
    %1729 = arith.mulf %1727, %1728 : vector<8x49xf32>
    %1730 = arith.addf %1726, %1729 : vector<8x49xf32>
    %1731 = vector.broadcast %211 : vector<8x1xf32> to vector<8x49xf32>
    %1732 = vector.broadcast %129 : vector<1x49xf32> to vector<8x49xf32>
    %1733 = arith.mulf %1731, %1732 : vector<8x49xf32>
    %1734 = arith.addf %1730, %1733 : vector<8x49xf32>
    %1735 = vector.broadcast %213 : vector<8x1xf32> to vector<8x49xf32>
    %1736 = vector.broadcast %145 : vector<1x49xf32> to vector<8x49xf32>
    %1737 = arith.mulf %1735, %1736 : vector<8x49xf32>
    %1738 = arith.addf %1734, %1737 : vector<8x49xf32>
    %1739 = vector.broadcast %215 : vector<8x1xf32> to vector<8x49xf32>
    %1740 = vector.broadcast %147 : vector<1x49xf32> to vector<8x49xf32>
    %1741 = arith.mulf %1739, %1740 : vector<8x49xf32>
    %1742 = arith.addf %1738, %1741 : vector<8x49xf32>
    %1743 = vector.broadcast %217 : vector<8x1xf32> to vector<8x49xf32>
    %1744 = vector.broadcast %149 : vector<1x49xf32> to vector<8x49xf32>
    %1745 = arith.mulf %1743, %1744 : vector<8x49xf32>
    %1746 = arith.addf %1742, %1745 : vector<8x49xf32>
    %1747 = arith.maximumf %1709, %1746 : vector<8x49xf32>
    %cst_580 = arith.constant 0.000000e+00 : f32
    %1748 = vector.broadcast %cst_580 : f32 to vector<8x49xf32>
    %1749 = vector.broadcast %201 : vector<8x1xf32> to vector<8x49xf32>
    %1750 = vector.broadcast %107 : vector<1x49xf32> to vector<8x49xf32>
    %1751 = arith.mulf %1749, %1750 : vector<8x49xf32>
    %1752 = arith.addf %1748, %1751 : vector<8x49xf32>
    %1753 = vector.broadcast %203 : vector<8x1xf32> to vector<8x49xf32>
    %1754 = vector.broadcast %109 : vector<1x49xf32> to vector<8x49xf32>
    %1755 = arith.mulf %1753, %1754 : vector<8x49xf32>
    %1756 = arith.addf %1752, %1755 : vector<8x49xf32>
    %1757 = vector.broadcast %205 : vector<8x1xf32> to vector<8x49xf32>
    %1758 = vector.broadcast %111 : vector<1x49xf32> to vector<8x49xf32>
    %1759 = arith.mulf %1757, %1758 : vector<8x49xf32>
    %1760 = arith.addf %1756, %1759 : vector<8x49xf32>
    %1761 = vector.broadcast %207 : vector<8x1xf32> to vector<8x49xf32>
    %1762 = vector.broadcast %127 : vector<1x49xf32> to vector<8x49xf32>
    %1763 = arith.mulf %1761, %1762 : vector<8x49xf32>
    %1764 = arith.addf %1760, %1763 : vector<8x49xf32>
    %1765 = vector.broadcast %209 : vector<8x1xf32> to vector<8x49xf32>
    %1766 = vector.broadcast %129 : vector<1x49xf32> to vector<8x49xf32>
    %1767 = arith.mulf %1765, %1766 : vector<8x49xf32>
    %1768 = arith.addf %1764, %1767 : vector<8x49xf32>
    %1769 = vector.broadcast %211 : vector<8x1xf32> to vector<8x49xf32>
    %1770 = vector.broadcast %131 : vector<1x49xf32> to vector<8x49xf32>
    %1771 = arith.mulf %1769, %1770 : vector<8x49xf32>
    %1772 = arith.addf %1768, %1771 : vector<8x49xf32>
    %1773 = vector.broadcast %213 : vector<8x1xf32> to vector<8x49xf32>
    %1774 = vector.broadcast %147 : vector<1x49xf32> to vector<8x49xf32>
    %1775 = arith.mulf %1773, %1774 : vector<8x49xf32>
    %1776 = arith.addf %1772, %1775 : vector<8x49xf32>
    %1777 = vector.broadcast %215 : vector<8x1xf32> to vector<8x49xf32>
    %1778 = vector.broadcast %149 : vector<1x49xf32> to vector<8x49xf32>
    %1779 = arith.mulf %1777, %1778 : vector<8x49xf32>
    %1780 = arith.addf %1776, %1779 : vector<8x49xf32>
    %1781 = vector.broadcast %217 : vector<8x1xf32> to vector<8x49xf32>
    %1782 = vector.broadcast %151 : vector<1x49xf32> to vector<8x49xf32>
    %1783 = arith.mulf %1781, %1782 : vector<8x49xf32>
    %1784 = arith.addf %1780, %1783 : vector<8x49xf32>
    %1785 = arith.maximumf %1747, %1784 : vector<8x49xf32>
    %1786 = vector.broadcast %218 : vector<8x1xf32> to vector<8x49xf32>
    %1787 = arith.addf %1785, %1786 : vector<8x49xf32>
    %cst_581 = arith.constant 0.000000e+00 : f32
    %1788 = vector.broadcast %cst_581 : f32 to vector<8x49xf32>
    %1789 = arith.maximumf %1787, %1788 : vector<8x49xf32>
    %cst_582 = arith.constant 0.000000e+00 : f32
    %1790 = vector.broadcast %cst_582 : f32 to vector<8x49xf32>
    %1791 = vector.broadcast %201 : vector<8x1xf32> to vector<8x49xf32>
    %1792 = vector.broadcast %89 : vector<1x49xf32> to vector<8x49xf32>
    %1793 = arith.mulf %1791, %1792 : vector<8x49xf32>
    %1794 = arith.addf %1790, %1793 : vector<8x49xf32>
    %1795 = vector.broadcast %203 : vector<8x1xf32> to vector<8x49xf32>
    %1796 = vector.broadcast %91 : vector<1x49xf32> to vector<8x49xf32>
    %1797 = arith.mulf %1795, %1796 : vector<8x49xf32>
    %1798 = arith.addf %1794, %1797 : vector<8x49xf32>
    %1799 = vector.broadcast %205 : vector<8x1xf32> to vector<8x49xf32>
    %1800 = vector.broadcast %93 : vector<1x49xf32> to vector<8x49xf32>
    %1801 = arith.mulf %1799, %1800 : vector<8x49xf32>
    %1802 = arith.addf %1798, %1801 : vector<8x49xf32>
    %1803 = vector.broadcast %207 : vector<8x1xf32> to vector<8x49xf32>
    %1804 = vector.broadcast %109 : vector<1x49xf32> to vector<8x49xf32>
    %1805 = arith.mulf %1803, %1804 : vector<8x49xf32>
    %1806 = arith.addf %1802, %1805 : vector<8x49xf32>
    %1807 = vector.broadcast %209 : vector<8x1xf32> to vector<8x49xf32>
    %1808 = vector.broadcast %111 : vector<1x49xf32> to vector<8x49xf32>
    %1809 = arith.mulf %1807, %1808 : vector<8x49xf32>
    %1810 = arith.addf %1806, %1809 : vector<8x49xf32>
    %1811 = vector.broadcast %211 : vector<8x1xf32> to vector<8x49xf32>
    %1812 = vector.broadcast %113 : vector<1x49xf32> to vector<8x49xf32>
    %1813 = arith.mulf %1811, %1812 : vector<8x49xf32>
    %1814 = arith.addf %1810, %1813 : vector<8x49xf32>
    %1815 = vector.broadcast %213 : vector<8x1xf32> to vector<8x49xf32>
    %1816 = vector.broadcast %129 : vector<1x49xf32> to vector<8x49xf32>
    %1817 = arith.mulf %1815, %1816 : vector<8x49xf32>
    %1818 = arith.addf %1814, %1817 : vector<8x49xf32>
    %1819 = vector.broadcast %215 : vector<8x1xf32> to vector<8x49xf32>
    %1820 = vector.broadcast %131 : vector<1x49xf32> to vector<8x49xf32>
    %1821 = arith.mulf %1819, %1820 : vector<8x49xf32>
    %1822 = arith.addf %1818, %1821 : vector<8x49xf32>
    %1823 = vector.broadcast %217 : vector<8x1xf32> to vector<8x49xf32>
    %1824 = vector.broadcast %133 : vector<1x49xf32> to vector<8x49xf32>
    %1825 = arith.mulf %1823, %1824 : vector<8x49xf32>
    %1826 = arith.addf %1822, %1825 : vector<8x49xf32>
    %cst_583 = arith.constant 0.000000e+00 : f32
    %1827 = vector.broadcast %cst_583 : f32 to vector<8x49xf32>
    %1828 = vector.broadcast %201 : vector<8x1xf32> to vector<8x49xf32>
    %1829 = vector.broadcast %91 : vector<1x49xf32> to vector<8x49xf32>
    %1830 = arith.mulf %1828, %1829 : vector<8x49xf32>
    %1831 = arith.addf %1827, %1830 : vector<8x49xf32>
    %1832 = vector.broadcast %203 : vector<8x1xf32> to vector<8x49xf32>
    %1833 = vector.broadcast %93 : vector<1x49xf32> to vector<8x49xf32>
    %1834 = arith.mulf %1832, %1833 : vector<8x49xf32>
    %1835 = arith.addf %1831, %1834 : vector<8x49xf32>
    %1836 = vector.broadcast %205 : vector<8x1xf32> to vector<8x49xf32>
    %1837 = vector.broadcast %95 : vector<1x49xf32> to vector<8x49xf32>
    %1838 = arith.mulf %1836, %1837 : vector<8x49xf32>
    %1839 = arith.addf %1835, %1838 : vector<8x49xf32>
    %1840 = vector.broadcast %207 : vector<8x1xf32> to vector<8x49xf32>
    %1841 = vector.broadcast %111 : vector<1x49xf32> to vector<8x49xf32>
    %1842 = arith.mulf %1840, %1841 : vector<8x49xf32>
    %1843 = arith.addf %1839, %1842 : vector<8x49xf32>
    %1844 = vector.broadcast %209 : vector<8x1xf32> to vector<8x49xf32>
    %1845 = vector.broadcast %113 : vector<1x49xf32> to vector<8x49xf32>
    %1846 = arith.mulf %1844, %1845 : vector<8x49xf32>
    %1847 = arith.addf %1843, %1846 : vector<8x49xf32>
    %1848 = vector.broadcast %211 : vector<8x1xf32> to vector<8x49xf32>
    %1849 = vector.broadcast %115 : vector<1x49xf32> to vector<8x49xf32>
    %1850 = arith.mulf %1848, %1849 : vector<8x49xf32>
    %1851 = arith.addf %1847, %1850 : vector<8x49xf32>
    %1852 = vector.broadcast %213 : vector<8x1xf32> to vector<8x49xf32>
    %1853 = vector.broadcast %131 : vector<1x49xf32> to vector<8x49xf32>
    %1854 = arith.mulf %1852, %1853 : vector<8x49xf32>
    %1855 = arith.addf %1851, %1854 : vector<8x49xf32>
    %1856 = vector.broadcast %215 : vector<8x1xf32> to vector<8x49xf32>
    %1857 = vector.broadcast %133 : vector<1x49xf32> to vector<8x49xf32>
    %1858 = arith.mulf %1856, %1857 : vector<8x49xf32>
    %1859 = arith.addf %1855, %1858 : vector<8x49xf32>
    %1860 = vector.broadcast %217 : vector<8x1xf32> to vector<8x49xf32>
    %1861 = vector.broadcast %135 : vector<1x49xf32> to vector<8x49xf32>
    %1862 = arith.mulf %1860, %1861 : vector<8x49xf32>
    %1863 = arith.addf %1859, %1862 : vector<8x49xf32>
    %1864 = arith.maximumf %1826, %1863 : vector<8x49xf32>
    %cst_584 = arith.constant 0.000000e+00 : f32
    %1865 = vector.broadcast %cst_584 : f32 to vector<8x49xf32>
    %1866 = vector.broadcast %201 : vector<8x1xf32> to vector<8x49xf32>
    %1867 = vector.broadcast %109 : vector<1x49xf32> to vector<8x49xf32>
    %1868 = arith.mulf %1866, %1867 : vector<8x49xf32>
    %1869 = arith.addf %1865, %1868 : vector<8x49xf32>
    %1870 = vector.broadcast %203 : vector<8x1xf32> to vector<8x49xf32>
    %1871 = vector.broadcast %111 : vector<1x49xf32> to vector<8x49xf32>
    %1872 = arith.mulf %1870, %1871 : vector<8x49xf32>
    %1873 = arith.addf %1869, %1872 : vector<8x49xf32>
    %1874 = vector.broadcast %205 : vector<8x1xf32> to vector<8x49xf32>
    %1875 = vector.broadcast %113 : vector<1x49xf32> to vector<8x49xf32>
    %1876 = arith.mulf %1874, %1875 : vector<8x49xf32>
    %1877 = arith.addf %1873, %1876 : vector<8x49xf32>
    %1878 = vector.broadcast %207 : vector<8x1xf32> to vector<8x49xf32>
    %1879 = vector.broadcast %129 : vector<1x49xf32> to vector<8x49xf32>
    %1880 = arith.mulf %1878, %1879 : vector<8x49xf32>
    %1881 = arith.addf %1877, %1880 : vector<8x49xf32>
    %1882 = vector.broadcast %209 : vector<8x1xf32> to vector<8x49xf32>
    %1883 = vector.broadcast %131 : vector<1x49xf32> to vector<8x49xf32>
    %1884 = arith.mulf %1882, %1883 : vector<8x49xf32>
    %1885 = arith.addf %1881, %1884 : vector<8x49xf32>
    %1886 = vector.broadcast %211 : vector<8x1xf32> to vector<8x49xf32>
    %1887 = vector.broadcast %133 : vector<1x49xf32> to vector<8x49xf32>
    %1888 = arith.mulf %1886, %1887 : vector<8x49xf32>
    %1889 = arith.addf %1885, %1888 : vector<8x49xf32>
    %1890 = vector.broadcast %213 : vector<8x1xf32> to vector<8x49xf32>
    %1891 = vector.broadcast %149 : vector<1x49xf32> to vector<8x49xf32>
    %1892 = arith.mulf %1890, %1891 : vector<8x49xf32>
    %1893 = arith.addf %1889, %1892 : vector<8x49xf32>
    %1894 = vector.broadcast %215 : vector<8x1xf32> to vector<8x49xf32>
    %1895 = vector.broadcast %151 : vector<1x49xf32> to vector<8x49xf32>
    %1896 = arith.mulf %1894, %1895 : vector<8x49xf32>
    %1897 = arith.addf %1893, %1896 : vector<8x49xf32>
    %1898 = vector.broadcast %217 : vector<8x1xf32> to vector<8x49xf32>
    %1899 = vector.broadcast %153 : vector<1x49xf32> to vector<8x49xf32>
    %1900 = arith.mulf %1898, %1899 : vector<8x49xf32>
    %1901 = arith.addf %1897, %1900 : vector<8x49xf32>
    %1902 = arith.maximumf %1864, %1901 : vector<8x49xf32>
    %cst_585 = arith.constant 0.000000e+00 : f32
    %1903 = vector.broadcast %cst_585 : f32 to vector<8x49xf32>
    %1904 = vector.broadcast %201 : vector<8x1xf32> to vector<8x49xf32>
    %1905 = vector.broadcast %111 : vector<1x49xf32> to vector<8x49xf32>
    %1906 = arith.mulf %1904, %1905 : vector<8x49xf32>
    %1907 = arith.addf %1903, %1906 : vector<8x49xf32>
    %1908 = vector.broadcast %203 : vector<8x1xf32> to vector<8x49xf32>
    %1909 = vector.broadcast %113 : vector<1x49xf32> to vector<8x49xf32>
    %1910 = arith.mulf %1908, %1909 : vector<8x49xf32>
    %1911 = arith.addf %1907, %1910 : vector<8x49xf32>
    %1912 = vector.broadcast %205 : vector<8x1xf32> to vector<8x49xf32>
    %1913 = vector.broadcast %115 : vector<1x49xf32> to vector<8x49xf32>
    %1914 = arith.mulf %1912, %1913 : vector<8x49xf32>
    %1915 = arith.addf %1911, %1914 : vector<8x49xf32>
    %1916 = vector.broadcast %207 : vector<8x1xf32> to vector<8x49xf32>
    %1917 = vector.broadcast %131 : vector<1x49xf32> to vector<8x49xf32>
    %1918 = arith.mulf %1916, %1917 : vector<8x49xf32>
    %1919 = arith.addf %1915, %1918 : vector<8x49xf32>
    %1920 = vector.broadcast %209 : vector<8x1xf32> to vector<8x49xf32>
    %1921 = vector.broadcast %133 : vector<1x49xf32> to vector<8x49xf32>
    %1922 = arith.mulf %1920, %1921 : vector<8x49xf32>
    %1923 = arith.addf %1919, %1922 : vector<8x49xf32>
    %1924 = vector.broadcast %211 : vector<8x1xf32> to vector<8x49xf32>
    %1925 = vector.broadcast %135 : vector<1x49xf32> to vector<8x49xf32>
    %1926 = arith.mulf %1924, %1925 : vector<8x49xf32>
    %1927 = arith.addf %1923, %1926 : vector<8x49xf32>
    %1928 = vector.broadcast %213 : vector<8x1xf32> to vector<8x49xf32>
    %1929 = vector.broadcast %151 : vector<1x49xf32> to vector<8x49xf32>
    %1930 = arith.mulf %1928, %1929 : vector<8x49xf32>
    %1931 = arith.addf %1927, %1930 : vector<8x49xf32>
    %1932 = vector.broadcast %215 : vector<8x1xf32> to vector<8x49xf32>
    %1933 = vector.broadcast %153 : vector<1x49xf32> to vector<8x49xf32>
    %1934 = arith.mulf %1932, %1933 : vector<8x49xf32>
    %1935 = arith.addf %1931, %1934 : vector<8x49xf32>
    %1936 = vector.broadcast %217 : vector<8x1xf32> to vector<8x49xf32>
    %1937 = vector.broadcast %155 : vector<1x49xf32> to vector<8x49xf32>
    %1938 = arith.mulf %1936, %1937 : vector<8x49xf32>
    %1939 = arith.addf %1935, %1938 : vector<8x49xf32>
    %1940 = arith.maximumf %1902, %1939 : vector<8x49xf32>
    %1941 = vector.broadcast %218 : vector<8x1xf32> to vector<8x49xf32>
    %1942 = arith.addf %1940, %1941 : vector<8x49xf32>
    %cst_586 = arith.constant 0.000000e+00 : f32
    %1943 = vector.broadcast %cst_586 : f32 to vector<8x49xf32>
    %1944 = arith.maximumf %1942, %1943 : vector<8x49xf32>
    %cst_587 = arith.constant 0.000000e+00 : f32
    %1945 = vector.broadcast %cst_587 : f32 to vector<8x49xf32>
    %1946 = vector.broadcast %201 : vector<8x1xf32> to vector<8x49xf32>
    %1947 = vector.broadcast %93 : vector<1x49xf32> to vector<8x49xf32>
    %1948 = arith.mulf %1946, %1947 : vector<8x49xf32>
    %1949 = arith.addf %1945, %1948 : vector<8x49xf32>
    %1950 = vector.broadcast %203 : vector<8x1xf32> to vector<8x49xf32>
    %1951 = vector.broadcast %95 : vector<1x49xf32> to vector<8x49xf32>
    %1952 = arith.mulf %1950, %1951 : vector<8x49xf32>
    %1953 = arith.addf %1949, %1952 : vector<8x49xf32>
    %1954 = vector.broadcast %205 : vector<8x1xf32> to vector<8x49xf32>
    %1955 = vector.broadcast %97 : vector<1x49xf32> to vector<8x49xf32>
    %1956 = arith.mulf %1954, %1955 : vector<8x49xf32>
    %1957 = arith.addf %1953, %1956 : vector<8x49xf32>
    %1958 = vector.broadcast %207 : vector<8x1xf32> to vector<8x49xf32>
    %1959 = vector.broadcast %113 : vector<1x49xf32> to vector<8x49xf32>
    %1960 = arith.mulf %1958, %1959 : vector<8x49xf32>
    %1961 = arith.addf %1957, %1960 : vector<8x49xf32>
    %1962 = vector.broadcast %209 : vector<8x1xf32> to vector<8x49xf32>
    %1963 = vector.broadcast %115 : vector<1x49xf32> to vector<8x49xf32>
    %1964 = arith.mulf %1962, %1963 : vector<8x49xf32>
    %1965 = arith.addf %1961, %1964 : vector<8x49xf32>
    %1966 = vector.broadcast %211 : vector<8x1xf32> to vector<8x49xf32>
    %1967 = vector.broadcast %117 : vector<1x49xf32> to vector<8x49xf32>
    %1968 = arith.mulf %1966, %1967 : vector<8x49xf32>
    %1969 = arith.addf %1965, %1968 : vector<8x49xf32>
    %1970 = vector.broadcast %213 : vector<8x1xf32> to vector<8x49xf32>
    %1971 = vector.broadcast %133 : vector<1x49xf32> to vector<8x49xf32>
    %1972 = arith.mulf %1970, %1971 : vector<8x49xf32>
    %1973 = arith.addf %1969, %1972 : vector<8x49xf32>
    %1974 = vector.broadcast %215 : vector<8x1xf32> to vector<8x49xf32>
    %1975 = vector.broadcast %135 : vector<1x49xf32> to vector<8x49xf32>
    %1976 = arith.mulf %1974, %1975 : vector<8x49xf32>
    %1977 = arith.addf %1973, %1976 : vector<8x49xf32>
    %1978 = vector.broadcast %217 : vector<8x1xf32> to vector<8x49xf32>
    %1979 = vector.broadcast %137 : vector<1x49xf32> to vector<8x49xf32>
    %1980 = arith.mulf %1978, %1979 : vector<8x49xf32>
    %1981 = arith.addf %1977, %1980 : vector<8x49xf32>
    %cst_588 = arith.constant 0.000000e+00 : f32
    %1982 = vector.broadcast %cst_588 : f32 to vector<8x49xf32>
    %1983 = vector.broadcast %201 : vector<8x1xf32> to vector<8x49xf32>
    %1984 = vector.broadcast %95 : vector<1x49xf32> to vector<8x49xf32>
    %1985 = arith.mulf %1983, %1984 : vector<8x49xf32>
    %1986 = arith.addf %1982, %1985 : vector<8x49xf32>
    %1987 = vector.broadcast %203 : vector<8x1xf32> to vector<8x49xf32>
    %1988 = vector.broadcast %97 : vector<1x49xf32> to vector<8x49xf32>
    %1989 = arith.mulf %1987, %1988 : vector<8x49xf32>
    %1990 = arith.addf %1986, %1989 : vector<8x49xf32>
    %1991 = vector.broadcast %205 : vector<8x1xf32> to vector<8x49xf32>
    %1992 = vector.broadcast %99 : vector<1x49xf32> to vector<8x49xf32>
    %1993 = arith.mulf %1991, %1992 : vector<8x49xf32>
    %1994 = arith.addf %1990, %1993 : vector<8x49xf32>
    %1995 = vector.broadcast %207 : vector<8x1xf32> to vector<8x49xf32>
    %1996 = vector.broadcast %115 : vector<1x49xf32> to vector<8x49xf32>
    %1997 = arith.mulf %1995, %1996 : vector<8x49xf32>
    %1998 = arith.addf %1994, %1997 : vector<8x49xf32>
    %1999 = vector.broadcast %209 : vector<8x1xf32> to vector<8x49xf32>
    %2000 = vector.broadcast %117 : vector<1x49xf32> to vector<8x49xf32>
    %2001 = arith.mulf %1999, %2000 : vector<8x49xf32>
    %2002 = arith.addf %1998, %2001 : vector<8x49xf32>
    %2003 = vector.broadcast %211 : vector<8x1xf32> to vector<8x49xf32>
    %2004 = vector.broadcast %119 : vector<1x49xf32> to vector<8x49xf32>
    %2005 = arith.mulf %2003, %2004 : vector<8x49xf32>
    %2006 = arith.addf %2002, %2005 : vector<8x49xf32>
    %2007 = vector.broadcast %213 : vector<8x1xf32> to vector<8x49xf32>
    %2008 = vector.broadcast %135 : vector<1x49xf32> to vector<8x49xf32>
    %2009 = arith.mulf %2007, %2008 : vector<8x49xf32>
    %2010 = arith.addf %2006, %2009 : vector<8x49xf32>
    %2011 = vector.broadcast %215 : vector<8x1xf32> to vector<8x49xf32>
    %2012 = vector.broadcast %137 : vector<1x49xf32> to vector<8x49xf32>
    %2013 = arith.mulf %2011, %2012 : vector<8x49xf32>
    %2014 = arith.addf %2010, %2013 : vector<8x49xf32>
    %2015 = vector.broadcast %217 : vector<8x1xf32> to vector<8x49xf32>
    %2016 = vector.broadcast %139 : vector<1x49xf32> to vector<8x49xf32>
    %2017 = arith.mulf %2015, %2016 : vector<8x49xf32>
    %2018 = arith.addf %2014, %2017 : vector<8x49xf32>
    %2019 = arith.maximumf %1981, %2018 : vector<8x49xf32>
    %cst_589 = arith.constant 0.000000e+00 : f32
    %2020 = vector.broadcast %cst_589 : f32 to vector<8x49xf32>
    %2021 = vector.broadcast %201 : vector<8x1xf32> to vector<8x49xf32>
    %2022 = vector.broadcast %113 : vector<1x49xf32> to vector<8x49xf32>
    %2023 = arith.mulf %2021, %2022 : vector<8x49xf32>
    %2024 = arith.addf %2020, %2023 : vector<8x49xf32>
    %2025 = vector.broadcast %203 : vector<8x1xf32> to vector<8x49xf32>
    %2026 = vector.broadcast %115 : vector<1x49xf32> to vector<8x49xf32>
    %2027 = arith.mulf %2025, %2026 : vector<8x49xf32>
    %2028 = arith.addf %2024, %2027 : vector<8x49xf32>
    %2029 = vector.broadcast %205 : vector<8x1xf32> to vector<8x49xf32>
    %2030 = vector.broadcast %117 : vector<1x49xf32> to vector<8x49xf32>
    %2031 = arith.mulf %2029, %2030 : vector<8x49xf32>
    %2032 = arith.addf %2028, %2031 : vector<8x49xf32>
    %2033 = vector.broadcast %207 : vector<8x1xf32> to vector<8x49xf32>
    %2034 = vector.broadcast %133 : vector<1x49xf32> to vector<8x49xf32>
    %2035 = arith.mulf %2033, %2034 : vector<8x49xf32>
    %2036 = arith.addf %2032, %2035 : vector<8x49xf32>
    %2037 = vector.broadcast %209 : vector<8x1xf32> to vector<8x49xf32>
    %2038 = vector.broadcast %135 : vector<1x49xf32> to vector<8x49xf32>
    %2039 = arith.mulf %2037, %2038 : vector<8x49xf32>
    %2040 = arith.addf %2036, %2039 : vector<8x49xf32>
    %2041 = vector.broadcast %211 : vector<8x1xf32> to vector<8x49xf32>
    %2042 = vector.broadcast %137 : vector<1x49xf32> to vector<8x49xf32>
    %2043 = arith.mulf %2041, %2042 : vector<8x49xf32>
    %2044 = arith.addf %2040, %2043 : vector<8x49xf32>
    %2045 = vector.broadcast %213 : vector<8x1xf32> to vector<8x49xf32>
    %2046 = vector.broadcast %153 : vector<1x49xf32> to vector<8x49xf32>
    %2047 = arith.mulf %2045, %2046 : vector<8x49xf32>
    %2048 = arith.addf %2044, %2047 : vector<8x49xf32>
    %2049 = vector.broadcast %215 : vector<8x1xf32> to vector<8x49xf32>
    %2050 = vector.broadcast %155 : vector<1x49xf32> to vector<8x49xf32>
    %2051 = arith.mulf %2049, %2050 : vector<8x49xf32>
    %2052 = arith.addf %2048, %2051 : vector<8x49xf32>
    %2053 = vector.broadcast %217 : vector<8x1xf32> to vector<8x49xf32>
    %2054 = vector.broadcast %157 : vector<1x49xf32> to vector<8x49xf32>
    %2055 = arith.mulf %2053, %2054 : vector<8x49xf32>
    %2056 = arith.addf %2052, %2055 : vector<8x49xf32>
    %2057 = arith.maximumf %2019, %2056 : vector<8x49xf32>
    %cst_590 = arith.constant 0.000000e+00 : f32
    %2058 = vector.broadcast %cst_590 : f32 to vector<8x49xf32>
    %2059 = vector.broadcast %201 : vector<8x1xf32> to vector<8x49xf32>
    %2060 = vector.broadcast %115 : vector<1x49xf32> to vector<8x49xf32>
    %2061 = arith.mulf %2059, %2060 : vector<8x49xf32>
    %2062 = arith.addf %2058, %2061 : vector<8x49xf32>
    %2063 = vector.broadcast %203 : vector<8x1xf32> to vector<8x49xf32>
    %2064 = vector.broadcast %117 : vector<1x49xf32> to vector<8x49xf32>
    %2065 = arith.mulf %2063, %2064 : vector<8x49xf32>
    %2066 = arith.addf %2062, %2065 : vector<8x49xf32>
    %2067 = vector.broadcast %205 : vector<8x1xf32> to vector<8x49xf32>
    %2068 = vector.broadcast %119 : vector<1x49xf32> to vector<8x49xf32>
    %2069 = arith.mulf %2067, %2068 : vector<8x49xf32>
    %2070 = arith.addf %2066, %2069 : vector<8x49xf32>
    %2071 = vector.broadcast %207 : vector<8x1xf32> to vector<8x49xf32>
    %2072 = vector.broadcast %135 : vector<1x49xf32> to vector<8x49xf32>
    %2073 = arith.mulf %2071, %2072 : vector<8x49xf32>
    %2074 = arith.addf %2070, %2073 : vector<8x49xf32>
    %2075 = vector.broadcast %209 : vector<8x1xf32> to vector<8x49xf32>
    %2076 = vector.broadcast %137 : vector<1x49xf32> to vector<8x49xf32>
    %2077 = arith.mulf %2075, %2076 : vector<8x49xf32>
    %2078 = arith.addf %2074, %2077 : vector<8x49xf32>
    %2079 = vector.broadcast %211 : vector<8x1xf32> to vector<8x49xf32>
    %2080 = vector.broadcast %139 : vector<1x49xf32> to vector<8x49xf32>
    %2081 = arith.mulf %2079, %2080 : vector<8x49xf32>
    %2082 = arith.addf %2078, %2081 : vector<8x49xf32>
    %2083 = vector.broadcast %213 : vector<8x1xf32> to vector<8x49xf32>
    %2084 = vector.broadcast %155 : vector<1x49xf32> to vector<8x49xf32>
    %2085 = arith.mulf %2083, %2084 : vector<8x49xf32>
    %2086 = arith.addf %2082, %2085 : vector<8x49xf32>
    %2087 = vector.broadcast %215 : vector<8x1xf32> to vector<8x49xf32>
    %2088 = vector.broadcast %157 : vector<1x49xf32> to vector<8x49xf32>
    %2089 = arith.mulf %2087, %2088 : vector<8x49xf32>
    %2090 = arith.addf %2086, %2089 : vector<8x49xf32>
    %2091 = vector.broadcast %217 : vector<8x1xf32> to vector<8x49xf32>
    %2092 = vector.broadcast %159 : vector<1x49xf32> to vector<8x49xf32>
    %2093 = arith.mulf %2091, %2092 : vector<8x49xf32>
    %2094 = arith.addf %2090, %2093 : vector<8x49xf32>
    %2095 = arith.maximumf %2057, %2094 : vector<8x49xf32>
    %2096 = vector.broadcast %218 : vector<8x1xf32> to vector<8x49xf32>
    %2097 = arith.addf %2095, %2096 : vector<8x49xf32>
    %cst_591 = arith.constant 0.000000e+00 : f32
    %2098 = vector.broadcast %cst_591 : f32 to vector<8x49xf32>
    %2099 = arith.maximumf %2097, %2098 : vector<8x49xf32>
    %c11 = arith.constant 11 : index
    %c0_592 = arith.constant 0 : index
    %2100 = vector.load %arg2[%c11, %c0_592] : memref<16x49xf32, #tpu.memory_space<vmem>>, vector<1x49xf32>
    %2101 = vector.broadcast %2100 : vector<1x49xf32> to vector<8x49xf32>
    %2102 = arith.mulf %2099, %2101 : vector<8x49xf32>
    %cst_593 = arith.constant 0.000000e+00 : f32
    %2103 = vector.broadcast %cst_593 : f32 to vector<8x49xf32>
    %2104 = vector.broadcast %201 : vector<8x1xf32> to vector<8x49xf32>
    %2105 = vector.broadcast %121 : vector<1x49xf32> to vector<8x49xf32>
    %2106 = arith.mulf %2104, %2105 : vector<8x49xf32>
    %2107 = arith.addf %2103, %2106 : vector<8x49xf32>
    %2108 = vector.broadcast %203 : vector<8x1xf32> to vector<8x49xf32>
    %2109 = vector.broadcast %123 : vector<1x49xf32> to vector<8x49xf32>
    %2110 = arith.mulf %2108, %2109 : vector<8x49xf32>
    %2111 = arith.addf %2107, %2110 : vector<8x49xf32>
    %2112 = vector.broadcast %205 : vector<8x1xf32> to vector<8x49xf32>
    %2113 = vector.broadcast %125 : vector<1x49xf32> to vector<8x49xf32>
    %2114 = arith.mulf %2112, %2113 : vector<8x49xf32>
    %2115 = arith.addf %2111, %2114 : vector<8x49xf32>
    %2116 = vector.broadcast %207 : vector<8x1xf32> to vector<8x49xf32>
    %2117 = vector.broadcast %141 : vector<1x49xf32> to vector<8x49xf32>
    %2118 = arith.mulf %2116, %2117 : vector<8x49xf32>
    %2119 = arith.addf %2115, %2118 : vector<8x49xf32>
    %2120 = vector.broadcast %209 : vector<8x1xf32> to vector<8x49xf32>
    %2121 = vector.broadcast %143 : vector<1x49xf32> to vector<8x49xf32>
    %2122 = arith.mulf %2120, %2121 : vector<8x49xf32>
    %2123 = arith.addf %2119, %2122 : vector<8x49xf32>
    %2124 = vector.broadcast %211 : vector<8x1xf32> to vector<8x49xf32>
    %2125 = vector.broadcast %145 : vector<1x49xf32> to vector<8x49xf32>
    %2126 = arith.mulf %2124, %2125 : vector<8x49xf32>
    %2127 = arith.addf %2123, %2126 : vector<8x49xf32>
    %2128 = vector.broadcast %213 : vector<8x1xf32> to vector<8x49xf32>
    %2129 = vector.broadcast %161 : vector<1x49xf32> to vector<8x49xf32>
    %2130 = arith.mulf %2128, %2129 : vector<8x49xf32>
    %2131 = arith.addf %2127, %2130 : vector<8x49xf32>
    %2132 = vector.broadcast %215 : vector<8x1xf32> to vector<8x49xf32>
    %2133 = vector.broadcast %163 : vector<1x49xf32> to vector<8x49xf32>
    %2134 = arith.mulf %2132, %2133 : vector<8x49xf32>
    %2135 = arith.addf %2131, %2134 : vector<8x49xf32>
    %2136 = vector.broadcast %217 : vector<8x1xf32> to vector<8x49xf32>
    %2137 = vector.broadcast %165 : vector<1x49xf32> to vector<8x49xf32>
    %2138 = arith.mulf %2136, %2137 : vector<8x49xf32>
    %2139 = arith.addf %2135, %2138 : vector<8x49xf32>
    %cst_594 = arith.constant 0.000000e+00 : f32
    %2140 = vector.broadcast %cst_594 : f32 to vector<8x49xf32>
    %2141 = vector.broadcast %201 : vector<8x1xf32> to vector<8x49xf32>
    %2142 = vector.broadcast %123 : vector<1x49xf32> to vector<8x49xf32>
    %2143 = arith.mulf %2141, %2142 : vector<8x49xf32>
    %2144 = arith.addf %2140, %2143 : vector<8x49xf32>
    %2145 = vector.broadcast %203 : vector<8x1xf32> to vector<8x49xf32>
    %2146 = vector.broadcast %125 : vector<1x49xf32> to vector<8x49xf32>
    %2147 = arith.mulf %2145, %2146 : vector<8x49xf32>
    %2148 = arith.addf %2144, %2147 : vector<8x49xf32>
    %2149 = vector.broadcast %205 : vector<8x1xf32> to vector<8x49xf32>
    %2150 = vector.broadcast %127 : vector<1x49xf32> to vector<8x49xf32>
    %2151 = arith.mulf %2149, %2150 : vector<8x49xf32>
    %2152 = arith.addf %2148, %2151 : vector<8x49xf32>
    %2153 = vector.broadcast %207 : vector<8x1xf32> to vector<8x49xf32>
    %2154 = vector.broadcast %143 : vector<1x49xf32> to vector<8x49xf32>
    %2155 = arith.mulf %2153, %2154 : vector<8x49xf32>
    %2156 = arith.addf %2152, %2155 : vector<8x49xf32>
    %2157 = vector.broadcast %209 : vector<8x1xf32> to vector<8x49xf32>
    %2158 = vector.broadcast %145 : vector<1x49xf32> to vector<8x49xf32>
    %2159 = arith.mulf %2157, %2158 : vector<8x49xf32>
    %2160 = arith.addf %2156, %2159 : vector<8x49xf32>
    %2161 = vector.broadcast %211 : vector<8x1xf32> to vector<8x49xf32>
    %2162 = vector.broadcast %147 : vector<1x49xf32> to vector<8x49xf32>
    %2163 = arith.mulf %2161, %2162 : vector<8x49xf32>
    %2164 = arith.addf %2160, %2163 : vector<8x49xf32>
    %2165 = vector.broadcast %213 : vector<8x1xf32> to vector<8x49xf32>
    %2166 = vector.broadcast %163 : vector<1x49xf32> to vector<8x49xf32>
    %2167 = arith.mulf %2165, %2166 : vector<8x49xf32>
    %2168 = arith.addf %2164, %2167 : vector<8x49xf32>
    %2169 = vector.broadcast %215 : vector<8x1xf32> to vector<8x49xf32>
    %2170 = vector.broadcast %165 : vector<1x49xf32> to vector<8x49xf32>
    %2171 = arith.mulf %2169, %2170 : vector<8x49xf32>
    %2172 = arith.addf %2168, %2171 : vector<8x49xf32>
    %2173 = vector.broadcast %217 : vector<8x1xf32> to vector<8x49xf32>
    %2174 = vector.broadcast %167 : vector<1x49xf32> to vector<8x49xf32>
    %2175 = arith.mulf %2173, %2174 : vector<8x49xf32>
    %2176 = arith.addf %2172, %2175 : vector<8x49xf32>
    %2177 = arith.maximumf %2139, %2176 : vector<8x49xf32>
    %cst_595 = arith.constant 0.000000e+00 : f32
    %2178 = vector.broadcast %cst_595 : f32 to vector<8x49xf32>
    %2179 = vector.broadcast %201 : vector<8x1xf32> to vector<8x49xf32>
    %2180 = vector.broadcast %141 : vector<1x49xf32> to vector<8x49xf32>
    %2181 = arith.mulf %2179, %2180 : vector<8x49xf32>
    %2182 = arith.addf %2178, %2181 : vector<8x49xf32>
    %2183 = vector.broadcast %203 : vector<8x1xf32> to vector<8x49xf32>
    %2184 = vector.broadcast %143 : vector<1x49xf32> to vector<8x49xf32>
    %2185 = arith.mulf %2183, %2184 : vector<8x49xf32>
    %2186 = arith.addf %2182, %2185 : vector<8x49xf32>
    %2187 = vector.broadcast %205 : vector<8x1xf32> to vector<8x49xf32>
    %2188 = vector.broadcast %145 : vector<1x49xf32> to vector<8x49xf32>
    %2189 = arith.mulf %2187, %2188 : vector<8x49xf32>
    %2190 = arith.addf %2186, %2189 : vector<8x49xf32>
    %2191 = vector.broadcast %207 : vector<8x1xf32> to vector<8x49xf32>
    %2192 = vector.broadcast %161 : vector<1x49xf32> to vector<8x49xf32>
    %2193 = arith.mulf %2191, %2192 : vector<8x49xf32>
    %2194 = arith.addf %2190, %2193 : vector<8x49xf32>
    %2195 = vector.broadcast %209 : vector<8x1xf32> to vector<8x49xf32>
    %2196 = vector.broadcast %163 : vector<1x49xf32> to vector<8x49xf32>
    %2197 = arith.mulf %2195, %2196 : vector<8x49xf32>
    %2198 = arith.addf %2194, %2197 : vector<8x49xf32>
    %2199 = vector.broadcast %211 : vector<8x1xf32> to vector<8x49xf32>
    %2200 = vector.broadcast %165 : vector<1x49xf32> to vector<8x49xf32>
    %2201 = arith.mulf %2199, %2200 : vector<8x49xf32>
    %2202 = arith.addf %2198, %2201 : vector<8x49xf32>
    %2203 = vector.broadcast %213 : vector<8x1xf32> to vector<8x49xf32>
    %2204 = vector.broadcast %181 : vector<1x49xf32> to vector<8x49xf32>
    %2205 = arith.mulf %2203, %2204 : vector<8x49xf32>
    %2206 = arith.addf %2202, %2205 : vector<8x49xf32>
    %2207 = vector.broadcast %215 : vector<8x1xf32> to vector<8x49xf32>
    %2208 = vector.broadcast %183 : vector<1x49xf32> to vector<8x49xf32>
    %2209 = arith.mulf %2207, %2208 : vector<8x49xf32>
    %2210 = arith.addf %2206, %2209 : vector<8x49xf32>
    %2211 = vector.broadcast %217 : vector<8x1xf32> to vector<8x49xf32>
    %2212 = vector.broadcast %185 : vector<1x49xf32> to vector<8x49xf32>
    %2213 = arith.mulf %2211, %2212 : vector<8x49xf32>
    %2214 = arith.addf %2210, %2213 : vector<8x49xf32>
    %2215 = arith.maximumf %2177, %2214 : vector<8x49xf32>
    %cst_596 = arith.constant 0.000000e+00 : f32
    %2216 = vector.broadcast %cst_596 : f32 to vector<8x49xf32>
    %2217 = vector.broadcast %201 : vector<8x1xf32> to vector<8x49xf32>
    %2218 = vector.broadcast %143 : vector<1x49xf32> to vector<8x49xf32>
    %2219 = arith.mulf %2217, %2218 : vector<8x49xf32>
    %2220 = arith.addf %2216, %2219 : vector<8x49xf32>
    %2221 = vector.broadcast %203 : vector<8x1xf32> to vector<8x49xf32>
    %2222 = vector.broadcast %145 : vector<1x49xf32> to vector<8x49xf32>
    %2223 = arith.mulf %2221, %2222 : vector<8x49xf32>
    %2224 = arith.addf %2220, %2223 : vector<8x49xf32>
    %2225 = vector.broadcast %205 : vector<8x1xf32> to vector<8x49xf32>
    %2226 = vector.broadcast %147 : vector<1x49xf32> to vector<8x49xf32>
    %2227 = arith.mulf %2225, %2226 : vector<8x49xf32>
    %2228 = arith.addf %2224, %2227 : vector<8x49xf32>
    %2229 = vector.broadcast %207 : vector<8x1xf32> to vector<8x49xf32>
    %2230 = vector.broadcast %163 : vector<1x49xf32> to vector<8x49xf32>
    %2231 = arith.mulf %2229, %2230 : vector<8x49xf32>
    %2232 = arith.addf %2228, %2231 : vector<8x49xf32>
    %2233 = vector.broadcast %209 : vector<8x1xf32> to vector<8x49xf32>
    %2234 = vector.broadcast %165 : vector<1x49xf32> to vector<8x49xf32>
    %2235 = arith.mulf %2233, %2234 : vector<8x49xf32>
    %2236 = arith.addf %2232, %2235 : vector<8x49xf32>
    %2237 = vector.broadcast %211 : vector<8x1xf32> to vector<8x49xf32>
    %2238 = vector.broadcast %167 : vector<1x49xf32> to vector<8x49xf32>
    %2239 = arith.mulf %2237, %2238 : vector<8x49xf32>
    %2240 = arith.addf %2236, %2239 : vector<8x49xf32>
    %2241 = vector.broadcast %213 : vector<8x1xf32> to vector<8x49xf32>
    %2242 = vector.broadcast %183 : vector<1x49xf32> to vector<8x49xf32>
    %2243 = arith.mulf %2241, %2242 : vector<8x49xf32>
    %2244 = arith.addf %2240, %2243 : vector<8x49xf32>
    %2245 = vector.broadcast %215 : vector<8x1xf32> to vector<8x49xf32>
    %2246 = vector.broadcast %185 : vector<1x49xf32> to vector<8x49xf32>
    %2247 = arith.mulf %2245, %2246 : vector<8x49xf32>
    %2248 = arith.addf %2244, %2247 : vector<8x49xf32>
    %2249 = vector.broadcast %217 : vector<8x1xf32> to vector<8x49xf32>
    %2250 = vector.broadcast %187 : vector<1x49xf32> to vector<8x49xf32>
    %2251 = arith.mulf %2249, %2250 : vector<8x49xf32>
    %2252 = arith.addf %2248, %2251 : vector<8x49xf32>
    %2253 = arith.maximumf %2215, %2252 : vector<8x49xf32>
    %2254 = vector.broadcast %218 : vector<8x1xf32> to vector<8x49xf32>
    %2255 = arith.addf %2253, %2254 : vector<8x49xf32>
    %cst_597 = arith.constant 0.000000e+00 : f32
    %2256 = vector.broadcast %cst_597 : f32 to vector<8x49xf32>
    %2257 = arith.maximumf %2255, %2256 : vector<8x49xf32>
    %c12 = arith.constant 12 : index
    %c0_598 = arith.constant 0 : index
    %2258 = vector.load %arg2[%c12, %c0_598] : memref<16x49xf32, #tpu.memory_space<vmem>>, vector<1x49xf32>
    %2259 = vector.broadcast %2258 : vector<1x49xf32> to vector<8x49xf32>
    %2260 = arith.mulf %2257, %2259 : vector<8x49xf32>
    %cst_599 = arith.constant 0.000000e+00 : f32
    %2261 = vector.broadcast %cst_599 : f32 to vector<8x49xf32>
    %2262 = vector.broadcast %201 : vector<8x1xf32> to vector<8x49xf32>
    %2263 = vector.broadcast %125 : vector<1x49xf32> to vector<8x49xf32>
    %2264 = arith.mulf %2262, %2263 : vector<8x49xf32>
    %2265 = arith.addf %2261, %2264 : vector<8x49xf32>
    %2266 = vector.broadcast %203 : vector<8x1xf32> to vector<8x49xf32>
    %2267 = vector.broadcast %127 : vector<1x49xf32> to vector<8x49xf32>
    %2268 = arith.mulf %2266, %2267 : vector<8x49xf32>
    %2269 = arith.addf %2265, %2268 : vector<8x49xf32>
    %2270 = vector.broadcast %205 : vector<8x1xf32> to vector<8x49xf32>
    %2271 = vector.broadcast %129 : vector<1x49xf32> to vector<8x49xf32>
    %2272 = arith.mulf %2270, %2271 : vector<8x49xf32>
    %2273 = arith.addf %2269, %2272 : vector<8x49xf32>
    %2274 = vector.broadcast %207 : vector<8x1xf32> to vector<8x49xf32>
    %2275 = vector.broadcast %145 : vector<1x49xf32> to vector<8x49xf32>
    %2276 = arith.mulf %2274, %2275 : vector<8x49xf32>
    %2277 = arith.addf %2273, %2276 : vector<8x49xf32>
    %2278 = vector.broadcast %209 : vector<8x1xf32> to vector<8x49xf32>
    %2279 = vector.broadcast %147 : vector<1x49xf32> to vector<8x49xf32>
    %2280 = arith.mulf %2278, %2279 : vector<8x49xf32>
    %2281 = arith.addf %2277, %2280 : vector<8x49xf32>
    %2282 = vector.broadcast %211 : vector<8x1xf32> to vector<8x49xf32>
    %2283 = vector.broadcast %149 : vector<1x49xf32> to vector<8x49xf32>
    %2284 = arith.mulf %2282, %2283 : vector<8x49xf32>
    %2285 = arith.addf %2281, %2284 : vector<8x49xf32>
    %2286 = vector.broadcast %213 : vector<8x1xf32> to vector<8x49xf32>
    %2287 = vector.broadcast %165 : vector<1x49xf32> to vector<8x49xf32>
    %2288 = arith.mulf %2286, %2287 : vector<8x49xf32>
    %2289 = arith.addf %2285, %2288 : vector<8x49xf32>
    %2290 = vector.broadcast %215 : vector<8x1xf32> to vector<8x49xf32>
    %2291 = vector.broadcast %167 : vector<1x49xf32> to vector<8x49xf32>
    %2292 = arith.mulf %2290, %2291 : vector<8x49xf32>
    %2293 = arith.addf %2289, %2292 : vector<8x49xf32>
    %2294 = vector.broadcast %217 : vector<8x1xf32> to vector<8x49xf32>
    %2295 = vector.broadcast %169 : vector<1x49xf32> to vector<8x49xf32>
    %2296 = arith.mulf %2294, %2295 : vector<8x49xf32>
    %2297 = arith.addf %2293, %2296 : vector<8x49xf32>
    %cst_600 = arith.constant 0.000000e+00 : f32
    %2298 = vector.broadcast %cst_600 : f32 to vector<8x49xf32>
    %2299 = vector.broadcast %201 : vector<8x1xf32> to vector<8x49xf32>
    %2300 = vector.broadcast %127 : vector<1x49xf32> to vector<8x49xf32>
    %2301 = arith.mulf %2299, %2300 : vector<8x49xf32>
    %2302 = arith.addf %2298, %2301 : vector<8x49xf32>
    %2303 = vector.broadcast %203 : vector<8x1xf32> to vector<8x49xf32>
    %2304 = vector.broadcast %129 : vector<1x49xf32> to vector<8x49xf32>
    %2305 = arith.mulf %2303, %2304 : vector<8x49xf32>
    %2306 = arith.addf %2302, %2305 : vector<8x49xf32>
    %2307 = vector.broadcast %205 : vector<8x1xf32> to vector<8x49xf32>
    %2308 = vector.broadcast %131 : vector<1x49xf32> to vector<8x49xf32>
    %2309 = arith.mulf %2307, %2308 : vector<8x49xf32>
    %2310 = arith.addf %2306, %2309 : vector<8x49xf32>
    %2311 = vector.broadcast %207 : vector<8x1xf32> to vector<8x49xf32>
    %2312 = vector.broadcast %147 : vector<1x49xf32> to vector<8x49xf32>
    %2313 = arith.mulf %2311, %2312 : vector<8x49xf32>
    %2314 = arith.addf %2310, %2313 : vector<8x49xf32>
    %2315 = vector.broadcast %209 : vector<8x1xf32> to vector<8x49xf32>
    %2316 = vector.broadcast %149 : vector<1x49xf32> to vector<8x49xf32>
    %2317 = arith.mulf %2315, %2316 : vector<8x49xf32>
    %2318 = arith.addf %2314, %2317 : vector<8x49xf32>
    %2319 = vector.broadcast %211 : vector<8x1xf32> to vector<8x49xf32>
    %2320 = vector.broadcast %151 : vector<1x49xf32> to vector<8x49xf32>
    %2321 = arith.mulf %2319, %2320 : vector<8x49xf32>
    %2322 = arith.addf %2318, %2321 : vector<8x49xf32>
    %2323 = vector.broadcast %213 : vector<8x1xf32> to vector<8x49xf32>
    %2324 = vector.broadcast %167 : vector<1x49xf32> to vector<8x49xf32>
    %2325 = arith.mulf %2323, %2324 : vector<8x49xf32>
    %2326 = arith.addf %2322, %2325 : vector<8x49xf32>
    %2327 = vector.broadcast %215 : vector<8x1xf32> to vector<8x49xf32>
    %2328 = vector.broadcast %169 : vector<1x49xf32> to vector<8x49xf32>
    %2329 = arith.mulf %2327, %2328 : vector<8x49xf32>
    %2330 = arith.addf %2326, %2329 : vector<8x49xf32>
    %2331 = vector.broadcast %217 : vector<8x1xf32> to vector<8x49xf32>
    %2332 = vector.broadcast %171 : vector<1x49xf32> to vector<8x49xf32>
    %2333 = arith.mulf %2331, %2332 : vector<8x49xf32>
    %2334 = arith.addf %2330, %2333 : vector<8x49xf32>
    %2335 = arith.maximumf %2297, %2334 : vector<8x49xf32>
    %cst_601 = arith.constant 0.000000e+00 : f32
    %2336 = vector.broadcast %cst_601 : f32 to vector<8x49xf32>
    %2337 = vector.broadcast %201 : vector<8x1xf32> to vector<8x49xf32>
    %2338 = vector.broadcast %145 : vector<1x49xf32> to vector<8x49xf32>
    %2339 = arith.mulf %2337, %2338 : vector<8x49xf32>
    %2340 = arith.addf %2336, %2339 : vector<8x49xf32>
    %2341 = vector.broadcast %203 : vector<8x1xf32> to vector<8x49xf32>
    %2342 = vector.broadcast %147 : vector<1x49xf32> to vector<8x49xf32>
    %2343 = arith.mulf %2341, %2342 : vector<8x49xf32>
    %2344 = arith.addf %2340, %2343 : vector<8x49xf32>
    %2345 = vector.broadcast %205 : vector<8x1xf32> to vector<8x49xf32>
    %2346 = vector.broadcast %149 : vector<1x49xf32> to vector<8x49xf32>
    %2347 = arith.mulf %2345, %2346 : vector<8x49xf32>
    %2348 = arith.addf %2344, %2347 : vector<8x49xf32>
    %2349 = vector.broadcast %207 : vector<8x1xf32> to vector<8x49xf32>
    %2350 = vector.broadcast %165 : vector<1x49xf32> to vector<8x49xf32>
    %2351 = arith.mulf %2349, %2350 : vector<8x49xf32>
    %2352 = arith.addf %2348, %2351 : vector<8x49xf32>
    %2353 = vector.broadcast %209 : vector<8x1xf32> to vector<8x49xf32>
    %2354 = vector.broadcast %167 : vector<1x49xf32> to vector<8x49xf32>
    %2355 = arith.mulf %2353, %2354 : vector<8x49xf32>
    %2356 = arith.addf %2352, %2355 : vector<8x49xf32>
    %2357 = vector.broadcast %211 : vector<8x1xf32> to vector<8x49xf32>
    %2358 = vector.broadcast %169 : vector<1x49xf32> to vector<8x49xf32>
    %2359 = arith.mulf %2357, %2358 : vector<8x49xf32>
    %2360 = arith.addf %2356, %2359 : vector<8x49xf32>
    %2361 = vector.broadcast %213 : vector<8x1xf32> to vector<8x49xf32>
    %2362 = vector.broadcast %185 : vector<1x49xf32> to vector<8x49xf32>
    %2363 = arith.mulf %2361, %2362 : vector<8x49xf32>
    %2364 = arith.addf %2360, %2363 : vector<8x49xf32>
    %2365 = vector.broadcast %215 : vector<8x1xf32> to vector<8x49xf32>
    %2366 = vector.broadcast %187 : vector<1x49xf32> to vector<8x49xf32>
    %2367 = arith.mulf %2365, %2366 : vector<8x49xf32>
    %2368 = arith.addf %2364, %2367 : vector<8x49xf32>
    %2369 = vector.broadcast %217 : vector<8x1xf32> to vector<8x49xf32>
    %2370 = vector.broadcast %189 : vector<1x49xf32> to vector<8x49xf32>
    %2371 = arith.mulf %2369, %2370 : vector<8x49xf32>
    %2372 = arith.addf %2368, %2371 : vector<8x49xf32>
    %2373 = arith.maximumf %2335, %2372 : vector<8x49xf32>
    %cst_602 = arith.constant 0.000000e+00 : f32
    %2374 = vector.broadcast %cst_602 : f32 to vector<8x49xf32>
    %2375 = vector.broadcast %201 : vector<8x1xf32> to vector<8x49xf32>
    %2376 = vector.broadcast %147 : vector<1x49xf32> to vector<8x49xf32>
    %2377 = arith.mulf %2375, %2376 : vector<8x49xf32>
    %2378 = arith.addf %2374, %2377 : vector<8x49xf32>
    %2379 = vector.broadcast %203 : vector<8x1xf32> to vector<8x49xf32>
    %2380 = vector.broadcast %149 : vector<1x49xf32> to vector<8x49xf32>
    %2381 = arith.mulf %2379, %2380 : vector<8x49xf32>
    %2382 = arith.addf %2378, %2381 : vector<8x49xf32>
    %2383 = vector.broadcast %205 : vector<8x1xf32> to vector<8x49xf32>
    %2384 = vector.broadcast %151 : vector<1x49xf32> to vector<8x49xf32>
    %2385 = arith.mulf %2383, %2384 : vector<8x49xf32>
    %2386 = arith.addf %2382, %2385 : vector<8x49xf32>
    %2387 = vector.broadcast %207 : vector<8x1xf32> to vector<8x49xf32>
    %2388 = vector.broadcast %167 : vector<1x49xf32> to vector<8x49xf32>
    %2389 = arith.mulf %2387, %2388 : vector<8x49xf32>
    %2390 = arith.addf %2386, %2389 : vector<8x49xf32>
    %2391 = vector.broadcast %209 : vector<8x1xf32> to vector<8x49xf32>
    %2392 = vector.broadcast %169 : vector<1x49xf32> to vector<8x49xf32>
    %2393 = arith.mulf %2391, %2392 : vector<8x49xf32>
    %2394 = arith.addf %2390, %2393 : vector<8x49xf32>
    %2395 = vector.broadcast %211 : vector<8x1xf32> to vector<8x49xf32>
    %2396 = vector.broadcast %171 : vector<1x49xf32> to vector<8x49xf32>
    %2397 = arith.mulf %2395, %2396 : vector<8x49xf32>
    %2398 = arith.addf %2394, %2397 : vector<8x49xf32>
    %2399 = vector.broadcast %213 : vector<8x1xf32> to vector<8x49xf32>
    %2400 = vector.broadcast %187 : vector<1x49xf32> to vector<8x49xf32>
    %2401 = arith.mulf %2399, %2400 : vector<8x49xf32>
    %2402 = arith.addf %2398, %2401 : vector<8x49xf32>
    %2403 = vector.broadcast %215 : vector<8x1xf32> to vector<8x49xf32>
    %2404 = vector.broadcast %189 : vector<1x49xf32> to vector<8x49xf32>
    %2405 = arith.mulf %2403, %2404 : vector<8x49xf32>
    %2406 = arith.addf %2402, %2405 : vector<8x49xf32>
    %2407 = vector.broadcast %217 : vector<8x1xf32> to vector<8x49xf32>
    %2408 = vector.broadcast %191 : vector<1x49xf32> to vector<8x49xf32>
    %2409 = arith.mulf %2407, %2408 : vector<8x49xf32>
    %2410 = arith.addf %2406, %2409 : vector<8x49xf32>
    %2411 = arith.maximumf %2373, %2410 : vector<8x49xf32>
    %2412 = vector.broadcast %218 : vector<8x1xf32> to vector<8x49xf32>
    %2413 = arith.addf %2411, %2412 : vector<8x49xf32>
    %cst_603 = arith.constant 0.000000e+00 : f32
    %2414 = vector.broadcast %cst_603 : f32 to vector<8x49xf32>
    %2415 = arith.maximumf %2413, %2414 : vector<8x49xf32>
    %c13 = arith.constant 13 : index
    %c0_604 = arith.constant 0 : index
    %2416 = vector.load %arg2[%c13, %c0_604] : memref<16x49xf32, #tpu.memory_space<vmem>>, vector<1x49xf32>
    %2417 = vector.broadcast %2416 : vector<1x49xf32> to vector<8x49xf32>
    %2418 = arith.mulf %2415, %2417 : vector<8x49xf32>
    %cst_605 = arith.constant 0.000000e+00 : f32
    %2419 = vector.broadcast %cst_605 : f32 to vector<8x49xf32>
    %2420 = vector.broadcast %201 : vector<8x1xf32> to vector<8x49xf32>
    %2421 = vector.broadcast %129 : vector<1x49xf32> to vector<8x49xf32>
    %2422 = arith.mulf %2420, %2421 : vector<8x49xf32>
    %2423 = arith.addf %2419, %2422 : vector<8x49xf32>
    %2424 = vector.broadcast %203 : vector<8x1xf32> to vector<8x49xf32>
    %2425 = vector.broadcast %131 : vector<1x49xf32> to vector<8x49xf32>
    %2426 = arith.mulf %2424, %2425 : vector<8x49xf32>
    %2427 = arith.addf %2423, %2426 : vector<8x49xf32>
    %2428 = vector.broadcast %205 : vector<8x1xf32> to vector<8x49xf32>
    %2429 = vector.broadcast %133 : vector<1x49xf32> to vector<8x49xf32>
    %2430 = arith.mulf %2428, %2429 : vector<8x49xf32>
    %2431 = arith.addf %2427, %2430 : vector<8x49xf32>
    %2432 = vector.broadcast %207 : vector<8x1xf32> to vector<8x49xf32>
    %2433 = vector.broadcast %149 : vector<1x49xf32> to vector<8x49xf32>
    %2434 = arith.mulf %2432, %2433 : vector<8x49xf32>
    %2435 = arith.addf %2431, %2434 : vector<8x49xf32>
    %2436 = vector.broadcast %209 : vector<8x1xf32> to vector<8x49xf32>
    %2437 = vector.broadcast %151 : vector<1x49xf32> to vector<8x49xf32>
    %2438 = arith.mulf %2436, %2437 : vector<8x49xf32>
    %2439 = arith.addf %2435, %2438 : vector<8x49xf32>
    %2440 = vector.broadcast %211 : vector<8x1xf32> to vector<8x49xf32>
    %2441 = vector.broadcast %153 : vector<1x49xf32> to vector<8x49xf32>
    %2442 = arith.mulf %2440, %2441 : vector<8x49xf32>
    %2443 = arith.addf %2439, %2442 : vector<8x49xf32>
    %2444 = vector.broadcast %213 : vector<8x1xf32> to vector<8x49xf32>
    %2445 = vector.broadcast %169 : vector<1x49xf32> to vector<8x49xf32>
    %2446 = arith.mulf %2444, %2445 : vector<8x49xf32>
    %2447 = arith.addf %2443, %2446 : vector<8x49xf32>
    %2448 = vector.broadcast %215 : vector<8x1xf32> to vector<8x49xf32>
    %2449 = vector.broadcast %171 : vector<1x49xf32> to vector<8x49xf32>
    %2450 = arith.mulf %2448, %2449 : vector<8x49xf32>
    %2451 = arith.addf %2447, %2450 : vector<8x49xf32>
    %2452 = vector.broadcast %217 : vector<8x1xf32> to vector<8x49xf32>
    %2453 = vector.broadcast %173 : vector<1x49xf32> to vector<8x49xf32>
    %2454 = arith.mulf %2452, %2453 : vector<8x49xf32>
    %2455 = arith.addf %2451, %2454 : vector<8x49xf32>
    %cst_606 = arith.constant 0.000000e+00 : f32
    %2456 = vector.broadcast %cst_606 : f32 to vector<8x49xf32>
    %2457 = vector.broadcast %201 : vector<8x1xf32> to vector<8x49xf32>
    %2458 = vector.broadcast %131 : vector<1x49xf32> to vector<8x49xf32>
    %2459 = arith.mulf %2457, %2458 : vector<8x49xf32>
    %2460 = arith.addf %2456, %2459 : vector<8x49xf32>
    %2461 = vector.broadcast %203 : vector<8x1xf32> to vector<8x49xf32>
    %2462 = vector.broadcast %133 : vector<1x49xf32> to vector<8x49xf32>
    %2463 = arith.mulf %2461, %2462 : vector<8x49xf32>
    %2464 = arith.addf %2460, %2463 : vector<8x49xf32>
    %2465 = vector.broadcast %205 : vector<8x1xf32> to vector<8x49xf32>
    %2466 = vector.broadcast %135 : vector<1x49xf32> to vector<8x49xf32>
    %2467 = arith.mulf %2465, %2466 : vector<8x49xf32>
    %2468 = arith.addf %2464, %2467 : vector<8x49xf32>
    %2469 = vector.broadcast %207 : vector<8x1xf32> to vector<8x49xf32>
    %2470 = vector.broadcast %151 : vector<1x49xf32> to vector<8x49xf32>
    %2471 = arith.mulf %2469, %2470 : vector<8x49xf32>
    %2472 = arith.addf %2468, %2471 : vector<8x49xf32>
    %2473 = vector.broadcast %209 : vector<8x1xf32> to vector<8x49xf32>
    %2474 = vector.broadcast %153 : vector<1x49xf32> to vector<8x49xf32>
    %2475 = arith.mulf %2473, %2474 : vector<8x49xf32>
    %2476 = arith.addf %2472, %2475 : vector<8x49xf32>
    %2477 = vector.broadcast %211 : vector<8x1xf32> to vector<8x49xf32>
    %2478 = vector.broadcast %155 : vector<1x49xf32> to vector<8x49xf32>
    %2479 = arith.mulf %2477, %2478 : vector<8x49xf32>
    %2480 = arith.addf %2476, %2479 : vector<8x49xf32>
    %2481 = vector.broadcast %213 : vector<8x1xf32> to vector<8x49xf32>
    %2482 = vector.broadcast %171 : vector<1x49xf32> to vector<8x49xf32>
    %2483 = arith.mulf %2481, %2482 : vector<8x49xf32>
    %2484 = arith.addf %2480, %2483 : vector<8x49xf32>
    %2485 = vector.broadcast %215 : vector<8x1xf32> to vector<8x49xf32>
    %2486 = vector.broadcast %173 : vector<1x49xf32> to vector<8x49xf32>
    %2487 = arith.mulf %2485, %2486 : vector<8x49xf32>
    %2488 = arith.addf %2484, %2487 : vector<8x49xf32>
    %2489 = vector.broadcast %217 : vector<8x1xf32> to vector<8x49xf32>
    %2490 = vector.broadcast %175 : vector<1x49xf32> to vector<8x49xf32>
    %2491 = arith.mulf %2489, %2490 : vector<8x49xf32>
    %2492 = arith.addf %2488, %2491 : vector<8x49xf32>
    %2493 = arith.maximumf %2455, %2492 : vector<8x49xf32>
    %cst_607 = arith.constant 0.000000e+00 : f32
    %2494 = vector.broadcast %cst_607 : f32 to vector<8x49xf32>
    %2495 = vector.broadcast %201 : vector<8x1xf32> to vector<8x49xf32>
    %2496 = vector.broadcast %149 : vector<1x49xf32> to vector<8x49xf32>
    %2497 = arith.mulf %2495, %2496 : vector<8x49xf32>
    %2498 = arith.addf %2494, %2497 : vector<8x49xf32>
    %2499 = vector.broadcast %203 : vector<8x1xf32> to vector<8x49xf32>
    %2500 = vector.broadcast %151 : vector<1x49xf32> to vector<8x49xf32>
    %2501 = arith.mulf %2499, %2500 : vector<8x49xf32>
    %2502 = arith.addf %2498, %2501 : vector<8x49xf32>
    %2503 = vector.broadcast %205 : vector<8x1xf32> to vector<8x49xf32>
    %2504 = vector.broadcast %153 : vector<1x49xf32> to vector<8x49xf32>
    %2505 = arith.mulf %2503, %2504 : vector<8x49xf32>
    %2506 = arith.addf %2502, %2505 : vector<8x49xf32>
    %2507 = vector.broadcast %207 : vector<8x1xf32> to vector<8x49xf32>
    %2508 = vector.broadcast %169 : vector<1x49xf32> to vector<8x49xf32>
    %2509 = arith.mulf %2507, %2508 : vector<8x49xf32>
    %2510 = arith.addf %2506, %2509 : vector<8x49xf32>
    %2511 = vector.broadcast %209 : vector<8x1xf32> to vector<8x49xf32>
    %2512 = vector.broadcast %171 : vector<1x49xf32> to vector<8x49xf32>
    %2513 = arith.mulf %2511, %2512 : vector<8x49xf32>
    %2514 = arith.addf %2510, %2513 : vector<8x49xf32>
    %2515 = vector.broadcast %211 : vector<8x1xf32> to vector<8x49xf32>
    %2516 = vector.broadcast %173 : vector<1x49xf32> to vector<8x49xf32>
    %2517 = arith.mulf %2515, %2516 : vector<8x49xf32>
    %2518 = arith.addf %2514, %2517 : vector<8x49xf32>
    %2519 = vector.broadcast %213 : vector<8x1xf32> to vector<8x49xf32>
    %2520 = vector.broadcast %189 : vector<1x49xf32> to vector<8x49xf32>
    %2521 = arith.mulf %2519, %2520 : vector<8x49xf32>
    %2522 = arith.addf %2518, %2521 : vector<8x49xf32>
    %2523 = vector.broadcast %215 : vector<8x1xf32> to vector<8x49xf32>
    %2524 = vector.broadcast %191 : vector<1x49xf32> to vector<8x49xf32>
    %2525 = arith.mulf %2523, %2524 : vector<8x49xf32>
    %2526 = arith.addf %2522, %2525 : vector<8x49xf32>
    %2527 = vector.broadcast %217 : vector<8x1xf32> to vector<8x49xf32>
    %2528 = vector.broadcast %193 : vector<1x49xf32> to vector<8x49xf32>
    %2529 = arith.mulf %2527, %2528 : vector<8x49xf32>
    %2530 = arith.addf %2526, %2529 : vector<8x49xf32>
    %2531 = arith.maximumf %2493, %2530 : vector<8x49xf32>
    %cst_608 = arith.constant 0.000000e+00 : f32
    %2532 = vector.broadcast %cst_608 : f32 to vector<8x49xf32>
    %2533 = vector.broadcast %201 : vector<8x1xf32> to vector<8x49xf32>
    %2534 = vector.broadcast %151 : vector<1x49xf32> to vector<8x49xf32>
    %2535 = arith.mulf %2533, %2534 : vector<8x49xf32>
    %2536 = arith.addf %2532, %2535 : vector<8x49xf32>
    %2537 = vector.broadcast %203 : vector<8x1xf32> to vector<8x49xf32>
    %2538 = vector.broadcast %153 : vector<1x49xf32> to vector<8x49xf32>
    %2539 = arith.mulf %2537, %2538 : vector<8x49xf32>
    %2540 = arith.addf %2536, %2539 : vector<8x49xf32>
    %2541 = vector.broadcast %205 : vector<8x1xf32> to vector<8x49xf32>
    %2542 = vector.broadcast %155 : vector<1x49xf32> to vector<8x49xf32>
    %2543 = arith.mulf %2541, %2542 : vector<8x49xf32>
    %2544 = arith.addf %2540, %2543 : vector<8x49xf32>
    %2545 = vector.broadcast %207 : vector<8x1xf32> to vector<8x49xf32>
    %2546 = vector.broadcast %171 : vector<1x49xf32> to vector<8x49xf32>
    %2547 = arith.mulf %2545, %2546 : vector<8x49xf32>
    %2548 = arith.addf %2544, %2547 : vector<8x49xf32>
    %2549 = vector.broadcast %209 : vector<8x1xf32> to vector<8x49xf32>
    %2550 = vector.broadcast %173 : vector<1x49xf32> to vector<8x49xf32>
    %2551 = arith.mulf %2549, %2550 : vector<8x49xf32>
    %2552 = arith.addf %2548, %2551 : vector<8x49xf32>
    %2553 = vector.broadcast %211 : vector<8x1xf32> to vector<8x49xf32>
    %2554 = vector.broadcast %175 : vector<1x49xf32> to vector<8x49xf32>
    %2555 = arith.mulf %2553, %2554 : vector<8x49xf32>
    %2556 = arith.addf %2552, %2555 : vector<8x49xf32>
    %2557 = vector.broadcast %213 : vector<8x1xf32> to vector<8x49xf32>
    %2558 = vector.broadcast %191 : vector<1x49xf32> to vector<8x49xf32>
    %2559 = arith.mulf %2557, %2558 : vector<8x49xf32>
    %2560 = arith.addf %2556, %2559 : vector<8x49xf32>
    %2561 = vector.broadcast %215 : vector<8x1xf32> to vector<8x49xf32>
    %2562 = vector.broadcast %193 : vector<1x49xf32> to vector<8x49xf32>
    %2563 = arith.mulf %2561, %2562 : vector<8x49xf32>
    %2564 = arith.addf %2560, %2563 : vector<8x49xf32>
    %2565 = vector.broadcast %217 : vector<8x1xf32> to vector<8x49xf32>
    %2566 = vector.broadcast %195 : vector<1x49xf32> to vector<8x49xf32>
    %2567 = arith.mulf %2565, %2566 : vector<8x49xf32>
    %2568 = arith.addf %2564, %2567 : vector<8x49xf32>
    %2569 = arith.maximumf %2531, %2568 : vector<8x49xf32>
    %2570 = vector.broadcast %218 : vector<8x1xf32> to vector<8x49xf32>
    %2571 = arith.addf %2569, %2570 : vector<8x49xf32>
    %cst_609 = arith.constant 0.000000e+00 : f32
    %2572 = vector.broadcast %cst_609 : f32 to vector<8x49xf32>
    %2573 = arith.maximumf %2571, %2572 : vector<8x49xf32>
    %c14 = arith.constant 14 : index
    %c0_610 = arith.constant 0 : index
    %2574 = vector.load %arg2[%c14, %c0_610] : memref<16x49xf32, #tpu.memory_space<vmem>>, vector<1x49xf32>
    %2575 = vector.broadcast %2574 : vector<1x49xf32> to vector<8x49xf32>
    %2576 = arith.mulf %2573, %2575 : vector<8x49xf32>
    %cst_611 = arith.constant 0.000000e+00 : f32
    %2577 = vector.broadcast %cst_611 : f32 to vector<8x49xf32>
    %2578 = vector.broadcast %201 : vector<8x1xf32> to vector<8x49xf32>
    %2579 = vector.broadcast %133 : vector<1x49xf32> to vector<8x49xf32>
    %2580 = arith.mulf %2578, %2579 : vector<8x49xf32>
    %2581 = arith.addf %2577, %2580 : vector<8x49xf32>
    %2582 = vector.broadcast %203 : vector<8x1xf32> to vector<8x49xf32>
    %2583 = vector.broadcast %135 : vector<1x49xf32> to vector<8x49xf32>
    %2584 = arith.mulf %2582, %2583 : vector<8x49xf32>
    %2585 = arith.addf %2581, %2584 : vector<8x49xf32>
    %2586 = vector.broadcast %205 : vector<8x1xf32> to vector<8x49xf32>
    %2587 = vector.broadcast %137 : vector<1x49xf32> to vector<8x49xf32>
    %2588 = arith.mulf %2586, %2587 : vector<8x49xf32>
    %2589 = arith.addf %2585, %2588 : vector<8x49xf32>
    %2590 = vector.broadcast %207 : vector<8x1xf32> to vector<8x49xf32>
    %2591 = vector.broadcast %153 : vector<1x49xf32> to vector<8x49xf32>
    %2592 = arith.mulf %2590, %2591 : vector<8x49xf32>
    %2593 = arith.addf %2589, %2592 : vector<8x49xf32>
    %2594 = vector.broadcast %209 : vector<8x1xf32> to vector<8x49xf32>
    %2595 = vector.broadcast %155 : vector<1x49xf32> to vector<8x49xf32>
    %2596 = arith.mulf %2594, %2595 : vector<8x49xf32>
    %2597 = arith.addf %2593, %2596 : vector<8x49xf32>
    %2598 = vector.broadcast %211 : vector<8x1xf32> to vector<8x49xf32>
    %2599 = vector.broadcast %157 : vector<1x49xf32> to vector<8x49xf32>
    %2600 = arith.mulf %2598, %2599 : vector<8x49xf32>
    %2601 = arith.addf %2597, %2600 : vector<8x49xf32>
    %2602 = vector.broadcast %213 : vector<8x1xf32> to vector<8x49xf32>
    %2603 = vector.broadcast %173 : vector<1x49xf32> to vector<8x49xf32>
    %2604 = arith.mulf %2602, %2603 : vector<8x49xf32>
    %2605 = arith.addf %2601, %2604 : vector<8x49xf32>
    %2606 = vector.broadcast %215 : vector<8x1xf32> to vector<8x49xf32>
    %2607 = vector.broadcast %175 : vector<1x49xf32> to vector<8x49xf32>
    %2608 = arith.mulf %2606, %2607 : vector<8x49xf32>
    %2609 = arith.addf %2605, %2608 : vector<8x49xf32>
    %2610 = vector.broadcast %217 : vector<8x1xf32> to vector<8x49xf32>
    %2611 = vector.broadcast %177 : vector<1x49xf32> to vector<8x49xf32>
    %2612 = arith.mulf %2610, %2611 : vector<8x49xf32>
    %2613 = arith.addf %2609, %2612 : vector<8x49xf32>
    %cst_612 = arith.constant 0.000000e+00 : f32
    %2614 = vector.broadcast %cst_612 : f32 to vector<8x49xf32>
    %2615 = vector.broadcast %201 : vector<8x1xf32> to vector<8x49xf32>
    %2616 = vector.broadcast %135 : vector<1x49xf32> to vector<8x49xf32>
    %2617 = arith.mulf %2615, %2616 : vector<8x49xf32>
    %2618 = arith.addf %2614, %2617 : vector<8x49xf32>
    %2619 = vector.broadcast %203 : vector<8x1xf32> to vector<8x49xf32>
    %2620 = vector.broadcast %137 : vector<1x49xf32> to vector<8x49xf32>
    %2621 = arith.mulf %2619, %2620 : vector<8x49xf32>
    %2622 = arith.addf %2618, %2621 : vector<8x49xf32>
    %2623 = vector.broadcast %205 : vector<8x1xf32> to vector<8x49xf32>
    %2624 = vector.broadcast %139 : vector<1x49xf32> to vector<8x49xf32>
    %2625 = arith.mulf %2623, %2624 : vector<8x49xf32>
    %2626 = arith.addf %2622, %2625 : vector<8x49xf32>
    %2627 = vector.broadcast %207 : vector<8x1xf32> to vector<8x49xf32>
    %2628 = vector.broadcast %155 : vector<1x49xf32> to vector<8x49xf32>
    %2629 = arith.mulf %2627, %2628 : vector<8x49xf32>
    %2630 = arith.addf %2626, %2629 : vector<8x49xf32>
    %2631 = vector.broadcast %209 : vector<8x1xf32> to vector<8x49xf32>
    %2632 = vector.broadcast %157 : vector<1x49xf32> to vector<8x49xf32>
    %2633 = arith.mulf %2631, %2632 : vector<8x49xf32>
    %2634 = arith.addf %2630, %2633 : vector<8x49xf32>
    %2635 = vector.broadcast %211 : vector<8x1xf32> to vector<8x49xf32>
    %2636 = vector.broadcast %159 : vector<1x49xf32> to vector<8x49xf32>
    %2637 = arith.mulf %2635, %2636 : vector<8x49xf32>
    %2638 = arith.addf %2634, %2637 : vector<8x49xf32>
    %2639 = vector.broadcast %213 : vector<8x1xf32> to vector<8x49xf32>
    %2640 = vector.broadcast %175 : vector<1x49xf32> to vector<8x49xf32>
    %2641 = arith.mulf %2639, %2640 : vector<8x49xf32>
    %2642 = arith.addf %2638, %2641 : vector<8x49xf32>
    %2643 = vector.broadcast %215 : vector<8x1xf32> to vector<8x49xf32>
    %2644 = vector.broadcast %177 : vector<1x49xf32> to vector<8x49xf32>
    %2645 = arith.mulf %2643, %2644 : vector<8x49xf32>
    %2646 = arith.addf %2642, %2645 : vector<8x49xf32>
    %2647 = vector.broadcast %217 : vector<8x1xf32> to vector<8x49xf32>
    %2648 = vector.broadcast %179 : vector<1x49xf32> to vector<8x49xf32>
    %2649 = arith.mulf %2647, %2648 : vector<8x49xf32>
    %2650 = arith.addf %2646, %2649 : vector<8x49xf32>
    %2651 = arith.maximumf %2613, %2650 : vector<8x49xf32>
    %cst_613 = arith.constant 0.000000e+00 : f32
    %2652 = vector.broadcast %cst_613 : f32 to vector<8x49xf32>
    %2653 = vector.broadcast %201 : vector<8x1xf32> to vector<8x49xf32>
    %2654 = vector.broadcast %153 : vector<1x49xf32> to vector<8x49xf32>
    %2655 = arith.mulf %2653, %2654 : vector<8x49xf32>
    %2656 = arith.addf %2652, %2655 : vector<8x49xf32>
    %2657 = vector.broadcast %203 : vector<8x1xf32> to vector<8x49xf32>
    %2658 = vector.broadcast %155 : vector<1x49xf32> to vector<8x49xf32>
    %2659 = arith.mulf %2657, %2658 : vector<8x49xf32>
    %2660 = arith.addf %2656, %2659 : vector<8x49xf32>
    %2661 = vector.broadcast %205 : vector<8x1xf32> to vector<8x49xf32>
    %2662 = vector.broadcast %157 : vector<1x49xf32> to vector<8x49xf32>
    %2663 = arith.mulf %2661, %2662 : vector<8x49xf32>
    %2664 = arith.addf %2660, %2663 : vector<8x49xf32>
    %2665 = vector.broadcast %207 : vector<8x1xf32> to vector<8x49xf32>
    %2666 = vector.broadcast %173 : vector<1x49xf32> to vector<8x49xf32>
    %2667 = arith.mulf %2665, %2666 : vector<8x49xf32>
    %2668 = arith.addf %2664, %2667 : vector<8x49xf32>
    %2669 = vector.broadcast %209 : vector<8x1xf32> to vector<8x49xf32>
    %2670 = vector.broadcast %175 : vector<1x49xf32> to vector<8x49xf32>
    %2671 = arith.mulf %2669, %2670 : vector<8x49xf32>
    %2672 = arith.addf %2668, %2671 : vector<8x49xf32>
    %2673 = vector.broadcast %211 : vector<8x1xf32> to vector<8x49xf32>
    %2674 = vector.broadcast %177 : vector<1x49xf32> to vector<8x49xf32>
    %2675 = arith.mulf %2673, %2674 : vector<8x49xf32>
    %2676 = arith.addf %2672, %2675 : vector<8x49xf32>
    %2677 = vector.broadcast %213 : vector<8x1xf32> to vector<8x49xf32>
    %2678 = vector.broadcast %193 : vector<1x49xf32> to vector<8x49xf32>
    %2679 = arith.mulf %2677, %2678 : vector<8x49xf32>
    %2680 = arith.addf %2676, %2679 : vector<8x49xf32>
    %2681 = vector.broadcast %215 : vector<8x1xf32> to vector<8x49xf32>
    %2682 = vector.broadcast %195 : vector<1x49xf32> to vector<8x49xf32>
    %2683 = arith.mulf %2681, %2682 : vector<8x49xf32>
    %2684 = arith.addf %2680, %2683 : vector<8x49xf32>
    %2685 = vector.broadcast %217 : vector<8x1xf32> to vector<8x49xf32>
    %2686 = vector.broadcast %197 : vector<1x49xf32> to vector<8x49xf32>
    %2687 = arith.mulf %2685, %2686 : vector<8x49xf32>
    %2688 = arith.addf %2684, %2687 : vector<8x49xf32>
    %2689 = arith.maximumf %2651, %2688 : vector<8x49xf32>
    %cst_614 = arith.constant 0.000000e+00 : f32
    %2690 = vector.broadcast %cst_614 : f32 to vector<8x49xf32>
    %2691 = vector.broadcast %201 : vector<8x1xf32> to vector<8x49xf32>
    %2692 = vector.broadcast %155 : vector<1x49xf32> to vector<8x49xf32>
    %2693 = arith.mulf %2691, %2692 : vector<8x49xf32>
    %2694 = arith.addf %2690, %2693 : vector<8x49xf32>
    %2695 = vector.broadcast %203 : vector<8x1xf32> to vector<8x49xf32>
    %2696 = vector.broadcast %157 : vector<1x49xf32> to vector<8x49xf32>
    %2697 = arith.mulf %2695, %2696 : vector<8x49xf32>
    %2698 = arith.addf %2694, %2697 : vector<8x49xf32>
    %2699 = vector.broadcast %205 : vector<8x1xf32> to vector<8x49xf32>
    %2700 = vector.broadcast %159 : vector<1x49xf32> to vector<8x49xf32>
    %2701 = arith.mulf %2699, %2700 : vector<8x49xf32>
    %2702 = arith.addf %2698, %2701 : vector<8x49xf32>
    %2703 = vector.broadcast %207 : vector<8x1xf32> to vector<8x49xf32>
    %2704 = vector.broadcast %175 : vector<1x49xf32> to vector<8x49xf32>
    %2705 = arith.mulf %2703, %2704 : vector<8x49xf32>
    %2706 = arith.addf %2702, %2705 : vector<8x49xf32>
    %2707 = vector.broadcast %209 : vector<8x1xf32> to vector<8x49xf32>
    %2708 = vector.broadcast %177 : vector<1x49xf32> to vector<8x49xf32>
    %2709 = arith.mulf %2707, %2708 : vector<8x49xf32>
    %2710 = arith.addf %2706, %2709 : vector<8x49xf32>
    %2711 = vector.broadcast %211 : vector<8x1xf32> to vector<8x49xf32>
    %2712 = vector.broadcast %179 : vector<1x49xf32> to vector<8x49xf32>
    %2713 = arith.mulf %2711, %2712 : vector<8x49xf32>
    %2714 = arith.addf %2710, %2713 : vector<8x49xf32>
    %2715 = vector.broadcast %213 : vector<8x1xf32> to vector<8x49xf32>
    %2716 = vector.broadcast %195 : vector<1x49xf32> to vector<8x49xf32>
    %2717 = arith.mulf %2715, %2716 : vector<8x49xf32>
    %2718 = arith.addf %2714, %2717 : vector<8x49xf32>
    %2719 = vector.broadcast %215 : vector<8x1xf32> to vector<8x49xf32>
    %2720 = vector.broadcast %197 : vector<1x49xf32> to vector<8x49xf32>
    %2721 = arith.mulf %2719, %2720 : vector<8x49xf32>
    %2722 = arith.addf %2718, %2721 : vector<8x49xf32>
    %2723 = vector.broadcast %217 : vector<8x1xf32> to vector<8x49xf32>
    %2724 = vector.broadcast %199 : vector<1x49xf32> to vector<8x49xf32>
    %2725 = arith.mulf %2723, %2724 : vector<8x49xf32>
    %2726 = arith.addf %2722, %2725 : vector<8x49xf32>
    %2727 = arith.maximumf %2689, %2726 : vector<8x49xf32>
    %2728 = vector.broadcast %218 : vector<8x1xf32> to vector<8x49xf32>
    %2729 = arith.addf %2727, %2728 : vector<8x49xf32>
    %cst_615 = arith.constant 0.000000e+00 : f32
    %2730 = vector.broadcast %cst_615 : f32 to vector<8x49xf32>
    %2731 = arith.maximumf %2729, %2730 : vector<8x49xf32>
    %c15 = arith.constant 15 : index
    %c0_616 = arith.constant 0 : index
    %2732 = vector.load %arg2[%c15, %c0_616] : memref<16x49xf32, #tpu.memory_space<vmem>>, vector<1x49xf32>
    %2733 = vector.broadcast %2732 : vector<1x49xf32> to vector<8x49xf32>
    %2734 = arith.mulf %2731, %2733 : vector<8x49xf32>
    %2735 = tpu.concatenate %376, %534, %692, %1008, %1163, %1318, %1634, %1789, %1944 in 0 : vector<8x49xf32>, vector<8x49xf32>, vector<8x49xf32>, vector<8x49xf32>, vector<8x49xf32>, vector<8x49xf32>, vector<8x49xf32>, vector<8x49xf32>, vector<8x49xf32> -> vector<72x49xf32>
    %c0_617 = arith.constant 0 : index
    %c0_618 = arith.constant 0 : index
    %2736 = vector.load %arg5[%c0_617, %c0_618] : memref<16x72xf32, #tpu.memory_space<vmem>>, vector<16x72xf32>
    %cst_619 = arith.constant dense<0.000000e+00> : vector<16x49xf32>
    %2737 = tpu.matmul %2736, %2735, %cst_619 {dimension_numbers = #tpu.dot_dimension_numbers<[1], [0], [0], [1], [0, 0, 1, 1], [], []>} : vector<16x72xf32>, vector<72x49xf32>, vector<16x49xf32> -> vector<16x49xf32>
    %2738 = tpu.concatenate %534, %692, %850, %1163, %1318, %1476, %1789, %1944, %2102 in 0 : vector<8x49xf32>, vector<8x49xf32>, vector<8x49xf32>, vector<8x49xf32>, vector<8x49xf32>, vector<8x49xf32>, vector<8x49xf32>, vector<8x49xf32>, vector<8x49xf32> -> vector<72x49xf32>
    %c0_620 = arith.constant 0 : index
    %c0_621 = arith.constant 0 : index
    %2739 = vector.load %arg5[%c0_620, %c0_621] : memref<16x72xf32, #tpu.memory_space<vmem>>, vector<16x72xf32>
    %cst_622 = arith.constant dense<0.000000e+00> : vector<16x49xf32>
    %2740 = tpu.matmul %2739, %2738, %cst_622 {dimension_numbers = #tpu.dot_dimension_numbers<[1], [0], [0], [1], [0, 0, 1, 1], [], []>} : vector<16x72xf32>, vector<72x49xf32>, vector<16x49xf32> -> vector<16x49xf32>
    %2741 = arith.maximumf %2737, %2740 : vector<16x49xf32>
    %2742 = tpu.concatenate %1008, %1163, %1318, %1634, %1789, %1944, %2260, %2418, %2576 in 0 : vector<8x49xf32>, vector<8x49xf32>, vector<8x49xf32>, vector<8x49xf32>, vector<8x49xf32>, vector<8x49xf32>, vector<8x49xf32>, vector<8x49xf32>, vector<8x49xf32> -> vector<72x49xf32>
    %c0_623 = arith.constant 0 : index
    %c0_624 = arith.constant 0 : index
    %2743 = vector.load %arg5[%c0_623, %c0_624] : memref<16x72xf32, #tpu.memory_space<vmem>>, vector<16x72xf32>
    %cst_625 = arith.constant dense<0.000000e+00> : vector<16x49xf32>
    %2744 = tpu.matmul %2743, %2742, %cst_625 {dimension_numbers = #tpu.dot_dimension_numbers<[1], [0], [0], [1], [0, 0, 1, 1], [], []>} : vector<16x72xf32>, vector<72x49xf32>, vector<16x49xf32> -> vector<16x49xf32>
    %2745 = arith.maximumf %2741, %2744 : vector<16x49xf32>
    %2746 = tpu.concatenate %1163, %1318, %1476, %1789, %1944, %2102, %2418, %2576, %2734 in 0 : vector<8x49xf32>, vector<8x49xf32>, vector<8x49xf32>, vector<8x49xf32>, vector<8x49xf32>, vector<8x49xf32>, vector<8x49xf32>, vector<8x49xf32>, vector<8x49xf32> -> vector<72x49xf32>
    %c0_626 = arith.constant 0 : index
    %c0_627 = arith.constant 0 : index
    %2747 = vector.load %arg5[%c0_626, %c0_627] : memref<16x72xf32, #tpu.memory_space<vmem>>, vector<16x72xf32>
    %cst_628 = arith.constant dense<0.000000e+00> : vector<16x49xf32>
    %2748 = tpu.matmul %2747, %2746, %cst_628 {dimension_numbers = #tpu.dot_dimension_numbers<[1], [0], [0], [1], [0, 0, 1, 1], [], []>} : vector<16x72xf32>, vector<72x49xf32>, vector<16x49xf32> -> vector<16x49xf32>
    %2749 = arith.maximumf %2745, %2748 : vector<16x49xf32>
    %c0_629 = arith.constant 0 : index
    %c0_630 = arith.constant 0 : index
    %2750 = vector.load %arg6[%c0_629, %c0_630] : memref<16x1xf32, #tpu.memory_space<vmem>>, vector<16x1xf32>
    %2751 = vector.broadcast %2750 : vector<16x1xf32> to vector<16x49xf32>
    %2752 = arith.addf %2749, %2751 : vector<16x49xf32>
    %cst_631 = arith.constant 0.000000e+00 : f32
    %2753 = vector.broadcast %cst_631 : f32 to vector<16x49xf32>
    %2754 = arith.maximumf %2752, %2753 : vector<16x49xf32>
    %2755 = vector.shape_cast %2754 : vector<16x49xf32> to vector<16x49x1xf32>
    %c0_632 = arith.constant 0 : index
    %c0_633 = arith.constant 0 : index
    %c0_634 = arith.constant 0 : index
    %2756 = vector.load %arg7[%c0_632, %c0_633, %c0_634] : memref<16x49x64xf32, #tpu.memory_space<vmem>>, vector<16x49x64xf32>
    %2757 = vector.broadcast %2755 : vector<16x49x1xf32> to vector<16x49x64xf32>
    %2758 = arith.mulf %2757, %2756 : vector<16x49x64xf32>
    %cst_635 = arith.constant dense<0.000000e+00> : vector<49x64xf32>
    %2759 = vector.multi_reduction <add>, %2758, %cst_635 [0] : vector<16x49x64xf32> to vector<49x64xf32>
    %cst_636 = arith.constant dense<0.000000e+00> : vector<64xf32>
    %2760 = vector.multi_reduction <add>, %2759, %cst_636 [0] : vector<49x64xf32> to vector<64xf32>
    %2761 = vector.shape_cast %2760 : vector<64xf32> to vector<1x64xf32>
    %c0_637 = arith.constant 0 : index
    %c0_638 = arith.constant 0 : index
    %2762 = vector.load %arg8[%c0_637, %c0_638] : memref<1x64xf32, #tpu.memory_space<vmem>>, vector<1x64xf32>
    %2763 = arith.addf %2761, %2762 : vector<1x64xf32>
    %cst_639 = arith.constant 0.000000e+00 : f32
    %2764 = vector.broadcast %cst_639 : f32 to vector<1x64xf32>
    %2765 = arith.maximumf %2763, %2764 : vector<1x64xf32>
    %c0_640 = arith.constant 0 : index
    %c0_641 = arith.constant 0 : index
    %2766 = vector.load %arg9[%c0_640, %c0_641] : memref<64x10xf32, #tpu.memory_space<vmem>>, vector<64x10xf32>
    %cst_642 = arith.constant dense<0.000000e+00> : vector<1x10xf32>
    %2767 = tpu.matmul %2765, %2766, %cst_642 {dimension_numbers = #tpu.dot_dimension_numbers<[1], [0], [0], [1], [0, 0, 1, 1], [], []>} : vector<1x64xf32>, vector<64x10xf32>, vector<1x10xf32> -> vector<1x10xf32>
    %c0_643 = arith.constant 0 : index
    %c0_644 = arith.constant 0 : index
    %2768 = vector.load %arg10[%c0_643, %c0_644] : memref<1x10xf32, #tpu.memory_space<vmem>>, vector<1x10xf32>
    %2769 = arith.addf %2767, %2768 : vector<1x10xf32>
    %c0_645 = arith.constant 0 : index
    %c0_646 = arith.constant 0 : index
    %c0_647 = arith.constant 0 : index
    %2770 = vector.load %arg11[%c0_645, %c0_646, %c0_647] : memref<1x1x10xf32, #tpu.memory_space<vmem>>, vector<1x1x10xf32>
    %2771 = vector.shape_cast %2770 : vector<1x1x10xf32> to vector<1x10xf32>
    %2772 = vector.shape_cast %2769 : vector<1x10xf32> to vector<1x1x10xf32>
    tpu.vector_store %arg11[%c0_645, %c0_646, %c0_647], %2772 {strides = array<i32>} : memref<1x1x10xf32, #tpu.memory_space<vmem>>, vector<1x1x10xf32>,
    return
  }
  func.func @transform_0(%arg0: i32) -> (i32, i32, i32, i32, i32) {
    %c0_i32 = arith.constant 0 : i32
    %c0_i32_0 = arith.constant 0 : i32
    %c0_i32_1 = arith.constant 0 : i32
    %c0_i32_2 = arith.constant 0 : i32
    %c0_i32_3 = arith.constant 0 : i32
    return %arg0, %c0_i32, %c0_i32_0, %c0_i32_1, %c0_i32_2 : i32, i32, i32, i32, i32
  }
  func.func @transform_1(%arg0: i32) -> (i32, i32) {
    %c0_i32 = arith.constant 0 : i32
    %c0_i32_0 = arith.constant 0 : i32
    %c0_i32_1 = arith.constant 0 : i32
    return %c0_i32, %c0_i32_0 : i32, i32
  }
  func.func @transform_2(%arg0: i32) -> (i32, i32, i32) {
    %c0_i32 = arith.constant 0 : i32
    %c0_i32_0 = arith.constant 0 : i32
    %c0_i32_1 = arith.constant 0 : i32
    %c0_i32_2 = arith.constant 0 : i32
    return %c0_i32, %c0_i32_0, %c0_i32_1 : i32, i32, i32
  }
  func.func @transform_3(%arg0: i32) -> (i32, i32) {
    %c0_i32 = arith.constant 0 : i32
    %c0_i32_0 = arith.constant 0 : i32
    %c0_i32_1 = arith.constant 0 : i32
    return %c0_i32, %c0_i32_0 : i32, i32
  }
  func.func @transform_4(%arg0: i32) -> (i32, i32) {
    %c0_i32 = arith.constant 0 : i32
    %c0_i32_0 = arith.constant 0 : i32
    %c0_i32_1 = arith.constant 0 : i32
    return %c0_i32, %c0_i32_0 : i32, i32
  }
  func.func @transform_5(%arg0: i32) -> (i32, i32) {
    %c0_i32 = arith.constant 0 : i32
    %c0_i32_0 = arith.constant 0 : i32
    %c0_i32_1 = arith.constant 0 : i32
    return %c0_i32, %c0_i32_0 : i32, i32
  }
  func.func @transform_6(%arg0: i32) -> (i32, i32, i32) {
    %c0_i32 = arith.constant 0 : i32
    %c0_i32_0 = arith.constant 0 : i32
    %c0_i32_1 = arith.constant 0 : i32
    %c0_i32_2 = arith.constant 0 : i32
    return %c0_i32, %c0_i32_0, %c0_i32_1 : i32, i32, i32
  }
  func.func @transform_7(%arg0: i32) -> (i32, i32) {
    %c0_i32 = arith.constant 0 : i32
    %c0_i32_0 = arith.constant 0 : i32
    %c0_i32_1 = arith.constant 0 : i32
    return %c0_i32, %c0_i32_0 : i32, i32
  }
  func.func @transform_8(%arg0: i32) -> (i32, i32) {
    %c0_i32 = arith.constant 0 : i32
    %c0_i32_0 = arith.constant 0 : i32
    %c0_i32_1 = arith.constant 0 : i32
    return %c0_i32, %c0_i32_0 : i32, i32
  }
  func.func @transform_9(%arg0: i32) -> (i32, i32) {
    %c0_i32 = arith.constant 0 : i32
    %c0_i32_0 = arith.constant 0 : i32
    %c0_i32_1 = arith.constant 0 : i32
    return %c0_i32, %c0_i32_0 : i32, i32
  }
  func.func @transform_10(%arg0: i32) -> (i32, i32, i32) {
    %c0_i32 = arith.constant 0 : i32
    %c0_i32_0 = arith.constant 0 : i32
    %c0_i32_1 = arith.constant 0 : i32
    return %arg0, %c0_i32, %c0_i32_0 : i32, i32, i32
  }
}

</mosaic_0001>

<bundles_post_ra>
// kernel: simple_cnn_pallas.1
= control target key start
LH: loop header
LB: loop body
LE: loop exit
PB: predicated region body
PF: predicated region fallthrough
CT: control target
= control target key end

     0   :  { %s6746_s0 = inlined_call_operand.vmem [shape: f32[2,12,12,1,49], index: 0, kind: input, shape index: {}]   ;;  %s6747_s1 = inlined_call_operand.vmem [shape: f32[16,49], index: 1, kind: input, shape index: {}]   ;;  %s6748_s2 = inlined_call_operand.vmem [shape: f32[9,8,1], index: 2, kind: input, shape index: {}]   ;;  %s6749_s3 = inlined_call_operand.vmem [shape: f32[8,1], index: 3, kind: input, shape index: {}]   ;;  %s6750_s4 = inlined_call_operand.vmem [shape: f32[16,72], index: 4, kind: input, shape index: {}]   ;;  %s6751_s5 = inlined_call_operand.vmem [shape: f32[16,1], index: 5, kind: input, shape index: {}]   ;;  %s6752_s6 = inlined_call_operand.vmem [shape: f32[16,49,64], index: 6, kind: input, shape index: {}]   ;;  %s6753_s7 = inlined_call_operand.vmem [shape: f32[1,64], index: 7, kind: input, shape index: {}]   ;;  %s6754_s8 = inlined_call_operand.vmem [shape: f32[64,10], index: 8, kind: input, shape index: {}]   ;;  %s6755_s9 = inlined_call_operand.vmem [shape: f32[1,10], index: 9, kind: input, shape index: {}]   ;;  %s6756_s10 = inlined_call_operand.hbm [shape: f32[2,1,10], index: 10, kind: output, shape index: {}]  }
   0x1   :  { %6777 = sst [smem:[#allocation47_spill]] %s6746_s0 }
   0x2   :  { %15 = vsyncpa [#allocation3], 0 }
   0x3   :  { %17 = vsyncpa [#allocation3 + $0x1], 0  ;;  %s4109_s13 = smov 0   ;;  %s4111_s14 = smov 0  }
   0x4   :  { %s4113_s15 = smov 0   ;;  %s4115_s16 = smov 0  }
   0x5 LB: > { %s4130_s17 = sadd.s32 4294967295, %s4051_s16   ;;  %s3567_s18 = sadd.s32 4294967294, %s4051_s16   ;;  %s4051_s16 = sphi %s4115_s16, %s6868_s16   ;;  %s4047_s15 = sphi %s4113_s15, %s6867_s15   ;;  %s4043_s14 = sphi %s4111_s14, %s6866_s14   ;;  %s4039_s13 = sphi %s4109_s13, %s6865_s13  }
   0x6   : > { %s4134_s19 = sadd.s32 1, %s4051_s16   ;;  %s245_s20 = sadd.s32 1, %s4047_s15 }
   0x7   : > { %s242_s21 = ssub.s32 %s4051_s16, %s4134_s19  ;;  %p255_p0 = scmp.ne.s32.totalorder %s4047_s15, %s4043_s14 }
   0x8   : > { %p243_p1 = scmp.eq.s32.totalorder %s242_s21, 0  ;;  %p256_p2 = scmp.eq.s32.totalorder %s4130_s17, 1 }
   0x9   : > { %p261_p3 = scmp.ne.s32.totalorder %s4043_s14, %s4039_s13  ;;  %p262_p4 = scmp.eq.s32.totalorder %s3567_s18, 1 }
   0xa   : > { %s4145_s22 = scalar_select %p243_p1, %s4047_s15, %s245_s20  }
   0xb   : > { %p4147_p5 = por %p256_p2, %p255_p0  ;;  %p4151_p6 = por %p262_p4, %p261_p3 }
   0xc   : > { %p3570_p7 = scmp.ge.s32.totalorder %s4051_s16, 1  ;;  %p314_p8 = scmp.lt.s32.totalorder %s4051_s16, 3 }
   0xe   : > { %p315_p9 = pnand %p3570_p7, %p314_p8 }
  0x10   : > { %318 = sbr.rel (%p315_p9) target bundleno = 1537 (0x601), region = 60 }
  0x15   : > { %v3671_v0 = vld [vmem:[%s6748_s2 + $0x10] sm:$0xff]  ;;  %v553_v1 = vld [vmem:[%s6748_s2] sm:$0xff]  ;;  %p350_p10 = scmp.lt.s32.totalorder %s4130_s17, 1  ;;  %v4053_v2 = vmov 0   ;;  %v3672_v4 = vld [vmem:[%s6748_s2 + $0x18] sm:$0xff]  ;;  %s6780_s0 = sld [smem:[#allocation47_spill]] }
  0x16   : > { %3731 = vset.pattern.permute.xlu1 %v4053_v2  ;;  %3730 = vset.pattern.permute.xlu0 %v4053_v2  ;;  %v3673_v3 = vld [vmem:[%s6748_s2 + $0x20] sm:$0xff]  ;;  %v3670_v5 = vld [vmem:[%s6748_s2 + $0x8] sm:$0xff]  ;;  %v3676_v7 = vld [vmem:[%s6748_s2 + $0x38] sm:$0xff]  ;;  %vm2191_vm0 = vcmask 588800   ;;  %vm3224_vm1 = vcmask 523264   ;;  %vm3411_vm2 = vcmask 516096   ;;  %s3508_s20 = scalar_lea.hbm %s6756_s10, %s4130_s17 }
  0x17   : > { %593 = vperm.xlu1 %3731, %v3671_v0   ;;  %573 = vperm.xlu0 %3730, %v553_v1   ;;  %s351_s11 = scalar_select %p350_p10, %s4130_s17, 1  ;;  %v3674_v6 = vld [vmem:[%s6748_s2 + $0x28] sm:$0xff]  ;;  %v3675_v8 = vld [vmem:[%s6748_s2 + $0x30] sm:$0xff]  ;;  %v3677_v9 = vld [vmem:[%s6748_s2 + $0x40] sm:$0xff]  ;;  %vm3497_vm3 = vcmask 73728  }
  0x18   : > { %3732 = vset.pattern.permute.xlu2 %v4053_v2  ;;  %v2296_v10 = vld [vmem:[%s6751_s5] sm:$0xff]  ;;  %v2297_v12 = vld [vmem:[%s6751_s5 + $0x8] sm:$0xff]  ;;  %s3512_s27 = sshll.u32 %s3508_s20, 4  ;;  %s4009_s18 = scalar_lea.hbm %s6756_s10, 2  ;;  %s3513_s27 = int_to_ptr.hbm [resolvable:$true] %s3512_s27 }
  0x19   : > { %613 = vperm.xlu2 %3732, %v3673_v3   ;;  %s3689_s12 = smul.u32 144, %s351_s11  ;;  %v570_v11 = vld [vmem:[%s6749_s3] sm:$0xff]  ;;  %s4003_s30 = sshra.s32 %s3513_s27, 4  ;;  %s4004_s30 = int_to_ptr.hbm [resolvable:$true] %s4003_s30 }
  0x1a   : > { %p4010_p0 = scmp.lt.s32.totalorder %s4004_s30, %s6756_s10 }
  0x1b   : > { %s4177_s28 = scalar_lea.vmem %s6780_s0, %s3689_s12  ;;  %s4005_s0 = scalar_lea.hbm %s4004_s30, 1 }
  0x1c   : > { %v4205_v15 = vld [vmem:[%s4177_s28 + $0x41] ss:$0 sm:$0xff]  ;;  %v4208_v16 = vld [vmem:[%s4177_s28 + $0x42] ss:$0 sm:$0xff]  ;;  %v4211_v17 = vld [vmem:[%s4177_s28 + $0x4d] ss:$0 sm:$0xff]  ;;  %p4006_p11 = scmp.ne.s32.totalorder %s4004_s30, %s4005_s0  ;;  %p4011_p1 = scmp.lt.s32.totalorder %s4009_s18, %s4005_s0 }
  0x1d   : > { %v4214_v18 = vld [vmem:[%s4177_s28 + $0x40] ss:$0 sm:$0xff]  ;;  %v4217_v19 = vld [vmem:[%s4177_s28 + $0x4e] ss:$0 sm:$0xff]  ;;  %v4220_v20 = vld [vmem:[%s4177_s28 + $0x3f] ss:$0 sm:$0xff] }
  0x1e   : > { %v4223_v21 = vld [vmem:[%s4177_s28 + $0x43] ss:$0 sm:$0xff]  ;;  %v4234_v24 = vld [vmem:[%s4177_s28 + $0x4f] ss:$0 sm:$0xff]  ;;  %v4241_v26 = vld [vmem:[%s4177_s28 + $0x4c] ss:$0 sm:$0xff]  ;;  %p4007_p12 = pnand %p4006_p11, %p4147_p5  ;;  %p4012_p2 = por %p4011_p1, %p4010_p0 }
  0x1f   : > { %603 = vperm.xlu1 %3731, %v3672_v4   ;;  %583 = vperm.xlu0 %3730, %v3670_v5   ;;  %6782 = vst [vmem:[#allocation6_spill] sm:$0xff] %v4223_v21  ;;  %v4252_v29 = vld [vmem:[%s4177_s28 + $0x4b] ss:$0 sm:$0xff]  ;;  %v4263_v32 = vld [vmem:[%s4177_s28 + $0x34] ss:$0 sm:$0xff] }
  0x20   : > { %v4274_v35 = vld [vmem:[%s4177_s28 + $0x5a] ss:$0 sm:$0xff]  ;;  %v4287_v39 = vld [vmem:[%s4177_s28 + $0x35] ss:$0 sm:$0xff]  ;;  %v4290_v40 = vld [vmem:[%s4177_s28 + $0x58] ss:$0 sm:$0xff]  ;;  %p4008_p13 = pneg %p4007_p12 }
  0x21   : > { %623 = vperm.xlu2 %3732, %v3674_v6   ;;  %v4293_v41 = vld [vmem:[%s4177_s28 + $0x5b] ss:$0 sm:$0xff]  ;;  %v3842_v46 = vld [vmem:[%s4177_s28 + $0x36] ss:$0 sm:$0xff]  ;;  %v4313_v47 = vld [vmem:[%s4177_s28 + $0x59] ss:$0 sm:$0xff] }
  0x22   : > { %6784 = vst [vmem:[#allocation8_spill] sm:$0xff] %v4293_v41  ;;  %v4332_v52 = vld [vmem:[%s4177_s28 + $0x44] ss:$0 sm:$0xff]  ;;  %v4335_v53 = vld [vmem:[%s4177_s28 + $0x50] ss:$0 sm:$0xff]  ;;  %p4013_p3 = pnand %p4012_p2, %p4008_p13 }
  0x23   : > { %6791 = vst [vmem:[#allocation15_spill] sm:$0xff] %v4332_v52  ;;  %v4346_v57 = vld [vmem:[%s4177_s28 + $0x32] ss:$0 sm:$0xff]  ;;  %v3865_v61 = vld [vmem:[%s4177_s28 + $0x45] ss:$0 sm:$0xff] }
  0x24   : > { %6795 = vst [vmem:[#allocation19_spill] sm:$0xff] %v4346_v57  ;;  %v4362_v62 = vld [vmem:[%s4177_s28 + $0x51] ss:$0 sm:$0xff]  ;;  %v4365_v63 = vld [vmem:[%s4177_s28 + $0x37] ss:$0 sm:$0xff] }
  0x25   : > { %6799 = vst [vmem:[#allocation23_spill] sm:$0xff] %v4362_v62  ;;  %v4368_v0 = vld [vmem:[%s4177_s28 + $0x33] ss:$0 sm:$0xff]  ;;  %v4371_v1 = vld [vmem:[%s4177_s28 + $0x3e] ss:$0 sm:$0xff] }
  0x26   : > { %6800 = vst [vmem:[#allocation24_spill] sm:$0xff] %v4368_v0 }
  0x27   : > { %643 = vperm.xlu1 %3731, %v3676_v7   ;;  %633 = vperm.xlu0 %3730, %v3675_v8  }
  0x29   : > { %653 = vperm.xlu2 %3732, %v3677_v9  }
  0x2f   : > { %2300 = vperm.xlu1 %3731, %v2296_v10   ;;  %741 = vperm.xlu0 %3730, %v570_v11  }
  0x31   : > { %2305 = vperm.xlu2 %3732, %v2297_v12  }
  0x73   : > { %v4200_v13 = vpop.permute.xlu2 %613 }
  0x74   : > { %6781 = vst [vmem:[#allocation5_spill] sm:$0xff] %v4200_v13  ;;  %v4227_v22 = vmul.f32 %v4205_v15, %v4200_v13  ;;  %v4231_v23 = vmul.f32 %v4208_v16, %v4200_v13  ;;  %v4238_v25 = vmul.f32 %v4211_v17, %v4200_v13  ;;  %v4249_v28 = vmul.f32 %v4217_v19, %v4200_v13 }
  0x75   : > { %v4256_v30 = vmul.f32 %v4220_v20, %v4200_v13  ;;  %v4260_v31 = vmul.f32 %v4214_v18, %v4200_v13  ;;  %v4301_v43 = vmul.f32 %v4252_v29, %v4200_v13  ;;  %v4309_v45 = vmul.f32 %v4241_v26, %v4200_v13 }
  0x76   : > { %v4379_v3 = vmul.f32 %v4223_v21, %v4200_v13  ;;  %v4393_v7 = vmul.f32 %v4332_v52, %v4200_v13 }
  0x77   : > { %6786 = vst [vmem:[#allocation10_spill] sm:$0xff] %v4301_v43  ;;  %v4445_v43 = vld [vmem:[%s4177_s28 + $0x5c] ss:$0 sm:$0xff] }
  0x78   : > { %6788 = vst [vmem:[#allocation12_spill] sm:$0xff] %v4309_v45 }
  0x79   : > { %6802 = vst [vmem:[#allocation26_spill] sm:$0xff] %v4379_v3 }
  0x7a   : > { %6805 = vst [vmem:[#allocation29_spill] sm:$0xff] %v4393_v7 }
  0x7b   : > { %v4202_v14 = vpop.permute.xlu2 %623  ;;  %6811 = vst [vmem:[#allocation35_spill] sm:$0xff] %v4445_v43 }
  0x7c   : > { %v4245_v27 = vmul.f32 %v4208_v16, %v4202_v14  ;;  %v4267_v33 = vmul.f32 %v4223_v21, %v4202_v14  ;;  %v4271_v34 = vmul.f32 %v4217_v19, %v4202_v14  ;;  %v4278_v36 = vmul.f32 %v4234_v24, %v4202_v14 }
  0x7d   : > { %v4282_v37 = vmul.f32 %v4214_v18, %v4202_v14  ;;  %v4297_v42 = vmul.f32 %v4205_v15, %v4202_v14  ;;  %v4305_v44 = vmul.f32 %v4241_v26, %v4202_v14  ;;  %v4329_v51 = vmul.f32 %v4211_v17, %v4202_v14 }
  0x7e   : > { %v4383_v4 = vmul.f32 %v4332_v52, %v4202_v14  ;;  %v4396_v8 = vmul.f32 %v3865_v61, %v4202_v14 }
  0x7f   : > { %6785 = vst [vmem:[#allocation9_spill] sm:$0xff] %v4297_v42 }
  0x80   : > { %6787 = vst [vmem:[#allocation11_spill] sm:$0xff] %v4305_v44 }
  0x81   : > { %6790 = vst [vmem:[#allocation14_spill] sm:$0xff] %v4329_v51 }
  0x82   : > { %6803 = vst [vmem:[#allocation27_spill] sm:$0xff] %v4383_v4 }
  0x83   : > { %v4284_v38 = vpop.permute.xlu2 %653  ;;  %6806 = vst [vmem:[#allocation30_spill] sm:$0xff] %v4396_v8 }
  0x84   : > { %6783 = vst [vmem:[#allocation7_spill] sm:$0xff] %v4284_v38  ;;  %v4317_v48 = vmul.f32 %v4217_v19, %v4284_v38  ;;  %v4321_v49 = vmul.f32 %v4234_v24, %v4284_v38  ;;  %v4325_v50 = vmul.f32 %v4274_v35, %v4284_v38  ;;  %v4343_v56 = vmul.f32 %v4293_v41, %v4284_v38  ;;  %v4410_v41 = vld [vmem:[%s4177_s28 + $0x38] ss:$0 sm:$0xff] }
  0x85   : > { %v4350_v58 = vmul.f32 %v4241_v26, %v4284_v38  ;;  %v4354_v59 = vmul.f32 %v4211_v17, %v4284_v38  ;;  %v4358_v60 = vmul.f32 %v4290_v40, %v4284_v38  ;;  %v4375_v2 = vmul.f32 %v4313_v47, %v4284_v38 }
  0x86   : > { %6789 = vst [vmem:[#allocation13_spill] sm:$0xff] %v4325_v50  ;;  %v4387_v5 = vmul.f32 %v4335_v53, %v4284_v38  ;;  %v4400_v9 = vmul.f32 %v4362_v62, %v4284_v38 }
  0x87   : > { %6794 = vst [vmem:[#allocation18_spill] sm:$0xff] %v4343_v56 }
  0x88   : > { %6796 = vst [vmem:[#allocation20_spill] sm:$0xff] %v4350_v58 }
  0x89   : > { %v4337_v54 = vpop.permute.xlu1 %593  ;;  %v4339_v55 = vpop.permute.xlu0 %573  ;;  %6797 = vst [vmem:[#allocation21_spill] sm:$0xff] %v4354_v59 }
  0x8a   : > { %6792 = vst [vmem:[#allocation16_spill] sm:$0xff] %v4337_v54  ;;  %v1628_v6 = vmul.f32 %v4263_v32, %v4339_v55  ;;  %v1632_v10 = vmul.f32 %v3842_v46, %v4337_v54  ;;  %v1649_v11 = vmul.f32 %v4287_v39, %v4339_v55  ;;  %v1653_v12 = vmul.f32 %v4365_v63, %v4337_v54 }
  0x8b   : > { %6793 = vst [vmem:[#allocation17_spill] sm:$0xff] %v4339_v55  ;;  %v1675_v8 = vmul.f32 %v4208_v16, %v4337_v54  ;;  %v1697_v7 = vmul.f32 %v4223_v21, %v4337_v54  ;;  %v1539_v4 = vmul.f32 %v4346_v57, %v4339_v55  ;;  %v1543_v3 = vmul.f32 %v4263_v32, %v4337_v54 }
  0x8c   : > { %6798 = vst [vmem:[#allocation22_spill] sm:$0xff] %v4358_v60  ;;  %v1560_v60 = vmul.f32 %v4368_v0, %v4339_v55  ;;  %v1564_v51 = vmul.f32 %v4287_v39, %v4337_v54  ;;  %v1582_v45 = vmul.f32 %v4371_v1, %v4339_v55  ;;  %v4431_v59 = vmul.f32 %v4214_v18, %v4337_v54 }
  0x8d   : > { %6801 = vst [vmem:[#allocation25_spill] sm:$0xff] %v4375_v2  ;;  %v3863_v2 = vld [vmem:[%s4177_s28 + $0x39] ss:$0 sm:$0xff]  ;;  %v4435_v44 = vmul.f32 %v4220_v20, %v4339_v55  ;;  %v4439_v57 = vmul.f32 %v4205_v15, %v4337_v54  ;;  %v4442_v58 = vmul.f32 %v3842_v46, %v4339_v55  ;;  %v4449_v56 = vmul.f32 %v4410_v41, %v4337_v54 }
  0x8e   : > { %6804 = vst [vmem:[#allocation28_spill] sm:$0xff] %v4387_v5  ;;  %v1671_v5 = vmul.f32 %v4214_v18, %v4339_v55  ;;  %v4453_v62 = vmul.f32 %v4365_v63, %v4339_v55  ;;  %v4456_v50 = vmul.f32 %v3863_v2, %v4337_v54  ;;  %v4468_v42 = vmul.f32 %v4332_v52, %v4337_v54 }
  0x8f   : > { %6807 = vst [vmem:[#allocation31_spill] sm:$0xff] %v4400_v9  ;;  %v1693_v9 = vmul.f32 %v4205_v15, %v4339_v55  ;;  %v4476_v2 = vmul.f32 %v4335_v53, %v4202_v14  ;;  %v4490_v52 = vmul.f32 %v3865_v61, %v4337_v54 }
  0x90   : > { %6808 = vst [vmem:[#allocation32_spill] sm:$0xff] %v4435_v44  ;;  %v4460_v44 = vmul.f32 %v4208_v16, %v4339_v55 }
  0x91   : > { %6809 = vst [vmem:[#allocation33_spill] sm:$0xff] %v4439_v57  ;;  %v4462_v57 = vpop.permute.xlu1 %603 }
  0x92   : > { %6810 = vst [vmem:[#allocation34_spill] sm:$0xff] %v4442_v58  ;;  %v4464_v58 = vpop.permute.xlu0 %583  ;;  %v1655_v61 = vmul.f32 %v4205_v15, %v4462_v57 }
  0x93   : > { %6812 = vst [vmem:[#allocation36_spill] sm:$0xff] %v4449_v56  ;;  %v4472_v56 = vmul.f32 %v4234_v24, %v4200_v13 }
  0x94   : > { %6813 = vst [vmem:[#allocation37_spill] sm:$0xff] %v4453_v62  ;;  %v1651_v62 = vmul.f32 %v3842_v46, %v4464_v58 }
  0x95   : > { %6814 = vst [vmem:[#allocation38_spill] sm:$0xff] %v4456_v50  ;;  %v4480_v50 = vmul.f32 %v4445_v43, %v4284_v38  ;;  %v1695_v38 = vmul.f32 %v4208_v16, %v4464_v58  ;;  %v1541_v43 = vmul.f32 %v4368_v0, %v4464_v58 }
  0x96   : > { %6815 = vst [vmem:[#allocation39_spill] sm:$0xff] %v4460_v44  ;;  %v1630_v44 = vmul.f32 %v4287_v39, %v4464_v58  ;;  %v4500_v39 = vmul.f32 %v4335_v53, %v4200_v13 }
  0x97   : > { %6816 = vst [vmem:[#allocation40_spill] sm:$0xff] %v4468_v42  ;;  %v4487_v42 = vmul.f32 %v4223_v21, %v4339_v55  ;;  %v1696_v55 = vadd.f32 %v1695_v38, %v1693_v9  ;;  %v1545_v38 = vmul.f32 %v4371_v1, %v4462_v57 }
  0x98   : > { %6817 = vst [vmem:[#allocation41_spill] sm:$0xff] %v4472_v56  ;;  %v1634_v56 = vmul.f32 %v4214_v18, %v4462_v57  ;;  %v1631_v46 = vadd.f32 %v1630_v44, %v1628_v6  ;;  %v1584_v44 = vmul.f32 %v4220_v20, %v4464_v58 }
  0x99   : > { %6818 = vst [vmem:[#allocation42_spill] sm:$0xff] %v4476_v2  ;;  %v1673_v2 = vmul.f32 %v4205_v15, %v4464_v58  ;;  %v1698_v6 = vadd.f32 %v1697_v7, %v1696_v55  ;;  %v1699_v15 = vmul.f32 %v4211_v17, %v4462_v57 }
  0x9a   : > { %6819 = vst [vmem:[#allocation43_spill] sm:$0xff] %v4480_v50  ;;  %v1652_v50 = vadd.f32 %v1651_v62, %v1649_v11  ;;  %v1633_v21 = vadd.f32 %v1632_v10, %v1631_v46  ;;  %v4515_v11 = vld [vmem:[%s4177_s28 + $0x4a] ss:$0 sm:$0xff] }
  0x9b   : > { %6820 = vst [vmem:[#allocation44_spill] sm:$0xff] %v4487_v42  ;;  %v1674_v54 = vadd.f32 %v1673_v2, %v1671_v5  ;;  %v1562_v42 = vmul.f32 %v4263_v32, %v4464_v58  ;;  %v1566_v32 = vmul.f32 %v4220_v20, %v4462_v57  ;;  %v1700_v55 = vadd.f32 %v1699_v15, %v1698_v6 }
  0x9c   : > { %6821 = vst [vmem:[#allocation45_spill] sm:$0xff] %v4490_v52  ;;  %v1677_v52 = vmul.f32 %v4241_v26, %v4462_v57  ;;  %v1654_v13 = vadd.f32 %v1653_v12, %v1652_v50  ;;  %v1635_v2 = vadd.f32 %v1634_v56, %v1633_v21  ;;  %v4523_v50 = vpop.permute.xlu0 %633  ;;  %v1588_v7 = vmul.f32 %v4515_v11, %v4462_v57 }
  0x9d   : > { %6822 = vst [vmem:[#allocation46_spill] sm:$0xff] %v4500_v39  ;;  %v1542_v39 = vadd.f32 %v1541_v43, %v1539_v4  ;;  %v1676_v62 = vadd.f32 %v1675_v8, %v1674_v54  ;;  %v1563_v5 = vadd.f32 %v1562_v42, %v1560_v60  ;;  %v4521_v43 = vpop.permute.xlu1 %643  ;;  %v1585_v56 = vadd.f32 %v1584_v44, %v1582_v45 }
  0x9e   : > { %v1656_v0 = vadd.f32 %v1655_v61, %v1654_v13  ;;  %v1637_v42 = vadd.f32 %v4227_v22, %v1635_v2  ;;  %v1640_v60 = vmul.f32 %v4241_v26, %v4523_v50  ;;  %v1642_v8 = vmul.f32 %v4211_v17, %v4521_v43 }
  0x9f   : > { %v1678_v54 = vadd.f32 %v1677_v52, %v1676_v62  ;;  %v1544_v4 = vadd.f32 %v1543_v3, %v1542_v39  ;;  %v1565_v21 = vadd.f32 %v1564_v51, %v1563_v5  ;;  %v1606_v52 = vmul.f32 %v4214_v18, %v4464_v58 }
  0xa0   : > { %v1658_v13 = vadd.f32 %v4231_v23, %v1656_v0  ;;  %v1639_v3 = vadd.f32 %v4245_v27, %v1637_v42  ;;  %v1661_v22 = vmul.f32 %v4211_v17, %v4523_v50  ;;  %v1702_v23 = vadd.f32 %v4249_v28, %v1700_v55  ;;  %v6823_v42 = vld [vmem:[#allocation9_spill] sm:$0xff] }
  0xa1   : > { %v1680_v9 = vadd.f32 %v4238_v25, %v1678_v54  ;;  %v1663_v45 = vmul.f32 %v4217_v19, %v4521_v43  ;;  %v1683_v25 = vmul.f32 %v4290_v40, %v4523_v50  ;;  %v1546_v0 = vadd.f32 %v1545_v38, %v1544_v4 }
  0xa2   : > { %v1660_v10 = vadd.f32 %v4267_v33, %v1658_v13  ;;  %v1641_v12 = vadd.f32 %v1640_v60, %v1639_v3  ;;  %v1704_v27 = vadd.f32 %v4278_v36, %v1702_v23  ;;  %v1705_v33 = vmul.f32 %v4313_v47, %v4523_v50  ;;  %v6824_v60 = vld [vmem:[#allocation13_spill] sm:$0xff] }
  0xa3   : > { %v1682_v51 = vadd.f32 %v4271_v34, %v1680_v9  ;;  %v1685_v28 = vmul.f32 %v4313_v47, %v4521_v43  ;;  %v1548_v46 = vadd.f32 %v4256_v30, %v1546_v0  ;;  %v1567_v61 = vadd.f32 %v1566_v32, %v1565_v21  ;;  %v6828_v0 = vld [vmem:[#allocation10_spill] sm:$0xff] }
  0xa4   : > { %v1662_v18 = vadd.f32 %v1661_v22, %v1660_v10  ;;  %v1643_v44 = vadd.f32 %v1642_v8, %v1641_v12  ;;  %v1706_v62 = vadd.f32 %v1705_v33, %v1704_v27  ;;  %v1707_v6 = vmul.f32 %v4274_v35, %v4521_v43  ;;  %v4568_v8 = vld [vmem:[%s4177_s28 + $0x56] ss:$0 sm:$0xff]  ;;  %v6826_v10 = vld [vmem:[#allocation32_spill] sm:$0xff]  ;;  %v6829_v27 = vld [vmem:[#allocation33_spill] sm:$0xff] }
  0xa5   : > { %v1684_v39 = vadd.f32 %v1683_v25, %v1682_v51  ;;  %v1550_v36 = vadd.f32 %v4282_v37, %v1548_v46  ;;  %v1551_v5 = vmul.f32 %v4515_v11, %v4523_v50  ;;  %v1569_v2 = vadd.f32 %v4260_v31, %v1567_v61  ;;  %v4579_v25 = vld [vmem:[%s4177_s28 + $0x57] ss:$0 sm:$0xff]  ;;  %v6830_v46 = vld [vmem:[#allocation20_spill] sm:$0xff] }
  0xa6   : > { %v1664_v34 = vadd.f32 %v1663_v45, %v1662_v18  ;;  %v1648_v38 = vadd.f32 %v4317_v48, %v1643_v44  ;;  %v1708_v32 = vadd.f32 %v1707_v6, %v1706_v62  ;;  %v1587_v54 = vadd.f32 %v4431_v59, %v1585_v56  ;;  %v6827_v45 = vld [vmem:[#allocation18_spill] sm:$0xff]  ;;  %v6831_v44 = vld [vmem:[#allocation11_spill] sm:$0xff]  ;;  %v4593_v6 = vpop.permute.xlu0 %741 }
  0xa7   : > { %v1686_v15 = vadd.f32 %v1685_v28, %v1684_v39  ;;  %v1552_v55 = vadd.f32 %v1551_v5, %v1550_v36  ;;  %v1553_v4 = vmul.f32 %v4252_v29, %v4521_v43  ;;  %v1571_v13 = vadd.f32 %v6823_v42, %v1569_v2 }
  0xa8   : > { %v1669_v30 = vadd.f32 %v4321_v49, %v1664_v34  ;;  %v1572_v37 = vmul.f32 %v4252_v29, %v4523_v50  ;;  %v1589_v48 = vadd.f32 %v1588_v7, %v1587_v54  ;;  %v6825_v49 = vld [vmem:[#allocation23_spill] sm:$0xff]  ;;  %v1574_v3 = vmul.f32 %v4241_v26, %v4521_v43 }
  0xa9   : > { %v1691_v31 = vadd.f32 %v6824_v60, %v1686_v15  ;;  %v4572_v9 = vmul.f32 %v6825_v49, %v4202_v14  ;;  %v1554_v59 = vadd.f32 %v1553_v4, %v1552_v55  ;;  %v1607_v22 = vadd.f32 %v1606_v52, %v6826_v10  ;;  %v6832_v15 = vld [vmem:[#allocation21_spill] sm:$0xff]  ;;  %v6834_v4 = vld [vmem:[#allocation12_spill] sm:$0xff]  ;;  %v6837_v10 = vld [vmem:[#allocation14_spill] sm:$0xff] }
  0xaa   : > { %v1670_v21 = vmax.f32 %v1648_v38, %v1669_v30  ;;  %v1573_v56 = vadd.f32 %v1572_v37, %v1571_v13  ;;  %v1713_v51 = vadd.f32 %v6827_v45, %v1708_v32  ;;  %v1591_v12 = vadd.f32 %v6828_v0, %v1589_v48  ;;  %v6833_v38 = vld [vmem:[#allocation34_spill] sm:$0xff]  ;;  %v6835_v13 = vld [vmem:[#allocation36_spill] sm:$0xff] }
  0xab   : > { %v1594_v7 = vmul.f32 %v4568_v8, %v4523_v50  ;;  %v1609_v33 = vadd.f32 %v6829_v27, %v1607_v22  ;;  %v1610_v39 = vmul.f32 %v4252_v29, %v4462_v57  ;;  %v1719_v28 = vmul.f32 %v4365_v63, %v4464_v58  ;;  %v6838_v45 = vld [vmem:[#allocation6_spill] sm:$0xff] }
  0xac   : > { %v1692_v23 = vmax.f32 %v1670_v21, %v1691_v31  ;;  %v1575_v18 = vadd.f32 %v1574_v3, %v1573_v56  ;;  %v1559_v61 = vadd.f32 %v6830_v46, %v1554_v59  ;;  %v1593_v34 = vadd.f32 %v6831_v44, %v1591_v12  ;;  %v6836_v56 = vld [vmem:[#allocation37_spill] sm:$0xff]  ;;  %v6840_v12 = vld [vmem:[#allocation38_spill] sm:$0xff] }
  0xad   : > { %v1596_v62 = vmul.f32 %v4579_v25, %v4521_v43  ;;  %v1611_v5 = vadd.f32 %v1610_v39, %v1609_v33  ;;  %v1616_v2 = vmul.f32 %v4579_v25, %v4523_v50  ;;  %v1720_v30 = vadd.f32 %v1719_v28, %v6833_v38  ;;  %v6841_v39 = vld [vmem:[#allocation26_spill] sm:$0xff]  ;;  %v6844_v38 = vld [vmem:[#allocation27_spill] sm:$0xff] }
  0xae   : > { %v1714_v52 = vmax.f32 %v1692_v23, %v1713_v51  ;;  %v1580_v36 = vadd.f32 %v6832_v15, %v1575_v18  ;;  %v1595_v32 = vadd.f32 %v1594_v7, %v1593_v34  ;;  %v1618_v54 = vmul.f32 %v4290_v40, %v4521_v43 }
  0xaf   : > { %v1740_v55 = vmul.f32 %v4410_v41, %v4464_v58  ;;  %v1613_v42 = vadd.f32 %v6834_v4, %v1611_v5  ;;  %v1722_v37 = vadd.f32 %v6835_v13, %v1720_v30  ;;  %v1723_v21 = vmul.f32 %v4208_v16, %v4462_v57  ;;  %v6839_v16 = vld [vmem:[#allocation22_spill] sm:$0xff]  ;;  %v6847_v4 = vld [vmem:[#allocation29_spill] sm:$0xff] }
  0xb0   : > { %v1715_v63 = vadd.f32 %v1714_v52, %v4593_v6  ;;  %v1729_v60 = vmul.f32 %v4217_v19, %v4523_v50  ;;  %v1581_v48 = vmax.f32 %v1559_v61, %v1580_v36  ;;  %v1597_v59 = vadd.f32 %v1596_v62, %v1595_v32  ;;  %v6842_v52 = vld [vmem:[#allocation39_spill] sm:$0xff]  ;;  %v6846_v32 = vld [vmem:[#allocation44_spill] sm:$0xff] }
  0xb1   : > { %v1741_v3 = vadd.f32 %v1740_v55, %v6836_v56  ;;  %v1615_v22 = vadd.f32 %v6837_v10, %v1613_v42  ;;  %v1724_v23 = vadd.f32 %v1723_v21, %v1722_v37  ;;  %v1731_v41 = vmul.f32 %v4234_v24, %v4521_v43  ;;  %v6843_v61 = vld [vmem:[#allocation15_spill] sm:$0xff]  ;;  %v6848_v37 = vld [vmem:[#allocation17_spill] sm:$0xff] }
  0xb2   : > { %v4610_v31 = vmax.f32 %v1715_v63, 0.0  ;;  %v1762_v51 = vmul.f32 %v6838_v45, %v4464_v58  ;;  %v1602_v0 = vadd.f32 %v6839_v16, %v1597_v59  ;;  %v1744_v18 = vmul.f32 %v6838_v45, %v4462_v57  ;;  %v6845_v63 = vld [vmem:[#allocation40_spill] sm:$0xff]  ;;  %v6849_v59 = vld [vmem:[#allocation25_spill] sm:$0xff] }
  0xb3   : > { %v1743_v7 = vadd.f32 %v6840_v12, %v1741_v3  ;;  %v1750_v27 = vmul.f32 %v4234_v24, %v4523_v50  ;;  %v1617_v33 = vadd.f32 %v1616_v2, %v1615_v22  ;;  %v1726_v28 = vadd.f32 %v6841_v39, %v1724_v23  ;;  %v6850_v10 = vld [vmem:[#allocation45_spill] sm:$0xff]  ;;  %v6851_v23 = vld [vmem:[#allocation30_spill] sm:$0xff] }
  0xb4   : > { %2205 = vmatpush.msra.mxu0 %v4610_v31  ;;  %v1763_v46 = vadd.f32 %v1762_v51, %v6842_v52  ;;  %v1784_v44 = vmul.f32 %v6843_v61, %v4464_v58  ;;  %v1603_v34 = vmax.f32 %v1581_v48, %v1602_v0  ;;  %v1752_v15 = vmul.f32 %v4335_v53, %v4521_v43  ;;  %v6852_v0 = vld [vmem:[#allocation16_spill] sm:$0xff] }
  0xb5   : > { %v1745_v62 = vadd.f32 %v1744_v18, %v1743_v7  ;;  %v1766_v36 = vmul.f32 %v4217_v19, %v4462_v57  ;;  %v1619_v5 = vadd.f32 %v1618_v54, %v1617_v33  ;;  %v1728_v30 = vadd.f32 %v6844_v38, %v1726_v28  ;;  %v6853_v33 = vld [vmem:[#allocation41_spill] sm:$0xff]  ;;  %v6856_v38 = vld [vmem:[#allocation46_spill] sm:$0xff] }
  0xb6   : > { %v1765_v2 = vadd.f32 %v6845_v63, %v1763_v46  ;;  %v1785_v55 = vadd.f32 %v1784_v44, %v6846_v32  ;;  %v1788_v13 = vmul.f32 %v4234_v24, %v4462_v57  ;;  %v2005_v21 = vmul.f32 %v4241_v26, %v6848_v37  ;;  %v6858_v32 = vld [vmem:[#allocation5_spill] sm:$0xff] }
  0xb7   : > { %v1747_v42 = vadd.f32 %v6847_v4, %v1745_v62  ;;  %v2007_v48 = vmul.f32 %v4211_v17, %v4464_v58  ;;  %v1624_v56 = vadd.f32 %v6849_v59, %v1619_v5  ;;  %v1730_v54 = vadd.f32 %v1729_v60, %v1728_v30  ;;  %v6854_v60 = vld [vmem:[#allocation8_spill] sm:$0xff]  ;;  %v6859_v59 = vld [vmem:[#allocation31_spill] sm:$0xff] }
  0xb8   : > { %v1767_v3 = vadd.f32 %v1766_v36, %v1765_v2  ;;  %v1787_v22 = vadd.f32 %v6850_v10, %v1785_v55  ;;  %v1772_v51 = vmul.f32 %v4274_v35, %v4523_v50  ;;  %v2009_v12 = vmul.f32 %v4217_v19, %v6852_v0  ;;  %v6855_v36 = vld [vmem:[#allocation42_spill] sm:$0xff] }
  0xb9   : > { %v1749_v45 = vadd.f32 %v6851_v23, %v1747_v42  ;;  %v2008_v16 = vadd.f32 %v2007_v48, %v2005_v21  ;;  %v1625_v7 = vmax.f32 %v1603_v34, %v1624_v56  ;;  %v1732_v18 = vadd.f32 %v1731_v41, %v1730_v54  ;;  %v6857_v34 = vld [vmem:[#allocation28_spill] sm:$0xff]  ;;  %v4667_v21 = vld [vmem:[%s4177_s28 + $0x64] ss:$0 sm:$0xff] }
  0xba   : > { %v1769_v39 = vadd.f32 %v6853_v33, %v1767_v3  ;;  %v1789_v28 = vadd.f32 %v1788_v13, %v1787_v22  ;;  %v1774_v46 = vmul.f32 %v6854_v60, %v4521_v43  ;;  %v2011_v44 = vmul.f32 %v4290_v40, %v4462_v57 }
  0xbb   : > { %v1751_v52 = vadd.f32 %v1750_v27, %v1749_v45  ;;  %v2010_v61 = vadd.f32 %v2009_v12, %v2008_v16  ;;  %v1626_v62 = vadd.f32 %v1625_v7, %v4593_v6  ;;  %v1794_v41 = vmul.f32 %v6854_v60, %v4523_v50  ;;  %v4680_v45 = vld [vmem:[%s4177_s28 + $0x5d] ss:$0 sm:$0xff]  ;;  %v4685_v12 = vld [vmem:[%s4177_s28 + $0x65] ss:$0 sm:$0xff]  ;;  %v4688_v7 = vld [vmem:[%s4177_s28 + $0x66] ss:$0 sm:$0xff] }
  0xbc   : > { %v1771_v5 = vadd.f32 %v6855_v36, %v1769_v39  ;;  %v1791_v30 = vadd.f32 %v6856_v38, %v1789_v28  ;;  %v1737_v63 = vadd.f32 %v6857_v34, %v1732_v18  ;;  %v2013_v55 = vmul.f32 %v4313_v47, %v6858_v32  ;;  %v6861_v39 = vld [vmem:[#allocation43_spill] sm:$0xff]  ;;  %v4704_v34 = vld [vmem:[%s4177_s28 + $0x67] ss:$0 sm:$0xff] }
  0xbd   : > { %v1753_v2 = vadd.f32 %v1752_v15, %v1751_v52  ;;  %v2012_v27 = vadd.f32 %v2011_v44, %v2010_v61  ;;  %v4663_v4 = vmax.f32 %v1626_v62, 0.0  ;;  %v2015_v48 = vmul.f32 %v4274_v35, %v4202_v14 }
  0xbe   : > { %v1773_v42 = vadd.f32 %v1772_v51, %v1771_v5  ;;  %v1793_v13 = vadd.f32 %v4572_v9, %v1791_v30  ;;  %v2026_v54 = vmul.f32 %v4211_v17, %v6848_v37  ;;  %v2028_v3 = vmul.f32 %v4217_v19, %v4464_v58  ;;  %v6860_v9 = vld [vmem:[#allocation35_spill] sm:$0xff] }
  0xbf   : > { %v1758_v56 = vadd.f32 %v6859_v59, %v1753_v2  ;;  %v2014_v15 = vadd.f32 %v2013_v55, %v2012_v27  ;;  %2206 = vmatpush.msra.mxu0 %v4663_v4  ;;  %v1796_v23 = vmul.f32 %v6860_v9, %v4521_v43  ;;  %v2017_v51 = vmul.f32 %v4667_v21, %v4523_v50 }
  0xc0   : > { %v1775_v10 = vadd.f32 %v1774_v46, %v1773_v42  ;;  %v1795_v22 = vadd.f32 %v1794_v41, %v1793_v13  ;;  %v2029_v18 = vadd.f32 %v2028_v3, %v2026_v54  ;;  %v2030_v33 = vmul.f32 %v4234_v24, %v6852_v0  ;;  %v6862_v46 = vld [vmem:[#allocation7_spill] sm:$0xff] }
  0xc1   : > { %v1759_v16 = vmax.f32 %v1737_v63, %v1758_v56  ;;  %v2016_v17 = vadd.f32 %v2015_v48, %v2014_v15  ;;  %v1801_v61 = vmul.f32 %v4680_v45, %v6862_v46  ;;  %v4697_v44 = vmul.f32 %v6825_v49, %v6852_v0 }
  0xc2   : > { %v1780_v28 = vadd.f32 %v6861_v39, %v1775_v10  ;;  %v1797_v52 = vadd.f32 %v1796_v23, %v1795_v22  ;;  %v2019_v36 = vmul.f32 %v4685_v12, %v4521_v43  ;;  %v2031_v5 = vadd.f32 %v2030_v33, %v2029_v18  ;;  %v3870_v23 = vld [vmem:[%s6747_s1 + $0xb] ss:$0 sm:$0xff]  ;;  %v4735_v18 = vld [vmem:[%s4177_s28 + $0x70] ss:$0 sm:$0xff] }
  0xc3   : > { %v2018_v62 = vadd.f32 %v2017_v51, %v2016_v17  ;;  %v2032_v38 = vmul.f32 %v4313_v47, %v4462_v57  ;;  %v2048_v63 = vmul.f32 %v4290_v40, %v6848_v37  ;;  %v2050_v2 = vmul.f32 %v4313_v47, %v4464_v58 }
  0xc4   : > { %v1781_v30 = vmax.f32 %v1759_v16, %v1780_v28  ;;  %v1802_v41 = vadd.f32 %v1801_v61, %v1797_v52  ;;  %v4712_v49 = vmul.f32 %v4680_v45, %v6852_v0  ;;  %v2024_v27 = vmul.f32 %v4688_v7, %v6862_v46 }
  0xc5   : > { %v2033_v55 = vadd.f32 %v2032_v38, %v2031_v5  ;;  %v2034_v42 = vmul.f32 %v4274_v35, %v6858_v32  ;;  %v2020_v48 = vadd.f32 %v2019_v36, %v2018_v62  ;;  %v2051_v59 = vadd.f32 %v2050_v2, %v2048_v63  ;;  %v4744_v62 = vld [vmem:[%s4177_s28 + $0x71] ss:$0 sm:$0xff] }
  0xc6   : > { %v1803_v13 = vmax.f32 %v1781_v30, %v1802_v41  ;;  %v2052_v56 = vmul.f32 %v4274_v35, %v6852_v0  ;;  %v2036_v54 = vmul.f32 %v6854_v60, %v4202_v14  ;;  %v2038_v3 = vmul.f32 %v4685_v12, %v4523_v50  ;;  %v4749_v30 = vld [vmem:[%s4177_s28 + $0x72] ss:$0 sm:$0xff] }
  0xc7   : > { %v2035_v15 = vadd.f32 %v2034_v42, %v2033_v55  ;;  %v2040_v10 = vmul.f32 %v4688_v7, %v4521_v43  ;;  %v2045_v51 = vmul.f32 %v4704_v34, %v6862_v46  ;;  %v2054_v17 = vmul.f32 %v4667_v21, %v4462_v57 }
  0xc8   : > { %v1804_v22 = vadd.f32 %v1803_v13, %v4593_v6  ;;  %v2053_v16 = vadd.f32 %v2052_v56, %v2051_v59  ;;  %v2056_v39 = vmul.f32 %v4685_v12, %v6858_v32  ;;  %v2070_v28 = vmul.f32 %v4313_v47, %v6848_v37 }
  0xc9   : > { %v2037_v33 = vadd.f32 %v2036_v54, %v2035_v15  ;;  %v2072_v52 = vmul.f32 %v4274_v35, %v4464_v58  ;;  %v2025_v36 = vadd.f32 %v2024_v27, %v2020_v48  ;;  %v2058_v38 = vmul.f32 %v4688_v7, %v4202_v14 }
  0xca   : > { %v1805_v61 = vmax.f32 %v1804_v22, 0.0  ;;  %v2055_v5 = vadd.f32 %v2054_v17, %v2053_v16  ;;  %v2060_v63 = vmul.f32 %v4735_v18, %v4523_v50  ;;  %v2074_v55 = vmul.f32 %v6854_v60, %v6852_v0 }
  0xcb   : > { %v2039_v41 = vadd.f32 %v2038_v3, %v2037_v33  ;;  %v2073_v2 = vadd.f32 %v2072_v52, %v2070_v28  ;;  %v2062_v27 = vmul.f32 %v4744_v62, %v4521_v43  ;;  %v2076_v48 = vmul.f32 %v4685_v12, %v4462_v57 }
  0xcc   : > { %v4755_v42 = vmul.f32 %v3870_v23, %v1805_v61  ;;  %v2057_v13 = vadd.f32 %v2056_v39, %v2055_v5  ;;  %v2097_v15 = vmul.f32 %v4217_v19, %v6848_v37  ;;  %v2099_v54 = vmul.f32 %v4234_v24, %v4464_v58 }
  0xcd   : > { %v2041_v59 = vadd.f32 %v2040_v10, %v2039_v41  ;;  %v2075_v56 = vadd.f32 %v2074_v55, %v2073_v2  ;;  %v2067_v22 = vmul.f32 %v4749_v30, %v6862_v46  ;;  %v2078_v23 = vmul.f32 %v4688_v7, %v6858_v32  ;;  %v4773_v10 = vld [vmem:[%s4177_s28 + $0x73] ss:$0 sm:$0xff] }
  0xce   : > { %2228 = vmatpush.msra.mxu1 %v4755_v42  ;;  %v2059_v3 = vadd.f32 %v2058_v38, %v2057_v13  ;;  %v2080_v16 = vmul.f32 %v4704_v34, %v4202_v14  ;;  %v2100_v19 = vadd.f32 %v2099_v54, %v2097_v15  ;;  %v2101_v39 = vmul.f32 %v4335_v53, %v6852_v0 }
  0xcf   : > { %v2046_v17 = vadd.f32 %v2045_v51, %v2041_v59  ;;  %v2077_v33 = vadd.f32 %v2076_v48, %v2075_v56  ;;  %v2082_v52 = vmul.f32 %v4744_v62, %v4523_v50  ;;  %v2084_v61 = vmul.f32 %v4749_v30, %v4521_v43 }
  0xd0   : > { %v2061_v28 = vadd.f32 %v2060_v63, %v2059_v3  ;;  %v2103_v5 = vmul.f32 %v4274_v35, %v4462_v57  ;;  %2229 = vmatpush.msra.mxu1 %v4610_v31  ;;  %v2102_v51 = vadd.f32 %v2101_v39, %v2100_v19  ;;  %v2118_v41 = vmul.f32 %v4234_v24, %v6848_v37 }
  0xd1   : > { %v2079_v38 = vadd.f32 %v2078_v23, %v2077_v33  ;;  %v2120_v63 = vmul.f32 %v4335_v53, %v4464_v58  ;;  %v2047_v2 = vmax.f32 %v2025_v36, %v2046_v17  ;;  %v2089_v13 = vmul.f32 %v4773_v10, %v6862_v46  ;;  %v3880_v36 = vld [vmem:[%s4177_s28 + $0x68] ss:$0 sm:$0xff] }
  0xd2   : > { %v2063_v55 = vadd.f32 %v2062_v27, %v2061_v28  ;;  %v2105_v48 = vmul.f32 %v6854_v60, %v6858_v32  ;;  %2230 = vmatpush.msra.mxu1 %v4663_v4  ;;  %v2104_v56 = vadd.f32 %v2103_v5, %v2102_v51  ;;  %v2107_v15 = vmul.f32 %v6860_v9, %v4202_v14 }
  0xd3   : > { %v2081_v59 = vadd.f32 %v2080_v16, %v2079_v38  ;;  %v2121_v54 = vadd.f32 %v2120_v63, %v2118_v41  ;;  %v2109_v53 = vmul.f32 %v4688_v7, %v4523_v50  ;;  %v2124_v27 = vmul.f32 %v6854_v60, %v4462_v57  ;;  %v3881_v63 = vld [vmem:[%s4177_s28 + $0x69] ss:$0 sm:$0xff] }
  0xd4   : > { %v2068_v24 = vadd.f32 %v2067_v22, %v2063_v55  ;;  %v2140_v3 = vmul.f32 %v4274_v35, %v6848_v37  ;;  %v2106_v17 = vadd.f32 %v2105_v48, %v2104_v56  ;;  %v2142_v33 = vmul.f32 %v6854_v60, %v4464_v58 }
  0xd5   : > { %v2083_v23 = vadd.f32 %v2082_v52, %v2081_v59  ;;  %v2123_v16 = vadd.f32 %v4697_v44, %v2121_v54  ;;  %v2111_v22 = vmul.f32 %v4704_v34, %v4521_v43  ;;  %v2126_v39 = vmul.f32 %v6860_v9, %v6858_v32 }
  0xd6   : > { %v2069_v19 = vmax.f32 %v2047_v2, %v2068_v24  ;;  %v2144_v28 = vmul.f32 %v6860_v9, %v6852_v0  ;;  %v2108_v35 = vadd.f32 %v2107_v15, %v2106_v17  ;;  %v2143_v38 = vadd.f32 %v2142_v33, %v2140_v3  ;;  %v3885_v24 = vld [vmem:[%s4177_s28 + $0x30] ss:$0 sm:$0xff]  ;;  %v3886_v33 = vld [vmem:[%s4177_s28 + $0x31] ss:$0 sm:$0xff] }
  0xd7   : > { %v2085_v5 = vadd.f32 %v2084_v61, %v2083_v23  ;;  %v2125_v52 = vadd.f32 %v2124_v27, %v2123_v16  ;;  %v2116_v44 = vmul.f32 %v3880_v36, %v6862_v46  ;;  %v2128_v51 = vmul.f32 %v4680_v45, %v4202_v14 }
  0xd8   : > { %v2130_v41 = vmul.f32 %v4704_v34, %v4523_v50  ;;  %v2146_v2 = vmul.f32 %v4688_v7, %v4462_v57  ;;  %v2110_v48 = vadd.f32 %v2109_v53, %v2108_v35  ;;  %v2145_v59 = vadd.f32 %v2144_v28, %v2143_v38  ;;  %v3882_v28 = vld [vmem:[%s4177_s28 + $0x74] ss:$0 sm:$0xff] }
  0xd9   : > { %v2090_v55 = vadd.f32 %v2089_v13, %v2085_v5  ;;  %v2127_v61 = vadd.f32 %v2126_v39, %v2125_v52  ;;  %v2132_v56 = vmul.f32 %v3880_v36, %v4521_v43  ;;  %v2148_v15 = vmul.f32 %v4704_v34, %v6858_v32 }
  0xda   : > { %v2162_v45 = vmul.f32 %v6854_v60, %v6848_v37  ;;  %v2164_v54 = vmul.f32 %v6860_v9, %v4464_v58  ;;  %v2112_v7 = vadd.f32 %v2111_v22, %v2110_v48  ;;  %v2147_v53 = vadd.f32 %v2146_v2, %v2145_v59  ;;  %v3879_v9 = vld [vmem:[%s6747_s1 + $0xe] ss:$0 sm:$0xff] }
  0xdb   : > { %v2091_v27 = vmax.f32 %v2069_v19, %v2090_v55  ;;  %v2129_v13 = vadd.f32 %v2128_v51, %v2127_v61  ;;  %v2137_v3 = vmul.f32 %v3881_v63, %v6862_v46  ;;  %v2150_v23 = vmul.f32 %v3880_v36, %v4202_v14  ;;  %v3887_v61 = vld [vmem:[%s4177_s28 + $0x3c] ss:$0 sm:$0xff] }
  0xdc   : > { %v2152_v17 = vmul.f32 %v4749_v30, %v4523_v50  ;;  %v2165_v16 = vadd.f32 %v2164_v54, %v2162_v45  ;;  %v2149_v22 = vadd.f32 %v2148_v15, %v2147_v53  ;;  %v2154_v39 = vmul.f32 %v4773_v10, %v4521_v43 }
  0xdd   : > { %v2092_v60 = vadd.f32 %v2091_v27, %v4593_v6  ;;  %v2131_v19 = vadd.f32 %v2130_v41, %v2129_v13  ;;  %v2168_v30 = vmul.f32 %v4704_v34, %v4462_v57  ;;  %v1435_v35 = vmul.f32 %v3885_v24, %v6848_v37  ;;  %v3883_v27 = vld [vmem:[%s4177_s28 + $0x75] ss:$0 sm:$0xff]  ;;  %v3888_v13 = vld [vmem:[%s4177_s28 + $0x3d] ss:$0 sm:$0xff] }
  0xde   : > { %v2167_v5 = vadd.f32 %v4712_v49, %v2165_v16  ;;  %v1437_v52 = vmul.f32 %v3886_v33, %v4464_v58  ;;  %v2117_v51 = vadd.f32 %v2116_v44, %v2112_v7  ;;  %v2151_v41 = vadd.f32 %v2150_v23, %v2149_v22  ;;  %v6863_v49 = vld [vmem:[#allocation19_spill] sm:$0xff] }
  0xdf   : > { %v2093_v38 = vmax.f32 %v2092_v60, 0.0  ;;  %v2133_v2 = vadd.f32 %v2132_v56, %v2131_v19  ;;  %v2170_v48 = vmul.f32 %v3880_v36, %v6858_v32  ;;  %v1439_v15 = vmul.f32 %v6863_v49, %v6852_v0 }
  0xe0   : > { %v2169_v55 = vadd.f32 %v2168_v30, %v2167_v5  ;;  %v1438_v59 = vadd.f32 %v1437_v52, %v1435_v35  ;;  %v2153_v54 = vadd.f32 %v2152_v17, %v2151_v41  ;;  %v2159_v24 = vmul.f32 %v3882_v28, %v6862_v46  ;;  %v4867_v30 = vld [vmem:[%s4177_s28 + $0x48] ss:$0 sm:$0xff]  ;;  %v4874_v41 = vld [vmem:[%s4177_s28 + $0x49] ss:$0 sm:$0xff] }
  0xe1   : > { %v4848_v45 = vmul.f32 %v3879_v9, %v2093_v38  ;;  %v2138_v34 = vadd.f32 %v2137_v3, %v2133_v2  ;;  %v2172_v44 = vmul.f32 %v3881_v63, %v4202_v14  ;;  %v1441_v36 = vmul.f32 %v3887_v61, %v4462_v57  ;;  %v6864_v38 = vld [vmem:[#allocation24_spill] sm:$0xff] }
  0xe2   : > { %v2171_v53 = vadd.f32 %v2170_v48, %v2169_v55  ;;  %v1440_v56 = vadd.f32 %v1439_v15, %v1438_v59  ;;  %v2155_v23 = vadd.f32 %v2154_v39, %v2153_v54  ;;  %v2174_v16 = vmul.f32 %v4773_v10, %v4523_v50 }
  0xe3   : > { %2253 = vmatpush.msra.mxu2 %v4848_v45  ;;  %v2139_v7 = vmax.f32 %v2117_v51, %v2138_v34  ;;  %v1443_v3 = vmul.f32 %v3888_v13, %v6858_v32  ;;  %v1462_v9 = vmul.f32 %v3886_v33, %v6848_v37  ;;  %v1464_v63 = vmul.f32 %v6863_v49, %v4464_v58 }
  0xe4   : > { %v2173_v17 = vadd.f32 %v2172_v44, %v2171_v53  ;;  %v1442_v60 = vadd.f32 %v1441_v36, %v1440_v56  ;;  %v2160_v19 = vadd.f32 %v2159_v24, %v2155_v23  ;;  %v2176_v22 = vmul.f32 %v3882_v28, %v4521_v43 }
  0xe5   : > { %v2181_v5 = vmul.f32 %v3883_v27, %v6862_v46  ;;  %v1445_v39 = vmul.f32 %v4371_v1, %v4202_v14  ;;  %v1465_v52 = vadd.f32 %v1464_v63, %v1462_v9  ;;  %v1466_v51 = vmul.f32 %v6864_v38, %v6852_v0 }
  0xe6   : > { %v2175_v10 = vadd.f32 %v2174_v16, %v2173_v17  ;;  %v1444_v35 = vadd.f32 %v1443_v3, %v1442_v60  ;;  %v2161_v33 = vmax.f32 %v2139_v7, %v2160_v19  ;;  %v1450_v2 = vmul.f32 %v4867_v30, %v4523_v50 }
  0xe7   : > { %v1468_v28 = vmul.f32 %v3888_v13, %v4462_v57  ;;  %v1484_v55 = vmul.f32 %v3887_v61, %v6848_v37  ;;  %v1467_v49 = vadd.f32 %v1466_v51, %v1465_v52  ;;  %v1486_v15 = vmul.f32 %v3888_v13, %v4464_v58  ;;  %v3884_v52 = vld [vmem:[%s6747_s1 + $0xf] ss:$0 sm:$0xff] }
  0xe8   : > { %v2177_v48 = vadd.f32 %v2176_v22, %v2175_v10  ;;  %v1446_v59 = vadd.f32 %v1445_v39, %v1444_v35  ;;  %v1455_v34 = vmul.f32 %v4874_v41, %v4521_v43  ;;  %v1460_v54 = vmul.f32 %v4515_v11, %v6862_v46  ;;  %v4900_v22 = vld [vmem:[%s4177_s28 + $0x54] ss:$0 sm:$0xff] }
  0xe9   : > { %v1470_v24 = vmul.f32 %v4371_v1, %v6858_v32  ;;  %v1488_v27 = vmul.f32 %v4371_v1, %v6852_v0  ;;  %v1469_v44 = vadd.f32 %v1468_v28, %v1467_v49  ;;  %v1487_v56 = vadd.f32 %v1486_v15, %v1484_v55 }
  0xea   : > { %v2182_v61 = vadd.f32 %v2181_v5, %v2177_v48  ;;  %v1451_v53 = vadd.f32 %v1450_v2, %v1446_v59  ;;  %v1472_v36 = vmul.f32 %v4220_v20, %v4202_v14  ;;  %v1474_v7 = vmul.f32 %v4874_v41, %v4523_v50  ;;  %v4903_v5 = vld [vmem:[%s4177_s28 + $0x55] ss:$0 sm:$0xff] }
  0xeb   : > { %v1476_v23 = vmul.f32 %v4515_v11, %v4521_v43  ;;  %v1481_v16 = vmul.f32 %v4252_v29, %v6862_v46  ;;  %v1471_v17 = vadd.f32 %v1470_v24, %v1469_v44  ;;  %v1489_v60 = vadd.f32 %v1488_v27, %v1487_v56 }
  0xec   : > { %v2183_v3 = vmax.f32 %v2161_v33, %v2182_v61  ;;  %v1490_v9 = vmul.f32 %v4867_v30, %v4462_v57  ;;  %v1456_v63 = vadd.f32 %v1455_v34, %v1451_v53  ;;  %v1492_v19 = vmul.f32 %v4874_v41, %v6858_v32 }
  0xed   : > { %v1512_v39 = vmul.f32 %v3888_v13, %v6848_v37  ;;  %v1514_v10 = vmul.f32 %v4371_v1, %v4464_v58  ;;  %v1473_v38 = vadd.f32 %v1472_v36, %v1471_v17  ;;  %v1494_v33 = vmul.f32 %v4515_v11, %v4202_v14 }
  0xee   : > { %v2184_v35 = vadd.f32 %v2183_v3, %v4593_v6  ;;  %v1491_v51 = vadd.f32 %v1490_v9, %v1489_v60  ;;  %v1499_v2 = vmul.f32 %v4900_v22, %v4523_v50  ;;  %v1504_v13 = vmul.f32 %v4903_v5, %v4521_v43 }
  0xef   : > { %v1515_v28 = vadd.f32 %v1514_v10, %v1512_v39  ;;  %v1516_v1 = vmul.f32 %v4220_v20, %v6852_v0  ;;  %v1475_v48 = vadd.f32 %v1474_v7, %v1473_v38  ;;  %v1509_v49 = vmul.f32 %v4568_v8, %v6862_v46 }
  0xf0   : > { %v2185_v55 = vmax.f32 %v2184_v35, 0.0  ;;  %v1493_v59 = vadd.f32 %v1492_v19, %v1491_v51  ;;  %v1461_v15 = vadd.f32 %v1460_v54, %v1456_v63  ;;  %v1518_v24 = vmul.f32 %v4874_v41, %v4462_v57  ;;  %v4952_v51 = vld [vmem:[%s4177_s28 + $0x62] ss:$0 sm:$0xff] }
  0xf1   : > { %v1517_v34 = vadd.f32 %v1516_v1, %v1515_v28  ;;  %v1913_v27 = vmul.f32 %v4515_v11, %v6848_v37  ;;  %v1477_v53 = vadd.f32 %v1476_v23, %v1475_v48  ;;  %v1915_v20 = vmul.f32 %v4252_v29, %v4464_v58 }
  0xf2   : > { %v2188_v61 = vmul.f32 %v3884_v52, %v2185_v55  ;;  %v1495_v44 = vadd.f32 %v1494_v33, %v1493_v59  ;;  %v1520_v36 = vmul.f32 %v4515_v11, %v6858_v32  ;;  %v1522_v54 = vmul.f32 %v4252_v29, %v4202_v14 }
  0xf3   : > { %v1519_v56 = vadd.f32 %v1518_v24, %v1517_v34  ;;  %v1524_v7 = vmul.f32 %v4903_v5, %v4523_v50  ;;  %v1482_v3 = vadd.f32 %v1481_v16, %v1477_v53  ;;  %v1916_v60 = vadd.f32 %v1915_v20, %v1913_v27 }
  0xf4   : > { %2278 = vmatpush.msra.mxu3 %v2188_v61  ;;  %v1500_v17 = vadd.f32 %v1499_v2, %v1495_v44  ;;  %v1917_v23 = vmul.f32 %v4241_v26, %v6852_v0  ;;  %v1526_v63 = vmul.f32 %v4568_v8, %v4521_v43  ;;  %v1531_v11 = vmul.f32 %v4579_v25, %v6862_v46 }
  0xf5   : > { %v1521_v9 = vadd.f32 %v1520_v36, %v1519_v56  ;;  %v4942_v19 = vmul.f32 %v4867_v30, %v6848_v37  ;;  %v1483_v39 = vmax.f32 %v1461_v15, %v1482_v3  ;;  %v1919_v35 = vmul.f32 %v4568_v8, %v4462_v57  ;;  %v3950_v15 = vld [vmem:[%s4177_s28 + $0x4d] ss:$0 sm:$0xff] }
  0xf6   : > { %v1505_v10 = vadd.f32 %v1504_v13, %v1500_v17  ;;  %v1918_v16 = vadd.f32 %v1917_v23, %v1916_v60  ;;  %2279 = vmatpush.msra.mxu3 %v4848_v45  ;;  %v4949_v38 = vmul.f32 %v4900_v22, %v6848_v37  ;;  %v1934_v30 = vmul.f32 %v4252_v29, %v6848_v37  ;;  %v4959_v13 = vld [vmem:[%s4177_s28 + $0x63] ss:$0 sm:$0xff]  ;;  %v3951_v60 = vld [vmem:[%s4177_s28 + $0x58] ss:$0 sm:$0xff] }
  0xf7   : > { %v1523_v52 = vadd.f32 %v1522_v54, %v1521_v9  ;;  %v1936_v33 = vmul.f32 %v4241_v26, %v4464_v58  ;;  %v1921_v45 = vmul.f32 %v4579_v25, %v6858_v32  ;;  %v1923_v1 = vmul.f32 %v4290_v40, %v4202_v14 }
  0xf8   : > { %v1510_v2 = vadd.f32 %v1509_v49, %v1505_v10  ;;  %v1920_v28 = vadd.f32 %v1919_v35, %v1918_v16  ;;  %v1925_v48 = vmul.f32 %v4952_v51, %v4523_v50  ;;  %v1938_v29 = vmul.f32 %v3950_v15, %v6852_v0  ;;  %v4993_v16 = vld [vmem:[%s4177_s28 + $0x6e] ss:$0 sm:$0xff] }
  0xf9   : > { %v1525_v55 = vadd.f32 %v1524_v7, %v1523_v52  ;;  %v1937_v59 = vadd.f32 %v1936_v33, %v1934_v30  ;;  %v1927_v34 = vmul.f32 %v4959_v13, %v4521_v43  ;;  %v1940_v24 = vmul.f32 %v4579_v25, %v4462_v57  ;;  %v3952_v33 = vld [vmem:[%s4177_s28 + $0x59] ss:$0 sm:$0xff] }
  0xfa   : > { %v1511_v26 = vmax.f32 %v1483_v39, %v1510_v2  ;;  %v1922_v49 = vadd.f32 %v1921_v45, %v1920_v28  ;;  %v1956_v53 = vmul.f32 %v4568_v8, %v6848_v37  ;;  %v1958_v44 = vmul.f32 %v4579_v25, %v4464_v58  ;;  %v3893_v45 = vld [vmem:[%s6747_s1 + $0x8] ss:$0 sm:$0xff] }
  0xfb   : > { %v1527_v27 = vadd.f32 %v1526_v63, %v1525_v55  ;;  %v1939_v61 = vadd.f32 %v1938_v29, %v1937_v59  ;;  %v1932_v56 = vmul.f32 %v4667_v21, %v6862_v46  ;;  %v1942_v36 = vmul.f32 %v4290_v40, %v6858_v32 }
  0xfc   : > { %v1924_v20 = vadd.f32 %v1923_v1, %v1922_v49  ;;  %v1944_v54 = vmul.f32 %v4313_v47, %v4202_v14  ;;  %v1959_v17 = vadd.f32 %v1958_v44, %v1956_v53  ;;  %v1960_v8 = vmul.f32 %v3951_v60, %v6852_v0  ;;  %v5017_v49 = vld [vmem:[%s4177_s28 + $0x1d] ss:$0 sm:$0xff]  ;;  %v5020_v53 = vld [vmem:[%s4177_s28 + $0x6f] ss:$0 sm:$0xff] }
  0xfd   : > { %v1532_v7 = vadd.f32 %v1531_v11, %v1527_v27  ;;  %v1941_v3 = vadd.f32 %v1940_v24, %v1939_v61  ;;  %v1946_v9 = vmul.f32 %v4959_v13, %v4523_v50  ;;  %v1962_v63 = vmul.f32 %v4952_v51, %v4462_v57 }
  0xfe   : > { %v1926_v23 = vadd.f32 %v1925_v48, %v1924_v20  ;;  %v1978_v40 = vmul.f32 %v4579_v25, %v6848_v37  ;;  %v1961_v11 = vadd.f32 %v1960_v8, %v1959_v17  ;;  %v1980_v10 = vmul.f32 %v3951_v60, %v4464_v58  ;;  %v5002_v25 = vld [vmem:[%s4177_s28 + $0x1c] ss:$0 sm:$0xff] }
  0xff   : > { %v1533_v39 = vmax.f32 %v1511_v26, %v1532_v7  ;;  %v1943_v47 = vadd.f32 %v1942_v36, %v1941_v3  ;;  %v1948_v52 = vmul.f32 %v4667_v21, %v4521_v43  ;;  %v1964_v30 = vmul.f32 %v4959_v13, %v6858_v32  ;;  %v5025_v36 = vld [vmem:[%s4177_s28 + $0x1e] ss:$0 sm:$0xff] }
 0x100   : > { %v1928_v35 = vadd.f32 %v1927_v34, %v1926_v23  ;;  %v1982_v2 = vmul.f32 %v3952_v33, %v6852_v0  ;;  %v1963_v55 = vadd.f32 %v1962_v63, %v1961_v11  ;;  %v1981_v48 = vadd.f32 %v1980_v10, %v1978_v40  ;;  %v5038_v23 = vld [vmem:[%s4177_s28 + $0x28] ss:$0 sm:$0xff] }
 0x101   : > { %v1534_v28 = vadd.f32 %v1533_v39, %v4593_v6  ;;  %v1945_v1 = vadd.f32 %v1944_v54, %v1943_v47  ;;  %v1953_v59 = vmul.f32 %v4685_v12, %v6862_v46  ;;  %v1966_v15 = vmul.f32 %v4667_v21, %v4202_v14 }
 0x102   : > { %v1968_v29 = vmul.f32 %v4993_v16, %v4523_v50  ;;  %v1984_v26 = vmul.f32 %v4959_v13, %v4462_v57  ;;  %v1965_v27 = vadd.f32 %v1964_v30, %v1963_v55  ;;  %v1983_v61 = vadd.f32 %v1982_v2, %v1981_v48 }
 0x103   : > { %v1535_v34 = vmax.f32 %v1534_v28, 0.0  ;;  %v1947_v24 = vadd.f32 %v1946_v9, %v1945_v1  ;;  %v1933_v44 = vadd.f32 %v1932_v56, %v1928_v35  ;;  %v1986_v20 = vmul.f32 %v4667_v21, %v6858_v32  ;;  %v5048_v35 = vld [vmem:[%s4177_s28 + $0x29] ss:$0 sm:$0xff]  ;;  %v5055_v1 = vld [vmem:[%s4177_s28 + $0x1f] ss:$0 sm:$0xff] }
 0x104   : > { %v1254_v54 = vmul.f32 %v5002_v25, %v6848_v37  ;;  %v1256_v7 = vmul.f32 %v5017_v49, %v4464_v58  ;;  %v1967_v60 = vadd.f32 %v1966_v15, %v1965_v27  ;;  %v1985_v8 = vadd.f32 %v1984_v26, %v1983_v61 }
 0x105   : > { %v5031_v3 = vmul.f32 %v3893_v45, %v1535_v34  ;;  %v1949_v17 = vadd.f32 %v1948_v52, %v1947_v24  ;;  %v1970_v56 = vmul.f32 %v5020_v53, %v4521_v43  ;;  %v1975_v21 = vmul.f32 %v4735_v18, %v6862_v46 }
 0x106   : > { %v1257_v9 = vadd.f32 %v1256_v7, %v1254_v54  ;;  %v1258_v63 = vmul.f32 %v5025_v36, %v6852_v0  ;;  %v1969_v39 = vadd.f32 %v1968_v29, %v1967_v60  ;;  %v1987_v47 = vadd.f32 %v1986_v20, %v1985_v8  ;;  %v5078_v20 = vld [vmem:[%s4177_s28 + $0x35] ss:$0 sm:$0xff]  ;;  %v5083_v60 = vld [vmem:[%s4177_s28 + $0x2b] ss:$0 sm:$0xff] }
 0x107   : > { %2207 = vmatpush.msra.mxu0 %v5031_v3  ;;  %v1954_v40 = vadd.f32 %v1953_v59, %v1949_v17  ;;  %v1988_v11 = vmul.f32 %v4685_v12, %v4202_v14  ;;  %v1990_v10 = vmul.f32 %v5020_v53, %v4523_v50  ;;  %v1260_v30 = vmul.f32 %v5038_v23, %v4462_v57  ;;  %v5064_v59 = vld [vmem:[%s4177_s28 + $0x2a] ss:$0 sm:$0xff] }
 0x108   : > { %v1259_v52 = vadd.f32 %v1258_v63, %v1257_v9  ;;  %v1275_v33 = vmul.f32 %v5017_v49, %v6848_v37  ;;  %v1971_v28 = vadd.f32 %v1970_v56, %v1969_v39  ;;  %v1277_v12 = vmul.f32 %v5025_v36, %v4464_v58  ;;  %v5088_v9 = vld [vmem:[%s4177_s28 + $0x36] ss:$0 sm:$0xff] }
 0x109   : > { %v1955_v2 = vmax.f32 %v1933_v44, %v1954_v40  ;;  %v1989_v45 = vadd.f32 %v1988_v11, %v1987_v47  ;;  %v1992_v55 = vmul.f32 %v4735_v18, %v4521_v43  ;;  %v1997_v48 = vmul.f32 %v4744_v62, %v6862_v46  ;;  %v5073_v44 = vld [vmem:[%s4177_s28 + $0x34] ss:$0 sm:$0xff] }
 0x10a   : > { %v1261_v15 = vadd.f32 %v1260_v30, %v1259_v52  ;;  %v1262_v29 = vmul.f32 %v5048_v35, %v6858_v32  ;;  %v1976_v26 = vadd.f32 %v1975_v21, %v1971_v28  ;;  %v1278_v24 = vadd.f32 %v1277_v12, %v1275_v33 }
 0x10b   : > { %v1991_v34 = vadd.f32 %v1990_v10, %v1989_v45  ;;  %v1279_v27 = vmul.f32 %v5055_v1, %v6852_v0  ;;  %v1264_v18 = vmul.f32 %v5064_v59, %v4202_v14  ;;  %v1266_v62 = vmul.f32 %v5073_v44, %v4523_v50 }
 0x10c   : > { %v1263_v61 = vadd.f32 %v1262_v29, %v1261_v15  ;;  %v1268_v54 = vmul.f32 %v5078_v20, %v4521_v43  ;;  %v1977_v7 = vmax.f32 %v1955_v2, %v1976_v26  ;;  %v1281_v56 = vmul.f32 %v5048_v35, %v4462_v57 }
 0x10d   : > { %v1993_v17 = vadd.f32 %v1992_v55, %v1991_v34  ;;  %v1280_v8 = vadd.f32 %v1279_v27, %v1278_v24  ;;  %v1273_v63 = vmul.f32 %v5088_v9, %v6862_v46  ;;  %v1297_v40 = vmul.f32 %v5038_v23, %v6848_v37 }
 0x10e   : > { %v1265_v21 = vadd.f32 %v1264_v18, %v1263_v61  ;;  %v1299_v39 = vmul.f32 %v5048_v35, %v4464_v58  ;;  %v1283_v10 = vmul.f32 %v5064_v59, %v6858_v32  ;;  %v1285_v52 = vmul.f32 %v5083_v60, %v4202_v14  ;;  %v3898_v61 = vld [vmem:[%s6747_s1 + $0xd] ss:$0 sm:$0xff] }
 0x10f   : > { %v1998_v47 = vadd.f32 %v1997_v48, %v1993_v17  ;;  %v1282_v11 = vadd.f32 %v1281_v56, %v1280_v8  ;;  %v1287_v33 = vmul.f32 %v5078_v20, %v4523_v50  ;;  %v1301_v28 = vmul.f32 %v5064_v59, %v6852_v0  ;;  %v5107_v48 = vld [vmem:[%s4177_s28 + $0x37] ss:$0 sm:$0xff] }
 0x110   : > { %v1267_v30 = vadd.f32 %v1266_v62, %v1265_v21  ;;  %v1300_v2 = vadd.f32 %v1299_v39, %v1297_v40  ;;  %v1289_v55 = vmul.f32 %v5088_v9, %v4521_v43  ;;  %v1294_v15 = vmul.f32 %v5107_v48, %v6862_v46 }
 0x111   : > { %v1999_v45 = vmax.f32 %v1977_v7, %v1998_v47  ;;  %v1284_v12 = vadd.f32 %v1283_v10, %v1282_v11  ;;  %v1303_v26 = vmul.f32 %v5073_v44, %v4462_v57  ;;  %v1319_v34 = vmul.f32 %v5048_v35, %v6848_v37  ;;  %v5128_v47 = vld [vmem:[%s4177_s28 + $0x40] ss:$0 sm:$0xff]  ;;  %v5133_v11 = vld [vmem:[%s4177_s28 + $0x41] ss:$0 sm:$0xff] }
 0x112   : > { %v1302_v29 = vadd.f32 %v1301_v28, %v1300_v2  ;;  %v1321_v24 = vmul.f32 %v5064_v59, %v4464_v58  ;;  %v1269_v18 = vadd.f32 %v1268_v54, %v1267_v30  ;;  %v1305_v7 = vmul.f32 %v5078_v20, %v6858_v32 }
 0x113   : > { %v2000_v27 = vadd.f32 %v1999_v45, %v4593_v6  ;;  %v1286_v62 = vadd.f32 %v1285_v52, %v1284_v12  ;;  %v1307_v8 = vmul.f32 %v5088_v9, %v4202_v14  ;;  %v1323_v21 = vmul.f32 %v5083_v60, %v6852_v0 }
 0x114   : > { %v1304_v17 = vadd.f32 %v1303_v26, %v1302_v29  ;;  %v1322_v56 = vadd.f32 %v1321_v24, %v1319_v34  ;;  %v1309_v54 = vmul.f32 %v5128_v47, %v4523_v50  ;;  %v1311_v10 = vmul.f32 %v5133_v11, %v4521_v43 }
 0x115   : > { %v2001_v40 = vmax.f32 %v2000_v27, 0.0  ;;  %v1288_v39 = vadd.f32 %v1287_v33, %v1286_v62  ;;  %v1325_v2 = vmul.f32 %v5078_v20, %v4462_v57  ;;  %v1811_v33 = vmul.f32 %v4874_v41, %v4464_v58  ;;  %v3959_v27 = vld [vmem:[%s4177_s28 + $0x4a] ss:$0 sm:$0xff] }
 0x116   : > { %v1306_v52 = vadd.f32 %v1305_v7, %v1304_v17  ;;  %v1324_v30 = vadd.f32 %v1323_v21, %v1322_v56  ;;  %v1274_v45 = vadd.f32 %v1273_v63, %v1269_v18  ;;  %v1327_v29 = vmul.f32 %v5088_v9, %v6858_v32  ;;  %v5147_v17 = vld [vmem:[%s4177_s28 + $0x42] ss:$0 sm:$0xff] }
 0x117   : > { %v2004_v28 = vmul.f32 %v3898_v61, %v2001_v40  ;;  %v1290_v12 = vadd.f32 %v1289_v55, %v1288_v39  ;;  %v1812_v24 = vadd.f32 %v1811_v33, %v4942_v19  ;;  %v1813_v62 = vmul.f32 %v3959_v27, %v6852_v0  ;;  %v3907_v33 = vld [vmem:[%s4177_s28 + $0x60] ss:$0 sm:$0xff] }
 0x118   : > { %v1308_v26 = vadd.f32 %v1307_v8, %v1306_v52  ;;  %v1326_v34 = vadd.f32 %v1325_v2, %v1324_v30  ;;  %v1316_v56 = vmul.f32 %v5147_v17, %v6862_v46  ;;  %v1329_v63 = vmul.f32 %v5107_v48, %v4202_v14 }
 0x119   : > { %2254 = vmatpush.msra.mxu2 %v2004_v28  ;;  %v1295_v7 = vadd.f32 %v1294_v15, %v1290_v12  ;;  %v1331_v55 = vmul.f32 %v5133_v11, %v4523_v50  ;;  %v1814_v18 = vadd.f32 %v1813_v62, %v1812_v24  ;;  %v1815_v15 = vmul.f32 %v4900_v22, %v4462_v57  ;;  %v5167_v22 = vld [vmem:[%s4177_s28 + $0x43] ss:$0 sm:$0xff]  ;;  %v3962_v12 = vld [vmem:[%s4177_s28 + $0x56] ss:$0 sm:$0xff] }
 0x11a   : > { %v1310_v61 = vadd.f32 %v1309_v54, %v1308_v26  ;;  %v1328_v19 = vadd.f32 %v1327_v29, %v1326_v34  ;;  %2280 = vmatpush.msra.mxu3 %v2004_v28  ;;  %v1333_v8 = vmul.f32 %v5147_v17, %v4521_v43  ;;  %v1817_v21 = vmul.f32 %v4903_v5, %v6858_v32  ;;  %v3908_v26 = vld [vmem:[%s4177_s28 + $0x61] ss:$0 sm:$0xff] }
 0x11b   : > { %v1836_v40 = vmul.f32 %v4874_v41, %v6848_v37  ;;  %v1838_v39 = vmul.f32 %v3959_v27, %v4464_v58  ;;  %v1296_v54 = vmax.f32 %v1274_v45, %v1295_v7  ;;  %v1816_v2 = vadd.f32 %v1815_v15, %v1814_v18  ;;  %v3963_v41 = vld [vmem:[%s4177_s28 + $0x4b] ss:$0 sm:$0xff] }
 0x11c   : > { %v1312_v52 = vadd.f32 %v1311_v10, %v1310_v61  ;;  %v1330_v30 = vadd.f32 %v1329_v63, %v1328_v19  ;;  %2281 = vmatpush.msra.mxu3 %v4755_v42  ;;  %v1338_v28 = vmul.f32 %v5167_v22, %v6862_v46  ;;  %v1819_v29 = vmul.f32 %v3962_v12, %v4202_v14 }
 0x11d   : > { %v1839_v34 = vadd.f32 %v1838_v39, %v1836_v40  ;;  %v1840_v24 = vmul.f32 %v3963_v41, %v6852_v0  ;;  %v1818_v27 = vadd.f32 %v1817_v21, %v1816_v2  ;;  %v1824_v62 = vmul.f32 %v3907_v33, %v4523_v50  ;;  %v3964_v2 = vld [vmem:[%s4177_s28 + $0x57] ss:$0 sm:$0xff] }
 0x11e   : > { %v1317_v45 = vadd.f32 %v1316_v56, %v1312_v52  ;;  %v1332_v10 = vadd.f32 %v1331_v55, %v1330_v30  ;;  %2282 = vmatpush.msra.mxu3 %v4610_v31  ;;  %v1829_v42 = vmul.f32 %v3908_v26, %v4521_v43  ;;  %v1842_v63 = vmul.f32 %v4903_v5, %v4462_v57 }
 0x11f   : > { %v1841_v7 = vadd.f32 %v1840_v24, %v1839_v34  ;;  %v1860_v61 = vmul.f32 %v4903_v5, %v4464_v58  ;;  %v1820_v15 = vadd.f32 %v1819_v29, %v1818_v27  ;;  %v1834_v56 = vmul.f32 %v4952_v51, %v6862_v46 }
 0x120   : > { %v1318_v19 = vmax.f32 %v1296_v54, %v1317_v45  ;;  %v1334_v18 = vadd.f32 %v1333_v8, %v1332_v10  ;;  %2283 = vmatpush.msra.mxu3 %v4663_v4  ;;  %v1844_v21 = vmul.f32 %v3962_v12, %v6858_v32  ;;  %v1862_v39 = vmul.f32 %v3962_v12, %v6852_v0  ;;  %v3909_v45 = vld [vmem:[%s4177_s28 + $0x6c] ss:$0 sm:$0xff]  ;;  %v3910_v10 = vld [vmem:[%s4177_s28 + $0x6d] ss:$0 sm:$0xff] }
 0x121   : > { %v1843_v55 = vadd.f32 %v1842_v63, %v1841_v7  ;;  %v1861_v40 = vadd.f32 %v1860_v61, %v4949_v38  ;;  %v1825_v30 = vadd.f32 %v1824_v62, %v1820_v15  ;;  %v1846_v8 = vmul.f32 %v3964_v2, %v4202_v14 }
 0x122   : > { %v1339_v52 = vadd.f32 %v1338_v28, %v1334_v18  ;;  %v1848_v54 = vmul.f32 %v3908_v26, %v4523_v50  ;;  %v1850_v34 = vmul.f32 %v4952_v51, %v4521_v43  ;;  %v1864_v24 = vmul.f32 %v3907_v33, %v4462_v57  ;;  %v5206_v33 = vld [vmem:[%s4177_s28 + $0x1a] ss:$0 sm:$0xff] }
 0x123   : > { %v1845_v29 = vadd.f32 %v1844_v21, %v1843_v55  ;;  %v1863_v41 = vadd.f32 %v1862_v39, %v1861_v40  ;;  %v1855_v28 = vmul.f32 %v4959_v13, %v6862_v46  ;;  %v1886_v27 = vmul.f32 %v4903_v5, %v6848_v37 }
 0x124   : > { %v1340_v38 = vmax.f32 %v1318_v19, %v1339_v52  ;;  %v1888_v62 = vmul.f32 %v3962_v12, %v4464_v58  ;;  %v1866_v61 = vmul.f32 %v3908_v26, %v6858_v32  ;;  %v1868_v18 = vmul.f32 %v4952_v51, %v4202_v14  ;;  %v5213_v52 = vld [vmem:[%s4177_s28 + $0x1b] ss:$0 sm:$0xff] }
 0x125   : > { %v1847_v7 = vadd.f32 %v1846_v8, %v1845_v29  ;;  %v1865_v63 = vadd.f32 %v1864_v24, %v1863_v41  ;;  %v1830_v15 = vadd.f32 %v1829_v42, %v1825_v30  ;;  %v1890_v21 = vmul.f32 %v3964_v2, %v6852_v0 }
 0x126   : > { %v1341_v19 = vadd.f32 %v1340_v38, %v4593_v6  ;;  %v1889_v55 = vadd.f32 %v1888_v62, %v1886_v27  ;;  %v1873_v5 = vmul.f32 %v3909_v45, %v4523_v50  ;;  %v1878_v12 = vmul.f32 %v3910_v10, %v4521_v43 }
 0x127   : > { %v1849_v40 = vadd.f32 %v1848_v54, %v1847_v7  ;;  %v1867_v39 = vadd.f32 %v1866_v61, %v1865_v63  ;;  %v1883_v29 = vmul.f32 %v4993_v16, %v6862_v46  ;;  %v1892_v42 = vmul.f32 %v3908_v26, %v4462_v57  ;;  %v5230_v26 = vld [vmem:[%s4177_s28 + $0x26] ss:$0 sm:$0xff] }
 0x128   : > { %v5215_v8 = vmax.f32 %v1341_v19, 0.0  ;;  %v1891_v41 = vadd.f32 %v1890_v21, %v1889_v55  ;;  %v1165_v2 = vmul.f32 %v5206_v33, %v6848_v37  ;;  %v1167_v54 = vmul.f32 %v5213_v52, %v4464_v58 }
 0x129   : > { %v1851_v30 = vadd.f32 %v1850_v34, %v1849_v40  ;;  %v1869_v24 = vadd.f32 %v1868_v18, %v1867_v39  ;;  %v1835_v45 = vadd.f32 %v1834_v56, %v1830_v15  ;;  %v1894_v27 = vmul.f32 %v4952_v51, %v6858_v32  ;;  %v5238_v15 = vld [vmem:[%s4177_s28 + $0x27] ss:$0 sm:$0xff] }
 0x12a   : > { %2208 = vmatpush.msra.mxu0 %v5215_v8  ;;  %v1893_v38 = vadd.f32 %v1892_v42, %v1891_v41  ;;  %v1896_v62 = vmul.f32 %v4959_v13, %v4202_v14  ;;  %v1168_v63 = vadd.f32 %v1167_v54, %v1165_v2  ;;  %v1169_v61 = vmul.f32 %v5002_v25, %v6852_v0  ;;  %v5255_v2 = vld [vmem:[%s4177_s28 + $0x32] ss:$0 sm:$0xff] }
 0x12b   : > { %v1856_v34 = vadd.f32 %v1855_v28, %v1851_v30  ;;  %v1874_v7 = vadd.f32 %v1873_v5, %v1869_v24  ;;  %v1898_v19 = vmul.f32 %v3910_v10, %v4523_v50  ;;  %v1900_v56 = vmul.f32 %v4993_v16, %v4521_v43 }
 0x12c   : > { %v1895_v18 = vadd.f32 %v1894_v27, %v1893_v38  ;;  %v1171_v51 = vmul.f32 %v5230_v26, %v4462_v57  ;;  %v1170_v28 = vadd.f32 %v1169_v61, %v1168_v63  ;;  %v1186_v55 = vmul.f32 %v5213_v52, %v6848_v37 }
 0x12d   : > { %v1879_v13 = vadd.f32 %v1878_v12, %v1874_v7  ;;  %v1188_v21 = vmul.f32 %v5002_v25, %v4464_v58  ;;  %v1857_v40 = vmax.f32 %v1835_v45, %v1856_v34  ;;  %v1905_v16 = vmul.f32 %v5020_v53, %v6862_v46  ;;  %v5260_v45 = vld [vmem:[%s4177_s28 + $0x33] ss:$0 sm:$0xff] }
 0x12e   : > { %v1897_v10 = vadd.f32 %v1896_v62, %v1895_v18  ;;  %v1173_v39 = vmul.f32 %v5238_v15, %v6858_v32  ;;  %v1172_v5 = vadd.f32 %v1171_v51, %v1170_v28  ;;  %v1175_v12 = vmul.f32 %v5038_v23, %v4202_v14 }
 0x12f   : > { %v1189_v41 = vadd.f32 %v1188_v21, %v1186_v55  ;;  %v1190_v42 = vmul.f32 %v5017_v49, %v6852_v0  ;;  %v1884_v30 = vadd.f32 %v1883_v29, %v1879_v13  ;;  %v1177_v54 = vmul.f32 %v5255_v2, %v4523_v50 }
 0x130   : > { %v1899_v24 = vadd.f32 %v1898_v19, %v1897_v10  ;;  %v1179_v53 = vmul.f32 %v5260_v45, %v4521_v43  ;;  %v1174_v38 = vadd.f32 %v1173_v39, %v1172_v5  ;;  %v1184_v27 = vmul.f32 %v5073_v44, %v6862_v46 }
 0x131   : > { %v1191_v62 = vadd.f32 %v1190_v42, %v1189_v41  ;;  %v1192_v34 = vmul.f32 %v5238_v15, %v4462_v57  ;;  %v1885_v29 = vmax.f32 %v1857_v40, %v1884_v30  ;;  %v1208_v63 = vmul.f32 %v5230_v26, %v6848_v37 }
 0x132   : > { %v1901_v7 = vadd.f32 %v1900_v56, %v1899_v24  ;;  %v1210_v61 = vmul.f32 %v5238_v15, %v4464_v58  ;;  %v1176_v18 = vadd.f32 %v1175_v12, %v1174_v38  ;;  %v1194_v51 = vmul.f32 %v5038_v23, %v6858_v32 }
 0x133   : > { %v1193_v19 = vadd.f32 %v1192_v34, %v1191_v62  ;;  %v1196_v13 = vmul.f32 %v5048_v35, %v4202_v14  ;;  %v1198_v55 = vmul.f32 %v5260_v45, %v4523_v50  ;;  %v1212_v56 = vmul.f32 %v5038_v23, %v6852_v0  ;;  %v3911_v34 = vld [vmem:[%s6747_s1 + $0xc] ss:$0 sm:$0xff] }
 0x134   : > { %v1906_v28 = vadd.f32 %v1905_v16, %v1901_v7  ;;  %v1211_v21 = vadd.f32 %v1210_v61, %v1208_v63  ;;  %v1178_v40 = vadd.f32 %v1177_v54, %v1176_v18  ;;  %v1200_v39 = vmul.f32 %v5073_v44, %v4521_v43  ;;  %v5301_v18 = vld [vmem:[%s4177_s28 + $0x3e] ss:$0 sm:$0xff] }
 0x135   : > { %v1195_v10 = vadd.f32 %v1194_v51, %v1193_v19  ;;  %v1214_v5 = vmul.f32 %v5255_v2, %v4462_v57  ;;  %v1230_v16 = vmul.f32 %v5238_v15, %v6848_v37  ;;  %v1232_v42 = vmul.f32 %v5038_v23, %v4464_v58  ;;  %v5306_v51 = vld [vmem:[%s4177_s28 + $0x3f] ss:$0 sm:$0xff] }
 0x136   : > { %v1907_v12 = vmax.f32 %v1885_v29, %v1906_v28  ;;  %v1213_v41 = vadd.f32 %v1212_v56, %v1211_v21  ;;  %v1180_v30 = vadd.f32 %v1179_v53, %v1178_v40  ;;  %v1205_v54 = vmul.f32 %v5078_v20, %v6862_v46  ;;  %v5311_v28 = vld [vmem:[%s4177_s28 + $0x20] ss:$0 sm:$0xff] }
 0x137   : > { %v1197_v24 = vadd.f32 %v1196_v13, %v1195_v10  ;;  %v1216_v38 = vmul.f32 %v5260_v45, %v6858_v32  ;;  %v1233_v7 = vadd.f32 %v1232_v42, %v1230_v16  ;;  %v1234_v63 = vmul.f32 %v5048_v35, %v6852_v0 }
 0x138   : > { %v1908_v62 = vadd.f32 %v1907_v12, %v4593_v6  ;;  %v1215_v29 = vadd.f32 %v1214_v5, %v1213_v41  ;;  %v1218_v53 = vmul.f32 %v5073_v44, %v4202_v14  ;;  %v1220_v19 = vmul.f32 %v5301_v18, %v4523_v50 }
 0x139   : > { %v1199_v61 = vadd.f32 %v1198_v55, %v1197_v24  ;;  %v1222_v13 = vmul.f32 %v5306_v51, %v4521_v43  ;;  %v1235_v40 = vadd.f32 %v1234_v63, %v1233_v7  ;;  %v1236_v55 = vmul.f32 %v5260_v45, %v4462_v57 }
 0x13a   : > { %v1909_v21 = vmax.f32 %v1908_v62, 0.0  ;;  %v1217_v56 = vadd.f32 %v1216_v38, %v1215_v29  ;;  %v1185_v10 = vadd.f32 %v1184_v27, %v1180_v30  ;;  %v1343_v12 = vmul.f32 %v5025_v36, %v6848_v37 }
 0x13b   : > { %v1201_v5 = vadd.f32 %v1200_v39, %v1199_v61  ;;  %v1345_v41 = vmul.f32 %v5055_v1, %v4464_v58  ;;  %v1237_v24 = vadd.f32 %v1236_v55, %v1235_v40  ;;  %v1238_v38 = vmul.f32 %v5073_v44, %v6858_v32  ;;  %v5330_v61 = vld [vmem:[%s4177_s28 + $0x21] ss:$0 sm:$0xff] }
 0x13c   : > { %v1912_v16 = vmul.f32 %v3911_v34, %v1909_v21  ;;  %v1219_v42 = vadd.f32 %v1218_v53, %v1217_v56  ;;  %v1227_v29 = vmul.f32 %v5128_v47, %v6862_v46  ;;  %v1347_v39 = vmul.f32 %v5311_v28, %v6852_v0  ;;  %v5335_v53 = vld [vmem:[%s4177_s28 + $0x2c] ss:$0 sm:$0xff] }
 0x13d   : > { %v1206_v62 = vadd.f32 %v1205_v54, %v1201_v5  ;;  %v1346_v27 = vadd.f32 %v1345_v41, %v1343_v12  ;;  %v1239_v7 = vadd.f32 %v1238_v38, %v1237_v24  ;;  %v1240_v34 = vmul.f32 %v5078_v20, %v4202_v14 }
 0x13e   : > { %2255 = vmatpush.msra.mxu2 %v1912_v16  ;;  %v1221_v30 = vadd.f32 %v1220_v19, %v1219_v42  ;;  %v1242_v63 = vmul.f32 %v5306_v51, %v4523_v50  ;;  %v1244_v54 = vmul.f32 %v5128_v47, %v4521_v43  ;;  %v1349_v56 = vmul.f32 %v5064_v59, %v4462_v57 }
 0x13f   : > { %v1207_v44 = vmax.f32 %v1185_v10, %v1206_v62  ;;  %v1348_v21 = vadd.f32 %v1347_v39, %v1346_v27  ;;  %v1241_v40 = vadd.f32 %v1240_v34, %v1239_v7  ;;  %v1364_v20 = vmul.f32 %v5055_v1, %v6848_v37  ;;  %v3969_v34 = vld [vmem:[%s4177_s28 + $0x38] ss:$0 sm:$0xff] }
 0x140   : > { %v1223_v19 = vadd.f32 %v1222_v13, %v1221_v30  ;;  %v1366_v55 = vmul.f32 %v5311_v28, %v4464_v58  ;;  %2256 = vmatpush.msra.mxu2 %v4610_v31  ;;  %v1249_v10 = vmul.f32 %v5133_v11, %v6862_v46  ;;  %v1351_v5 = vmul.f32 %v5083_v60, %v6858_v32  ;;  %v5363_v30 = vld [vmem:[%s4177_s28 + $0x2d] ss:$0 sm:$0xff] }
 0x141   : > { %v1350_v47 = vadd.f32 %v1349_v56, %v1348_v21  ;;  %v1353_v13 = vmul.f32 %v5335_v53, %v4202_v14  ;;  %v1243_v41 = vadd.f32 %v1242_v63, %v1241_v40  ;;  %v1368_v42 = vmul.f32 %v5330_v61, %v6852_v0 }
 0x142   : > { %v1228_v12 = vadd.f32 %v1227_v29, %v1223_v19  ;;  %v1367_v16 = vadd.f32 %v1366_v55, %v1364_v20  ;;  %2257 = vmatpush.msra.mxu2 %v4663_v4  ;;  %v1355_v11 = vmul.f32 %v5088_v9, %v4523_v50  ;;  %v1370_v24 = vmul.f32 %v5083_v60, %v4462_v57 }
 0x143   : > { %v1352_v31 = vadd.f32 %v1351_v5, %v1350_v47  ;;  %v1386_v38 = vmul.f32 %v5064_v59, %v6848_v37  ;;  %v1245_v29 = vadd.f32 %v1244_v54, %v1243_v41  ;;  %v1388_v39 = vmul.f32 %v5083_v60, %v4464_v58 }
 0x144   : > { %v1229_v62 = vmax.f32 %v1207_v44, %v1228_v12  ;;  %v1369_v27 = vadd.f32 %v1368_v42, %v1367_v16  ;;  %2258 = vmatpush.msra.mxu2 %v5031_v3  ;;  %v1357_v7 = vmul.f32 %v5107_v48, %v4521_v43  ;;  %v1362_v63 = vmul.f32 %v3969_v34, %v6862_v46  ;;  %v3970_v12 = vld [vmem:[%s4177_s28 + $0x39] ss:$0 sm:$0xff] }
 0x145   : > { %v1354_v4 = vadd.f32 %v1353_v13, %v1352_v31  ;;  %v1372_v44 = vmul.f32 %v5335_v53, %v6858_v32  ;;  %v1250_v54 = vadd.f32 %v1249_v10, %v1245_v29  ;;  %v1389_v56 = vadd.f32 %v1388_v39, %v1386_v38 }
 0x146   : > { %v1371_v21 = vadd.f32 %v1370_v24, %v1369_v27  ;;  %v1390_v3 = vmul.f32 %v5335_v53, %v6852_v0  ;;  %2259 = vmatpush.msra.mxu2 %v5215_v8  ;;  %v1374_v40 = vmul.f32 %v5363_v30, %v4202_v14  ;;  %v1376_v20 = vmul.f32 %v5107_v48, %v4523_v50 }
 0x147   : > { %v1356_v19 = vadd.f32 %v1355_v11, %v1354_v4  ;;  %v1378_v55 = vmul.f32 %v3969_v34, %v4521_v43  ;;  %v1251_v47 = vmax.f32 %v1229_v62, %v1250_v54  ;;  %v1392_v13 = vmul.f32 %v5088_v9, %v4462_v57  ;;  %v5390_v11 = vld [vmem:[%s4177_s28 + $0x18] ss:$0 sm:$0xff] }
 0x148   : > { %v1373_v5 = vadd.f32 %v1372_v44, %v1371_v21  ;;  %v1391_v10 = vadd.f32 %v1390_v3, %v1389_v56  ;;  %v1383_v41 = vmul.f32 %v3970_v12, %v6862_v46  ;;  %v1394_v16 = vmul.f32 %v5107_v48, %v6858_v32  ;;  %v5399_v44 = vld [vmem:[%s4177_s28 + $0x19] ss:$0 sm:$0xff] }
 0x149   : > { %v1408_v42 = vmul.f32 %v5083_v60, %v6848_v37  ;;  %v1410_v31 = vmul.f32 %v5335_v53, %v4464_v58  ;;  %v1252_v24 = vadd.f32 %v1251_v47, %v4593_v6  ;;  %v1396_v9 = vmul.f32 %v3969_v34, %v4202_v14 }
 0x14a   : > { %v1375_v38 = vadd.f32 %v1374_v40, %v1373_v5  ;;  %v1393_v62 = vadd.f32 %v1392_v13, %v1391_v10  ;;  %v1358_v29 = vadd.f32 %v1357_v7, %v1356_v19  ;;  %v1398_v27 = vmul.f32 %v5147_v17, %v4523_v50 }
 0x14b   : > { %v1411_v39 = vadd.f32 %v1410_v31, %v1408_v42  ;;  %v1412_v4 = vmul.f32 %v5363_v30, %v6852_v0  ;;  %v5401_v54 = vmax.f32 %v1252_v24, 0.0  ;;  %v1400_v3 = vmul.f32 %v5167_v22, %v4521_v43 }
 0x14c   : > { %v1377_v21 = vadd.f32 %v1376_v20, %v1375_v38  ;;  %v1395_v56 = vadd.f32 %v1394_v16, %v1393_v62  ;;  %v1414_v7 = vmul.f32 %v5107_v48, %v4462_v57  ;;  %v1061_v17 = vmul.f32 %v5390_v11, %v6848_v37  ;;  %v3971_v20 = vld [vmem:[%s4177_s28 + $0x44] ss:$0 sm:$0xff] }
 0x14d   : > { %v1413_v40 = vadd.f32 %v1412_v4, %v1411_v39  ;;  %v1063_v19 = vmul.f32 %v5399_v44, %v4464_v58  ;;  %2209 = vmatpush.msra.mxu0 %v5401_v54  ;;  %v1405_v10 = vmul.f32 %v3971_v20, %v6862_v46  ;;  %v1416_v13 = vmul.f32 %v3969_v34, %v6858_v32  ;;  %v5416_v48 = vld [vmem:[%s4177_s28 + $0x24] ss:$0 sm:$0xff] }
 0x14e   : > { %v1379_v47 = vadd.f32 %v1378_v55, %v1377_v21  ;;  %v1397_v5 = vadd.f32 %v1396_v9, %v1395_v56  ;;  %v1363_v16 = vadd.f32 %v1362_v63, %v1358_v29  ;;  %v1065_v24 = vmul.f32 %v5206_v33, %v6852_v0  ;;  %2260 = vmatpush.msra.mxu2 %v5401_v54  ;;  %v5426_v29 = vld [vmem:[%s4177_s28 + $0x25] ss:$0 sm:$0xff] }
 0x14f   : > { %v1415_v42 = vadd.f32 %v1414_v7, %v1413_v40  ;;  %v1064_v31 = vadd.f32 %v1063_v19, %v1061_v17  ;;  %v1418_v62 = vmul.f32 %v3970_v12, %v4202_v14  ;;  %v1420_v9 = vmul.f32 %v5167_v22, %v4523_v50  ;;  %v3972_v56 = vld [vmem:[%s4177_s28 + $0x45] ss:$0 sm:$0xff] }
 0x150   : > { %v1384_v38 = vadd.f32 %v1383_v41, %v1379_v47  ;;  %v1399_v55 = vadd.f32 %v1398_v27, %v1397_v5  ;;  %v1422_v63 = vmul.f32 %v3971_v20, %v4521_v43  ;;  %v1067_v4 = vmul.f32 %v5416_v48, %v4462_v57 }
 0x151   : > { %v1417_v34 = vadd.f32 %v1416_v13, %v1415_v42  ;;  %v1066_v39 = vadd.f32 %v1065_v24, %v1064_v31  ;;  %v1427_v41 = vmul.f32 %v3972_v56, %v6862_v46  ;;  %v1088_v12 = vmul.f32 %v5399_v44, %v6848_v37  ;;  %v3974_v24 = vld [vmem:[%s4177_s28 + $0x31] ss:$0 sm:$0xff] }
 0x152   : > { %v1401_v21 = vadd.f32 %v1400_v3, %v1399_v55  ;;  %v1090_v22 = vmul.f32 %v5206_v33, %v4464_v58  ;;  %v1385_v27 = vmax.f32 %v1363_v16, %v1384_v38  ;;  %v1069_v17 = vmul.f32 %v5426_v29, %v6858_v32  ;;  %v3973_v3 = vld [vmem:[%s4177_s28 + $0x30] ss:$0 sm:$0xff] }
 0x153   : > { %v1419_v40 = vadd.f32 %v1418_v62, %v1417_v34  ;;  %v1068_v7 = vadd.f32 %v1067_v4, %v1066_v39  ;;  %v1071_v19 = vmul.f32 %v5230_v26, %v4202_v14  ;;  %v1076_v47 = vmul.f32 %v3973_v3, %v4523_v50 }
 0x154   : > { %v1091_v5 = vadd.f32 %v1090_v22, %v1088_v12  ;;  %v1092_v20 = vmul.f32 %v5213_v52, %v6852_v0  ;;  %v1406_v13 = vadd.f32 %v1405_v10, %v1401_v21  ;;  %v1081_v16 = vmul.f32 %v3974_v24, %v4521_v43 }
 0x155   : > { %v1421_v42 = vadd.f32 %v1420_v9, %v1419_v40  ;;  %v1070_v31 = vadd.f32 %v1069_v17, %v1068_v7  ;;  %v1094_v55 = vmul.f32 %v5426_v29, %v4462_v57  ;;  %v1110_v62 = vmul.f32 %v5416_v48, %v6848_v37 }
 0x156   : > { %v1093_v38 = vadd.f32 %v1092_v20, %v1091_v5  ;;  %v1112_v34 = vmul.f32 %v5426_v29, %v4464_v58  ;;  %v1407_v39 = vmax.f32 %v1385_v27, %v1406_v13  ;;  %v1086_v10 = vmul.f32 %v5255_v2, %v6862_v46 }
 0x157   : > { %v1423_v4 = vadd.f32 %v1422_v63, %v1421_v42  ;;  %v1072_v56 = vadd.f32 %v1071_v19, %v1070_v31  ;;  %v1096_v21 = vmul.f32 %v5230_v26, %v6858_v32  ;;  %v1114_v22 = vmul.f32 %v5230_v26, %v6852_v0 }
 0x158   : > { %v1095_v9 = vadd.f32 %v1094_v55, %v1093_v38  ;;  %v1113_v12 = vadd.f32 %v1112_v34, %v1110_v62  ;;  %v1098_v17 = vmul.f32 %v5238_v15, %v4202_v14  ;;  %v1100_v63 = vmul.f32 %v3974_v24, %v4523_v50  ;;  %v5472_v34 = vld [vmem:[%s4177_s28 + $0x4] ss:$0 sm:$0xff] }
 0x159   : > { %v1428_v40 = vadd.f32 %v1427_v41, %v1423_v4  ;;  %v1077_v7 = vadd.f32 %v1076_v47, %v1072_v56  ;;  %v1102_v19 = vmul.f32 %v5255_v2, %v4521_v43  ;;  %v1116_v20 = vmul.f32 %v3973_v3, %v4462_v57 }
 0x15a   : > { %v1097_v27 = vadd.f32 %v1096_v21, %v1095_v9  ;;  %v1115_v5 = vadd.f32 %v1114_v22, %v1113_v12  ;;  %v1138_v41 = vmul.f32 %v5426_v29, %v6848_v37  ;;  %v1140_v47 = vmul.f32 %v5230_v26, %v4464_v58  ;;  %v3975_v12 = vld [vmem:[%s4177_s28 + $0x3c] ss:$0 sm:$0xff] }
 0x15b   : > { %v1429_v13 = vmax.f32 %v1407_v39, %v1428_v40  ;;  %v1082_v42 = vadd.f32 %v1081_v16, %v1077_v7  ;;  %v1107_v38 = vmul.f32 %v5260_v45, %v6862_v46  ;;  %v1118_v62 = vmul.f32 %v3974_v24, %v6858_v32  ;;  %v3920_v16 = vld [vmem:[%s6747_s1 + $0x7] ss:$0 sm:$0xff]  ;;  %v3976_v40 = vld [vmem:[%s4177_s28 + $0x3d] ss:$0 sm:$0xff] }
 0x15c   : > { %v1099_v31 = vadd.f32 %v1098_v17, %v1097_v27  ;;  %v1117_v55 = vadd.f32 %v1116_v20, %v1115_v5  ;;  %v1120_v39 = vmul.f32 %v5255_v2, %v4202_v14  ;;  %v1141_v4 = vadd.f32 %v1140_v47, %v1138_v41  ;;  %v5487_v17 = vld [vmem:[%s4177_s28 + $0x5] ss:$0 sm:$0xff] }
 0x15d   : > { %v1430_v3 = vadd.f32 %v1429_v13, %v4593_v6  ;;  %v1142_v56 = vmul.f32 %v5238_v15, %v6852_v0  ;;  %v1125_v22 = vmul.f32 %v3975_v12, %v4523_v50  ;;  %v1130_v7 = vmul.f32 %v3976_v40, %v4521_v43 }
 0x15e   : > { %v1101_v9 = vadd.f32 %v1100_v63, %v1099_v31  ;;  %v1119_v21 = vadd.f32 %v1118_v62, %v1117_v55  ;;  %v1087_v5 = vadd.f32 %v1086_v10, %v1082_v42  ;;  %v1144_v13 = vmul.f32 %v3974_v24, %v4462_v57  ;;  %v5495_v55 = vld [vmem:[%s4177_s28 + $0x6] ss:$0 sm:$0xff]  ;;  %v5502_v42 = vld [vmem:[%s4177_s28 + $0x10] ss:$0 sm:$0xff] }
 0x15f   : > { %v1431_v27 = vmax.f32 %v1430_v3, 0.0  ;;  %v1143_v20 = vadd.f32 %v1142_v56, %v1141_v4  ;;  %v853_v63 = vmul.f32 %v5472_v34, %v6848_v37  ;;  %v855_v31 = vmul.f32 %v5487_v17, %v4464_v58 }
 0x160   : > { %v1103_v41 = vadd.f32 %v1102_v19, %v1101_v9  ;;  %v1121_v47 = vadd.f32 %v1120_v39, %v1119_v21  ;;  %v1135_v12 = vmul.f32 %v5301_v18, %v6862_v46  ;;  %v1146_v10 = vmul.f32 %v5255_v2, %v6858_v32 }
 0x161   : > { %v1434_v62 = vmul.f32 %v3920_v16, %v1431_v27  ;;  %v1145_v3 = vadd.f32 %v1144_v13, %v1143_v20  ;;  %v856_v39 = vadd.f32 %v855_v31, %v853_v63  ;;  %v860_v4 = vmul.f32 %v5495_v55, %v6852_v0  ;;  %v5517_v13 = vld [vmem:[%s4177_s28 + $0x12] ss:$0 sm:$0xff] }
 0x162   : > { %v1108_v24 = vadd.f32 %v1107_v38, %v1103_v41  ;;  %v1126_v19 = vadd.f32 %v1125_v22, %v1121_v47  ;;  %v1148_v16 = vmul.f32 %v5260_v45, %v4202_v14  ;;  %v1150_v9 = vmul.f32 %v3976_v40, %v4523_v50  ;;  %v5512_v22 = vld [vmem:[%s4177_s28 + $0x11] ss:$0 sm:$0xff] }
 0x163   : > { %2231 = vmatpush.msra.mxu1 %v1434_v62  ;;  %v1147_v56 = vadd.f32 %v1146_v10, %v1145_v3  ;;  %v1152_v2 = vmul.f32 %v5301_v18, %v4521_v43  ;;  %v861_v27 = vadd.f32 %v860_v4, %v856_v39  ;;  %v862_v20 = vmul.f32 %v5502_v42, %v4462_v57  ;;  %v5544_v4 = vld [vmem:[%s4177_s28 + $0x13] ss:$0 sm:$0xff] }
 0x164   : > { %v1109_v21 = vmax.f32 %v1087_v5, %v1108_v24  ;;  %v1131_v38 = vadd.f32 %v1130_v7, %v1126_v19  ;;  %2284 = vmatpush.msra.mxu3 %v1434_v62  ;;  %v1157_v45 = vmul.f32 %v5306_v51, %v6862_v46  ;;  %v880_v18 = vmul.f32 %v5487_v17, %v6848_v37  ;;  %v5527_v7 = vld [vmem:[%s4177_s28 + $0x7] ss:$0 sm:$0xff] }
 0x165   : > { %v1149_v41 = vadd.f32 %v1148_v16, %v1147_v56  ;;  %2232 = vmatpush.msra.mxu1 %v5215_v8  ;;  %v882_v40 = vmul.f32 %v5495_v55, %v4464_v58  ;;  %v863_v47 = vadd.f32 %v862_v20, %v861_v27  ;;  %v864_v63 = vmul.f32 %v5512_v22, %v6858_v32 }
 0x166   : > { %v1136_v5 = vadd.f32 %v1135_v12, %v1131_v38  ;;  %v869_v31 = vmul.f32 %v5517_v13, %v4202_v14  ;;  %2285 = vmatpush.msra.mxu3 %v5215_v8  ;;  %v871_v62 = vmul.f32 %v5002_v25, %v4523_v50  ;;  %v887_v10 = vmul.f32 %v5527_v7, %v6852_v0 }
 0x167   : > { %v1151_v51 = vadd.f32 %v1150_v9, %v1149_v41  ;;  %v883_v3 = vadd.f32 %v882_v40, %v880_v18  ;;  %2233 = vmatpush.msra.mxu1 %v5401_v54  ;;  %v865_v24 = vadd.f32 %v864_v63, %v863_v47  ;;  %v873_v19 = vmul.f32 %v5017_v49, %v4521_v43 }
 0x168   : > { %v1137_v12 = vmax.f32 %v1109_v21, %v1136_v5  ;;  %v889_v39 = vmul.f32 %v5512_v22, %v4462_v57  ;;  %2286 = vmatpush.msra.mxu3 %v5401_v54  ;;  %v908_v16 = vmul.f32 %v5502_v42, %v6848_v37  ;;  %v910_v9 = vmul.f32 %v5512_v22, %v4464_v58 }
 0x169   : > { %v1153_v8 = vadd.f32 %v1152_v2, %v1151_v51  ;;  %v888_v56 = vadd.f32 %v887_v10, %v883_v3  ;;  %v870_v21 = vadd.f32 %v869_v31, %v865_v24  ;;  %v878_v38 = vmul.f32 %v5025_v36, %v6862_v46 }
 0x16a   : > { %v891_v27 = vmul.f32 %v5517_v13, %v6858_v32  ;;  %v896_v20 = vmul.f32 %v5544_v4, %v4202_v14  ;;  %v911_v2 = vadd.f32 %v910_v9, %v908_v16  ;;  %v912_v18 = vmul.f32 %v5517_v13, %v6852_v0 }
 0x16b   : > { %v1158_v41 = vadd.f32 %v1157_v45, %v1153_v8  ;;  %v890_v54 = vadd.f32 %v889_v39, %v888_v56  ;;  %v872_v40 = vadd.f32 %v871_v62, %v870_v21  ;;  %v898_v5 = vmul.f32 %v5017_v49, %v4523_v50  ;;  %v5574_v39 = vld [vmem:[%s4177_s28 + $0x2] ss:$0 sm:$0xff]  ;;  %v3925_v8 = vld [vmem:[%s6747_s1 + $0x4] ss:$0 sm:$0xff] }
 0x16c   : > { %v914_v47 = vmul.f32 %v5002_v25, %v4462_v57  ;;  %v930_v63 = vmul.f32 %v5512_v22, %v6848_v37  ;;  %v913_v3 = vadd.f32 %v912_v18, %v911_v2  ;;  %v932_v45 = vmul.f32 %v5517_v13, %v4464_v58 }
 0x16d   : > { %v1159_v31 = vmax.f32 %v1137_v12, %v1158_v41  ;;  %v892_v51 = vadd.f32 %v891_v27, %v890_v54  ;;  %v874_v10 = vadd.f32 %v873_v19, %v872_v40  ;;  %v900_v62 = vmul.f32 %v5025_v36, %v4521_v43  ;;  %v5589_v54 = vld [vmem:[%s4177_s28 + $0x3] ss:$0 sm:$0xff] }
 0x16e   : > { %v916_v24 = vmul.f32 %v5017_v49, %v6858_v32  ;;  %v934_v25 = vmul.f32 %v5544_v4, %v6852_v0  ;;  %v915_v16 = vadd.f32 %v914_v47, %v913_v3  ;;  %v933_v19 = vadd.f32 %v932_v45, %v930_v63 }
 0x16f   : > { %v1160_v12 = vadd.f32 %v1159_v31, %v4593_v6  ;;  %v897_v56 = vadd.f32 %v896_v20, %v892_v51  ;;  %v905_v9 = vmul.f32 %v5055_v1, %v6862_v46  ;;  %v918_v21 = vmul.f32 %v5025_v36, %v4202_v14 }
 0x170   : > { %v920_v27 = vmul.f32 %v5038_v23, %v4523_v50  ;;  %v936_v41 = vmul.f32 %v5017_v49, %v4462_v57  ;;  %v917_v20 = vadd.f32 %v916_v24, %v915_v16  ;;  %v935_v40 = vadd.f32 %v934_v25, %v933_v19  ;;  %v5611_v16 = vld [vmem:[%s4177_s28 + $0xf] ss:$0 sm:$0xff] }
 0x171   : > { %v1161_v2 = vmax.f32 %v1160_v12, 0.0  ;;  %v899_v18 = vadd.f32 %v898_v5, %v897_v56  ;;  %v879_v47 = vadd.f32 %v878_v38, %v874_v10  ;;  %v938_v63 = vmul.f32 %v5025_v36, %v6858_v32  ;;  %v5602_v10 = vld [vmem:[%s4177_s28 + $0xe] ss:$0 sm:$0xff] }
 0x172   : > { %v749_v31 = vmul.f32 %v5574_v39, %v6848_v37  ;;  %v751_v23 = vmul.f32 %v5589_v54, %v4464_v58  ;;  %v919_v3 = vadd.f32 %v918_v21, %v917_v20  ;;  %v937_v45 = vadd.f32 %v936_v41, %v935_v40 }
 0x173   : > { %v1164_v51 = vmul.f32 %v3925_v8, %v1161_v2  ;;  %v901_v49 = vadd.f32 %v900_v62, %v899_v18  ;;  %v922_v5 = vmul.f32 %v5048_v35, %v4521_v43  ;;  %v927_v38 = vmul.f32 %v5064_v59, %v6862_v46 }
 0x174   : > { %v752_v36 = vadd.f32 %v751_v23, %v749_v31  ;;  %v756_v24 = vmul.f32 %v5472_v34, %v6852_v0  ;;  %v921_v12 = vadd.f32 %v920_v27, %v919_v3  ;;  %v939_v56 = vadd.f32 %v938_v63, %v937_v45 }
 0x175   : > { %2210 = vmatpush.msra.mxu0 %v1164_v51  ;;  %v906_v25 = vadd.f32 %v905_v9, %v901_v49  ;;  %v940_v62 = vmul.f32 %v5055_v1, %v4202_v14  ;;  %v942_v8 = vmul.f32 %v5048_v35, %v4523_v50  ;;  %v758_v21 = vmul.f32 %v5602_v10, %v4462_v57 }
 0x176   : > { %v757_v19 = vadd.f32 %v756_v24, %v752_v36  ;;  %v776_v41 = vmul.f32 %v5589_v54, %v6848_v37  ;;  %2261 = vmatpush.msra.mxu2 %v1164_v51  ;;  %v923_v9 = vadd.f32 %v922_v5, %v921_v12  ;;  %v778_v18 = vmul.f32 %v5472_v34, %v4464_v58  ;;  %v3977_v36 = vld [vmem:[%s4177_s28 + $0x1c] ss:$0 sm:$0xff] }
 0x177   : > { %v907_v2 = vmax.f32 %v879_v47, %v906_v25  ;;  %v941_v27 = vadd.f32 %v940_v62, %v939_v56  ;;  %v944_v1 = vmul.f32 %v5064_v59, %v4521_v43  ;;  %v949_v35 = vmul.f32 %v5083_v60, %v6862_v46 }
 0x178   : > { %v759_v20 = vadd.f32 %v758_v21, %v757_v19  ;;  %v760_v40 = vmul.f32 %v5611_v16, %v6858_v32  ;;  %v928_v63 = vadd.f32 %v927_v38, %v923_v9  ;;  %v779_v23 = vadd.f32 %v778_v18, %v776_v41 }
 0x179   : > { %v943_v31 = vadd.f32 %v942_v8, %v941_v27  ;;  %v783_v47 = vmul.f32 %v5487_v17, %v6852_v0  ;;  %v765_v34 = vmul.f32 %v5502_v42, %v4202_v14  ;;  %v767_v59 = vmul.f32 %v5206_v33, %v4523_v50 }
 0x17a   : > { %v761_v51 = vadd.f32 %v760_v40, %v759_v20  ;;  %v769_v60 = vmul.f32 %v5213_v52, %v4521_v43  ;;  %v929_v49 = vmax.f32 %v907_v2, %v928_v63  ;;  %v785_v5 = vmul.f32 %v5611_v16, %v4462_v57 }
 0x17b   : > { %v945_v3 = vadd.f32 %v944_v1, %v943_v31  ;;  %v784_v45 = vadd.f32 %v783_v47, %v779_v23  ;;  %v774_v17 = vmul.f32 %v3977_v36, %v6862_v46  ;;  %v804_v24 = vmul.f32 %v5602_v10, %v6848_v37  ;;  %v3978_v1 = vld [vmem:[%s4177_s28 + $0x1d] ss:$0 sm:$0xff]  ;;  %v3934_v47 = vld [vmem:[%s6747_s1 + $0x2] ss:$0 sm:$0xff] }
 0x17c   : > { %v766_v38 = vadd.f32 %v765_v34, %v761_v51  ;;  %v806_v25 = vmul.f32 %v5611_v16, %v4464_v58  ;;  %v787_v62 = vmul.f32 %v5502_v42, %v6858_v32  ;;  %v792_v8 = vmul.f32 %v5512_v22, %v4202_v14 }
 0x17d   : > { %v950_v12 = vadd.f32 %v949_v35, %v945_v3  ;;  %v786_v56 = vadd.f32 %v785_v5, %v784_v45  ;;  %v794_v21 = vmul.f32 %v5213_v52, %v4523_v50  ;;  %v808_v2 = vmul.f32 %v5502_v42, %v6852_v0 }
 0x17e   : > { %v768_v19 = vadd.f32 %v767_v59, %v766_v38  ;;  %v807_v41 = vadd.f32 %v806_v25, %v804_v24  ;;  %v796_v18 = vmul.f32 %v3977_v36, %v4521_v43  ;;  %v801_v35 = vmul.f32 %v3978_v1, %v6862_v46  ;;  %v3940_v25 = vld [vmem:[%s4177_s28 + $0x8] ss:$0 sm:$0xff] }
 0x17f   : > { %v951_v9 = vmax.f32 %v929_v49, %v950_v12  ;;  %v788_v27 = vadd.f32 %v787_v62, %v786_v56  ;;  %v810_v40 = vmul.f32 %v5206_v33, %v4462_v57  ;;  %v826_v63 = vmul.f32 %v5611_v16, %v6848_v37  ;;  %v3979_v56 = vld [vmem:[%s4177_s28 + $0x28] ss:$0 sm:$0xff] }
 0x180   : > { %v809_v20 = vadd.f32 %v808_v2, %v807_v41  ;;  %v828_v31 = vmul.f32 %v5502_v42, %v4464_v58  ;;  %v812_v34 = vmul.f32 %v5213_v52, %v6858_v32  ;;  %v814_v33 = vmul.f32 %v3977_v36, %v4202_v14 }
 0x181   : > { %v952_v23 = vadd.f32 %v951_v9, %v4593_v6  ;;  %v793_v51 = vadd.f32 %v792_v8, %v788_v27  ;;  %v770_v59 = vadd.f32 %v769_v60, %v768_v19  ;;  %v830_v45 = vmul.f32 %v5512_v22, %v6852_v0 }
 0x182   : > { %v811_v49 = vadd.f32 %v810_v40, %v809_v20  ;;  %v829_v3 = vadd.f32 %v828_v31, %v826_v63  ;;  %v816_v38 = vmul.f32 %v5230_v26, %v4523_v50  ;;  %v818_v24 = vmul.f32 %v5238_v15, %v4521_v43  ;;  %v3942_v63 = vld [vmem:[%s4177_s28 + $0x9] ss:$0 sm:$0xff] }
 0x183   : > { %v953_v42 = vmax.f32 %v952_v23, 0.0  ;;  %v795_v5 = vadd.f32 %v794_v21, %v793_v51  ;;  %v823_v62 = vmul.f32 %v3979_v56, %v6862_v46  ;;  %v832_v8 = vmul.f32 %v5213_v52, %v4462_v57 }
 0x184   : > { %v813_v12 = vadd.f32 %v812_v34, %v811_v49  ;;  %v831_v60 = vadd.f32 %v830_v45, %v829_v3  ;;  %v957_v21 = vmul.f32 %v5495_v55, %v6848_v37  ;;  %v959_v26 = vmul.f32 %v5527_v7, %v4464_v58 }
 0x185   : > { %v5676_v19 = vmul.f32 %v3934_v47, %v953_v42  ;;  %v797_v22 = vadd.f32 %v796_v18, %v795_v5  ;;  %v775_v41 = vadd.f32 %v774_v17, %v770_v59  ;;  %v834_v27 = vmul.f32 %v3977_v36, %v6858_v32  ;;  %v3980_v59 = vld [vmem:[%s4177_s28 + $0x29] ss:$0 sm:$0xff] }
 0x186   : > { %v815_v2 = vadd.f32 %v814_v33, %v813_v12  ;;  %v833_v9 = vadd.f32 %v832_v8, %v831_v60  ;;  %v836_v52 = vmul.f32 %v3978_v1, %v4202_v14  ;;  %v960_v40 = vadd.f32 %v959_v26, %v957_v21  ;;  %v3981_v12 = vld [vmem:[%s4177_s28 + $0x1e] ss:$0 sm:$0xff]  ;;  %v3982_v60 = vld [vmem:[%s4177_s28 + $0x1f] ss:$0 sm:$0xff] }
 0x187   : > { %2211 = vmatpush.msra.mxu0 %v5676_v19  ;;  %v802_v20 = vadd.f32 %v801_v35, %v797_v22  ;;  %v964_v18 = vmul.f32 %v3940_v25, %v6852_v0  ;;  %v838_v17 = vmul.f32 %v5238_v15, %v4523_v50  ;;  %v840_v23 = vmul.f32 %v3979_v56, %v4521_v43  ;;  %v3941_v15 = vld [vmem:[%s4177_s28 + $0x14] ss:$0 sm:$0xff] }
 0x188   : > { %v817_v55 = vadd.f32 %v816_v38, %v815_v2  ;;  %v835_v31 = vadd.f32 %v834_v27, %v833_v9  ;;  %v966_v36 = vmul.f32 %v5517_v13, %v4462_v57  ;;  %v984_v1 = vmul.f32 %v5527_v7, %v6848_v37  ;;  %v3943_v2 = vld [vmem:[%s4177_s28 + $0x15] ss:$0 sm:$0xff] }
 0x189   : > { %v965_v47 = vadd.f32 %v964_v18, %v960_v40  ;;  %v986_v35 = vmul.f32 %v3940_v25, %v4464_v58  ;;  %v803_v51 = vmax.f32 %v775_v41, %v802_v20  ;;  %v845_v49 = vmul.f32 %v3980_v59, %v6862_v46 }
 0x18a   : > { %v819_v34 = vadd.f32 %v818_v24, %v817_v55  ;;  %v837_v33 = vadd.f32 %v836_v52, %v835_v31  ;;  %v968_v45 = vmul.f32 %v5544_v4, %v6858_v32  ;;  %v991_v5 = vmul.f32 %v3942_v63, %v6852_v0 }
 0x18b   : > { %v967_v3 = vadd.f32 %v966_v36, %v965_v47  ;;  %v987_v42 = vadd.f32 %v986_v35, %v984_v1  ;;  %v973_v25 = vmul.f32 %v3941_v15, %v4202_v14  ;;  %v975_v24 = vmul.f32 %v3981_v12, %v4523_v50 }
 0x18c   : > { %v824_v38 = vadd.f32 %v823_v62, %v819_v34  ;;  %v839_v7 = vadd.f32 %v838_v17, %v837_v33  ;;  %v977_v8 = vmul.f32 %v3982_v60, %v4521_v43  ;;  %v993_v21 = vmul.f32 %v5544_v4, %v4462_v57 }
 0x18d   : > { %v969_v56 = vadd.f32 %v968_v45, %v967_v3  ;;  %v992_v22 = vadd.f32 %v991_v5, %v987_v42  ;;  %v1012_v62 = vmul.f32 %v5517_v13, %v6848_v37  ;;  %v1014_v9 = vmul.f32 %v5544_v4, %v4464_v58  ;;  %v3945_v3 = vld [vmem:[%s4177_s28] ss:$0 sm:$0xff]  ;;  %v3939_v42 = vld [vmem:[%s6747_s1 + $0x1] ss:$0 sm:$0xff] }
 0x18e   : > { %v825_v26 = vmax.f32 %v803_v51, %v824_v38  ;;  %v841_v41 = vadd.f32 %v840_v23, %v839_v7  ;;  %v982_v20 = vmul.f32 %v5311_v28, %v6862_v46  ;;  %v995_v40 = vmul.f32 %v3941_v15, %v6858_v32 }
 0x18f   : > { %v974_v27 = vadd.f32 %v973_v25, %v969_v56  ;;  %v994_v52 = vadd.f32 %v993_v21, %v992_v22  ;;  %v1000_v63 = vmul.f32 %v3943_v2, %v4202_v14  ;;  %v1015_v55 = vadd.f32 %v1014_v9, %v1012_v62  ;;  %v3946_v56 = vld [vmem:[%s4177_s28 + $0x1] ss:$0 sm:$0xff] }
 0x190   : > { %v846_v18 = vadd.f32 %v845_v49, %v841_v41  ;;  %v1016_v31 = vmul.f32 %v3941_v15, %v6852_v0  ;;  %v1002_v13 = vmul.f32 %v3982_v60, %v4523_v50  ;;  %v1018_v47 = vmul.f32 %v3981_v12, %v4462_v57  ;;  %v3983_v12 = vld [vmem:[%s4177_s28 + $0x2a] ss:$0 sm:$0xff] }
 0x191   : > { %v976_v17 = vadd.f32 %v975_v24, %v974_v27  ;;  %v996_v23 = vadd.f32 %v995_v40, %v994_v52  ;;  %v1034_v35 = vmul.f32 %v5544_v4, %v6848_v37  ;;  %v1036_v51 = vmul.f32 %v3941_v15, %v4464_v58 }
 0x192   : > { %v847_v36 = vmax.f32 %v825_v26, %v846_v18  ;;  %v1017_v1 = vadd.f32 %v1016_v31, %v1015_v55  ;;  %v1004_v59 = vmul.f32 %v5311_v28, %v4521_v43  ;;  %v1020_v49 = vmul.f32 %v3982_v60, %v6858_v32  ;;  %v3984_v55 = vld [vmem:[%s4177_s28 + $0x2b] ss:$0 sm:$0xff] }
 0x193   : > { %v978_v34 = vadd.f32 %v977_v8, %v976_v17  ;;  %v1001_v33 = vadd.f32 %v1000_v63, %v996_v23  ;;  %v1037_v38 = vadd.f32 %v1036_v51, %v1034_v35  ;;  %v1038_v4 = vmul.f32 %v3943_v2, %v6852_v0 }
 0x194   : > { %v848_v45 = vadd.f32 %v847_v36, %v4593_v6  ;;  %v1019_v5 = vadd.f32 %v1018_v47, %v1017_v1  ;;  %v1009_v7 = vmul.f32 %v5330_v61, %v6862_v46  ;;  %v1022_v25 = vmul.f32 %v5311_v28, %v4202_v14 }
 0x195   : > { %v1003_v15 = vadd.f32 %v1002_v13, %v1001_v33  ;;  %v1024_v24 = vmul.f32 %v3983_v12, %v4523_v50  ;;  %v1039_v21 = vadd.f32 %v1038_v4, %v1037_v38  ;;  %v1040_v26 = vmul.f32 %v3982_v60, %v4462_v57 }
 0x196   : > { %v849_v8 = vmax.f32 %v848_v45, 0.0  ;;  %v1021_v22 = vadd.f32 %v1020_v49, %v1019_v5  ;;  %v983_v41 = vadd.f32 %v982_v20, %v978_v34  ;;  %v579_v62 = vmul.f32 %v3945_v3, %v6848_v37  ;;  %v3947_v20 = vld [vmem:[%s4177_s28 + $0xc] ss:$0 sm:$0xff]  ;;  %v3948_v34 = vld [vmem:[%s4177_s28 + $0xd] ss:$0 sm:$0xff] }
 0x197   : > { %v1005_v2 = vadd.f32 %v1004_v59, %v1003_v15  ;;  %v589_v9 = vmul.f32 %v3946_v56, %v4464_v58  ;;  %v1041_v40 = vadd.f32 %v1040_v26, %v1039_v21  ;;  %v1042_v18 = vmul.f32 %v5311_v28, %v6858_v32 }
 0x198   : > { %v5742_v27 = vmul.f32 %v3939_v42, %v849_v8  ;;  %v1023_v52 = vadd.f32 %v1022_v25, %v1021_v22  ;;  %v1026_v31 = vmul.f32 %v3984_v55, %v4521_v43  ;;  %v599_v60 = vmul.f32 %v5574_v39, %v6852_v0 }
 0x199   : > { %v1010_v63 = vadd.f32 %v1009_v7, %v1005_v2  ;;  %v590_v17 = vadd.f32 %v589_v9, %v579_v62  ;;  %v1031_v13 = vmul.f32 %v5335_v53, %v6862_v46  ;;  %v1043_v47 = vadd.f32 %v1042_v18, %v1041_v40  ;;  %v3985_v9 = vld [vmem:[%s4177_s28 + $0x1a] ss:$0 sm:$0xff] }
 0x19a   : > { %2212 = vmatpush.msra.mxu0 %v5742_v27  ;;  %v1025_v23 = vadd.f32 %v1024_v24, %v1023_v52  ;;  %v1044_v28 = vmul.f32 %v5330_v61, %v4202_v14  ;;  %v1046_v1 = vmul.f32 %v3984_v55, %v4523_v50  ;;  %v609_v51 = vmul.f32 %v3947_v20, %v4462_v57 }
 0x19b   : > { %v1011_v36 = vmax.f32 %v983_v41, %v1010_v63  ;;  %v600_v35 = vadd.f32 %v599_v60, %v590_v17  ;;  %v661_v49 = vmul.f32 %v3946_v56, %v6848_v37  ;;  %v663_v3 = vmul.f32 %v5574_v39, %v4464_v58 }
 0x19c   : > { %v1027_v33 = vadd.f32 %v1026_v31, %v1025_v23  ;;  %v1045_v59 = vadd.f32 %v1044_v28, %v1043_v47  ;;  %v1048_v45 = vmul.f32 %v5335_v53, %v4521_v43  ;;  %v619_v61 = vmul.f32 %v3948_v34, %v6858_v32  ;;  %v3944_v28 = vld [vmem:[%s6747_s1 + $0x3] ss:$0 sm:$0xff] }
 0x19d   : > { %v610_v42 = vadd.f32 %v609_v51, %v600_v35  ;;  %v664_v4 = vadd.f32 %v663_v3, %v661_v49  ;;  %v668_v15 = vmul.f32 %v5589_v54, %v6852_v0  ;;  %v1053_v7 = vmul.f32 %v5363_v30, %v6862_v46 }
 0x19e   : > { %v1032_v5 = vadd.f32 %v1031_v13, %v1027_v33  ;;  %v1047_v38 = vadd.f32 %v1046_v1, %v1045_v59  ;;  %v629_v39 = vmul.f32 %v5602_v10, %v4202_v14  ;;  %v670_v56 = vmul.f32 %v3948_v34, %v4462_v57  ;;  %v3986_v59 = vld [vmem:[%s4177_s28 + $0x1b] ss:$0 sm:$0xff] }
 0x19f   : > { %v620_v25 = vadd.f32 %v619_v61, %v610_v42  ;;  %v669_v53 = vadd.f32 %v668_v15, %v664_v4  ;;  %v639_v22 = vmul.f32 %v5390_v11, %v4523_v50  ;;  %v689_v21 = vmul.f32 %v3947_v20, %v6848_v37 }
 0x1a0   : > { %v1033_v12 = vmax.f32 %v1011_v36, %v1032_v5  ;;  %v1049_v24 = vadd.f32 %v1048_v45, %v1047_v38  ;;  %v691_v54 = vmul.f32 %v3948_v34, %v4464_v58  ;;  %v649_v30 = vmul.f32 %v5399_v44, %v4521_v43 }
 0x1a1   : > { %v630_v8 = vadd.f32 %v629_v39, %v620_v25  ;;  %v671_v41 = vadd.f32 %v670_v56, %v669_v53  ;;  %v672_v2 = vmul.f32 %v5602_v10, %v6858_v32  ;;  %v659_v52 = vmul.f32 %v3985_v9, %v6862_v46 }
 0x1a2   : > { %v1054_v26 = vadd.f32 %v1053_v7, %v1049_v24  ;;  %v692_v40 = vadd.f32 %v691_v54, %v689_v21  ;;  %v693_v18 = vmul.f32 %v5602_v10, %v6852_v0  ;;  %v677_v31 = vmul.f32 %v5611_v16, %v4202_v14  ;;  %v3987_v24 = vld [vmem:[%s4177_s28 + $0x26] ss:$0 sm:$0xff] }
 0x1a3   : > { %v640_v62 = vadd.f32 %v639_v22, %v630_v8  ;;  %v673_v55 = vadd.f32 %v672_v2, %v671_v41  ;;  %v679_v17 = vmul.f32 %v5399_v44, %v4523_v50  ;;  %v695_v20 = vmul.f32 %v5390_v11, %v4462_v57  ;;  %v2190_v22 = vld [vmem:[%s6750_s4 + $0x8] sm:$0xff] }
 0x1a4   : > { %v1055_v63 = vmax.f32 %v1033_v12, %v1054_v26  ;;  %v694_v60 = vadd.f32 %v693_v18, %v692_v40  ;;  %v717_v23 = vmul.f32 %v3948_v34, %v6848_v37  ;;  %v719_v13 = vmul.f32 %v5602_v10, %v4464_v58  ;;  %v2189_v58 = vld [vmem:[%s6750_s4] sm:$0xff] }
 0x1a5   : > { %v678_v36 = vadd.f32 %v677_v31, %v673_v55  ;;  %v681_v1 = vmul.f32 %v3985_v9, %v4521_v43  ;;  %v697_v35 = vmul.f32 %v5399_v44, %v6858_v32  ;;  %v650_v51 = vadd.f32 %v649_v30, %v640_v62  ;;  %3682 = vmatmul.msk.f32.vlgmr.msra.gmra.mxu2 %vm2191_vm0, %v2189_v58  ;;  %v3988_v30 = vld [vmem:[%s4177_s28 + $0x27] ss:$0 sm:$0xff]  ;;  %s348_s28 = sand.u32 1, %s4043_s14  }
 0x1a6   : > { %v1056_v47 = vadd.f32 %v1055_v63, %v4593_v6  ;;  %v696_v33 = vadd.f32 %v695_v20, %v694_v60  ;;  %v720_v11 = vadd.f32 %v719_v13, %v717_v23  ;;  %v721_v37 = vmul.f32 %v5611_v16, %v6852_v0  ;;  %3684 = vmatmul.msk.f32.vlgmr.msra.gmra.mxu3 %vm2191_vm0, %v2189_v58  ;;  %v2301_v20 = vpop.permute.xlu1 %2300  ;;  %s349_s25 = scalar_lea.vmem [#allocation2], %s348_s28  ;;  %s3500_s29 = scalar_lea.sflag [#allocation3], %s348_s28 }
 0x1a7   : > { %v680_v34 = vadd.f32 %v679_v17, %v678_v36  ;;  %v686_v49 = vmul.f32 %v3986_v59, %v6862_v46  ;;  %v699_v3 = vmul.f32 %v3985_v9, %v4202_v14  ;;  %v723_v61 = vmul.f32 %v5399_v44, %v4462_v57  ;;  %s3510_s26 = sshll.u32 %s349_s25, 4  ;;  %s3511_s26 = int_to_ptr.vmem [resolvable:$true] %s3510_s26 }
 0x1a8   : > { %v1057_v10 = vmax.f32 %v1056_v47, 0.0  ;;  %v698_v45 = vadd.f32 %v697_v35, %v696_v33  ;;  %v722_v42 = vadd.f32 %v721_v37, %v720_v11  ;;  %v704_v16 = vmul.f32 %v5416_v48, %v4523_v50 }
 0x1a9   : > { %v682_v0 = vadd.f32 %v681_v1, %v680_v34  ;;  %v660_v38 = vadd.f32 %v659_v52, %v650_v51  ;;  %v725_v7 = vmul.f32 %v3985_v9, %v6858_v32  ;;  %v709_v57 = vmul.f32 %v5426_v29, %v4521_v43 }
 0x1aa   : > { %v1060_v5 = vmul.f32 %v3944_v28, %v1057_v10  ;;  %v700_v4 = vadd.f32 %v699_v3, %v698_v45  ;;  %v724_v15 = vadd.f32 %v723_v61, %v722_v42  ;;  %v727_v12 = vmul.f32 %v3986_v59, %v4202_v14  ;;  %v3007_v45 = vld [vmem:[%s6752_s6 + $0x38] sm:$0xff] }
 0x1ab   : > { %v687_v25 = vadd.f32 %v686_v49, %v682_v0  ;;  %v714_v48 = vmul.f32 %v3987_v24, %v6862_v46  ;;  %v729_v32 = vmul.f32 %v5426_v29, %v4523_v50  ;;  %v731_v54 = vmul.f32 %v3987_v24, %v4521_v43  ;;  %v3000_v49 = vld [vmem:[%s6752_s6] sm:$0xff] }
 0x1ac   : > { %2234 = vmatpush.msra.mxu1 %v1060_v5  ;;  %v705_v39 = vadd.f32 %v704_v16, %v700_v4  ;;  %v726_v44 = vadd.f32 %v725_v7, %v724_v15  ;;  %v736_v50 = vmul.f32 %v3988_v30, %v6862_v46  ;;  %v2313_v9 = vlaneseq  ;;  %v3002_v4 = vld [vmem:[%s6752_s6 + $0x10] sm:$0xff]  ;;  %v3009_v7 = vld [vmem:[%s6752_s6 + $0x48] sm:$0xff] }
 0x1ad   : > { %v688_v53 = vmax.f32 %v660_v38, %v687_v25  ;;  %3683 = vmatmul.msk.f32.gmra.mxu2 %vm2191_vm0, %v2190_v22 }
 0x1ae   : > { %2235 = vmatpush.msra.mxu1 %v5676_v19  ;;  %v710_v56 = vadd.f32 %v709_v57, %v705_v39  ;;  %v728_v8 = vadd.f32 %v727_v12, %v726_v44  ;;  %3685 = vmatmul.msk.f32.gmra.mxu3 %vm2191_vm0, %v2190_v22  ;;  %v5840_v52 = vshrl.u32 %v2313_v9, 7 }
 0x1b0   : > { %2236 = vmatpush.msra.mxu1 %v5742_v27  ;;  %v715_v21 = vadd.f32 %v714_v48, %v710_v56  ;;  %v730_v14 = vadd.f32 %v729_v32, %v728_v8  ;;  %v3949_v27 = vld [vmem:[%s6747_s1] ss:$0 sm:$0xff]  ;;  %v5843_v46 = vadd.s32 16, %v5840_v52  ;;  %3733 = vset.pattern.permute.xlu0 %v5840_v52  ;;  %v5855_v28 = vadd.s32 32, %v5840_v52  ;;  %v3010_v32 = vld [vmem:[%s6752_s6 + $0x50] sm:$0xff] }
 0x1b1   : > { %3680 = vmatmul.msk.f32.vlgmr.msra.gmra.mxu1 %vm2191_vm0, %v2189_v58  ;;  %v5858_v36 = vadd.s32 24, %v5840_v52  ;;  %v5861_v1 = vadd.s32 40, %v5840_v52  ;;  %v5867_v35 = vadd.s32 48, %v5840_v52 }
 0x1b2   : > { %v716_v19 = vmax.f32 %v688_v53, %v715_v21  ;;  %v732_v26 = vadd.f32 %v731_v54, %v730_v14  ;;  %3735 = vset.pattern.permute.xlu2 %v5843_v46  ;;  %v3003_v53 = vld [vmem:[%s6752_s6 + $0x18] sm:$0xff] }
 0x1b4   : > { %v737_v29 = vadd.f32 %v736_v50, %v732_v26 }
 0x1b6   : > { %v738_v41 = vmax.f32 %v716_v19, %v737_v29  ;;  %v3005_v19 = vld [vmem:[%s6752_s6 + $0x28] sm:$0xff] }
 0x1b8   : > { %v744_v2 = vadd.f32 %v4593_v6, %v738_v41  ;;  %v5846_v6 = vadd.s32 8, %v5840_v52  ;;  %v3012_v41 = vld [vmem:[%s6752_s6 + $0x60] sm:$0xff] }
 0x1b9   : > { %3681 = vmatmul.msk.f32.gmra.mxu1 %vm2191_vm0, %v2190_v22 }
 0x1ba   : > { %v745_v43 = vmax.f32 %v744_v2, 0.0  ;;  %3734 = vset.pattern.permute.xlu1 %v5846_v6 }
 0x1bc   : > { %v748_v62 = vmul.f32 %v3949_v27, %v745_v43 }
 0x1be   : > { %2213 = vmatpush.msra.mxu0 %v748_v62 }
 0x1bf   : > { %3678 = vmatmul.msk.f32.vlgmr.msra.gmra.mxu0 %vm2191_vm0, %v2189_v58  ;;  %v5894_v58 = vpop.permute.xlu2 %2305 }
 0x1c7   : > { %3679 = vmatmul.msk.f32.gmra.mxu0 %vm2191_vm0, %v2190_v22 }
 0x228   : > { %v2263_v63 = vpop.f32.mrf.mxu2 }
 0x229   : > { %v2288_v31 = vpop.f32.mrf.mxu3 }
 0x22e   : > { %v2238_v40 = vpop.f32.mrf.mxu1 }
 0x236   : > { %v2241_v29 = vpop.f32.mrf.mxu1 }
 0x23c   : > { %v2215_v18 = vpop.f32.mrf.mxu0 }
 0x23d   : > { %v2244_v55 = vmax.f32 %v2215_v18, %v2238_v40  ;;  %v2266_v40 = vpop.f32.mrf.mxu2 }
 0x23f   : > { %v2269_v17 = vmax.f32 %v2244_v55, %v2263_v63  ;;  %v3001_v55 = vld [vmem:[%s6752_s6 + $0x8] sm:$0xff] }
 0x241   : > { %v2294_v60 = vmax.f32 %v2269_v17, %v2288_v31 }
 0x243   : > { %v2308_v23 = vadd.f32 %v2301_v20, %v2294_v60  ;;  %v2291_v20 = vpop.f32.mrf.mxu3 }
 0x244   : > { %v2218_v50 = vpop.f32.mrf.mxu0 }
 0x245   : > { %v5851_v13 = vmax.f32 %v2308_v23, 0.0  ;;  %v2245_v62 = vmax.f32 %v2218_v50, %v2241_v29  ;;  %v3008_v23 = vld [vmem:[%s6752_s6 + $0x40] sm:$0xff] }
 0x246   : > { %v3020_v50 = vld [vmem:[%s6752_s6 + $0xa0] sm:$0x1] }
 0x247   : > { %v2312_v47 = vperm.slane %v5851_v13, 0  ;;  %v2355_v51 = vperm.slane %v5851_v13, 1  ;;  %v2398_v33 = vperm.slane %v5851_v13, 2  ;;  %v5884_v11 = vperm.slane %v5851_v13, 3 }
 0x248   : > { %v5891_v37 = vperm.slane %v5851_v13, 4  ;;  %v5900_v34 = vperm.slane %v5851_v13, 5  ;;  %v5938_v8 = vperm.slane %v5851_v13, 6  ;;  %v2270_v17 = vmax.f32 %v2245_v62, %v2266_v40 }
 0x249   : > { %2329 = vperm.xlu2 %3735, %v2312_v47   ;;  %2323 = vperm.xlu1 %3734, %v2312_v47   ;;  %v5969_v60 = vperm.slane %v5851_v13, 7 }
 0x24a   : > { %2317 = vperm.xlu0 %3733, %v2312_v47  }
 0x251   : > { %3737 = vset.pattern.permute.xlu2 %v5855_v28  ;;  %3736 = vset.pattern.permute.xlu1 %v5858_v36 }
 0x252   : > { %3738 = vset.pattern.permute.xlu0 %v5861_v1 }
 0x259   : > { %2341 = vperm.xlu2 %3737, %v2312_v47   ;;  %2335 = vperm.xlu1 %3736, %v2312_v47  }
 0x25a   : > { %2347 = vperm.xlu0 %3738, %v2312_v47  }
 0x261   : > { %3740 = vset.pattern.permute.xlu2 %v5840_v52  ;;  %3739 = vset.pattern.permute.xlu1 %v5867_v35 }
 0x262   : > { %3743 = vset.pattern.permute.xlu0 %v5858_v36 }
 0x269   : > { %2360 = vperm.xlu2 %3740, %v2355_v51   ;;  %2353 = vperm.xlu1 %3739, %v2312_v47  }
 0x26a   : > { %2378 = vperm.xlu0 %3743, %v2355_v51  }
 0x271   : > { %3742 = vset.pattern.permute.xlu2 %v5843_v46  ;;  %3741 = vset.pattern.permute.xlu1 %v5846_v6 }
 0x272   : > { %3748 = vset.pattern.permute.xlu0 %v5846_v6 }
 0x279   : > { %2372 = vperm.xlu2 %3742, %v2355_v51   ;;  %2366 = vperm.xlu1 %3741, %v2355_v51  }
 0x27a   : > { %2409 = vperm.xlu0 %3748, %v2398_v33  }
 0x281   : > { %3745 = vset.pattern.permute.xlu2 %v5861_v1  ;;  %3744 = vset.pattern.permute.xlu1 %v5855_v28 }
 0x282   : > { %3753 = vset.pattern.permute.xlu0 %v5867_v35 }
 0x289   : > { %2390 = vperm.xlu2 %3745, %v2355_v51   ;;  %2384 = vperm.xlu1 %3744, %v2355_v51  }
 0x28a   : > { %2439 = vperm.xlu0 %3753, %v2398_v33  }
 0x291   : > { %3747 = vset.pattern.permute.xlu2 %v5840_v52  ;;  %3746 = vset.pattern.permute.xlu1 %v5867_v35 }
 0x292   : > { %3758 = vset.pattern.permute.xlu0 %v5855_v28 }
 0x299   : > { %2403 = vperm.xlu2 %3747, %v2398_v33   ;;  %2396 = vperm.xlu1 %3746, %v2355_v51   ;;  %v3015_v51 = vld [vmem:[%s6752_s6 + $0x78] sm:$0xff] }
 0x29a   : > { %2470 = vperm.xlu0 %3758, %v5884_v11  }
 0x2a1   : > { %3750 = vset.pattern.permute.xlu2 %v5858_v36  ;;  %3749 = vset.pattern.permute.xlu1 %v5843_v46 }
 0x2a2   : > { %3763 = vset.pattern.permute.xlu0 %v5843_v46 }
 0x2a3   : > { %v2330_v10 = vpop.permute.xlu2 %2329 }
 0x2a4   : > { %v3114_v25 = vmul.f32 %v3002_v4, %v2330_v10  ;;  %v2295_v10 = vmax.f32 %v2270_v17, %v2291_v20 }
 0x2a6   : > { %v3287_v12 = vsel %vm3224_vm1, %v3114_v25, 0.0  ;;  %v3004_v25 = vld [vmem:[%s6752_s6 + $0x20] sm:$0xff] }
 0x2a9   : > { %2421 = vperm.xlu2 %3750, %v2398_v33   ;;  %2415 = vperm.xlu1 %3749, %v2398_v33  }
 0x2aa   : > { %2501 = vperm.xlu0 %3763, %v5891_v37  }
 0x2b1   : > { %3752 = vset.pattern.permute.xlu2 %v5861_v1  ;;  %3751 = vset.pattern.permute.xlu1 %v5855_v28 }
 0x2b2   : > { %3768 = vset.pattern.permute.xlu0 %v5840_v52 }
 0x2b3   : > { %v5903_v59 = vpop.permute.xlu2 %2341 }
 0x2b9   : > { %2433 = vperm.xlu2 %3752, %v2398_v33   ;;  %2427 = vperm.xlu1 %3751, %v2398_v33  }
 0x2ba   : > { %2532 = vperm.xlu0 %3768, %v5900_v34  }
 0x2bb   : > { %v2324_v15 = vpop.permute.xlu1 %2323 }
 0x2bc   : > { %v2318_v3 = vpop.permute.xlu0 %2317  ;;  %v3113_v47 = vmul.f32 %v3001_v55, %v2324_v15 }
 0x2bd   : > { %v3112_v42 = vmul.f32 %v3000_v49, %v2318_v3 }
 0x2bf   : > { %v3225_v0 = vsel %vm3224_vm1, %v3112_v42, 0.0 }
 0x2c1   : > { %3755 = vset.pattern.permute.xlu2 %v5846_v6  ;;  %3754 = vset.pattern.permute.xlu1 %v5840_v52 }
 0x2c2   : > { %3773 = vset.pattern.permute.xlu0 %v5861_v1 }
 0x2c3   : > { %v2361_v61 = vpop.permute.xlu2 %2360 }
 0x2c4   : > { %v3119_v5 = vmul.f32 %v3007_v45, %v2361_v61  ;;  %v3256_v45 = vsel %vm3224_vm1, %v3113_v47, 0.0  ;;  %v2309_v61 = vadd.f32 %v5894_v58, %v2295_v10 }
 0x2c6   : > { %v3226_v16 = vsel %vm3224_vm1, %v3119_v5, 0.0  ;;  %v5992_v15 = vmax.f32 %v2309_v61, 0.0 }
 0x2c7   : > { %v5916_v38 = vadd.f32 %v3226_v16, %v3225_v0  ;;  %v3014_v16 = vld [vmem:[%s6752_s6 + $0x70] sm:$0xff] }
 0x2c9   : > { %2452 = vperm.xlu2 %3755, %v5884_v11   ;;  %2446 = vperm.xlu1 %3754, %v5884_v11  }
 0x2ca   : > { %2562 = vperm.xlu0 %3773, %v5900_v34  }
 0x2cb   : > { %v2336_v56 = vpop.permute.xlu1 %2335 }
 0x2cc   : > { %v2348_v57 = vpop.permute.xlu0 %2347  ;;  %v3115_v22 = vmul.f32 %v3003_v53, %v2336_v56 }
 0x2cd   : > { %v3117_v2 = vmul.f32 %v3005_v19, %v2348_v57  ;;  %v6002_v57 = vperm.slane %v5992_v15, 0 }
 0x2ce   : > { %v3318_v54 = vsel %vm3224_vm1, %v3115_v22, 0.0  ;;  %v3017_v22 = vld [vmem:[%s6752_s6 + $0x88] sm:$0xff] }
 0x2cf   : > { %v3380_v18 = vsel %vm3224_vm1, %v3117_v2, 0.0 }
 0x2d1   : > { %3757 = vset.pattern.permute.xlu2 %v5858_v36  ;;  %3756 = vset.pattern.permute.xlu1 %v5843_v46 }
 0x2d2   : > { %3778 = vset.pattern.permute.xlu0 %v5858_v36 }
 0x2d3   : > { %v2373_v39 = vpop.permute.xlu2 %2372 }
 0x2d4   : > { %v3121_v44 = vmul.f32 %v3009_v7, %v2373_v39 }
 0x2d6   : > { %v3288_v24 = vsel %vm3224_vm1, %v3121_v44, 0.0  ;;  %v3011_v44 = vld [vmem:[%s6752_s6 + $0x58] sm:$0xff] }
 0x2d7   : > { %v5932_v48 = vadd.f32 %v3288_v24, %v3287_v12  ;;  %v3116_v12 = vmul.f32 %v3004_v25, %v5903_v59 }
 0x2d9   : > { %2464 = vperm.xlu2 %3757, %v5884_v11   ;;  %2458 = vperm.xlu1 %3756, %v5884_v11  }
 0x2da   : > { %2593 = vperm.xlu0 %3778, %v5938_v8  }
 0x2db   : > { %v5959_v27 = vpop.permute.xlu1 %2353 }
 0x2dc   : > { %v2379_v21 = vpop.permute.xlu0 %2378 }
 0x2dd   : > { %v3122_v14 = vmul.f32 %v3010_v32, %v2379_v21 }
 0x2df   : > { %v3319_v26 = vsel %vm3224_vm1, %v3122_v14, 0.0 }
 0x2e0   : > { %v5951_v30 = vadd.f32 %v3319_v26, %v3318_v54  ;;  %v3006_v54 = vld [vmem:[%s6752_s6 + $0x30] sm:$0x1]  ;;  %v6029_v26 = vperm.slane %v5992_v15, 1 }
 0x2e1   : > { %3760 = vset.pattern.permute.xlu2 %v5867_v35  ;;  %3759 = vset.pattern.permute.xlu1 %v5861_v1  ;;  %v3118_v2 = vmul.f32 %v3006_v54, %v5959_v27  ;;  %v3019_v27 = vld [vmem:[%s6752_s6 + $0x98] sm:$0xff] }
 0x2e2   : > { %3783 = vset.pattern.permute.xlu0 %v5846_v6 }
 0x2e3   : > { %v2391_v43 = vpop.permute.xlu2 %2390 }
 0x2e4   : > { %v3124_v9 = vmul.f32 %v3012_v41, %v2391_v43  ;;  %v3013_v41 = vld [vmem:[%s6752_s6 + $0x68] sm:$0x1] }
 0x2e6   : > { %v3381_v63 = vsel %vm3224_vm1, %v3124_v9, 0.0  ;;  %v3412_v9 = vsel %vm3411_vm2, %v3118_v2, 0.0 }
 0x2e7   : > { %v5966_v31 = vadd.f32 %v3381_v63, %v3380_v18 }
 0x2e9   : > { %2482 = vperm.xlu2 %3760, %v5884_v11   ;;  %2476 = vperm.xlu1 %3759, %v5884_v11  }
 0x2ea   : > { %2624 = vperm.xlu0 %3783, %v5969_v60  }
 0x2eb   : > { %v2367_v33 = vpop.permute.xlu1 %2366 }
 0x2ec   : > { %v3120_v13 = vmul.f32 %v3008_v23, %v2367_v33  ;;  %v2410_v49 = vpop.permute.xlu0 %2409  ;;  %v3016_v33 = vld [vmem:[%s6752_s6 + $0x80] sm:$0xff] }
 0x2ed   : > { %v3127_v3 = vmul.f32 %v3015_v51, %v2410_v49  ;;  %v6055_v51 = vperm.slane %v5992_v15, 2 }
 0x2ee   : > { %v3257_v11 = vsel %vm3224_vm1, %v3120_v13, 0.0 }
 0x2ef   : > { %v3258_v42 = vadd.f32 %v3257_v11, %v3256_v45  ;;  %v3259_v5 = vsel %vm3224_vm1, %v3127_v3, 0.0  ;;  %v6066_v3 = vperm.slane %v5992_v15, 4 }
 0x2f1   : > { %v5984_v0 = vadd.f32 %v3259_v5, %v3258_v42  ;;  %3762 = vset.pattern.permute.xlu2 %v5846_v6  ;;  %3761 = vset.pattern.permute.xlu1 %v5840_v52 }
 0x2f2   : > { %3792 = vset.pattern.permute.xlu0 %v5855_v28 }
 0x2f3   : > { %v2404_v4 = vpop.permute.xlu2 %2403 }
 0x2f4   : > { %v3126_v7 = vmul.f32 %v3014_v16, %v2404_v4  ;;  %v3018_v16 = vld [vmem:[%s6752_s6 + $0x90] sm:$0xff] }
 0x2f6   : > { %v3228_v58 = vsel %vm3224_vm1, %v3126_v7, 0.0 }
 0x2f7   : > { %v5999_v39 = vadd.f32 %v3228_v58, %v5916_v38  ;;  %v3349_v38 = vsel %vm3224_vm1, %v3116_v12, 0.0  ;;  %v6089_v12 = vperm.slane %v5992_v15, 5 }
 0x2f9   : > { %2495 = vperm.xlu2 %3762, %v5891_v37   ;;  %2489 = vperm.xlu1 %3761, %v5891_v37  }
 0x2fa   : > { %2685 = vperm.xlu0 %3792, %v6002_v57  }
 0x2fb   : > { %v2385_v24 = vpop.permute.xlu1 %2384 }
 0x2fc   : > { %v3123_v53 = vmul.f32 %v3011_v44, %v2385_v24  ;;  %v2440_v29 = vpop.permute.xlu0 %2439  ;;  %v3024_v24 = vld [vmem:[%s6752_s6 + $0xc0] sm:$0xff] }
 0x2fd   : > { %v3132_v43 = vmul.f32 %v3020_v50, %v2440_v29  ;;  %v3027_v29 = vld [vmem:[%s6752_s6 + $0xd8] sm:$0x1] }
 0x2fe   : > { %v3350_v56 = vsel %vm3224_vm1, %v3123_v53, 0.0 }
 0x2ff   : > { %v6013_v32 = vadd.f32 %v3350_v56, %v3349_v38  ;;  %v3415_v63 = vsel %vm3411_vm2, %v3132_v43, 0.0 }
 0x301   : > { %3765 = vset.pattern.permute.xlu2 %v5855_v28  ;;  %3764 = vset.pattern.permute.xlu1 %v5858_v36 }
 0x302   : > { %3797 = vset.pattern.permute.xlu0 %v5843_v46 }
 0x303   : > { %v2422_v59 = vpop.permute.xlu2 %2421 }
 0x304   : > { %v3129_v21 = vmul.f32 %v3017_v22, %v2422_v59  ;;  %v6102_v59 = vperm.slane %v5992_v15, 6 }
 0x306   : > { %v3321_v14 = vsel %vm3224_vm1, %v3129_v21, 0.0  ;;  %v3021_v21 = vld [vmem:[%s6752_s6 + $0xa8] sm:$0xff] }
 0x307   : > { %v6026_v19 = vadd.f32 %v3321_v14, %v5951_v30 }
 0x309   : > { %2513 = vperm.xlu2 %3765, %v5891_v37   ;;  %2507 = vperm.xlu1 %3764, %v5891_v37  }
 0x30a   : > { %2716 = vperm.xlu0 %3797, %v6029_v26  }
 0x30b   : > { %v2397_v30 = vpop.permute.xlu1 %2396 }
 0x30c   : > { %v3125_v62 = vmul.f32 %v3013_v41, %v2397_v30  ;;  %v2471_v5 = vpop.permute.xlu0 %2470 }
 0x30e   : > { %v3413_v40 = vsel %vm3411_vm2, %v3125_v62, 0.0  ;;  %v3030_v62 = vld [vmem:[%s6752_s6 + $0xf0] sm:$0xff] }
 0x30f   : > { %v3414_v18 = vadd.f32 %v3413_v40, %v3412_v9  ;;  %v3023_v9 = vld [vmem:[%s6752_s6 + $0xb8] sm:$0xff] }
 0x311   : > { %3767 = vset.pattern.permute.xlu2 %v5867_v35  ;;  %3766 = vset.pattern.permute.xlu1 %v5861_v1  ;;  %v3416_v55 = vadd.f32 %v3415_v63, %v3414_v18 }
 0x312   : > { %3802 = vset.pattern.permute.xlu0 %v5840_v52 }
 0x313   : > { %v2434_v17 = vpop.permute.xlu2 %2433 }
 0x314   : > { %v3131_v20 = vmul.f32 %v3019_v27, %v2434_v17 }
 0x316   : > { %v3383_v23 = vsel %vm3224_vm1, %v3131_v20, 0.0 }
 0x317   : > { %v6052_v47 = vadd.f32 %v3383_v23, %v5966_v31 }
 0x319   : > { %2525 = vperm.xlu2 %3767, %v5891_v37   ;;  %2519 = vperm.xlu1 %3766, %v5891_v37   ;;  %v3022_v37 = vld [vmem:[%s6752_s6 + $0xb0] sm:$0xff] }
 0x31a   : > { %2747 = vperm.xlu0 %3802, %v6055_v51  }
 0x31b   : > { %v2416_v10 = vpop.permute.xlu1 %2415 }
 0x31c   : > { %v3128_v13 = vmul.f32 %v3016_v33, %v2416_v10 }
 0x31e   : > { %v3290_v49 = vsel %vm3224_vm1, %v3128_v13, 0.0 }
 0x31f   : > { %v3291_v31 = vadd.f32 %v3290_v49, %v5932_v48  ;;  %v3025_v48 = vld [vmem:[%s6752_s6 + $0xc8] sm:$0xff]  ;;  %v3026_v49 = vld [vmem:[%s6752_s6 + $0xd0] sm:$0xff] }
 0x320   : > { %v3137_v7 = vmul.f32 %v3025_v48, %v2471_v5 }
 0x321   : > { %3770 = vset.pattern.permute.xlu2 %v5843_v46  ;;  %3769 = vset.pattern.permute.xlu1 %v5846_v6 }
 0x322   : > { %2833 = vperm.xlu0 %3802, %v6066_v3   ;;  %v3354_v44 = vsel %vm3224_vm1, %v3137_v7, 0.0  ;;  %v3028_v7 = vld [vmem:[%s6752_s6 + $0xe0] sm:$0xff] }
 0x323   : > { %v2453_v45 = vpop.permute.xlu2 %2452 }
 0x324   : > { %v3134_v11 = vmul.f32 %v3022_v37, %v2453_v45 }
 0x326   : > { %v3261_v42 = vsel %vm3224_vm1, %v3134_v11, 0.0 }
 0x327   : > { %v3262_v61 = vadd.f32 %v3261_v42, %v5984_v0  ;;  %v3032_v42 = vld [vmem:[%s6752_s6 + $0x100] sm:$0xff] }
 0x329   : > { %2544 = vperm.xlu2 %3770, %v5900_v34   ;;  %2538 = vperm.xlu1 %3769, %v5900_v34  }
 0x32a   : > { %3814 = vset.pattern.permute.xlu0 %v5846_v6 }
 0x32b   : > { %v2428_v4 = vpop.permute.xlu1 %2427 }
 0x32c   : > { %v3130_v58 = vmul.f32 %v3018_v16, %v2428_v4  ;;  %v3035_v4 = vld [vmem:[%s6752_s6 + $0x118] sm:$0xff] }
 0x32e   : > { %v3352_v0 = vsel %vm3224_vm1, %v3130_v58, 0.0 }
 0x32f   : > { %v3353_v25 = vadd.f32 %v3352_v0, %v6013_v32 }
 0x331   : > { %3772 = vset.pattern.permute.xlu2 %v5855_v28  ;;  %3771 = vset.pattern.permute.xlu1 %v5858_v36  ;;  %v3355_v53 = vadd.f32 %v3354_v44, %v3353_v25 }
 0x332   : > { %2882 = vperm.xlu0 %3814, %v6089_v12  }
 0x333   : > { %v2465_v38 = vpop.permute.xlu2 %2464 }
 0x334   : > { %v3136_v56 = vmul.f32 %v3024_v24, %v2465_v38  ;;  %v3034_v38 = vld [vmem:[%s6752_s6 + $0x110] sm:$0x1] }
 0x336   : > { %v3323_v32 = vsel %vm3224_vm1, %v3136_v56, 0.0 }
 0x337   : > { %v6099_v22 = vadd.f32 %v3323_v32, %v6026_v19 }
 0x339   : > { %2556 = vperm.xlu2 %3772, %v5900_v34   ;;  %2550 = vperm.xlu1 %3771, %v5900_v34  }
 0x33a   : > { %2925 = vperm.xlu0 %3814, %v6102_v59  }
 0x33b   : > { %v2447_v14 = vpop.permute.xlu1 %2446 }
 0x33c   : > { %v3133_v54 = vmul.f32 %v3021_v21, %v2447_v14 }
 0x33e   : > { %v3230_v50 = vsel %vm3224_vm1, %v3133_v54, 0.0 }
 0x33f   : > { %v3231_v19 = vadd.f32 %v3230_v50, %v5999_v39  ;;  %v2502_v39 = vpop.permute.xlu0 %2501  ;;  %v3031_v50 = vld [vmem:[%s6752_s6 + $0xf8] sm:$0xff] }
 0x340   : > { %v3142_v18 = vmul.f32 %v3030_v62, %v2502_v39 }
 0x341   : > { %3775 = vset.pattern.permute.xlu2 %v5840_v52  ;;  %3774 = vset.pattern.permute.xlu1 %v5867_v35 }
 0x342   : > { %3821 = vset.pattern.permute.xlu0 %v5858_v36  ;;  %v3294_v17 = vsel %vm3224_vm1, %v3142_v18, 0.0  ;;  %v3033_v18 = vld [vmem:[%s6752_s6 + $0x108] sm:$0xff] }
 0x343   : > { %v2483_v41 = vpop.permute.xlu2 %2482 }
 0x344   : > { %v3139_v2 = vmul.f32 %v3027_v29, %v2483_v41 }
 0x346   : > { %v3417_v30 = vsel %vm3411_vm2, %v3139_v2, 0.0 }
 0x347   : > { %v3418_v43 = vadd.f32 %v3417_v30, %v3416_v55 }
 0x349   : > { %2575 = vperm.xlu2 %3775, %v5938_v8   ;;  %2568 = vperm.xlu1 %3774, %v5900_v34   ;;  %v3029_v34 = vld [vmem:[%s6752_s6 + $0xe8] sm:$0xff] }
 0x34a   : > { %2894 = vperm.xlu0 %3821, %v6089_v12  }
 0x34b   : > { %v2459_v40 = vpop.permute.xlu1 %2458 }
 0x34c   : > { %v3135_v63 = vmul.f32 %v3023_v9, %v2459_v40  ;;  %v6190_v9 = vperm.slane %v5992_v15, 7 }
 0x34e   : > { %v3292_v27 = vsel %vm3224_vm1, %v3135_v63, 0.0 }
 0x34f   : > { %v3293_v55 = vadd.f32 %v3292_v27, %v3291_v31 }
 0x351   : > { %3777 = vset.pattern.permute.xlu2 %v5843_v46  ;;  %3776 = vset.pattern.permute.xlu1 %v5846_v6  ;;  %v3295_v20 = vadd.f32 %v3294_v17, %v3293_v55 }
 0x352   : > { %3822 = vset.pattern.permute.xlu0 %v5861_v1 }
 0x353   : > { %v2496_v23 = vpop.permute.xlu2 %2495 }
 0x354   : > { %v3141_v33 = vmul.f32 %v3029_v34, %v2496_v23  ;;  %v3039_v23 = vld [vmem:[%s6752_s6 + $0x138] sm:$0xff] }
 0x356   : > { %v3263_v10 = vsel %vm3224_vm1, %v3141_v33, 0.0 }
 0x357   : > { %v6137_v13 = vadd.f32 %v3263_v10, %v3262_v61 }
 0x359   : > { %2587 = vperm.xlu2 %3777, %v5938_v8   ;;  %2581 = vperm.xlu1 %3776, %v5938_v8  }
 0x35a   : > { %2777 = vperm.xlu0 %3822, %v6055_v51  }
 0x35b   : > { %v2477_v31 = vpop.permute.xlu1 %2476 }
 0x35c   : > { %v3138_v37 = vmul.f32 %v3026_v49, %v2477_v31 }
 0x35e   : > { %v3385_v45 = vsel %vm3224_vm1, %v3138_v37, 0.0 }
 0x35f   : > { %v3386_v11 = vadd.f32 %v3385_v45, %v6052_v47  ;;  %v2533_v47 = vpop.permute.xlu0 %2532  ;;  %v3036_v45 = vld [vmem:[%s6752_s6 + $0x120] sm:$0xff] }
 0x360   : > { %v3147_v0 = vmul.f32 %v3035_v4, %v2533_v47 }
 0x361   : > { %3780 = vset.pattern.permute.xlu2 %v5861_v1  ;;  %3779 = vset.pattern.permute.xlu1 %v5855_v28 }
 0x362   : > { %2863 = vperm.xlu0 %3822, %v6066_v3  }
 0x363   : > { %v2514_v61 = vpop.permute.xlu2 %2513 }
 0x364   : > { %v3144_v48 = vmul.f32 %v3032_v42, %v2514_v61 }
 0x366   : > { %v3356_v5 = vsel %vm3224_vm1, %v3144_v48, 0.0 }
 0x367   : > { %v3357_v16 = vadd.f32 %v3356_v5, %v3355_v53  ;;  %v3234_v53 = vsel %vm3224_vm1, %v3147_v0, 0.0  ;;  %v2563_v40 = vpop.permute.xlu0 %2562  ;;  %v3042_v5 = vld [vmem:[%s6752_s6 + $0x150] sm:$0xff] }
 0x369   : > { %2605 = vperm.xlu2 %3780, %v5938_v8   ;;  %2599 = vperm.xlu1 %3779, %v5938_v8  }
 0x36a   : > { %2906 = vperm.xlu0 %3822, %v6089_v12  }
 0x36b   : > { %v2490_v58 = vpop.permute.xlu1 %2489 }
 0x36c   : > { %v3140_v25 = vmul.f32 %v3028_v7, %v2490_v58  ;;  %v3045_v7 = vld [vmem:[%s6752_s6 + $0x168] sm:$0xff] }
 0x36e   : > { %v3232_v44 = vsel %vm3224_vm1, %v3140_v25, 0.0 }
 0x36f   : > { %v3233_v24 = vadd.f32 %v3232_v44, %v3231_v19  ;;  %v2594_v58 = vpop.permute.xlu0 %2593 }
 0x370   : > { %v3157_v25 = vmul.f32 %v3045_v7, %v2594_v58 }
 0x371   : > { %3782 = vset.pattern.permute.xlu2 %v5840_v52  ;;  %3781 = vset.pattern.permute.xlu1 %v5867_v35  ;;  %v3235_v56 = vadd.f32 %v3234_v53, %v3233_v24 }
 0x372   : > { %3831 = vset.pattern.permute.xlu0 %v5867_v35 }
 0x373   : > { %v2526_v32 = vpop.permute.xlu2 %2525 }
 0x374   : > { %v3146_v21 = vmul.f32 %v3034_v38, %v2526_v32  ;;  %v3329_v38 = vsel %vm3224_vm1, %v3157_v25, 0.0 }
 0x376   : > { %v3419_v14 = vsel %vm3411_vm2, %v3146_v21, 0.0 }
 0x377   : > { %v6172_v54 = vadd.f32 %v3419_v14, %v3418_v43 }
 0x379   : > { %2618 = vperm.xlu2 %3782, %v5969_v60   ;;  %2611 = vperm.xlu1 %3781, %v5938_v8   ;;  %v3037_v8 = vld [vmem:[%s6752_s6 + $0x128] sm:$0xff] }
 0x37a   : > { %2654 = vperm.xlu0 %3831, %v5969_v60  }
 0x37b   : > { %v2508_v19 = vpop.permute.xlu1 %2507 }
 0x37c   : > { %v3143_v29 = vmul.f32 %v3031_v50, %v2508_v19 }
 0x37e   : > { %v3325_v41 = vsel %vm3224_vm1, %v3143_v29, 0.0  ;;  %v3041_v29 = vld [vmem:[%s6752_s6 + $0x148] sm:$0x1] }
 0x37f   : > { %v3326_v2 = vadd.f32 %v3325_v41, %v6099_v22  ;;  %v3040_v22 = vld [vmem:[%s6752_s6 + $0x140] sm:$0xff] }
 0x380   : > { %v3152_v27 = vmul.f32 %v3040_v22, %v2563_v40 }
 0x381   : > { %3785 = vset.pattern.permute.xlu2 %v5858_v36  ;;  %3784 = vset.pattern.permute.xlu1 %v5843_v46 }
 0x382   : > { %2912 = vperm.xlu0 %3831, %v6089_v12  }
 0x383   : > { %v2545_v30 = vpop.permute.xlu2 %2544 }
 0x384   : > { %v3149_v43 = vmul.f32 %v3037_v8, %v2545_v30  ;;  %v2625_v8 = vpop.permute.xlu0 %2624 }
 0x386   : > { %v3296_v62 = vsel %vm3224_vm1, %v3149_v43, 0.0 }
 0x387   : > { %v3297_v39 = vadd.f32 %v3296_v62, %v3295_v20  ;;  %v3389_v20 = vsel %vm3224_vm1, %v3152_v27, 0.0  ;;  %v3047_v62 = vld [vmem:[%s6752_s6 + $0x178] sm:$0xff]  ;;  %v3050_v27 = vld [vmem:[%s6752_s6 + $0x190] sm:$0xff] }
 0x389   : > { %2636 = vperm.xlu2 %3785, %v5969_v60   ;;  %2630 = vperm.xlu1 %3784, %v5969_v60  }
 0x38a   : > { %2998 = vperm.xlu0 %3831, %v6190_v9  }
 0x38b   : > { %v2520_v63 = vpop.permute.xlu1 %2519 }
 0x38c   : > { %v3145_v55 = vmul.f32 %v3033_v18, %v2520_v63  ;;  %v6254_v40 = vpop.permute.xlu0 %2685 }
 0x38e   : > { %v3387_v17 = vsel %vm3224_vm1, %v3145_v55, 0.0 }
 0x38f   : > { %v3388_v34 = vadd.f32 %v3387_v17, %v3386_v11  ;;  %v3162_v17 = vmul.f32 %v3050_v27, %v2625_v8  ;;  %v3051_v8 = vld [vmem:[%s6752_s6 + $0x198] sm:$0xff] }
 0x391   : > { %3787 = vset.pattern.permute.xlu2 %v5861_v1  ;;  %3786 = vset.pattern.permute.xlu1 %v5855_v28  ;;  %v3390_v33 = vadd.f32 %v3389_v20, %v3388_v34 }
 0x393   : > { %v2557_v10 = vpop.permute.xlu2 %2556 }
 0x394   : > { %v3151_v49 = vmul.f32 %v3039_v23, %v2557_v10  ;;  %v6265_v20 = vpop.permute.xlu0 %2716  ;;  %v3269_v10 = vsel %vm3224_vm1, %v3162_v17, 0.0 }
 0x396   : > { %v3358_v31 = vsel %vm3224_vm1, %v3151_v49, 0.0 }
 0x397   : > { %v6209_v37 = vadd.f32 %v3358_v31, %v3357_v16 }
 0x399   : > { %2648 = vperm.xlu2 %3787, %v5969_v60   ;;  %2642 = vperm.xlu1 %3786, %v5969_v60  }
 0x39b   : > { %v2539_v11 = vpop.permute.xlu1 %2538 }
 0x39c   : > { %v3148_v42 = vmul.f32 %v3036_v45, %v2539_v11  ;;  %v6274_v11 = vpop.permute.xlu0 %2747 }
 0x39e   : > { %v3265_v61 = vsel %vm3224_vm1, %v3148_v42, 0.0 }
 0x39f   : > { %v3266_v48 = vadd.f32 %v3265_v61, %v6137_v13  ;;  %v3038_v13 = vld [vmem:[%s6752_s6 + $0x130] sm:$0xff] }
 0x3a1   : > { %3789 = vset.pattern.permute.xlu2 %v5846_v6  ;;  %3788 = vset.pattern.permute.xlu1 %v5840_v52 }
 0x3a3   : > { %v2576_v16 = vpop.permute.xlu2 %2575 }
 0x3a4   : > { %v3154_v60 = vmul.f32 %v3042_v5, %v2576_v16 }
 0x3a6   : > { %v3236_v4 = vsel %vm3224_vm1, %v3154_v60, 0.0 }
 0x3a7   : > { %v3237_v47 = vadd.f32 %v3236_v4, %v3235_v56  ;;  %v3044_v56 = vld [vmem:[%s6752_s6 + $0x160] sm:$0xff]  ;;  %v6285_v4 = vpop.permute.xlu0 %2833 }
 0x3a9   : > { %2667 = vperm.xlu2 %3789, %v6002_v57   ;;  %2661 = vperm.xlu1 %3788, %v6002_v57  }
 0x3ab   : > { %v2551_v0 = vpop.permute.xlu1 %2550 }
 0x3ac   : > { %v3150_v44 = vmul.f32 %v3038_v13, %v2551_v0 }
 0x3ae   : > { %v3327_v24 = vsel %vm3224_vm1, %v3150_v44, 0.0 }
 0x3af   : > { %v3328_v53 = vadd.f32 %v3327_v24, %v3326_v2  ;;  %v6294_v25 = vpop.permute.xlu0 %2882 }
 0x3b1   : > { %3791 = vset.pattern.permute.xlu2 %v5858_v36  ;;  %3790 = vset.pattern.permute.xlu1 %v5843_v46  ;;  %v3330_v32 = vadd.f32 %v3329_v38, %v3328_v53 }
 0x3b3   : > { %v2588_v21 = vpop.permute.xlu2 %2587 }
 0x3b4   : > { %v3156_v14 = vmul.f32 %v3044_v56, %v2588_v21 }
 0x3b6   : > { %v3298_v50 = vsel %vm3224_vm1, %v3156_v14, 0.0 }
 0x3b7   : > { %v6240_v19 = vadd.f32 %v3298_v50, %v3297_v39  ;;  %v6302_v21 = vpop.permute.xlu0 %2925 }
 0x3b9   : > { %2679 = vperm.xlu2 %3791, %v6002_v57   ;;  %2673 = vperm.xlu1 %3790, %v6002_v57  }
 0x3bb   : > { %v2569_v41 = vpop.permute.xlu1 %2568 }
 0x3bc   : > { %v3153_v2 = vmul.f32 %v3041_v29, %v2569_v41 }
 0x3be   : > { %v3421_v30 = vsel %vm3411_vm2, %v3153_v2, 0.0 }
 0x3bf   : > { %v3422_v43 = vadd.f32 %v3421_v30, %v6172_v54  ;;  %v3043_v54 = vld [vmem:[%s6752_s6 + $0x158] sm:$0xff]  ;;  %v6312_v2 = vpop.permute.xlu0 %2894 }
 0x3c1   : > { %3794 = vset.pattern.permute.xlu2 %v5867_v35  ;;  %3793 = vset.pattern.permute.xlu1 %v5861_v1 }
 0x3c3   : > { %v2606_v39 = vpop.permute.xlu2 %2605 }
 0x3c4   : > { %v3159_v22 = vmul.f32 %v3047_v62, %v2606_v39 }
 0x3c6   : > { %v3391_v18 = vsel %vm3224_vm1, %v3159_v22, 0.0 }
 0x3c7   : > { %v3392_v63 = vadd.f32 %v3391_v18, %v3390_v33 }
 0x3c9   : > { %2697 = vperm.xlu2 %3794, %v6002_v57   ;;  %2691 = vperm.xlu1 %3793, %v6002_v57   ;;  %v3049_v57 = vld [vmem:[%s6752_s6 + $0x188] sm:$0xff] }
 0x3cb   : > { %v2582_v55 = vpop.permute.xlu1 %2581 }
 0x3cc   : > { %v3155_v34 = vmul.f32 %v3043_v54, %v2582_v55  ;;  %v6321_v22 = vpop.permute.xlu0 %2777  ;;  %v3060_v55 = vld [vmem:[%s6752_s6 + $0x1e0] sm:$0xff] }
 0x3ce   : > { %v3267_v23 = vsel %vm3224_vm1, %v3155_v34, 0.0 }
 0x3cf   : > { %v3268_v33 = vadd.f32 %v3267_v23, %v3266_v48  ;;  %v3046_v48 = vld [vmem:[%s6752_s6 + $0x170] sm:$0xff]  ;;  %v3172_v23 = vmul.f32 %v3060_v55, %v6254_v40 }
 0x3d1   : > { %3796 = vset.pattern.permute.xlu2 %v5846_v6  ;;  %3795 = vset.pattern.permute.xlu1 %v5840_v52  ;;  %v3270_v49 = vadd.f32 %v3269_v10, %v3268_v33 }
 0x3d3   : > { %v2619_v31 = vpop.permute.xlu2 %2618 }
 0x3d4   : > { %v3161_v45 = vmul.f32 %v3049_v57, %v2619_v31  ;;  %v6337_v17 = vpop.permute.xlu0 %2863  ;;  %v3059_v31 = vld [vmem:[%s6752_s6 + $0x1d8] sm:$0xff] }
 0x3d6   : > { %v3238_v42 = vsel %vm3224_vm1, %v3161_v45, 0.0 }
 0x3d7   : > { %v6277_v61 = vadd.f32 %v3238_v42, %v3237_v47  ;;  %v3052_v47 = vld [vmem:[%s6752_s6 + $0x1a0] sm:$0xff] }
 0x3d9   : > { %2710 = vperm.xlu2 %3796, %v6029_v26   ;;  %2704 = vperm.xlu1 %3795, %v6029_v26  }
 0x3db   : > { %v2600_v5 = vpop.permute.xlu1 %2599 }
 0x3dc   : > { %v3158_v16 = vmul.f32 %v3046_v48, %v2600_v5  ;;  %v6347_v5 = vpop.permute.xlu0 %2906 }
 0x3de   : > { %v3360_v60 = vsel %vm3224_vm1, %v3158_v16, 0.0 }
 0x3df   : > { %v3361_v7 = vadd.f32 %v3360_v60, %v6209_v37  ;;  %v3048_v37 = vld [vmem:[%s6752_s6 + $0x180] sm:$0x1] }
 0x3e0   : > { %v3056_v60 = vld [vmem:[%s6752_s6 + $0x1c0] sm:$0xff] }
 0x3e1   : > { %3799 = vset.pattern.permute.xlu2 %v5855_v28  ;;  %3798 = vset.pattern.permute.xlu1 %v5858_v36 }
 0x3e3   : > { %v2637_v58 = vpop.permute.xlu2 %2636 }
 0x3e4   : > { %v3164_v13 = vmul.f32 %v3052_v47, %v2637_v58  ;;  %v3055_v58 = vld [vmem:[%s6752_s6 + $0x1b8] sm:$0x1] }
 0x3e6   : > { %v3331_v0 = vsel %vm3224_vm1, %v3164_v13, 0.0 }
 0x3e7   : > { %v3332_v44 = vadd.f32 %v3331_v0, %v3330_v32  ;;  %v3054_v32 = vld [vmem:[%s6752_s6 + $0x1b0] sm:$0xff] }
 0x3e9   : > { %2728 = vperm.xlu2 %3799, %v6029_v26   ;;  %2722 = vperm.xlu1 %3798, %v6029_v26  }
 0x3eb   : > { %v2612_v24 = vpop.permute.xlu1 %2611 }
 0x3ec   : > { %v3160_v53 = vmul.f32 %v3048_v37, %v2612_v24  ;;  %v2655_v13 = vpop.permute.xlu0 %2654  ;;  %v3062_v24 = vld [vmem:[%s6752_s6 + $0x1f0] sm:$0x1] }
 0x3ed   : > { %v3167_v37 = vmul.f32 %v3055_v58, %v2655_v13 }
 0x3ee   : > { %v3423_v38 = vsel %vm3411_vm2, %v3160_v53, 0.0 }
 0x3ef   : > { %v3424_v56 = vadd.f32 %v3423_v38, %v3422_v43  ;;  %v3425_v38 = vsel %vm3411_vm2, %v3167_v37, 0.0 }
 0x3f1   : > { %3801 = vset.pattern.permute.xlu2 %v5867_v35  ;;  %3800 = vset.pattern.permute.xlu1 %v5861_v1 }
 0x3f3   : > { %v2649_v14 = vpop.permute.xlu2 %2648 }
 0x3f4   : > { %v3166_v50 = vmul.f32 %v3054_v32, %v2649_v14  ;;  %v3426_v14 = vadd.f32 %v3425_v38, %v3424_v56 }
 0x3f6   : > { %v3393_v29 = vsel %vm3224_vm1, %v3166_v50, 0.0 }
 0x3f7   : > { %v6310_v41 = vadd.f32 %v3393_v29, %v3392_v63 }
 0x3f9   : > { %2740 = vperm.xlu2 %3801, %v6029_v26   ;;  %2734 = vperm.xlu1 %3800, %v6029_v26   ;;  %v3057_v26 = vld [vmem:[%s6752_s6 + $0x1c8] sm:$0xff] }
 0x3fb   : > { %v2631_v30 = vpop.permute.xlu1 %2630 }
 0x3fc   : > { %v3163_v43 = vmul.f32 %v3051_v8, %v2631_v30  ;;  %v6370_v8 = vperm.slane %v5992_v15, 3  ;;  %v3058_v30 = vld [vmem:[%s6752_s6 + $0x1d0] sm:$0xff] }
 0x3fe   : > { %v3300_v62 = vsel %vm3224_vm1, %v3163_v43, 0.0 }
 0x3ff   : > { %v3301_v39 = vadd.f32 %v3300_v62, %v6240_v19  ;;  %v3053_v19 = vld [vmem:[%s6752_s6 + $0x1a8] sm:$0xff] }
 0x401   : > { %3804 = vset.pattern.permute.xlu2 %v5843_v46  ;;  %3803 = vset.pattern.permute.xlu1 %v5846_v6 }
 0x403   : > { %v2668_v18 = vpop.permute.xlu2 %2667 }
 0x404   : > { %v3169_v63 = vmul.f32 %v3057_v26, %v2668_v18 }
 0x406   : > { %v3271_v27 = vsel %vm3224_vm1, %v3169_v63, 0.0 }
 0x407   : > { %v3272_v54 = vadd.f32 %v3271_v27, %v3270_v49  ;;  %v3364_v49 = vsel %vm3224_vm1, %v3172_v23, 0.0 }
 0x409   : > { %2759 = vperm.xlu2 %3804, %v6055_v51   ;;  %2753 = vperm.xlu1 %3803, %v6055_v51  }
 0x40b   : > { %v2643_v34 = vpop.permute.xlu1 %2642 }
 0x40c   : > { %v3165_v33 = vmul.f32 %v3053_v19, %v2643_v34 }
 0x40e   : > { %v3362_v10 = vsel %vm3224_vm1, %v3165_v33, 0.0 }
 0x40f   : > { %v3363_v57 = vadd.f32 %v3362_v10, %v3361_v7 }
 0x411   : > { %3806 = vset.pattern.permute.xlu2 %v5855_v28  ;;  %3805 = vset.pattern.permute.xlu1 %v5858_v36  ;;  %v3365_v45 = vadd.f32 %v3364_v49, %v3363_v57 }
 0x413   : > { %v2680_v42 = vpop.permute.xlu2 %2679 }
 0x414   : > { %v3171_v48 = vmul.f32 %v3059_v31, %v2680_v42 }
 0x416   : > { %v3333_v40 = vsel %vm3224_vm1, %v3171_v48, 0.0 }
 0x417   : > { %v6350_v16 = vadd.f32 %v3333_v40, %v3332_v44 }
 0x419   : > { %2771 = vperm.xlu2 %3806, %v6055_v51   ;;  %2765 = vperm.xlu1 %3805, %v6055_v51  }
 0x41b   : > { %v2662_v7 = vpop.permute.xlu1 %2661 }
 0x41c   : > { %v3168_v47 = vmul.f32 %v3056_v60, %v2662_v7 }
 0x41e   : > { %v3240_v0 = vsel %vm3224_vm1, %v3168_v47, 0.0 }
 0x41f   : > { %v3241_v44 = vadd.f32 %v3240_v0, %v6277_v61  ;;  %v3065_v61 = vld [vmem:[%s6752_s6 + $0x208] sm:$0xff] }
 0x420   : > { %v3177_v56 = vmul.f32 %v3065_v61, %v6265_v20 }
 0x421   : > { %3808 = vset.pattern.permute.xlu2 %v5840_v52  ;;  %3807 = vset.pattern.permute.xlu1 %v5867_v35 }
 0x422   : > { %v3304_v18 = vsel %vm3224_vm1, %v3177_v56, 0.0 }
 0x423   : > { %v2698_v53 = vpop.permute.xlu2 %2697 }
 0x424   : > { %v3174_v32 = vmul.f32 %v3062_v24, %v2698_v53 }
 0x426   : > { %v3427_v50 = vsel %vm3411_vm2, %v3174_v32, 0.0  ;;  %v3072_v32 = vld [vmem:[%s6752_s6 + $0x240] sm:$0xff] }
 0x427   : > { %v3428_v29 = vadd.f32 %v3427_v50, %v3426_v14 }
 0x429   : > { %2790 = vperm.xlu2 %3808, %v6370_v8   ;;  %2783 = vperm.xlu1 %3807, %v6055_v51   ;;  %v3064_v51 = vld [vmem:[%s6752_s6 + $0x200] sm:$0xff] }
 0x42b   : > { %v2674_v43 = vpop.permute.xlu1 %2673 }
 0x42c   : > { %v3170_v62 = vmul.f32 %v3058_v30, %v2674_v43 }
 0x42e   : > { %v3302_v26 = vsel %vm3224_vm1, %v3170_v62, 0.0 }
 0x42f   : > { %v3303_v15 = vadd.f32 %v3302_v26, %v3301_v39  ;;  %v3061_v39 = vld [vmem:[%s6752_s6 + $0x1e8] sm:$0xff]  ;;  %v3074_v26 = vld [vmem:[%s6752_s6 + $0x250] sm:$0xff] }
 0x431   : > { %3810 = vset.pattern.permute.xlu2 %v5843_v46  ;;  %3809 = vset.pattern.permute.xlu1 %v5846_v6  ;;  %v3305_v63 = vadd.f32 %v3304_v18, %v3303_v15 }
 0x433   : > { %v2711_v27 = vpop.permute.xlu2 %2710 }
 0x434   : > { %v3176_v55 = vmul.f32 %v3064_v51, %v2711_v27  ;;  %v3071_v27 = vld [vmem:[%s6752_s6 + $0x238] sm:$0xff] }
 0x436   : > { %v3273_v19 = vsel %vm3224_vm1, %v3176_v55, 0.0 }
 0x437   : > { %v6389_v20 = vadd.f32 %v3273_v19, %v3272_v54  ;;  %v3067_v54 = vld [vmem:[%s6752_s6 + $0x218] sm:$0xff] }
 0x439   : > { %2802 = vperm.xlu2 %3810, %v6370_v8   ;;  %2796 = vperm.xlu1 %3809, %v6370_v8  }
 0x43b   : > { %v2692_v34 = vpop.permute.xlu1 %2691 }
 0x43c   : > { %v3173_v23 = vmul.f32 %v3061_v39, %v2692_v34  ;;  %v3070_v39 = vld [vmem:[%s6752_s6 + $0x230] sm:$0xff] }
 0x43e   : > { %v3395_v33 = vsel %vm3224_vm1, %v3173_v23, 0.0 }
 0x43f   : > { %v3396_v10 = vadd.f32 %v3395_v33, %v6310_v41  ;;  %v3063_v41 = vld [vmem:[%s6752_s6 + $0x1f8] sm:$0xff]  ;;  %v3182_v33 = vmul.f32 %v3070_v39, %v6274_v11  ;;  %v3073_v11 = vld [vmem:[%s6752_s6 + $0x248] sm:$0xff] }
 0x441   : > { %3811 = vset.pattern.permute.xlu2 %v5858_v36  ;;  %2839 = vperm.xlu1 %3809, %v6066_v3  }
 0x443   : > { %v2729_v57 = vpop.permute.xlu2 %2728 }
 0x444   : > { %v3179_v49 = vmul.f32 %v3067_v54, %v2729_v57  ;;  %v3244_v57 = vsel %vm3224_vm1, %v3182_v33, 0.0 }
 0x446   : > { %v3366_v31 = vsel %vm3224_vm1, %v3179_v49, 0.0 }
 0x447   : > { %v3367_v42 = vadd.f32 %v3366_v31, %v3365_v45  ;;  %v3069_v45 = vld [vmem:[%s6752_s6 + $0x228] sm:$0x1] }
 0x449   : > { %2808 = vperm.xlu2 %3811, %v6370_v8   ;;  %3812 = vset.pattern.permute.xlu1 %v5843_v46 }
 0x44b   : > { %v2705_v48 = vpop.permute.xlu1 %2704 }
 0x44c   : > { %v3175_v40 = vmul.f32 %v3063_v41, %v2705_v48 }
 0x44e   : > { %v3242_v60 = vsel %vm3224_vm1, %v3175_v40, 0.0 }
 0x44f   : > { %v3243_v7 = vadd.f32 %v3242_v60, %v3241_v44  ;;  %v3066_v44 = vld [vmem:[%s6752_s6 + $0x210] sm:$0xff] }
 0x451   : > { %3813 = vset.pattern.permute.xlu2 %v5840_v52  ;;  %2845 = vperm.xlu1 %3812, %v6066_v3   ;;  %v3245_v31 = vadd.f32 %v3244_v57, %v3243_v7  ;;  %v3079_v7 = vld [vmem:[%s6752_s6 + $0x278] sm:$0xff] }
 0x453   : > { %v2741_v47 = vpop.permute.xlu2 %2740 }
 0x454   : > { %v3181_v58 = vmul.f32 %v3069_v45, %v2741_v47 }
 0x456   : > { %v3429_v13 = vsel %vm3411_vm2, %v3181_v58, 0.0 }
 0x457   : > { %v6416_v0 = vadd.f32 %v3429_v13, %v3428_v29 }
 0x459   : > { %2876 = vperm.xlu2 %3813, %v6089_v12   ;;  %3815 = vset.pattern.permute.xlu1 %v5855_v28 }
 0x45b   : > { %v2723_v37 = vpop.permute.xlu1 %2722 }
 0x45c   : > { %v3178_v24 = vmul.f32 %v3066_v44, %v2723_v37  ;;  %v3076_v44 = vld [vmem:[%s6752_s6 + $0x260] sm:$0x1] }
 0x45e   : > { %v3335_v53 = vsel %vm3224_vm1, %v3178_v24, 0.0 }
 0x45f   : > { %v3336_v38 = vadd.f32 %v3335_v53, %v6350_v16  ;;  %v3068_v16 = vld [vmem:[%s6752_s6 + $0x220] sm:$0xff] }
 0x461   : > { %3816 = vset.pattern.permute.xlu2 %v5858_v36  ;;  %2814 = vperm.xlu1 %3815, %v6370_v8  }
 0x463   : > { %v2760_v14 = vpop.permute.xlu2 %2759 }
 0x464   : > { %v3184_v50 = vmul.f32 %v3072_v32, %v2760_v14 }
 0x466   : > { %v3306_v29 = vsel %vm3224_vm1, %v3184_v50, 0.0 }
 0x467   : > { %v3307_v61 = vadd.f32 %v3306_v29, %v3305_v63 }
 0x469   : > { %2851 = vperm.xlu2 %3816, %v6066_v3   ;;  %3817 = vset.pattern.permute.xlu1 %v5843_v46 }
 0x46b   : > { %v2735_v30 = vpop.permute.xlu1 %2734 }
 0x46c   : > { %v3180_v43 = vmul.f32 %v3068_v16, %v2735_v30  ;;  %v3084_v16 = vld [vmem:[%s6752_s6 + $0x2a0] sm:$0xff] }
 0x46e   : > { %v3397_v56 = vsel %vm3224_vm1, %v3180_v43, 0.0 }
 0x46f   : > { %v6437_v62 = vadd.f32 %v3397_v56, %v3396_v10  ;;  %v3077_v10 = vld [vmem:[%s6752_s6 + $0x268] sm:$0xff]  ;;  %v3196_v56 = vmul.f32 %v3084_v16, %v6285_v4 }
 0x471   : > { %3818 = vset.pattern.permute.xlu2 %v5840_v52  ;;  %2888 = vperm.xlu1 %3817, %v6089_v12  }
 0x473   : > { %v2772_v15 = vpop.permute.xlu2 %2771 }
 0x474   : > { %v3186_v18 = vmul.f32 %v3074_v26, %v2772_v15  ;;  %v3085_v26 = vld [vmem:[%s6752_s6 + $0x2a8] sm:$0xff] }
 0x476   : > { %v3368_v51 = vsel %vm3224_vm1, %v3186_v18, 0.0 }
 0x477   : > { %v6445_v63 = vadd.f32 %v3368_v51, %v3367_v42  ;;  %v3248_v51 = vsel %vm3224_vm1, %v3196_v56, 0.0  ;;  %v3100_v56 = vld [vmem:[%s6752_s6 + $0x320] sm:$0xff] }
 0x479   : > { %2919 = vperm.xlu2 %3818, %v6102_v59   ;;  %3819 = vset.pattern.permute.xlu1 %v5861_v1 }
 0x47b   : > { %v2754_v55 = vpop.permute.xlu1 %2753 }
 0x47c   : > { %v3183_v19 = vmul.f32 %v3071_v27, %v2754_v55 }
 0x47e   : > { %v3275_v34 = vsel %vm3224_vm1, %v3183_v19, 0.0 }
 0x47f   : > { %v3276_v23 = vadd.f32 %v3275_v34, %v6389_v20 }
 0x481   : > { %3820 = vset.pattern.permute.xlu2 %v5855_v28  ;;  %2820 = vperm.xlu1 %3819, %v6370_v8  }
 0x483   : > { %v2791_v54 = vpop.permute.xlu2 %2790 }
 0x484   : > { %v3189_v49 = vmul.f32 %v3077_v10, %v2791_v54 }
 0x486   : > { %v3246_v42 = vsel %vm3224_vm1, %v3189_v49, 0.0 }
 0x487   : > { %v3247_v41 = vadd.f32 %v3246_v42, %v3245_v31  ;;  %v3092_v42 = vld [vmem:[%s6752_s6 + $0x2e0] sm:$0xff] }
 0x489   : > { %2857 = vperm.xlu2 %3820, %v6066_v3   ;;  %3823 = vset.pattern.permute.xlu1 %v5843_v46  ;;  %v3249_v19 = vadd.f32 %v3248_v51, %v3247_v41  ;;  %v3204_v41 = vmul.f32 %v3092_v42, %v6294_v25 }
 0x48b   : > { %v2766_v20 = vpop.permute.xlu1 %2765 }
 0x48c   : > { %v3185_v48 = vmul.f32 %v3073_v11, %v2766_v20  ;;  %v3099_v20 = vld [vmem:[%s6752_s6 + $0x318] sm:$0xff] }
 0x48e   : > { %v3337_v40 = vsel %vm3224_vm1, %v3185_v48, 0.0 }
 0x48f   : > { %v3338_v60 = vadd.f32 %v3337_v40, %v3336_v38  ;;  %v3080_v38 = vld [vmem:[%s6752_s6 + $0x280] sm:$0xff]  ;;  %v3281_v40 = vsel %vm3224_vm1, %v3204_v41, 0.0 }
 0x491   : > { %3824 = vset.pattern.permute.xlu2 %v5840_v52  ;;  %2931 = vperm.xlu1 %3823, %v6102_v59  }
 0x493   : > { %v2803_v45 = vpop.permute.xlu2 %2802 }
 0x494   : > { %v3191_v47 = vmul.f32 %v3079_v7, %v2803_v45 }
 0x496   : > { %v3308_v58 = vsel %vm3224_vm1, %v3191_v47, 0.0  ;;  %v3106_v47 = vld [vmem:[%s6752_s6 + $0x350] sm:$0xff] }
 0x497   : > { %v3309_v13 = vadd.f32 %v3308_v58, %v3307_v61 }
 0x499   : > { %2962 = vperm.xlu2 %3824, %v6190_v9   ;;  %3825 = vset.pattern.permute.xlu1 %v5846_v6 }
 0x49b   : > { %v2784_v52 = vpop.permute.xlu1 %2783 }
 0x49c   : > { %v3188_v37 = vmul.f32 %v3076_v44, %v2784_v52 }
 0x49e   : > { %v3431_v24 = vsel %vm3411_vm2, %v3188_v37, 0.0 }
 0x49f   : > { %v6484_v53 = vadd.f32 %v3431_v24, %v6416_v0  ;;  %v3078_v0 = vld [vmem:[%s6752_s6 + $0x270] sm:$0xff] }
 0x4a1   : > { %3826 = vset.pattern.permute.xlu2 %v5867_v35  ;;  %2968 = vperm.xlu1 %3825, %v6190_v9  }
 0x4a3   : > { %v2809_v6 = vpop.permute.xlu2 %2808 }
 0x4a4   : > { %v3192_v32 = vmul.f32 %v3080_v38, %v2809_v6 }
 0x4a6   : > { %v3339_v14 = vsel %vm3224_vm1, %v3192_v32, 0.0 }
 0x4a7   : > { %v6492_v50 = vadd.f32 %v3339_v14, %v3338_v60  ;;  %v3211_v60 = vmul.f32 %v3099_v20, %v6302_v21 }
 0x4a9   : > { %2826 = vperm.xlu2 %3826, %v6370_v8   ;;  %3827 = vset.pattern.permute.xlu1 %v5855_v28  ;;  %v3091_v8 = vld [vmem:[%s6752_s6 + $0x2d8] sm:$0xff]  ;;  %v3283_v44 = vsel %vm3224_vm1, %v3211_v60, 0.0 }
 0x4aa   : > { %v3095_v60 = vld [vmem:[%s6752_s6 + $0x2f8] sm:$0xff] }
 0x4ab   : > { %v2797_v29 = vpop.permute.xlu1 %2796 }
 0x4ac   : > { %v3190_v61 = vmul.f32 %v3078_v0, %v2797_v29 }
 0x4ae   : > { %v3277_v30 = vsel %vm3224_vm1, %v3190_v61, 0.0  ;;  %v3087_v61 = vld [vmem:[%s6752_s6 + $0x2b8] sm:$0xff] }
 0x4af   : > { %v3278_v43 = vadd.f32 %v3277_v30, %v3276_v23  ;;  %v3086_v23 = vld [vmem:[%s6752_s6 + $0x2b0] sm:$0xff]  ;;  %v3093_v30 = vld [vmem:[%s6752_s6 + $0x2e8] sm:$0xff] }
 0x4b1   : > { %3828 = vset.pattern.permute.xlu2 %v5858_v36  ;;  %2900 = vperm.xlu1 %3827, %v6089_v12  }
 0x4b3   : > { %v2877_v15 = vpop.permute.xlu2 %2876  ;;  %v2840_v18 = vpop.permute.xlu1 %2839 }
 0x4b4   : > { %v3203_v27 = vmul.f32 %v3091_v8, %v2877_v15  ;;  %v3197_v55 = vmul.f32 %v3085_v26, %v2840_v18  ;;  %v3101_v8 = vld [vmem:[%s6752_s6 + $0x328] sm:$0xff] }
 0x4b6   : > { %v3250_v4 = vsel %vm3224_vm1, %v3203_v27, 0.0  ;;  %v3279_v39 = vsel %vm3224_vm1, %v3197_v55, 0.0 }
 0x4b7   : > { %v3251_v12 = vadd.f32 %v3250_v4, %v3249_v19  ;;  %v3280_v34 = vadd.f32 %v3279_v39, %v3278_v43  ;;  %v3094_v43 = vld [vmem:[%s6752_s6 + $0x2f0] sm:$0xff] }
 0x4b8   : > { %v3206_v27 = vmul.f32 %v3094_v43, %v6312_v2 }
 0x4b9   : > { %2937 = vperm.xlu2 %3828, %v6102_v59   ;;  %3829 = vset.pattern.permute.xlu1 %v5843_v46  ;;  %v3282_v45 = vadd.f32 %v3281_v40, %v3280_v34  ;;  %v3107_v34 = vld [vmem:[%s6752_s6 + $0x358] sm:$0xff] }
 0x4bb   : > { %v3284_v24 = vadd.f32 %v3283_v44, %v3282_v45 }
 0x4c1   : > { %3830 = vset.pattern.permute.xlu2 %v5867_v35  ;;  %2974 = vperm.xlu1 %3829, %v6190_v9  }
 0x4c3   : > { %v2846_v33 = vpop.permute.xlu1 %2845  ;;  %v2852_v46 = vpop.permute.xlu2 %2851 }
 0x4c4   : > { %v3198_v10 = vmul.f32 %v3086_v23, %v2846_v33  ;;  %v3199_v16 = vmul.f32 %v3087_v61, %v2852_v46  ;;  %v3343_v23 = vsel %vm3224_vm1, %v3206_v27, 0.0 }
 0x4c6   : > { %v3310_v54 = vsel %vm3224_vm1, %v3198_v10, 0.0  ;;  %v3341_v18 = vsel %vm3224_vm1, %v3199_v16, 0.0 }
 0x4c7   : > { %v6523_v57 = vadd.f32 %v3310_v54, %v3309_v13  ;;  %v3342_v4 = vadd.f32 %v3341_v18, %v6492_v50 }
 0x4c9   : > { %2869 = vperm.xlu2 %3830, %v6066_v3   ;;  %3832 = vset.pattern.permute.xlu1 %v5855_v28  ;;  %v3344_v54 = vadd.f32 %v3343_v23, %v3342_v4  ;;  %v3471_v23 = vld [vmem:[%s6754_s8 + $0x30] sm:$0xff] }
 0x4d1   : > { %3833 = vset.pattern.permute.xlu2 %v5858_v36  ;;  %2943 = vperm.xlu1 %3832, %v6102_v59  }
 0x4d3   : > { %v6537_v36 = vpop.permute.xlu1 %2814  ;;  %v2920_v3 = vpop.permute.xlu2 %2919 }
 0x4d9   : > { %2980 = vperm.xlu2 %3833, %v6190_v9   ;;  %3834 = vset.pattern.permute.xlu1 %v5861_v1 }
 0x4e1   : > { %3835 = vset.pattern.permute.xlu2 %v5855_v28  ;;  %2949 = vperm.xlu1 %3834, %v6102_v59  }
 0x4e3   : > { %v2889_v49 = vpop.permute.xlu1 %2888  ;;  %v6540_v31 = vpop.permute.xlu2 %2857 }
 0x4e4   : > { %v3205_v51 = vmul.f32 %v3093_v30, %v2889_v49 }
 0x4e6   : > { %v3312_v39 = vsel %vm3224_vm1, %v3205_v51, 0.0 }
 0x4e7   : > { %v3313_v10 = vadd.f32 %v3312_v39, %v6523_v57  ;;  %v3088_v57 = vld [vmem:[%s6752_s6 + $0x2c0] sm:$0xff] }
 0x4e8   : > { %v3200_v45 = vmul.f32 %v3088_v57, %v6540_v31  ;;  %v3075_v31 = vld [vmem:[%s6752_s6 + $0x258] sm:$0xff] }
 0x4e9   : > { %2986 = vperm.xlu2 %3835, %v6190_v9   ;;  %3836 = vset.pattern.permute.xlu1 %v5867_v35  ;;  %v3105_v35 = vld [vmem:[%s6752_s6 + $0x348] sm:$0xff] }
 0x4f1   : > { %3837 = vset.pattern.permute.xlu2 %v5861_v1  ;;  %2955 = vperm.xlu1 %3836, %v6102_v59   ;;  %v3098_v1 = vld [vmem:[%s6752_s6 + $0x310] sm:$0xff] }
 0x4f2   : > { %v3210_v11 = vmul.f32 %v3098_v1, %v2920_v3 }
 0x4f3   : > { %v6542_v28 = vpop.permute.xlu1 %2820  ;;  %v2963_v59 = vpop.permute.xlu2 %2962 }
 0x4f4   : > { %v3217_v48 = vmul.f32 %v3105_v35, %v2963_v59  ;;  %v3252_v7 = vsel %vm3224_vm1, %v3210_v11, 0.0 }
 0x4f5   : > { %v3253_v25 = vadd.f32 %v3252_v7, %v3251_v12  ;;  %v3108_v12 = vld [vmem:[%s6752_s6 + $0x360] sm:$0xff] }
 0x4f6   : > { %v3254_v58 = vsel %vm3224_vm1, %v3217_v48, 0.0 }
 0x4f7   : > { %v3255_v37 = vadd.f32 %v3254_v58, %v3253_v25 }
 0x4f9   : > { %2992 = vperm.xlu2 %3837, %v6190_v9   ;;  %v3443_v21 = vsel %vm3224_vm1, %v3255_v37, 0.0 }
 0x503   : > { %v2932_v9 = vpop.permute.xlu1 %2931  ;;  %v6568_v0 = vpop.permute.xlu2 %2826 }
 0x504   : > { %v3212_v55 = vmul.f32 %v3100_v56, %v2932_v9  ;;  %v3081_v9 = vld [vmem:[%s6752_s6 + $0x288] sm:$0xff] }
 0x505   : > { %v3193_v48 = vmul.f32 %v3081_v9, %v6537_v36  ;;  %v3109_v36 = vld [vmem:[%s6752_s6 + $0x368] sm:$0xff] }
 0x506   : > { %v3314_v33 = vsel %vm3224_vm1, %v3212_v55, 0.0  ;;  %v3089_v56 = vld [vmem:[%s6752_s6 + $0x2c8] sm:$0xff]  ;;  %v3096_v55 = vld [vmem:[%s6752_s6 + $0x300] sm:$0xff] }
 0x507   : > { %v3315_v42 = vadd.f32 %v3314_v33, %v3313_v10  ;;  %v3370_v58 = vsel %vm3224_vm1, %v3193_v48, 0.0  ;;  %v3208_v39 = vmul.f32 %v3096_v55, %v6347_v5  ;;  %v3467_v48 = vld [vmem:[%s6754_s8 + $0x10] sm:$0xff] }
 0x508   : > { %v3371_v44 = vadd.f32 %v3370_v58, %v6445_v63 }
 0x509   : > { %v3405_v5 = vsel %vm3224_vm1, %v3208_v39, 0.0 }
 0x513   : > { %v2969_v13 = vpop.permute.xlu1 %2968  ;;  %v2938_v29 = vpop.permute.xlu2 %2937 }
 0x514   : > { %v3218_v52 = vmul.f32 %v3106_v47, %v2969_v13  ;;  %v3213_v19 = vmul.f32 %v3101_v8, %v2938_v29  ;;  %v3372_v13 = vsel %vm3224_vm1, %v3200_v45, 0.0  ;;  %v3187_v29 = vmul.f32 %v3075_v31, %v6321_v22  ;;  %v3097_v45 = vld [vmem:[%s6752_s6 + $0x308] sm:$0x1] }
 0x516   : > { %v3285_v38 = vsel %vm3224_vm1, %v3218_v52, 0.0  ;;  %v3345_v2 = vsel %vm3224_vm1, %v3213_v19, 0.0  ;;  %v3102_v52 = vld [vmem:[%s6752_s6 + $0x330] sm:$0xff] }
 0x517   : > { %v3286_v6 = vadd.f32 %v3285_v38, %v3284_v24  ;;  %v3346_v1 = vadd.f32 %v3345_v2, %v3344_v54  ;;  %v3373_v24 = vadd.f32 %v3372_v13, %v3371_v44  ;;  %v3082_v38 = vld [vmem:[%s6752_s6 + $0x290] sm:$0xff]  ;;  %v3111_v13 = vld [vmem:[%s6752_s6 + $0x378] sm:$0x1] }
 0x518   : > { %v3194_v61 = vmul.f32 %v3082_v38, %v6542_v28  ;;  %v3201_v28 = vmul.f32 %v3089_v56, %v6337_v17  ;;  %v3472_v17 = vld [vmem:[%s6754_s8 + $0x38] sm:$0xff] }
 0x519   : > { %v3444_v32 = vsel %vm3224_vm1, %v3286_v6, 0.0  ;;  %3485 = vmatpush.msrb.mxu0 %v3472_v17 }
 0x51a   : > { %v3445_v14 = vadd.f32 %v3444_v32, %v3443_v21  ;;  %v3401_v18 = vsel %vm3224_vm1, %v3194_v61, 0.0  ;;  %v3403_v4 = vsel %vm3224_vm1, %v3201_v28, 0.0 }
 0x51b   : > { %3486 = vmatpush.msrb.mxu0 %v3471_v23 }
 0x523   : > { %v6585_v26 = vpop.permute.xlu2 %2869  ;;  %v2901_v15 = vpop.permute.xlu1 %2900 }
 0x524   : > { %v3207_v25 = vmul.f32 %v3095_v60, %v2901_v15  ;;  %v3399_v15 = vsel %vm3224_vm1, %v3187_v29, 0.0 }
 0x525   : > { %v3400_v51 = vadd.f32 %v3399_v15, %v6437_v62  ;;  %v3103_v62 = vld [vmem:[%s6752_s6 + $0x338] sm:$0xff] }
 0x526   : > { %v3374_v37 = vsel %vm3224_vm1, %v3207_v25, 0.0 }
 0x527   : > { %v3402_v19 = vadd.f32 %v3401_v18, %v3400_v51 }
 0x533   : > { %v2981_v50 = vpop.permute.xlu2 %2980  ;;  %v2975_v46 = vpop.permute.xlu1 %2974 }
 0x534   : > { %v3220_v3 = vmul.f32 %v3108_v12, %v2981_v50  ;;  %v3219_v49 = vmul.f32 %v3107_v34, %v2975_v46  ;;  %v3404_v12 = vadd.f32 %v3403_v4, %v3402_v19  ;;  %v3110_v34 = vld [vmem:[%s6752_s6 + $0x370] sm:$0xff]  ;;  %v3470_v50 = vld [vmem:[%s6754_s8 + $0x28] sm:$0xff]  ;;  %v3083_v46 = vld [vmem:[%s6752_s6 + $0x298] sm:$0x1] }
 0x535   : > { %3487 = vmatpush.msrb.mxu0 %v3470_v50  ;;  %v3195_v9 = vmul.f32 %v3083_v46, %v6568_v0 }
 0x536   : > { %v3347_v35 = vsel %vm3224_vm1, %v3220_v3, 0.0  ;;  %v3316_v59 = vsel %vm3224_vm1, %v3219_v49, 0.0  ;;  %v3406_v3 = vadd.f32 %v3405_v5, %v3404_v12 }
 0x537   : > { %v3348_v41 = vadd.f32 %v3347_v35, %v3346_v1  ;;  %v3317_v11 = vadd.f32 %v3316_v59, %v3315_v42  ;;  %v3469_v42 = vld [vmem:[%s6754_s8 + $0x20] sm:$0xff]  ;;  %v2913_v1 = vpop.permute.xlu0 %2912  ;;  %v3090_v35 = vld [vmem:[%s6752_s6 + $0x2d0] sm:$0x1]  ;;  %v3433_v60 = vsel %vm3411_vm2, %v3195_v9, 0.0 }
 0x538   : > { %3488 = vmatpush.msrb.mxu0 %v3469_v42  ;;  %v3434_v58 = vadd.f32 %v3433_v60, %v6484_v53  ;;  %v3209_v25 = vmul.f32 %v3097_v45, %v2913_v1 }
 0x539   : > { %v3446_v20 = vsel %vm3224_vm1, %v3317_v11, 0.0  ;;  %v3448_v7 = vsel %vm3224_vm1, %v3348_v41, 0.0  ;;  %v3468_v11 = vld [vmem:[%s6754_s8 + $0x18] sm:$0xff] }
 0x53a   : > { %v3447_v40 = vadd.f32 %v3446_v20, %v3445_v14  ;;  %v3375_v14 = vadd.f32 %v3374_v37, %v3373_v24  ;;  %v3202_v20 = vmul.f32 %v3090_v35, %v6585_v26  ;;  %3489 = vmatpush.msrb.mxu0 %v3468_v11  ;;  %v3437_v31 = vsel %vm3411_vm2, %v3209_v25, 0.0 }
 0x53c   : > { %v3449_v47 = vadd.f32 %v3448_v7, %v3447_v40  ;;  %v3466_v7 = vld [vmem:[%s6754_s8 + $0x8] sm:$0xff]  ;;  %3490 = vmatpush.msrb.mxu0 %v3467_v48  ;;  %v3435_v26 = vsel %vm3411_vm2, %v3202_v20, 0.0 }
 0x53e   : > { %3491 = vmatpush.msrb.mxu0 %v3466_v7 }
 0x53f   : > { %v2999_v44 = vpop.permute.xlu0 %2998 }
 0x540   : > { %v3223_v24 = vmul.f32 %v3111_v13, %v2999_v44 }
 0x543   : > { %v2987_v63 = vpop.permute.xlu2 %2986  ;;  %v2944_v6 = vpop.permute.xlu1 %2943 }
 0x544   : > { %v3221_v21 = vmul.f32 %v3109_v36, %v2987_v63  ;;  %v3214_v32 = vmul.f32 %v3102_v52, %v2944_v6  ;;  %v3436_v36 = vadd.f32 %v3435_v26, %v3434_v58  ;;  %v3104_v52 = vld [vmem:[%s6752_s6 + $0x340] sm:$0x1] }
 0x546   : > { %v3376_v16 = vsel %vm3224_vm1, %v3214_v32, 0.0  ;;  %v3378_v43 = vsel %vm3224_vm1, %v3221_v21, 0.0  ;;  %v3438_v63 = vadd.f32 %v3437_v31, %v3436_v36  ;;  %v3441_v21 = vsel %vm3411_vm2, %v3223_v24, 0.0 }
 0x547   : > { %v3377_v30 = vadd.f32 %v3376_v16, %v3375_v14 }
 0x549   : > { %v3379_v8 = vadd.f32 %v3378_v43, %v3377_v30 }
 0x54b   : > { %v3450_v22 = vsel %vm3224_vm1, %v3379_v8, 0.0  ;;  %v3462_v8 = vld [vmem:[%s6753_s7] sm:$0x1] }
 0x54c   : > { %v3451_v27 = vadd.f32 %v3450_v22, %v3449_v47  ;;  %v3465_v47 = vld [vmem:[%s6754_s8] sm:$0xff] }
 0x54d   : > { %3492 = vmatpush.msrb.mxu0 %v3465_v47  ;;  %v3473_v22 = vld [vmem:[%s6755_s9] sm:$0x1] }
 0x553   : > { %v2993_v33 = vpop.permute.xlu2 %2992  ;;  %v2950_v2 = vpop.permute.xlu1 %2949 }
 0x554   : > { %v3222_v10 = vmul.f32 %v3110_v34, %v2993_v33  ;;  %v3215_v54 = vmul.f32 %v3103_v62, %v2950_v2 }
 0x556   : > { %v3407_v49 = vsel %vm3224_vm1, %v3215_v54, 0.0  ;;  %v3409_v41 = vsel %vm3224_vm1, %v3222_v10, 0.0 }
 0x557   : > { %v3408_v59 = vadd.f32 %v3407_v49, %v3406_v3 }
 0x559   : > { %v3410_v57 = vadd.f32 %v3409_v41, %v3408_v59 }
 0x55b   : > { %v3452_v40 = vsel %vm3224_vm1, %v3410_v57, 0.0 }
 0x55c   : > { %v3453_v0 = vadd.f32 %v3452_v40, %v3451_v27 }
 0x563   : > { %v2956_v37 = vpop.permute.xlu1 %2955 }
 0x564   : > { %v3216_v38 = vmul.f32 %v3104_v52, %v2956_v37 }
 0x566   : > { %v3439_v53 = vsel %vm3411_vm2, %v3216_v38, 0.0 }
 0x567   : > { %v3440_v6 = vadd.f32 %v3439_v53, %v3438_v63 }
 0x569   : > { %v3442_v32 = vadd.f32 %v3441_v21, %v3440_v6 }
 0x56b   : > { %v3454_v14 = vsel %vm3411_vm2, %v3442_v32, 0.0 }
 0x56c   : > { %v3455_v29 = vadd.f32 %v3454_v14, %v3453_v0 }
 0x56e   : > { %v3456_v61 = vrot.slane %v3455_v29, 4 }
 0x570   : > { %v3457_v16 = vadd.f32 %v3456_v61, %v3455_v29 }
 0x572   : > { %v3458_v30 = vrot.slane %v3457_v16, 2 }
 0x574   : > { %v3459_v43 = vadd.f32 %v3458_v30, %v3457_v16 }
 0x576   : > { %v3460_v56 = vrot.slane %v3459_v43, 1 }
 0x578   : > { %v3461_v15 = vadd.f32 %v3460_v56, %v3459_v43 }
 0x57a   : > { %v3463_v18 = vadd.f32 %v3462_v8, %v3461_v15 }
 0x57c   : > { %v3464_v51 = vmax.f32 %v3463_v18, 0.0 }
 0x57e   : > { %3686 = vmatmul.msk.f32.vlgmr.msrb.gmra.mxu0 %vm3224_vm1, %v3464_v51 }
 0x5fb   : > { %v3494_v28 = vpop.f32.mrf.mxu0 }
 0x5fc   : > { %v3495_v27 = vadd.f32 %v3494_v28, %v3473_v22 }
 0x5fe   : > { %3498 = vst.msk [vmem:[%s349_s25] sm:$0x1] %vm3497_vm3, %v3495_v27 }
 0x5ff   : > { %4016 = shalt.err (!%p4013_p3)
}
 0x600   : > { %3690 = dma.vmem_to_hbm [thread:$0]  (%p4147_p5), %s3511_s26, 16, %s3513_s27, %s3500_s29  }
 0x601 PF: > { %p3696_p4 = scmp.ge.s32.totalorder %s4051_s16, 2  ;;  %s3524_s28 = sand.u32 1, %s4039_s13  }
 0x602   : > { %s3525_s12 = scalar_lea.sflag [#allocation3], %s3524_s28 }
 0x603   : > { %p3693_p7 = pnand %p3696_p4, %p4151_p6 }
 0x605   : > { %p3694_p8 = pneg %p3693_p7 }
 0x607   : > { %4034 = dma.done.wait (%p3694_p8), %s3525_s12, 16  }
 0x608   : > { %4036 = vsyncadd (%p3694_p8), %s3525_s12, 4294967280  ;;  %p20_p9 = scmp.ge.s32.totalorder %s4134_s19, 4   ;;  %s6865_s13 = smov %s4043_s14 }
 0x609   : > { %s6866_s14 = smov %s4047_s15  ;;  %s6867_s15 = smov %s4145_s22 }
 0x60a   : > { %s6868_s16 = smov %s4134_s19  ;;  %22 = sbr.rel (!%p20_p9) target bundleno = 5 (0x5), region = 202 }
 0x60f   :  { %3530 = vsyncpa [#allocation3], 1 }
 0x610   :  { %3532 = vsyncpa [#allocation3 + $0x1], 1 }

</bundles_post_ra>
